<compile_context>
chip_gen: v7x
topology: tpu7x:2x2x1
jax: 0.10.0
libtpu: 0.0.40
codegen_flags: <defaults>
</compile_context>

<pallas_src>
import functools

import jax
import jax.numpy as jnp
from jax import lax
from jax.experimental import pallas as pl
from jax.experimental.pallas import tpu as pltpu


def _round_up(x, m):
    return (x + m - 1) // m * m


def _pick_b_tile(n, h, w):
    """Pack batch so each grid step feeds the MXU a few hundred rows."""
    rows = max(h * w, 1)
    target = max(1, 512 // rows)          # aim for ~512 matmul rows per step
    best = 1
    for b in range(1, n + 1):
        if n % b == 0 and b <= target and (n // b >= 2 or n <= 2):
            best = b
    return best


def _vmem_limit_bytes():
    """Per-generation VMEM cap: ~40 MiB on v7x (64 MiB VMEM), ~100 MiB on
    v5e/v6e (128 MiB VMEM).  Conservative fallback if the query fails."""
    try:
        cap = int(getattr(pltpu.get_tpu_info(), "vmem_capacity_bytes"))
    except Exception:
        cap = 64 << 20
    return max(32 << 20, min(cap - (24 << 20), 100 << 20))


def _bottleneck_kernel(x_ref, w1_ref, b1_ref, w2_ref, b2_ref, w3_ref, b3_ref,
                       o_ref, pad_ref, *, dilation):
    """One batch-tile per grid step.  x_ref: (B, H, W, C) bf16 (C padded)."""
    B, H, W, C = x_ref.shape
    Pp = w1_ref.shape[1]
    d = dilation
    M = B * H * W

    # ---- conv1 (1x1, BN1 scale folded into w1) + bias + ReLU ---------------
    x_bf = x_ref[...].reshape(M, C)                              # bf16
    h1 = jnp.dot(x_bf, w1_ref[...], preferred_element_type=jnp.float32)
    h1 = jnp.maximum(h1 + b1_ref[...], 0.0)                      # (M, Pp) f32
    h1_img = h1.astype(jnp.bfloat16).reshape(B, H, W, Pp)

    # ---- conv2 (3x3, stride=1, dilation=d, padding=d) ----------------------
    # bf16 spatially-padded intermediate lives in a persistent VMEM scratch.
    # INVARIANT: the border ring is zeroed only at grid step 0; the interior
    # store below never touches the ring, and the grid axis is "arbitrary"
    # (serial on one core), so the ring stays zero for every later step.
    @pl.when(pl.program_id(0) == 0)
    def _init_ring():
        pad_ref[:, 0:d, :, :] = jnp.zeros((B, d, W + 2 * d, Pp), jnp.bfloat16)
        pad_ref[:, H + d:H + 2 * d, :, :] = jnp.zeros(
            (B, d, W + 2 * d, Pp), jnp.bfloat16)
        pad_ref[:, :, 0:d, :] = jnp.zeros((B, H + 2 * d, d, Pp), jnp.bfloat16)
        pad_ref[:, :, W + d:W + 2 * d, :] = jnp.zeros(
            (B, H + 2 * d, d, Pp), jnp.bfloat16)

    pad_ref[:, d:d + H, d:d + W, :] = h1_img

    # 9 per-tap matmuls (K = Pp) accumulated in f32 -- no im2col buffer.
    h2 = None
    for k in range(9):
        ky, kx = divmod(k, 3)
        tap = pad_ref[:, ky * d:ky * d + H, kx * d:kx * d + W, :]
        p = jnp.dot(tap.reshape(M, Pp), w2_ref[k],
                    preferred_element_type=jnp.float32)
        h2 = p if h2 is None else h2 + p
    h2 = jnp.maximum(h2 + b2_ref[...], 0.0).astype(jnp.bfloat16)  # (M, Pp)

    # ---- conv3 (1x1) + bias + residual + ReLU ------------------------------
    h3 = jnp.dot(h2, w3_ref[...], preferred_element_type=jnp.float32)
    h3 = h3 + b3_ref[...]
    # Re-read x for the residual (block is VMEM-resident; avoids keeping a
    # full f32 copy live across the three matmuls).
    res = x_ref[...].reshape(M, C).astype(jnp.float32)
    out = jnp.maximum(h3 + res, 0.0)
    o_ref[...] = out.reshape(B, H, W, C).astype(o_ref.dtype)


def bottleneck_forward(x_nchw, folded, *, dilation=1):
    """x_nchw: (N, C, H, W) float32 (PyTorch layout). Returns NCHW bf16."""
    N, Cin, H, W = x_nchw.shape
    Cp = folded["cp"]
    Pp = folded["pp"]
    d = dilation

    # NCHW f32 -> NHWC bf16, channels padded to a multiple of 128.
    x = jnp.transpose(x_nchw, (0, 2, 3, 1)).astype(jnp.bfloat16)
    if Cp != Cin:
        x = jnp.pad(x, ((0, 0), (0, 0), (0, 0), (0, Cp - Cin)))

    b_tile = _pick_b_tile(N, H, W)
    grid = (N // b_tile,)

    kernel = functools.partial(_bottleneck_kernel, dilation=d)

    out_nhwc = pl.pallas_call(
        kernel,
        out_shape=jax.ShapeDtypeStruct((N, H, W, Cp), jnp.bfloat16),
        grid=grid,
        in_specs=[
            pl.BlockSpec((b_tile, H, W, Cp), lambda n: (n, 0, 0, 0)),  # x
            pl.BlockSpec((Cp, Pp), lambda n: (0, 0)),                  # w1
            pl.BlockSpec((1, Pp), lambda n: (0, 0)),                   # b1
            pl.BlockSpec((9, Pp, Pp), lambda n: (0, 0, 0)),            # w2 taps
            pl.BlockSpec((1, Pp), lambda n: (0, 0)),                   # b2
            pl.BlockSpec((Pp, Cp), lambda n: (0, 0)),                  # w3
            pl.BlockSpec((1, Cp), lambda n: (0, 0)),                   # b3
        ],
        out_specs=pl.BlockSpec((b_tile, H, W, Cp), lambda n: (n, 0, 0, 0)),
        scratch_shapes=[
            pltpu.VMEM((b_tile, H + 2 * d, W + 2 * d, Pp), jnp.bfloat16)],
        compiler_params=pltpu.CompilerParams(
            # "arbitrary": the persistent pad-scratch ring is initialized only
            # at step 0 -- a megacore-parallel split of this axis could start
            # a core at a later step with an unzeroed ring.
            dimension_semantics=("arbitrary",),
            vmem_limit_bytes=_vmem_limit_bytes()),
    )(x,
      folded["w1"], folded["b1"],
      folded["w2"], folded["b2"],
      folded["w3"], folded["b3"])

    out_nhwc = out_nhwc[..., :Cin]
    return jnp.transpose(out_nhwc, (0, 3, 1, 2))            # -> NCHW (bf16)


# ------------------------- parameter construction ----------------------------

def make_params(key, inplanes, planes):
    """Deterministic synthetic params matching Bottleneck.__init__ shapes."""
    ks = jax.random.split(key, 16)
    raw = {
        # PyTorch conv weights, OIHW
        "w1": 0.1 * jax.random.normal(ks[0], (planes, inplanes, 1, 1), jnp.float32),
        "w2": 0.1 * jax.random.normal(ks[1], (planes, planes, 3, 3), jnp.float32),
        "w3": 0.1 * jax.random.normal(ks[2], (planes * 4, planes, 1, 1), jnp.float32),
    }
    for i, c in [(1, planes), (2, planes), (3, planes * 4)]:
        raw[f"g{i}"] = 1.0 + 0.1 * jax.random.normal(ks[3 * i], (c,), jnp.float32)
        raw[f"be{i}"] = 0.1 * jax.random.normal(ks[3 * i + 1], (c,), jnp.float32)
        raw[f"m{i}"] = 0.1 * jax.random.normal(ks[3 * i + 2], (c,), jnp.float32)
        raw[f"v{i}"] = 0.5 + jax.random.uniform(ks[12 + i], (c,), jnp.float32)
    return raw


def fold_params(raw, eps=1e-5, lane=128):
    """Fold eval-mode BN scale into conv weights (leaving only bias), lay
    weights out for the NHWC matmul kernel, cast to bf16, and pad all channel
    axes to a multiple of `lane` so the lane dim is dense."""
    def scale_shift(i):
        s = raw[f"g{i}"] / jnp.sqrt(raw[f"v{i}"] + eps)
        b = raw[f"be{i}"] - raw[f"m{i}"] * s
        return s, b

    s1, b1 = scale_shift(1)
    s2, b2 = scale_shift(2)
    s3, b3 = scale_shift(3)

    w1 = jnp.transpose(raw["w1"][:, :, 0, 0], (1, 0)) * s1[None, :]        # (Cin, P)
    w2 = jnp.transpose(raw["w2"], (2, 3, 1, 0)) * s2[None, None, None, :]  # (3,3,P,P)
    w3 = jnp.transpose(raw["w3"][:, :, 0, 0], (1, 0)) * s3[None, :]        # (P, 4P)

    Cin, P = w1.shape
    Cout = w3.shape[1]
    assert Cin == Cout, "identity residual requires inplanes == planes * 4"
    Cp = _round_up(Cin, lane)
    Pp = _round_up(P, lane)

    w1p = jnp.zeros((Cp, Pp), jnp.float32).at[:Cin, :P].set(w1)
    w2p = jnp.zeros((3, 3, Pp, Pp), jnp.float32).at[:, :, :P, :P].set(w2)
    w3p = jnp.zeros((Pp, Cp), jnp.float32).at[:P, :Cout].set(w3)

    b1p = jnp.zeros((1, Pp), jnp.float32).at[0, :P].set(b1)
    b2p = jnp.zeros((1, Pp), jnp.float32).at[0, :P].set(b2)
    b3p = jnp.zeros((1, Cp), jnp.float32).at[0, :Cout].set(b3)

    return {
        "w1": w1p.astype(jnp.bfloat16),                       # (Cp, Pp)
        "w2": w2p.reshape(9, Pp, Pp).astype(jnp.bfloat16),    # (9, Pp, Pp) taps
        "w3": w3p.astype(jnp.bfloat16),                       # (Pp, Cp)
        "b1": b1p, "b2": b2p, "b3": b3p,                      # f32 biases
        "cp": Cp, "pp": Pp,
    }


# ------------------------- pure-JAX reference (NCHW) -------------------------

def reference_forward(x, raw, dilation=1, eps=1e-5):
    def bn(y, i):
        g, b, m, v = raw[f"g{i}"], raw[f"be{i}"], raw[f"m{i}"], raw[f"v{i}"]
        rs = lambda a: a[None, :, None, None]
        return (y - rs(m)) / jnp.sqrt(rs(v) + eps) * rs(g) + rs(b)

    dn = ("NCHW", "OIHW", "NCHW")
    y = lax.conv_general_dilated(x, raw["w1"], (1, 1), "VALID",
                                 dimension_numbers=dn)
    y = jax.nn.relu(bn(y, 1))
    y = lax.conv_general_dilated(y, raw["w2"], (1, 1),
                                 [(dilation, dilation), (dilation, dilation)],
                                 rhs_dilation=(dilation, dilation),
                                 dimension_numbers=dn)
    y = jax.nn.relu(bn(y, 2))
    y = lax.conv_general_dilated(y, raw["w3"], (1, 1), "VALID",
                                 dimension_numbers=dn)
    y = bn(y, 3)
    return jax.nn.relu(y + x)


if __name__ == "__main__":
    planes = 4
    inplanes = planes * 4          # residual add requires Cin == planes * 4
    N, H, W = 2, 16, 16
    dilation = 1

    key = jax.random.PRNGKey(0)
    k_x, k_p = jax.random.split(key)
    x = jax.random.normal(k_x, (N, inplanes, H, W), jnp.float32)   # NCHW input

    raw = make_params(k_p, inplanes, planes)
    folded = fold_params(raw)

    out = jax.block_until_ready(bottleneck_forward(x, folded, dilation=dilation))
    ref = jax.block_until_ready(reference_forward(x, raw, dilation=dilation))

    assert out.shape == (N, inplanes, H, W)
    out_f32 = out.astype(jnp.float32)
    max_err = jnp.max(jnp.abs(out_f32 - ref))
    # bf16 activations + bf16 matmuls (f32 accumulation) -> bf16-level tolerance
    assert jnp.allclose(out_f32, ref, rtol=5e-2, atol=5e-2), \
        f"max abs err = {max_err}"

    print("KERNEL_OK")
</pallas_src>

<mosaic_0001>
module attributes {stable_mosaic.version = 11 : i64} {
  func.func @_bottleneck_kernel(%arg0: i32, %arg1: memref<2x16x16x128xbf16, #tpu.memory_space<vmem>>, %arg2: memref<128x128xbf16, #tpu.memory_space<vmem>>, %arg3: memref<1x128xf32, #tpu.memory_space<vmem>>, %arg4: memref<9x128x128xbf16, #tpu.memory_space<vmem>>, %arg5: memref<1x128xf32, #tpu.memory_space<vmem>>, %arg6: memref<128x128xbf16, #tpu.memory_space<vmem>>, %arg7: memref<1x128xf32, #tpu.memory_space<vmem>>, %arg8: memref<2x16x16x128xbf16, #tpu.memory_space<vmem>>, %arg9: memref<2x18x18x128xbf16, #tpu.memory_space<vmem>>) attributes {dimension_semantics = [#tpu.dimension_semantics<arbitrary>], iteration_bounds = array<i64: 1>, scalar_prefetch = 0 : i64, scratch_operands = 1 : i64, tpu.core_type = #tpu.core_type<tc>, window_params = [{transform_indices = @transform_0, window_bounds = array<i64: 2, 16, 16, 128>}, {pipeline_mode = #tpu.pipeline_mode<synchronous>, transform_indices = @transform_1, window_bounds = array<i64: 128, 128>}, {pipeline_mode = #tpu.pipeline_mode<synchronous>, transform_indices = @transform_2, window_bounds = array<i64: 1, 128>}, {pipeline_mode = #tpu.pipeline_mode<synchronous>, transform_indices = @transform_3, window_bounds = array<i64: 9, 128, 128>}, {pipeline_mode = #tpu.pipeline_mode<synchronous>, transform_indices = @transform_4, window_bounds = array<i64: 1, 128>}, {pipeline_mode = #tpu.pipeline_mode<synchronous>, transform_indices = @transform_5, window_bounds = array<i64: 128, 128>}, {pipeline_mode = #tpu.pipeline_mode<synchronous>, transform_indices = @transform_6, window_bounds = array<i64: 1, 128>}, {transform_indices = @transform_7, window_bounds = array<i64: 2, 16, 16, 128>}]} {
    %c0 = arith.constant 0 : index
    %c0_0 = arith.constant 0 : index
    %c0_1 = arith.constant 0 : index
    %c0_2 = arith.constant 0 : index
    %0 = vector.load %arg1[%c0, %c0_0, %c0_1, %c0_2] : memref<2x16x16x128xbf16, #tpu.memory_space<vmem>>, vector<2x16x16x128xbf16>
    %1 = vector.shape_cast %0 : vector<2x16x16x128xbf16> to vector<512x128xbf16>
    %c0_3 = arith.constant 0 : index
    %c0_4 = arith.constant 0 : index
    %2 = vector.load %arg2[%c0_3, %c0_4] : memref<128x128xbf16, #tpu.memory_space<vmem>>, vector<128x128xbf16>
    %cst = arith.constant dense<0.000000e+00> : vector<512x128xf32>
    %3 = tpu.matmul %1, %2, %cst {dimension_numbers = #tpu.dot_dimension_numbers<[1], [0], [0], [1], [0, 0, 1, 1], [], []>} : vector<512x128xbf16>, vector<128x128xbf16>, vector<512x128xf32> -> vector<512x128xf32>
    %c0_5 = arith.constant 0 : index
    %c0_6 = arith.constant 0 : index
    %4 = vector.load %arg3[%c0_5, %c0_6] : memref<1x128xf32, #tpu.memory_space<vmem>>, vector<1x128xf32>
    %5 = vector.broadcast %4 : vector<1x128xf32> to vector<512x128xf32>
    %6 = arith.addf %3, %5 : vector<512x128xf32>
    %cst_7 = arith.constant 0.000000e+00 : f32
    %7 = vector.broadcast %cst_7 : f32 to vector<512x128xf32>
    %8 = arith.maximumf %6, %7 : vector<512x128xf32>
    %9 = arith.truncf %8 : vector<512x128xf32> to vector<512x128xbf16>
    %10 = vector.shape_cast %9 : vector<512x128xbf16> to vector<2x16x16x128xbf16>
    %c0_i32 = arith.constant 0 : i32
    %11 = arith.cmpi eq, %arg0, %c0_i32 : i32
    %12 = arith.extui %11 : i1 to i32
    %c0_i32_8 = arith.constant 0 : i32
    %13 = arith.cmpi ne, %12, %c0_i32_8 : i32
    scf.if %13 {
      %cst_94 = arith.constant 0.000000e+00 : bf16
      %88 = vector.broadcast %cst_94 : bf16 to vector<2x1x18x128xbf16>
      %c0_95 = arith.constant 0 : index
      %c0_96 = arith.constant 0 : index
      %c0_97 = arith.constant 0 : index
      %c0_98 = arith.constant 0 : index
      %89 = vector.load %arg9[%c0_95, %c0_96, %c0_97, %c0_98] : memref<2x18x18x128xbf16, #tpu.memory_space<vmem>>, vector<2x1x18x128xbf16>
      tpu.vector_store %arg9[%c0_95, %c0_96, %c0_97, %c0_98], %88 {strides = array<i32>} : memref<2x18x18x128xbf16, #tpu.memory_space<vmem>>, vector<2x1x18x128xbf16>,
      %cst_99 = arith.constant 0.000000e+00 : bf16
      %90 = vector.broadcast %cst_99 : bf16 to vector<2x1x18x128xbf16>
      %c0_100 = arith.constant 0 : index
      %c17 = arith.constant 17 : index
      %c0_101 = arith.constant 0 : index
      %c0_102 = arith.constant 0 : index
      %91 = vector.load %arg9[%c0_100, %c17, %c0_101, %c0_102] : memref<2x18x18x128xbf16, #tpu.memory_space<vmem>>, vector<2x1x18x128xbf16>
      tpu.vector_store %arg9[%c0_100, %c17, %c0_101, %c0_102], %90 {strides = array<i32>} : memref<2x18x18x128xbf16, #tpu.memory_space<vmem>>, vector<2x1x18x128xbf16>,
      %cst_103 = arith.constant 0.000000e+00 : bf16
      %92 = vector.broadcast %cst_103 : bf16 to vector<2x18x1x128xbf16>
      %c0_104 = arith.constant 0 : index
      %c0_105 = arith.constant 0 : index
      %c0_106 = arith.constant 0 : index
      %c0_107 = arith.constant 0 : index
      %93 = vector.load %arg9[%c0_104, %c0_105, %c0_106, %c0_107] : memref<2x18x18x128xbf16, #tpu.memory_space<vmem>>, vector<2x18x1x128xbf16>
      tpu.vector_store %arg9[%c0_104, %c0_105, %c0_106, %c0_107], %92 {strides = array<i32>} : memref<2x18x18x128xbf16, #tpu.memory_space<vmem>>, vector<2x18x1x128xbf16>,
      %cst_108 = arith.constant 0.000000e+00 : bf16
      %94 = vector.broadcast %cst_108 : bf16 to vector<2x18x1x128xbf16>
      %c0_109 = arith.constant 0 : index
      %c0_110 = arith.constant 0 : index
      %c17_111 = arith.constant 17 : index
      %c0_112 = arith.constant 0 : index
      %95 = vector.load %arg9[%c0_109, %c0_110, %c17_111, %c0_112] : memref<2x18x18x128xbf16, #tpu.memory_space<vmem>>, vector<2x18x1x128xbf16>
      tpu.vector_store %arg9[%c0_109, %c0_110, %c17_111, %c0_112], %94 {strides = array<i32>} : memref<2x18x18x128xbf16, #tpu.memory_space<vmem>>, vector<2x18x1x128xbf16>,
    } else {
    }
    %c0_9 = arith.constant 0 : index
    %c1 = arith.constant 1 : index
    %c1_10 = arith.constant 1 : index
    %c0_11 = arith.constant 0 : index
    %14 = vector.load %arg9[%c0_9, %c1, %c1_10, %c0_11] : memref<2x18x18x128xbf16, #tpu.memory_space<vmem>>, vector<2x16x16x128xbf16>
    tpu.vector_store %arg9[%c0_9, %c1, %c1_10, %c0_11], %10 {strides = array<i32>} : memref<2x18x18x128xbf16, #tpu.memory_space<vmem>>, vector<2x16x16x128xbf16>,
    %c0_12 = arith.constant 0 : index
    %c0_13 = arith.constant 0 : index
    %c0_14 = arith.constant 0 : index
    %c0_15 = arith.constant 0 : index
    %15 = vector.load %arg9[%c0_12, %c0_13, %c0_14, %c0_15] : memref<2x18x18x128xbf16, #tpu.memory_space<vmem>>, vector<2x16x16x128xbf16>
    %16 = vector.shape_cast %15 : vector<2x16x16x128xbf16> to vector<512x128xbf16>
    %c0_16 = arith.constant 0 : index
    %c0_17 = arith.constant 0 : index
    %c0_18 = arith.constant 0 : index
    %17 = vector.load %arg4[%c0_16, %c0_17, %c0_18] : memref<9x128x128xbf16, #tpu.memory_space<vmem>>, vector<1x128x128xbf16>
    %18 = vector.shape_cast %17 : vector<1x128x128xbf16> to vector<128x128xbf16>
    %cst_19 = arith.constant dense<0.000000e+00> : vector<512x128xf32>
    %19 = tpu.matmul %16, %18, %cst_19 {dimension_numbers = #tpu.dot_dimension_numbers<[1], [0], [0], [1], [0, 0, 1, 1], [], []>} : vector<512x128xbf16>, vector<128x128xbf16>, vector<512x128xf32> -> vector<512x128xf32>
    %c0_20 = arith.constant 0 : index
    %c0_21 = arith.constant 0 : index
    %c1_22 = arith.constant 1 : index
    %c0_23 = arith.constant 0 : index
    %20 = vector.load %arg9[%c0_20, %c0_21, %c1_22, %c0_23] : memref<2x18x18x128xbf16, #tpu.memory_space<vmem>>, vector<2x16x16x128xbf16>
    %21 = vector.shape_cast %20 : vector<2x16x16x128xbf16> to vector<512x128xbf16>
    %c1_24 = arith.constant 1 : index
    %c0_25 = arith.constant 0 : index
    %c0_26 = arith.constant 0 : index
    %22 = vector.load %arg4[%c1_24, %c0_25, %c0_26] : memref<9x128x128xbf16, #tpu.memory_space<vmem>>, vector<1x128x128xbf16>
    %23 = vector.shape_cast %22 : vector<1x128x128xbf16> to vector<128x128xbf16>
    %cst_27 = arith.constant dense<0.000000e+00> : vector<512x128xf32>
    %24 = tpu.matmul %21, %23, %cst_27 {dimension_numbers = #tpu.dot_dimension_numbers<[1], [0], [0], [1], [0, 0, 1, 1], [], []>} : vector<512x128xbf16>, vector<128x128xbf16>, vector<512x128xf32> -> vector<512x128xf32>
    %25 = arith.addf %19, %24 : vector<512x128xf32>
    %c0_28 = arith.constant 0 : index
    %c0_29 = arith.constant 0 : index
    %c2 = arith.constant 2 : index
    %c0_30 = arith.constant 0 : index
    %26 = vector.load %arg9[%c0_28, %c0_29, %c2, %c0_30] : memref<2x18x18x128xbf16, #tpu.memory_space<vmem>>, vector<2x16x16x128xbf16>
    %27 = vector.shape_cast %26 : vector<2x16x16x128xbf16> to vector<512x128xbf16>
    %c2_31 = arith.constant 2 : index
    %c0_32 = arith.constant 0 : index
    %c0_33 = arith.constant 0 : index
    %28 = vector.load %arg4[%c2_31, %c0_32, %c0_33] : memref<9x128x128xbf16, #tpu.memory_space<vmem>>, vector<1x128x128xbf16>
    %29 = vector.shape_cast %28 : vector<1x128x128xbf16> to vector<128x128xbf16>
    %cst_34 = arith.constant dense<0.000000e+00> : vector<512x128xf32>
    %30 = tpu.matmul %27, %29, %cst_34 {dimension_numbers = #tpu.dot_dimension_numbers<[1], [0], [0], [1], [0, 0, 1, 1], [], []>} : vector<512x128xbf16>, vector<128x128xbf16>, vector<512x128xf32> -> vector<512x128xf32>
    %31 = arith.addf %25, %30 : vector<512x128xf32>
    %c0_35 = arith.constant 0 : index
    %c1_36 = arith.constant 1 : index
    %c0_37 = arith.constant 0 : index
    %c0_38 = arith.constant 0 : index
    %32 = vector.load %arg9[%c0_35, %c1_36, %c0_37, %c0_38] : memref<2x18x18x128xbf16, #tpu.memory_space<vmem>>, vector<2x16x16x128xbf16>
    %33 = vector.shape_cast %32 : vector<2x16x16x128xbf16> to vector<512x128xbf16>
    %c3 = arith.constant 3 : index
    %c0_39 = arith.constant 0 : index
    %c0_40 = arith.constant 0 : index
    %34 = vector.load %arg4[%c3, %c0_39, %c0_40] : memref<9x128x128xbf16, #tpu.memory_space<vmem>>, vector<1x128x128xbf16>
    %35 = vector.shape_cast %34 : vector<1x128x128xbf16> to vector<128x128xbf16>
    %cst_41 = arith.constant dense<0.000000e+00> : vector<512x128xf32>
    %36 = tpu.matmul %33, %35, %cst_41 {dimension_numbers = #tpu.dot_dimension_numbers<[1], [0], [0], [1], [0, 0, 1, 1], [], []>} : vector<512x128xbf16>, vector<128x128xbf16>, vector<512x128xf32> -> vector<512x128xf32>
    %37 = arith.addf %31, %36 : vector<512x128xf32>
    %c0_42 = arith.constant 0 : index
    %c1_43 = arith.constant 1 : index
    %c1_44 = arith.constant 1 : index
    %c0_45 = arith.constant 0 : index
    %38 = vector.load %arg9[%c0_42, %c1_43, %c1_44, %c0_45] : memref<2x18x18x128xbf16, #tpu.memory_space<vmem>>, vector<2x16x16x128xbf16>
    %39 = vector.shape_cast %38 : vector<2x16x16x128xbf16> to vector<512x128xbf16>
    %c4 = arith.constant 4 : index
    %c0_46 = arith.constant 0 : index
    %c0_47 = arith.constant 0 : index
    %40 = vector.load %arg4[%c4, %c0_46, %c0_47] : memref<9x128x128xbf16, #tpu.memory_space<vmem>>, vector<1x128x128xbf16>
    %41 = vector.shape_cast %40 : vector<1x128x128xbf16> to vector<128x128xbf16>
    %cst_48 = arith.constant dense<0.000000e+00> : vector<512x128xf32>
    %42 = tpu.matmul %39, %41, %cst_48 {dimension_numbers = #tpu.dot_dimension_numbers<[1], [0], [0], [1], [0, 0, 1, 1], [], []>} : vector<512x128xbf16>, vector<128x128xbf16>, vector<512x128xf32> -> vector<512x128xf32>
    %43 = arith.addf %37, %42 : vector<512x128xf32>
    %c0_49 = arith.constant 0 : index
    %c1_50 = arith.constant 1 : index
    %c2_51 = arith.constant 2 : index
    %c0_52 = arith.constant 0 : index
    %44 = vector.load %arg9[%c0_49, %c1_50, %c2_51, %c0_52] : memref<2x18x18x128xbf16, #tpu.memory_space<vmem>>, vector<2x16x16x128xbf16>
    %45 = vector.shape_cast %44 : vector<2x16x16x128xbf16> to vector<512x128xbf16>
    %c5 = arith.constant 5 : index
    %c0_53 = arith.constant 0 : index
    %c0_54 = arith.constant 0 : index
    %46 = vector.load %arg4[%c5, %c0_53, %c0_54] : memref<9x128x128xbf16, #tpu.memory_space<vmem>>, vector<1x128x128xbf16>
    %47 = vector.shape_cast %46 : vector<1x128x128xbf16> to vector<128x128xbf16>
    %cst_55 = arith.constant dense<0.000000e+00> : vector<512x128xf32>
    %48 = tpu.matmul %45, %47, %cst_55 {dimension_numbers = #tpu.dot_dimension_numbers<[1], [0], [0], [1], [0, 0, 1, 1], [], []>} : vector<512x128xbf16>, vector<128x128xbf16>, vector<512x128xf32> -> vector<512x128xf32>
    %49 = arith.addf %43, %48 : vector<512x128xf32>
    %c0_56 = arith.constant 0 : index
    %c2_57 = arith.constant 2 : index
    %c0_58 = arith.constant 0 : index
    %c0_59 = arith.constant 0 : index
    %50 = vector.load %arg9[%c0_56, %c2_57, %c0_58, %c0_59] : memref<2x18x18x128xbf16, #tpu.memory_space<vmem>>, vector<2x16x16x128xbf16>
    %51 = vector.shape_cast %50 : vector<2x16x16x128xbf16> to vector<512x128xbf16>
    %c6 = arith.constant 6 : index
    %c0_60 = arith.constant 0 : index
    %c0_61 = arith.constant 0 : index
    %52 = vector.load %arg4[%c6, %c0_60, %c0_61] : memref<9x128x128xbf16, #tpu.memory_space<vmem>>, vector<1x128x128xbf16>
    %53 = vector.shape_cast %52 : vector<1x128x128xbf16> to vector<128x128xbf16>
    %cst_62 = arith.constant dense<0.000000e+00> : vector<512x128xf32>
    %54 = tpu.matmul %51, %53, %cst_62 {dimension_numbers = #tpu.dot_dimension_numbers<[1], [0], [0], [1], [0, 0, 1, 1], [], []>} : vector<512x128xbf16>, vector<128x128xbf16>, vector<512x128xf32> -> vector<512x128xf32>
    %55 = arith.addf %49, %54 : vector<512x128xf32>
    %c0_63 = arith.constant 0 : index
    %c2_64 = arith.constant 2 : index
    %c1_65 = arith.constant 1 : index
    %c0_66 = arith.constant 0 : index
    %56 = vector.load %arg9[%c0_63, %c2_64, %c1_65, %c0_66] : memref<2x18x18x128xbf16, #tpu.memory_space<vmem>>, vector<2x16x16x128xbf16>
    %57 = vector.shape_cast %56 : vector<2x16x16x128xbf16> to vector<512x128xbf16>
    %c7 = arith.constant 7 : index
    %c0_67 = arith.constant 0 : index
    %c0_68 = arith.constant 0 : index
    %58 = vector.load %arg4[%c7, %c0_67, %c0_68] : memref<9x128x128xbf16, #tpu.memory_space<vmem>>, vector<1x128x128xbf16>
    %59 = vector.shape_cast %58 : vector<1x128x128xbf16> to vector<128x128xbf16>
    %cst_69 = arith.constant dense<0.000000e+00> : vector<512x128xf32>
    %60 = tpu.matmul %57, %59, %cst_69 {dimension_numbers = #tpu.dot_dimension_numbers<[1], [0], [0], [1], [0, 0, 1, 1], [], []>} : vector<512x128xbf16>, vector<128x128xbf16>, vector<512x128xf32> -> vector<512x128xf32>
    %61 = arith.addf %55, %60 : vector<512x128xf32>
    %c0_70 = arith.constant 0 : index
    %c2_71 = arith.constant 2 : index
    %c2_72 = arith.constant 2 : index
    %c0_73 = arith.constant 0 : index
    %62 = vector.load %arg9[%c0_70, %c2_71, %c2_72, %c0_73] : memref<2x18x18x128xbf16, #tpu.memory_space<vmem>>, vector<2x16x16x128xbf16>
    %63 = vector.shape_cast %62 : vector<2x16x16x128xbf16> to vector<512x128xbf16>
    %c8 = arith.constant 8 : index
    %c0_74 = arith.constant 0 : index
    %c0_75 = arith.constant 0 : index
    %64 = vector.load %arg4[%c8, %c0_74, %c0_75] : memref<9x128x128xbf16, #tpu.memory_space<vmem>>, vector<1x128x128xbf16>
    %65 = vector.shape_cast %64 : vector<1x128x128xbf16> to vector<128x128xbf16>
    %cst_76 = arith.constant dense<0.000000e+00> : vector<512x128xf32>
    %66 = tpu.matmul %63, %65, %cst_76 {dimension_numbers = #tpu.dot_dimension_numbers<[1], [0], [0], [1], [0, 0, 1, 1], [], []>} : vector<512x128xbf16>, vector<128x128xbf16>, vector<512x128xf32> -> vector<512x128xf32>
    %67 = arith.addf %61, %66 : vector<512x128xf32>
    %c0_77 = arith.constant 0 : index
    %c0_78 = arith.constant 0 : index
    %68 = vector.load %arg5[%c0_77, %c0_78] : memref<1x128xf32, #tpu.memory_space<vmem>>, vector<1x128xf32>
    %69 = vector.broadcast %68 : vector<1x128xf32> to vector<512x128xf32>
    %70 = arith.addf %67, %69 : vector<512x128xf32>
    %cst_79 = arith.constant 0.000000e+00 : f32
    %71 = vector.broadcast %cst_79 : f32 to vector<512x128xf32>
    %72 = arith.maximumf %70, %71 : vector<512x128xf32>
    %73 = arith.truncf %72 : vector<512x128xf32> to vector<512x128xbf16>
    %c0_80 = arith.constant 0 : index
    %c0_81 = arith.constant 0 : index
    %74 = vector.load %arg6[%c0_80, %c0_81] : memref<128x128xbf16, #tpu.memory_space<vmem>>, vector<128x128xbf16>
    %cst_82 = arith.constant dense<0.000000e+00> : vector<512x128xf32>
    %75 = tpu.matmul %73, %74, %cst_82 {dimension_numbers = #tpu.dot_dimension_numbers<[1], [0], [0], [1], [0, 0, 1, 1], [], []>} : vector<512x128xbf16>, vector<128x128xbf16>, vector<512x128xf32> -> vector<512x128xf32>
    %c0_83 = arith.constant 0 : index
    %c0_84 = arith.constant 0 : index
    %76 = vector.load %arg7[%c0_83, %c0_84] : memref<1x128xf32, #tpu.memory_space<vmem>>, vector<1x128xf32>
    %77 = vector.broadcast %76 : vector<1x128xf32> to vector<512x128xf32>
    %78 = arith.addf %75, %77 : vector<512x128xf32>
    %c0_85 = arith.constant 0 : index
    %c0_86 = arith.constant 0 : index
    %c0_87 = arith.constant 0 : index
    %c0_88 = arith.constant 0 : index
    %79 = vector.load %arg1[%c0_85, %c0_86, %c0_87, %c0_88] : memref<2x16x16x128xbf16, #tpu.memory_space<vmem>>, vector<2x16x16x128xbf16>
    %80 = vector.shape_cast %79 : vector<2x16x16x128xbf16> to vector<512x128xbf16>
    %81 = arith.extf %80 : vector<512x128xbf16> to vector<512x128xf32>
    %82 = arith.addf %78, %81 : vector<512x128xf32>
    %cst_89 = arith.constant 0.000000e+00 : f32
    %83 = vector.broadcast %cst_89 : f32 to vector<512x128xf32>
    %84 = arith.maximumf %82, %83 : vector<512x128xf32>
    %85 = vector.shape_cast %84 : vector<512x128xf32> to vector<2x16x16x128xf32>
    %86 = arith.truncf %85 : vector<2x16x16x128xf32> to vector<2x16x16x128xbf16>
    %c0_90 = arith.constant 0 : index
    %c0_91 = arith.constant 0 : index
    %c0_92 = arith.constant 0 : index
    %c0_93 = arith.constant 0 : index
    %87 = vector.load %arg8[%c0_90, %c0_91, %c0_92, %c0_93] : memref<2x16x16x128xbf16, #tpu.memory_space<vmem>>, vector<2x16x16x128xbf16>
    tpu.vector_store %arg8[%c0_90, %c0_91, %c0_92, %c0_93], %86 {strides = array<i32>} : memref<2x16x16x128xbf16, #tpu.memory_space<vmem>>, vector<2x16x16x128xbf16>,
    return
  }
  func.func @transform_0(%arg0: i32) -> (i32, i32, i32, i32) {
    %c0_i32 = arith.constant 0 : i32
    %c0_i32_0 = arith.constant 0 : i32
    %c0_i32_1 = arith.constant 0 : i32
    %c0_i32_2 = arith.constant 0 : i32
    return %arg0, %c0_i32, %c0_i32_0, %c0_i32_1 : i32, i32, i32, i32
  }
  func.func @transform_1(%arg0: i32) -> (i32, i32) {
    %c0_i32 = arith.constant 0 : i32
    %c0_i32_0 = arith.constant 0 : i32
    %c0_i32_1 = arith.constant 0 : i32
    return %c0_i32, %c0_i32_0 : i32, i32
  }
  func.func @transform_2(%arg0: i32) -> (i32, i32) {
    %c0_i32 = arith.constant 0 : i32
    %c0_i32_0 = arith.constant 0 : i32
    %c0_i32_1 = arith.constant 0 : i32
    return %c0_i32, %c0_i32_0 : i32, i32
  }
  func.func @transform_3(%arg0: i32) -> (i32, i32, i32) {
    %c0_i32 = arith.constant 0 : i32
    %c0_i32_0 = arith.constant 0 : i32
    %c0_i32_1 = arith.constant 0 : i32
    %c0_i32_2 = arith.constant 0 : i32
    return %c0_i32, %c0_i32_0, %c0_i32_1 : i32, i32, i32
  }
  func.func @transform_4(%arg0: i32) -> (i32, i32) {
    %c0_i32 = arith.constant 0 : i32
    %c0_i32_0 = arith.constant 0 : i32
    %c0_i32_1 = arith.constant 0 : i32
    return %c0_i32, %c0_i32_0 : i32, i32
  }
  func.func @transform_5(%arg0: i32) -> (i32, i32) {
    %c0_i32 = arith.constant 0 : i32
    %c0_i32_0 = arith.constant 0 : i32
    %c0_i32_1 = arith.constant 0 : i32
    return %c0_i32, %c0_i32_0 : i32, i32
  }
  func.func @transform_6(%arg0: i32) -> (i32, i32) {
    %c0_i32 = arith.constant 0 : i32
    %c0_i32_0 = arith.constant 0 : i32
    %c0_i32_1 = arith.constant 0 : i32
    return %c0_i32, %c0_i32_0 : i32, i32
  }
  func.func @transform_7(%arg0: i32) -> (i32, i32, i32, i32) {
    %c0_i32 = arith.constant 0 : i32
    %c0_i32_0 = arith.constant 0 : i32
    %c0_i32_1 = arith.constant 0 : i32
    %c0_i32_2 = arith.constant 0 : i32
    return %arg0, %c0_i32, %c0_i32_0, %c0_i32_1 : i32, i32, i32, i32
  }
}

</mosaic_0001>

<bundles_post_ra>
// kernel: tpu_custom_call.1
= control target key start
LH: loop header
LB: loop body
LE: loop exit
PB: predicated region body
PF: predicated region fallthrough
CT: control target
= control target key end

     0   :  { %12 = vsyncpa [#allocation4], 0  ;;  %s17669_s0 = inlined_call_operand.hbm [shape: bf16[2,16,16,128], index: 0, kind: input, shape index: {}]   ;;  %s17670_s1 = inlined_call_operand.hbm [shape: bf16[128,128], index: 1, kind: input, shape index: {}]   ;;  %s17671_s2 = inlined_call_operand.vmem [shape: f32[1,128], index: 2, kind: input, shape index: {}]   ;;  %s17672_s3 = inlined_call_operand.hbm [shape: bf16[9,128,128], index: 3, kind: input, shape index: {}]   ;;  %s17673_s4 = inlined_call_operand.vmem [shape: f32[1,128], index: 4, kind: input, shape index: {}]   ;;  %s17674_s5 = inlined_call_operand.hbm [shape: bf16[128,128], index: 5, kind: input, shape index: {}]   ;;  %s17675_s6 = inlined_call_operand.vmem [shape: f32[1,128], index: 6, kind: input, shape index: {}]   ;;  %s17676_s7 = inlined_call_operand.hbm [shape: bf16[2,16,16,128], index: 7, kind: output, shape index: {}]  }
   0x1   :  { %13 = vsyncpa [#allocation7], 0 }
   0x2   :  { %14 = vsyncpa [#allocation10], 0 }
   0x3   :  { %15 = vsyncpa [#allocation5], 0  ;;  %s15465_s24 = smov [#allocation6]   ;;  %s15466_s26 = smov [#allocation3]  }
   0x4   :  { %s33_s25 = sshll.u32 %s15465_s24, 4  ;;  %s21_s27 = sshll.u32 %s15466_s26, 4  ;;  %s34_s25 = int_to_ptr.vmem [resolvable:$true] %s33_s25  ;;  %s15513_s27 = int_to_ptr.vmem [resolvable:$true] %s21_s27 }
   0x5   :  { %s15347_s30 = scalar_lea.hbm %s17670_s1, 1024 }
   0x6   :  { %p15348_p0 = scmp.ne.s32.totalorder %s17670_s1, %s15347_s30  ;;  %p15351_p1 = scmp.lt.u32.totalorder %s15347_s30, %s17670_s1 }
   0x8   :  { %p15353_p2 = pnand %p15351_p1, %p15348_p0 }
   0xa   :  { %15356 = shalt.err (!%p15353_p2)
}
   0xb   :  { %s15357_s12 = scalar_lea.vmem %s34_s25, 1024  ;;  %p15362_p4 = scmp.lt.s32.totalorder %s34_s25, %s34_s25 }
   0xc   :  { %p15358_p3 = scmp.ne.s32.totalorder %s34_s25, %s15357_s12  ;;  %p15363_p5 = scmp.lt.s32.totalorder %s15357_s12, %s15357_s12 }
   0xe   :  { %p15364_p6 = por %p15363_p5, %p15362_p4 }
  0x10   :  { %p15365_p7 = pnand %p15364_p6, %p15358_p3 }
  0x12   :  { %15368 = shalt.err (!%p15365_p7)
}
  0x13   :  { %s15467_s13 = smov 64   ;;  %s15468_s14 = smov 4  }
  0x14   :  { %39 = dma.hbm_to_vmem [thread:$0]  %s17670_s1, 1024, %s34_s25, [#allocation7], %s15467_s13, %s15467_s13, %s15468_s14  }
  0x15   :  { %s15369_s19 = scalar_lea.hbm %s17669_s0, 4096 }
  0x16   :  { %p15370_p8 = scmp.ne.s32.totalorder %s17669_s0, %s15369_s19  ;;  %p15373_p9 = scmp.lt.u32.totalorder %s15369_s19, %s17669_s0 }
  0x18   :  { %p15375_p10 = pnand %p15373_p9, %p15370_p8 }
  0x1a   :  { %15378 = shalt.err (!%p15375_p10)
}
  0x1b   :  { %s15379_s24 = scalar_lea.vmem %s15513_s27, 4096  ;;  %p15384_p12 = scmp.lt.s32.totalorder %s15513_s27, %s15513_s27 }
  0x1c   :  { %p15380_p11 = scmp.ne.s32.totalorder %s15513_s27, %s15379_s24  ;;  %p15385_p13 = scmp.lt.s32.totalorder %s15379_s24, %s15379_s24 }
  0x1e   :  { %p15386_p0 = por %p15385_p13, %p15384_p12 }
  0x20   :  { %p15387_p1 = pnand %p15386_p0, %p15380_p11 }
  0x22   :  { %15390 = shalt.err (!%p15387_p1)
}
  0x23   :  { %27 = dma.hbm_to_vmem [thread:$0]  %s17669_s0, 4096, %s15513_s27, [#allocation4], %s15467_s13, %s15467_s13, %s15468_s14  }
  0x24   :  { %s15469_s26 = smov [#allocation8]   ;;  %s15470_s29 = smov [#allocation9]  }
  0x25   :  { %s47_s28 = sshll.u32 %s15469_s26, 4  ;;  %s61_s30 = sshll.u32 %s15470_s29, 4  ;;  %s48_s28 = int_to_ptr.vmem [resolvable:$true] %s47_s28  ;;  %s15550_s30 = int_to_ptr.vmem [resolvable:$true] %s61_s30 }
  0x26   :  { %s15391_s10 = scalar_lea.hbm %s17672_s3, 9216 }
  0x27   :  { %p15392_p2 = scmp.ne.s32.totalorder %s17672_s3, %s15391_s10  ;;  %p15395_p3 = scmp.lt.u32.totalorder %s15391_s10, %s17672_s3 }
  0x29   :  { %p15397_p4 = pnand %p15395_p3, %p15392_p2 }
  0x2b   :  { %15400 = shalt.err (!%p15397_p4)
}
  0x2c   :  { %s15401_s0 = scalar_lea.vmem %s48_s28, 9216  ;;  %p15406_p6 = scmp.lt.s32.totalorder %s48_s28, %s48_s28 }
  0x2d   :  { %p15402_p5 = scmp.ne.s32.totalorder %s48_s28, %s15401_s0  ;;  %p15407_p7 = scmp.lt.s32.totalorder %s15401_s0, %s15401_s0 }
  0x2f   :  { %p15408_p8 = por %p15407_p7, %p15406_p6 }
  0x31   :  { %p15409_p9 = pnand %p15408_p8, %p15402_p5 }
  0x33   :  { %15412 = shalt.err (!%p15409_p9)
}
  0x34   :  { %53 = dma.hbm_to_vmem [thread:$0]  %s17672_s3, 9216, %s48_s28, [#allocation7], %s15467_s13, %s15467_s13, %s15468_s14  }
  0x35   :  { %s15413_s20 = scalar_lea.hbm %s17674_s5, 1024 }
  0x36   :  { %p15414_p10 = scmp.ne.s32.totalorder %s17674_s5, %s15413_s20  ;;  %p15417_p11 = scmp.lt.u32.totalorder %s15413_s20, %s17674_s5 }
  0x38   :  { %p15419_p12 = pnand %p15417_p11, %p15414_p10 }
  0x3a   :  { %15422 = shalt.err (!%p15419_p12)
}
  0x3b   :  { %s15423_s1 = scalar_lea.vmem %s15550_s30, 1024  ;;  %p15428_p0 = scmp.lt.s32.totalorder %s15550_s30, %s15550_s30 }
  0x3c   :  { %p15424_p13 = scmp.ne.s32.totalorder %s15550_s30, %s15423_s1  ;;  %p15429_p1 = scmp.lt.s32.totalorder %s15423_s1, %s15423_s1 }
  0x3e   :  { %p15430_p2 = por %p15429_p1, %p15428_p0 }
  0x40   :  { %p15431_p3 = pnand %p15430_p2, %p15424_p13 }
  0x42   :  { %15434 = shalt.err (!%p15431_p3)
}
  0x43   :  { %67 = dma.hbm_to_vmem [thread:$0]  %s17674_s5, 1024, %s15550_s30, [#allocation10], %s15467_s13, %s15467_s13, %s15468_s14  }
  0x44   :  { %15457 = dma.done.wait [#allocation4], 4096  }
  0x45   :  { %15458 = vsyncadd [#allocation4], 4294963200 }
  0x46   :  { %15459 = dma.done.wait [#allocation7], 10240  }
  0x47   :  { %15460 = vsyncadd [#allocation7], 4294957056 }
  0x48   :  { %15461 = dma.done.wait [#allocation10], 1024  }
  0x49   :  { %15462 = vsyncadd [#allocation10], 4294966272  ;;  %v14885_v0 = vld [vmem:[#allocation6] sm:$0xff]   ;;  %v14886_v1 = vld [vmem:[#allocation6 + $0x8] sm:$0xff]   ;;  %vm812_vm0 = vcmask 1040384   ;;  %v15471_v54 = vmov 0  }
  0x4a   :  { %13469 = vmatprep.subr.bf16.mxu0 %v14885_v0  ;;  %v14887_v2 = vld [vmem:[#allocation6 + $0x10] sm:$0xff]   ;;  %v14888_v3 = vld [vmem:[#allocation6 + $0x18] sm:$0xff]   ;;  %v14893_v4 = vld [vmem:[#allocation3] sm:$0xff]   ;;  %vm813_vm1 = vsmask.f32 256  ;;  %vm1837_vm8 = vcmask 1043456  }
  0x4b   :  { %13470 = vmatpush3.bf16.msra.mxu0 %v14885_v0  ;;  %13485 = vmatprep.mubr.bf16.mxu0 %v14893_v4  ;;  %v14889_v5 = vld [vmem:[#allocation6 + $0x20] sm:$0xff]   ;;  %v14890_v6 = vld [vmem:[#allocation6 + $0x28] sm:$0xff]   ;;  %v14891_v7 = vld [vmem:[#allocation6 + $0x30] sm:$0xff]   ;;  %vm923_vm3 = vsmask.f32 7938  ;;  %vm4056_vm12 = vcmask 1042432  }
  0x4c   :  { %13471 = vmatprep.subr.bf16.mxu0 %v14886_v1  ;;  %v14892_v8 = vld [vmem:[#allocation6 + $0x38] sm:$0xff]   ;;  %v14894_v9 = vld [vmem:[#allocation3 + $0x8] sm:$0xff]   ;;  %v14895_v10 = vld [vmem:[#allocation3 + $0x10] sm:$0xff]   ;;  %799 = vst [vmem:[#allocation2] sm:$0xf] %v15471_v54  ;;  %vm4057_vm13 = vcmask 1046532  }
  0x4d   :  { %v14896_v11 = vld [vmem:[#allocation3 + $0x18] sm:$0xff]   ;;  %v14897_v12 = vld [vmem:[#allocation3 + $0x20] sm:$0xff]   ;;  %v14898_v13 = vld [vmem:[#allocation3 + $0x28] sm:$0xff]   ;;  %800 = vst [vmem:[#allocation2 + $0x4] sm:$0xf] %v15471_v54 }
  0x4e   :  { %v14899_v14 = vld [vmem:[#allocation3 + $0x30] sm:$0xff]   ;;  %v14900_v15 = vld [vmem:[#allocation3 + $0x38] sm:$0xff]   ;;  %v14901_v16 = vld [vmem:[#allocation3 + $0x40] sm:$0xff]   ;;  %801 = vst [vmem:[#allocation2 + $0x8] sm:$0x1] %v15471_v54 }
  0x4f   :  { %13472 = vmatpush3.bf16.msra.mxu0 %v14886_v1  ;;  %v14902_v17 = vld [vmem:[#allocation3 + $0x48] sm:$0xff]   ;;  %v14903_v18 = vld [vmem:[#allocation3 + $0x50] sm:$0xff]   ;;  %v14904_v19 = vld [vmem:[#allocation3 + $0x58] sm:$0xff]   ;;  %802 = vst [vmem:[#allocation2 + $0xd8] sm:$0xf] %v15471_v54 }
  0x50   :  { %13473 = vmatprep.subr.bf16.mxu0 %v14887_v2  ;;  %v14905_v20 = vld [vmem:[#allocation3 + $0x60] sm:$0xff]   ;;  %v14906_v21 = vld [vmem:[#allocation3 + $0x68] sm:$0xff]   ;;  %v14907_v22 = vld [vmem:[#allocation3 + $0x70] sm:$0xff]   ;;  %803 = vst [vmem:[#allocation2 + $0xdc] sm:$0xf] %v15471_v54 }
  0x51   :  { %v14908_v23 = vld [vmem:[#allocation3 + $0x78] sm:$0xff]   ;;  %v14909_v24 = vld [vmem:[#allocation3 + $0x80] sm:$0xff]   ;;  %v14910_v25 = vld [vmem:[#allocation3 + $0x88] sm:$0xff]   ;;  %804 = vst [vmem:[#allocation2 + $0xe0] sm:$0x1] %v15471_v54 }
  0x52   :  { %v14911_v26 = vld [vmem:[#allocation3 + $0x90] sm:$0xff]   ;;  %v14912_v27 = vld [vmem:[#allocation3 + $0x98] sm:$0xff]   ;;  %v14913_v28 = vld [vmem:[#allocation3 + $0xa0] sm:$0xff]   ;;  %806 = vst [vmem:[#allocation2 + $0xcc] sm:$0xf] %v15471_v54 }
  0x53   :  { %13474 = vmatpush3.bf16.msra.mxu0 %v14887_v2  ;;  %v14914_v29 = vld [vmem:[#allocation3 + $0xa8] sm:$0xff]   ;;  %v14915_v30 = vld [vmem:[#allocation3 + $0xb0] sm:$0xff]   ;;  %v14916_v31 = vld [vmem:[#allocation3 + $0xb8] sm:$0xff]   ;;  %807 = vst [vmem:[#allocation2 + $0xd0] sm:$0xf] %v15471_v54 }
  0x54   :  { %13475 = vmatprep.subr.bf16.mxu0 %v14888_v3  ;;  %v14917_v32 = vld [vmem:[#allocation3 + $0xc0] sm:$0xff]   ;;  %vm15588_vm2 = vmand %vm812_vm0, %vm813_vm1  ;;  %v821_v35 = vld [vmem:[#allocation2 + $0x18] sm:$0x1]  ;;  %808 = vst [vmem:[#allocation2 + $0xd4] sm:$0x1] %v15471_v54 }
  0x55   :  { %v14925_v33 = vld [vmem:[#allocation8 + $0x40] sm:$0xff]   ;;  %v822_v36 = vsel %vm15588_vm2, 0, %v821_v35  ;;  %v818_v37 = vld [vmem:[#allocation2 + $0xc] sm:$0x1]  ;;  %vm15597_vm4 = vmand %vm812_vm0, %vm923_vm3  ;;  %809 = vst [vmem:[#allocation2 + $0x1a4] sm:$0xf] %v15471_v54 }
  0x56   :  { %823 = vst [vmem:[#allocation2 + $0x18] sm:$0x1] %v822_v36  ;;  %v819_v38 = vsel %vm15588_vm2, 0, %v818_v37  ;;  %v931_v40 = vld [vmem:[#allocation2 + $0x20] sm:$0x1]  ;;  %v14926_v43 = vld [vmem:[#allocation8 + $0x48] sm:$0xff]   ;;  %vm15692_vm10 = vmand %vm1837_vm8, %vm923_vm3 }
  0x57   :  { %13476 = vmatpush3.bf16.msra.mxu0 %v14888_v3  ;;  %820 = vst [vmem:[#allocation2 + $0xc] sm:$0x1] %v819_v38  ;;  %v932_v41 = vsel %vm15597_vm4, 0, %v931_v40  ;;  %v928_v42 = vld [vmem:[#allocation2 + $0x14] sm:$0x1]  ;;  %v14918_v45 = vld [vmem:[#allocation3 + $0xc8] sm:$0xff]   ;;  %vm16459_vm14 = vmor %vm4056_vm12, %vm4057_vm13 }
  0x58   :  { %13477 = vmatprep.subr.bf16.mxu0 %v14889_v5  ;;  %933 = vst [vmem:[#allocation2 + $0x20] sm:$0x1] %v932_v41  ;;  %v929_v44 = vsel %vm15597_vm4, 0, %v928_v42  ;;  %v14919_v46 = vld [vmem:[#allocation3 + $0xd0] sm:$0xff]   ;;  %v827_v47 = vld [vmem:[#allocation2 + $0x30] sm:$0x1] }
  0x59   :  { %930 = vst [vmem:[#allocation2 + $0x14] sm:$0x1] %v929_v44  ;;  %v828_v48 = vsel %vm15588_vm2, 0, %v827_v47  ;;  %v824_v49 = vld [vmem:[#allocation2 + $0x24] sm:$0x1]  ;;  %v14920_v52 = vld [vmem:[#allocation3 + $0xd8] sm:$0xff]  }
  0x5a   :  { %829 = vst [vmem:[#allocation2 + $0x30] sm:$0x1] %v828_v48  ;;  %v825_v50 = vsel %vm15588_vm2, 0, %v824_v49  ;;  %v14927_v51 = vld [vmem:[#allocation8 + $0x50] sm:$0xff]   ;;  %v14921_v53 = vld [vmem:[#allocation3 + $0xe0] sm:$0xff]   ;;  %v14928_v58 = vld [vmem:[#allocation8 + $0x58] sm:$0xff]  }
  0x5b   :  { %13478 = vmatpush3.bf16.msra.mxu0 %v14889_v5  ;;  %826 = vst [vmem:[#allocation2 + $0x24] sm:$0x1] %v825_v50  ;;  %810 = vst [vmem:[#allocation2 + $0x1a8] sm:$0xf] %v15471_v54  ;;  %v937_v55 = vld [vmem:[#allocation2 + $0x38] sm:$0x1] }
  0x5c   :  { %13479 = vmatprep.subr.bf16.mxu0 %v14890_v6  ;;  %811 = vst [vmem:[#allocation2 + $0x1ac] sm:$0x1] %v15471_v54  ;;  %v938_v56 = vsel %vm15597_vm4, 0, %v937_v55  ;;  %v934_v57 = vld [vmem:[#allocation2 + $0x2c] sm:$0x1]  ;;  %v14922_v60 = vld [vmem:[#allocation3 + $0xe8] sm:$0xff]  }
  0x5d   :  { %939 = vst [vmem:[#allocation2 + $0x38] sm:$0x1] %v938_v56  ;;  %v935_v59 = vsel %vm15597_vm4, 0, %v934_v57  ;;  %v14923_v61 = vld [vmem:[#allocation3 + $0xf0] sm:$0xff]   ;;  %v833_v62 = vld [vmem:[#allocation2 + $0x48] sm:$0x1] }
  0x5e   :  { %936 = vst [vmem:[#allocation2 + $0x2c] sm:$0x1] %v935_v59  ;;  %v14929_v63 = vld [vmem:[#allocation8 + $0x60] sm:$0xff]   ;;  %v815_v0 = vld [vmem:[#allocation2] sm:$0x1]  ;;  %v834_v1 = vsel %vm15588_vm2, 0, %v833_v62 }
  0x5f   :  { %13480 = vmatpush3.bf16.msra.mxu0 %v14890_v6  ;;  %v830_v2 = vld [vmem:[#allocation2 + $0x3c] sm:$0x1]  ;;  %v816_v3 = vsel %vm15588_vm2, 0, %v815_v0  ;;  %835 = vst [vmem:[#allocation2 + $0x48] sm:$0x1] %v834_v1 }
  0x60   :  { %13481 = vmatprep.subr.bf16.mxu0 %v14891_v7  ;;  %v831_v4 = vsel %vm15588_vm2, 0, %v830_v2  ;;  %v943_v5 = vld [vmem:[#allocation2 + $0x50] sm:$0x1]  ;;  %817 = vst [vmem:[#allocation2] sm:$0x1] %v816_v3 }
  0x61   :  { %832 = vst [vmem:[#allocation2 + $0x3c] sm:$0x1] %v831_v4  ;;  %v944_v6 = vsel %vm15597_vm4, 0, %v943_v5  ;;  %vm2178_vm5 = vsmask.f32 3328 }
  0x62   :  { %945 = vst [vmem:[#allocation2 + $0x50] sm:$0x1] %v944_v6  ;;  %v845_v36 = vld [vmem:[#allocation2 + $0x78] sm:$0x1]  ;;  %vm2179_vm6 = vsmask.f32 7440 }
  0x63   :  { %13482 = vmatpush3.bf16.msra.mxu0 %v14891_v7  ;;  %v940_v7 = vld [vmem:[#allocation2 + $0x44] sm:$0x1]  ;;  %v846_v40 = vsel %vm15588_vm2, 0, %v845_v36  ;;  %v842_v41 = vld [vmem:[#allocation2 + $0x6c] sm:$0x1]  ;;  %vm15637_vm7 = vmor %vm2178_vm5, %vm2179_vm6 }
  0x64   :  { %13483 = vmatprep.subr.bf16.mxu0 %v14892_v8  ;;  %847 = vst [vmem:[#allocation2 + $0x78] sm:$0x1] %v846_v40  ;;  %v843_v42 = vsel %vm15588_vm2, 0, %v842_v41  ;;  %v955_v48 = vld [vmem:[#allocation2 + $0x80] sm:$0x1] }
  0x65   :  { %844 = vst [vmem:[#allocation2 + $0x6c] sm:$0x1] %v843_v42  ;;  %v956_v49 = vsel %vm15597_vm4, 0, %v955_v48  ;;  %v851_v54 = vld [vmem:[#allocation2 + $0x90] sm:$0x1] }
  0x66   :  { %957 = vst [vmem:[#allocation2 + $0x80] sm:$0x1] %v956_v49  ;;  %v852_v55 = vsel %vm15588_vm2, 0, %v851_v54  ;;  %v848_v56 = vld [vmem:[#allocation2 + $0x84] sm:$0x1] }
  0x67   :  { %13484 = vmatpush3.bf16.msra.mxu0 %v14892_v8  ;;  %v14930_v8 = vld [vmem:[#allocation8 + $0x68] sm:$0xff]   ;;  %853 = vst [vmem:[#allocation2 + $0x90] sm:$0x1] %v852_v55  ;;  %v857_v62 = vld [vmem:[#allocation2 + $0xa8] sm:$0x1] }
  0x68   :  { %13549 = vmatprep.subr.bf16.mxu0 %v14925_v33  ;;  %v961_v57 = vld [vmem:[#allocation2 + $0x98] sm:$0x1]  ;;  %v854_v0 = vld [vmem:[#allocation2 + $0x9c] sm:$0x1]  ;;  %v967_v1 = vld [vmem:[#allocation2 + $0xb0] sm:$0x1] }
  0x69   :  { %v962_v59 = vsel %vm15597_vm4, 0, %v961_v57  ;;  %v855_v2 = vsel %vm15588_vm2, 0, %v854_v0  ;;  %v968_v3 = vsel %vm15597_vm4, 0, %v967_v1  ;;  %v964_v4 = vld [vmem:[#allocation2 + $0xa4] sm:$0x1] }
  0x6a   :  { %13486 = vmatmul.mubr.bf16.vlgmr.msra.gmra.mrb[0].mxu0 %v14894_v9  ;;  %v941_v9 = vsel %vm15597_vm4, 0, %v940_v7  ;;  %963 = vst [vmem:[#allocation2 + $0x98] sm:$0x1] %v962_v59  ;;  %856 = vst [vmem:[#allocation2 + $0x9c] sm:$0x1] %v855_v2  ;;  %v965_v5 = vsel %vm15597_vm4, 0, %v964_v4 }
  0x6b   :  { %13489 = vmatprep.mubr.bf16.mxu0 %v14895_v10  ;;  %13550 = vmatpush3.bf16.msra.mxu0 %v14925_v33  ;;  %v925_v10 = vld [vmem:[#allocation2 + $0x8] sm:$0x1]  ;;  %942 = vst [vmem:[#allocation2 + $0x44] sm:$0x1] %v941_v9  ;;  %969 = vst [vmem:[#allocation2 + $0xb0] sm:$0x1] %v968_v3 }
  0x6c   :  { %13551 = vmatprep.subr.bf16.mxu0 %v14926_v43  ;;  %966 = vst [vmem:[#allocation2 + $0xa4] sm:$0x1] %v965_v5  ;;  %v863_v6 = vld [vmem:[#allocation2 + $0xc0] sm:$0x1]  ;;  %vm1194_vm9 = vsmask.f32 4368 }
  0x6d   :  { %v864_v7 = vsel %vm15588_vm2, 0, %v863_v6  ;;  %v1840_v0 = vld [vmem:[#allocation2 + $0xc] sm:$0xf]  ;;  %vm15699_vm11 = vmor %vm813_vm1, %vm1194_vm9 }
  0x6e   :  { %865 = vst [vmem:[#allocation2 + $0xc0] sm:$0x1] %v864_v7  ;;  %v1853_v7 = vld [vmem:[#allocation2 + $0x20] sm:$0x1] }
  0x6f   :  { %13552 = vmatpush3.bf16.msra.mxu0 %v14926_v43 }
  0x70   :  { %13553 = vmatprep.subr.bf16.mxu0 %v14927_v51 }
  0x72   :  { %13490 = vmatmul.mubr.bf16.gmra.mrb[4].mxu0 %v14896_v11  ;;  %v926_v11 = vsel %vm15597_vm4, 0, %v925_v10  ;;  %v973_v10 = vld [vmem:[#allocation2 + $0xc8] sm:$0x1] }
  0x73   :  { %13493 = vmatprep.mubr.bf16.mxu0 %v14897_v12  ;;  %13554 = vmatpush3.bf16.msra.mxu0 %v14927_v51  ;;  %927 = vst [vmem:[#allocation2 + $0x8] sm:$0x1] %v926_v11  ;;  %v14924_v12 = vld [vmem:[#allocation3 + $0xf8] sm:$0xff]   ;;  %v952_v51 = vld [vmem:[#allocation2 + $0x74] sm:$0x1]  ;;  %v974_v11 = vsel %vm15597_vm4, 0, %v973_v10 }
  0x74   :  { %13555 = vmatprep.subr.bf16.mxu0 %v14928_v58  ;;  %975 = vst [vmem:[#allocation2 + $0xc8] sm:$0x1] %v974_v11  ;;  %v14936_v10 = vld [vmem:[#allocation8 + $0xd8] sm:$0xff]  }
  0x77   :  { %13556 = vmatpush3.bf16.msra.mxu0 %v14928_v58  ;;  %v849_v58 = vsel %vm15588_vm2, 0, %v848_v56  ;;  %v1849_v56 = vld [vmem:[#allocation2 + $0x18] sm:$0xf] }
  0x78   :  { %13557 = vmatprep.subr.bf16.mxu0 %v14929_v63  ;;  %850 = vst [vmem:[#allocation2 + $0x84] sm:$0x1] %v849_v58 }
  0x7a   :  { %13494 = vmatmul.mubr.bf16.gmra.mrb[8].mxu0 %v14898_v13  ;;  %v14931_v13 = vld [vmem:[#allocation8 + $0x70] sm:$0xff]  }
  0x7b   :  { %13497 = vmatprep.mubr.bf16.mxu0 %v14899_v14  ;;  %13558 = vmatpush3.bf16.msra.mxu0 %v14929_v63  ;;  %v839_v14 = vld [vmem:[#allocation2 + $0x60] sm:$0x1]  ;;  %v858_v63 = vsel %vm15588_vm2, 0, %v857_v62 }
  0x7c   :  { %13559 = vmatprep.subr.bf16.mxu0 %v14930_v8  ;;  %859 = vst [vmem:[#allocation2 + $0xa8] sm:$0x1] %v858_v63 }
  0x7f   :  { %13560 = vmatpush3.bf16.msra.mxu0 %v14930_v8  ;;  %v860_v8 = vld [vmem:[#allocation2 + $0xb4] sm:$0x1] }
  0x80   :  { %13561 = vmatprep.subr.bf16.mxu0 %v14931_v13  ;;  %v861_v9 = vsel %vm15588_vm2, 0, %v860_v8 }
  0x81   :  { %862 = vst [vmem:[#allocation2 + $0xb4] sm:$0x1] %v861_v9 }
  0x82   :  { %13498 = vmatmul.mubr.bf16.gmra.mrb[12].mxu0 %v14900_v15  ;;  %v2066_v15 = vld [vmem:[#allocation2] sm:$0xf] }
  0x83   :  { %13501 = vmatprep.mubr.bf16.mxu0 %v14901_v16  ;;  %v840_v16 = vsel %vm15588_vm2, 0, %v839_v14  ;;  %13562 = vmatpush3.bf16.msra.mxu0 %v14931_v13  ;;  %v14933_v14 = vld [vmem:[#allocation8 + $0xc0] sm:$0xff]  }
  0x84   :  { %841 = vst [vmem:[#allocation2 + $0x60] sm:$0x1] %v840_v16  ;;  %14349 = vmatprep.subr.bf16.mxu1 %v14933_v14  ;;  %v875_v16 = vld [vmem:[#allocation2 + $0xf0] sm:$0x1] }
  0x85   :  { %14357 = vmatpush3.bf16.msra.mxu1 %v14933_v14  ;;  %v1846_v14 = vld [vmem:[#allocation2 + $0x14] sm:$0x1] }
  0x8a   :  { %13502 = vmatmul.mubr.bf16.gmra.mrb[16].mxu0 %v14902_v17  ;;  %v836_v17 = vld [vmem:[#allocation2 + $0x54] sm:$0x1] }
  0x8b   :  { %13505 = vmatprep.mubr.bf16.mxu0 %v14903_v18  ;;  %v2182_v18 = vshrl.u32 %v2066_v15, 16 }
  0x92   :  { %13506 = vmatmul.mubr.bf16.gmra.mrb[20].mxu0 %v14904_v19  ;;  %v837_v19 = vsel %vm15588_vm2, 0, %v836_v17  ;;  %v876_v17 = vsel %vm15588_vm2, 0, %v875_v16 }
  0x93   :  { %13509 = vmatprep.mubr.bf16.mxu0 %v14905_v20  ;;  %v949_v20 = vld [vmem:[#allocation2 + $0x68] sm:$0x1]  ;;  %838 = vst [vmem:[#allocation2 + $0x54] sm:$0x1] %v837_v19  ;;  %877 = vst [vmem:[#allocation2 + $0xf0] sm:$0x1] %v876_v17 }
  0x94   :  { %v15678_v19 = vld [vmem:[%s17671_s2] ss:$0 sm:$0xff] }
  0x9a   :  { %13510 = vmatmul.mubr.bf16.gmra.mrb[24].mxu0 %v14906_v21  ;;  %v2067_v21 = vld [vmem:[#allocation2 + $0x4] sm:$0xf] }
  0x9b   :  { %13513 = vmatprep.mubr.bf16.mxu0 %v14907_v22  ;;  %v2185_v22 = vshll.u32 %v2066_v15, 16  ;;  %v2195_v33 = vshrl.u32 %v2067_v21, 16  ;;  %v14934_v15 = vld [vmem:[#allocation8 + $0xc8] sm:$0xff]  }
  0x9c   :  { %14350 = vmatprep.subr.bf16.mxu1 %v14934_v15 }
  0x9d   :  { %v2197_v38 = vrot.slane %v2195_v33, 4  ;;  %14358 = vmatpush3.bf16.msra.mxu1 %v14934_v15 }
  0xa2   :  { %13514 = vmatmul.mubr.bf16.gmra.mrb[28].mxu0 %v14908_v23  ;;  %v950_v23 = vsel %vm15597_vm4, 0, %v949_v20 }
  0xa3   :  { %13517 = vmatprep.mubr.bf16.mxu0 %v14909_v24  ;;  %v946_v24 = vld [vmem:[#allocation2 + $0x5c] sm:$0x1]  ;;  %951 = vst [vmem:[#allocation2 + $0x68] sm:$0x1] %v950_v23  ;;  %v982_v23 = vld [vmem:[#allocation2 + $0xec] sm:$0x1] }
  0xaa   :  { %13518 = vmatmul.mubr.bf16.gmra.mrb[32].mxu0 %v14910_v25  ;;  %v14932_v25 = vld [vmem:[#allocation8 + $0x78] sm:$0xff]  }
  0xab   :  { %13521 = vmatprep.mubr.bf16.mxu0 %v14911_v26  ;;  %v947_v26 = vsel %vm15597_vm4, 0, %v946_v24  ;;  %13563 = vmatprep.subr.bf16.mxu0 %v14932_v25 }
  0xac   :  { %948 = vst [vmem:[#allocation2 + $0x5c] sm:$0x1] %v947_v26  ;;  %13564 = vmatpush3.bf16.msra.mxu0 %v14932_v25  ;;  %v983_v25 = vsel %vm15597_vm4, 0, %v982_v23  ;;  %v14935_v26 = vld [vmem:[#allocation8 + $0xd0] sm:$0xff]  }
  0xad   :  { %984 = vst [vmem:[#allocation2 + $0xec] sm:$0x1] %v983_v25  ;;  %14351 = vmatprep.subr.bf16.mxu1 %v14935_v26  ;;  %v881_v25 = vld [vmem:[#allocation2 + $0x108] sm:$0x1] }
  0xae   :  { %14359 = vmatpush3.bf16.msra.mxu1 %v14935_v26  ;;  %v878_v26 = vld [vmem:[#allocation2 + $0xfc] sm:$0x1] }
  0xaf   :  { %14352 = vmatprep.subr.bf16.mxu1 %v14936_v10 }
  0xb2   :  { %13522 = vmatmul.mubr.bf16.gmra.mrb[36].mxu0 %v14912_v27  ;;  %v2184_v27 = vrot.slane %v2182_v18, 4  ;;  %v872_v18 = vld [vmem:[#allocation2 + $0xe4] sm:$0x1]  ;;  %14360 = vmatpush3.bf16.msra.mxu1 %v14936_v10 }
  0xb3   :  { %13525 = vmatprep.mubr.bf16.mxu0 %v14913_v28  ;;  %v2187_v28 = vrot.slane %v2185_v22, 5  ;;  %v873_v20 = vsel %vm15588_vm2, 0, %v872_v18 }
  0xb4   :  { %874 = vst [vmem:[#allocation2 + $0xe4] sm:$0x1] %v873_v20 }
  0xba   :  { %13526 = vmatmul.mubr.bf16.gmra.mrb[40].mxu0 %v14914_v29  ;;  %v2191_v29 = vshll.u32 %v2067_v21, 16  ;;  %v985_v21 = vld [vmem:[#allocation2 + $0xf8] sm:$0x1] }
  0xbb   :  { %13529 = vmatprep.mubr.bf16.mxu0 %v14915_v30  ;;  %v2146_v30 = vld [vmem:[#allocation2 + $0x8] sm:$0x1]  ;;  %v986_v22 = vsel %vm15597_vm4, 0, %v985_v21 }
  0xbc   :  { %v2201_v35 = vshll.u32 %v2146_v30, 16  ;;  %987 = vst [vmem:[#allocation2 + $0xf8] sm:$0x1] %v986_v22 }
  0xbe   :  { %v2203_v44 = vrot.slane %v2201_v35, 5 }
  0xc2   :  { %13530 = vmatmul.mubr.bf16.gmra.mrb[44].mxu0 %v14916_v31  ;;  %v2188_v31 = vor.u32 %v2187_v28, %v2184_v27 }
  0xc3   :  { %13533 = vmatprep.mubr.bf16.mxu0 %v14917_v32  ;;  %v2193_v32 = vrot.slane %v2191_v29, 5 }
  0xc4   :  { %v2189_v37 = vrot.slane %v2188_v31, 4 }
  0xc5   :  { %v2198_v43 = vor.u32 %v2197_v38, %v2193_v32 }
  0xc7   :  { %v2199_v47 = vrot.slane %v2198_v43, 4 }
  0xc9   :  { %v2204_v50 = vsel %vm15637_vm7, %v2199_v47, %v2203_v44 }
  0xca   :  { %13534 = vmatmul.mubr.bf16.gmra.mrb[48].mxu0 %v14918_v45 }
  0xcb   :  { %13537 = vmatprep.mubr.bf16.mxu0 %v14919_v46  ;;  %v2194_v46 = vsel %vm15637_vm7, %v2189_v37, %v2193_v32 }
  0xd2   :  { %13538 = vmatmul.mubr.bf16.gmra.mrb[52].mxu0 %v14920_v52  ;;  %v12021_v52 = vcombine.low %v2194_v46, %v2204_v50 }
  0xd3   :  { %13541 = vmatprep.mubr.bf16.mxu0 %v14921_v53  ;;  %v953_v53 = vsel %vm15597_vm4, 0, %v952_v51 }
  0xd4   :  { %954 = vst [vmem:[#allocation2 + $0x74] sm:$0x1] %v953_v53 }
  0xda   :  { %13542 = vmatmul.mubr.bf16.gmra.mrb[56].mxu0 %v14922_v60  ;;  %v958_v60 = vld [vmem:[#allocation2 + $0x8c] sm:$0x1] }
  0xdb   :  { %13545 = vmatprep.mubr.bf16.mxu0 %v14923_v61  ;;  %v959_v61 = vsel %vm15597_vm4, 0, %v958_v60 }
  0xdc   :  { %960 = vst [vmem:[#allocation2 + $0x8c] sm:$0x1] %v959_v61 }
  0xe2   :  { %13546 = vmatmul.mubr.bf16.gmra.mrb[60].mxu0 %v14924_v12  ;;  %v970_v12 = vld [vmem:[#allocation2 + $0xbc] sm:$0x1] }
  0xe3   :  { %13565 = vmatprep.mubr.bf16.mxu0 %v12021_v52  ;;  %v971_v13 = vsel %vm15597_vm4, 0, %v970_v12 }
  0xe4   :  { %972 = vst [vmem:[#allocation2 + $0xbc] sm:$0x1] %v971_v13 }
 0x13d   :  { %v13487_v24 = vpop.f32.mrb[0].mxu0 }
 0x13e   :  { %v453_v27 = vadd.f32 %v13487_v24, %v15678_v19  ;;  %v444_v28 = vpop.f32.mrb[1].mxu0 }
 0x13f   :  { %v445_v29 = vadd.f32 %v15678_v19, %v444_v28  ;;  %v13488_v30 = vpop.f32.mrb[2].mxu0 }
 0x140   :  { %v701_v31 = vmax.f32 %v453_v27, 0.0  ;;  %v456_v32 = vadd.f32 %v13488_v30, %v15678_v19  ;;  %v447_v33 = vpop.f32.mrb[3].mxu0 }
 0x141   :  { %v699_v35 = vmax.f32 %v445_v29, 0.0  ;;  %v448_v36 = vadd.f32 %v15678_v19, %v447_v33  ;;  %v1863_v33 = vld [vmem:[#allocation2 + $0x30] sm:$0xf] }
 0x142   :  { %v12553_v37 = vpack.c.bf16 %v701_v31, %v701_v31  ;;  %v702_v38 = vmax.f32 %v456_v32, 0.0 }
 0x143   :  { %v12551_v40 = vpack.c.bf16 %v699_v35, %v699_v35  ;;  %v700_v41 = vmax.f32 %v448_v36, 0.0 }
 0x144   :  { %v1214_v42 = vshrl.u32 %v12553_v37, 16  ;;  %v12554_v43 = vpack.c.bf16 %v702_v38, %v702_v38  ;;  %v1217_v44 = vshll.u32 %v12553_v37, 16 }
 0x145   :  { %v1197_v46 = vshrl.u32 %v12551_v40, 16  ;;  %v1200_v47 = vshll.u32 %v12551_v40, 16  ;;  %v12552_v48 = vpack.c.bf16 %v700_v41, %v700_v41  ;;  %v13491_v49 = vpop.f32.mrb[4].mxu0  ;;  %v1856_v41 = vld [vmem:[#allocation2 + $0x24] sm:$0xf] }
 0x146   :  { %v1216_v50 = vrot.slane %v1214_v42, 7  ;;  %v1222_v51 = vshrl.u32 %v12554_v43, 16  ;;  %v1225_v52 = vshll.u32 %v12554_v43, 16  ;;  %v469_v53 = vadd.f32 %v13491_v49, %v15678_v19  ;;  %v460_v54 = vpop.f32.mrb[5].mxu0 }
 0x147   :  { %v1199_v57 = vrot.slane %v1197_v46, 7  ;;  %v1205_v58 = vshrl.u32 %v12552_v48, 16  ;;  %v1208_v59 = vshll.u32 %v12552_v48, 16  ;;  %v461_v60 = vadd.f32 %v15678_v19, %v460_v54  ;;  %v13492_v61 = vpop.f32.mrb[6].mxu0 }
 0x148   :  { %v1219_v62 = vor.u32 %v1217_v44, %v1216_v50  ;;  %v1220_v63 = vrot.slane %v1216_v50, 4  ;;  %v1224_v1 = vrot.slane %v1222_v51, 7  ;;  %v705_v2 = vmax.f32 %v469_v53, 0.0  ;;  %v463_v3 = vpop.f32.mrb[7].mxu0 }
 0x149   :  { %v1202_v4 = vor.u32 %v1200_v47, %v1199_v57  ;;  %v1203_v5 = vrot.slane %v1199_v57, 4  ;;  %v1207_v8 = vrot.slane %v1205_v58, 7  ;;  %v703_v9 = vmax.f32 %v461_v60, 0.0 }
 0x14a   :  { %v1850_v11 = vsel %vm15692_vm10, %v1219_v62, %v1849_v56  ;;  %v1227_v12 = vor.u32 %v1225_v52, %v1224_v1  ;;  %v1229_v13 = vrot.slane %v1224_v1, 4  ;;  %v12557_v15 = vpack.c.bf16 %v705_v2, %v705_v2  ;;  %v14937_v52 = vld [vmem:[#allocation8 + $0xe0] sm:$0xff]  }
 0x14b   :  { %1851 = vst [vmem:[#allocation2 + $0x18] sm:$0xf] %v1850_v11  ;;  %v1841_v16 = vsel %vm15692_vm10, %v1202_v4, %v1840_v0  ;;  %v1210_v17 = vor.u32 %v1208_v59, %v1207_v8  ;;  %v1212_v18 = vrot.slane %v1207_v8, 4  ;;  %v12555_v20 = vpack.c.bf16 %v703_v9, %v703_v9  ;;  %14353 = vmatprep.subr.bf16.mxu1 %v14937_v52  ;;  %v1860_v8 = vld [vmem:[#allocation2 + $0x2c] sm:$0x1] }
 0x14c   :  { %1842 = vst [vmem:[#allocation2 + $0xc] sm:$0xf] %v1841_v16  ;;  %v1228_v21 = vsel %vm15699_vm11, %v1220_v63, %v1227_v12  ;;  %v1854_v22 = vsel %vm15588_vm2, %v1229_v13, %v1853_v7  ;;  %v1248_v23 = vshrl.u32 %v12557_v15, 16  ;;  %v1251_v24 = vshll.u32 %v12557_v15, 16  ;;  %14361 = vmatpush3.bf16.msra.mxu1 %v14937_v52  ;;  %v1867_v7 = vld [vmem:[#allocation2 + $0x38] sm:$0x1] }
 0x14d   :  { %1852 = vst [vmem:[#allocation2 + $0x1c] sm:$0xf] %v1228_v21  ;;  %1855 = vst [vmem:[#allocation2 + $0x20] sm:$0x1] %v1854_v22  ;;  %v1211_v27 = vsel %vm15699_vm11, %v1203_v5, %v1210_v17  ;;  %v1847_v28 = vsel %vm15588_vm2, %v1212_v18, %v1846_v14  ;;  %v1231_v29 = vshrl.u32 %v12555_v20, 16  ;;  %v1234_v30 = vshll.u32 %v12555_v20, 16 }
 0x14e   :  { %v13495_v31 = vpop.f32.mrb[8].mxu0  ;;  %1843 = vst [vmem:[#allocation2 + $0x10] sm:$0xf] %v1211_v27  ;;  %1848 = vst [vmem:[#allocation2 + $0x14] sm:$0x1] %v1847_v28  ;;  %v15715_v32 = vrot.slane %v1248_v23, 7  ;;  %v472_v35 = vadd.f32 %v13492_v61, %v15678_v19  ;;  %v464_v36 = vadd.f32 %v15678_v19, %v463_v3 }
 0x14f   :  { %v485_v37 = vadd.f32 %v13495_v31, %v15678_v19  ;;  %v476_v38 = vpop.f32.mrb[9].mxu0  ;;  %v15720_v40 = vrot.slane %v1231_v29, 7  ;;  %v882_v44 = vsel %vm15588_vm2, 0, %v881_v25  ;;  %v879_v46 = vsel %vm15588_vm2, 0, %v878_v26  ;;  %v1877_v21 = vld [vmem:[#allocation2 + $0x48] sm:$0xf] }
 0x150   :  { %v477_v42 = vadd.f32 %v15678_v19, %v476_v38  ;;  %v13496_v43 = vpop.f32.mrb[10].mxu0  ;;  %v1253_v47 = vor.u32 %v1251_v24, %v15715_v32  ;;  %v1254_v48 = vrot.slane %v15715_v32, 4  ;;  %v706_v49 = vmax.f32 %v472_v35, 0.0  ;;  %883 = vst [vmem:[#allocation2 + $0x108] sm:$0x1] %v882_v44 }
 0x151   :  { %v704_v50 = vmax.f32 %v464_v36, 0.0  ;;  %v479_v51 = vpop.f32.mrb[11].mxu0  ;;  %880 = vst [vmem:[#allocation2 + $0xfc] sm:$0x1] %v879_v46  ;;  %v1236_v53 = vor.u32 %v1234_v30, %v15720_v40  ;;  %v1237_v54 = vrot.slane %v15720_v40, 4  ;;  %v709_v56 = vmax.f32 %v485_v37, 0.0 }
 0x152   :  { %v707_v57 = vmax.f32 %v477_v42, 0.0  ;;  %v1864_v58 = vsel %vm15692_vm10, %v1253_v47, %v1863_v33  ;;  %v12558_v59 = vpack.c.bf16 %v706_v49, %v706_v49  ;;  %v488_v61 = vadd.f32 %v13496_v43, %v15678_v19  ;;  %v1870_v30 = vld [vmem:[#allocation2 + $0x3c] sm:$0xf] }
 0x153   :  { %v12556_v60 = vpack.c.bf16 %v704_v50, %v704_v50  ;;  %1865 = vst [vmem:[#allocation2 + $0x30] sm:$0xf] %v1864_v58  ;;  %v1857_v62 = vsel %vm15692_vm10, %v1236_v53, %v1856_v41  ;;  %v12561_v63 = vpack.c.bf16 %v709_v56, %v709_v56  ;;  %v480_v1 = vadd.f32 %v15678_v19, %v479_v51  ;;  %v14938_v47 = vld [vmem:[#allocation8 + $0xe8] sm:$0xff]   ;;  %v1881_v58 = vld [vmem:[#allocation2 + $0x50] sm:$0x1] }
 0x154   :  { %v12559_v0 = vpack.c.bf16 %v707_v57, %v707_v57  ;;  %1858 = vst [vmem:[#allocation2 + $0x24] sm:$0xf] %v1857_v62  ;;  %v1256_v2 = vshrl.u32 %v12558_v59, 16  ;;  %v1259_v3 = vshll.u32 %v12558_v59, 16  ;;  %v710_v16 = vmax.f32 %v488_v61, 0.0  ;;  %14354 = vmatprep.subr.bf16.mxu1 %v14938_v47  ;;  %v15034_v34 = vld [vmem:[#allocation2 + $0x18] sm:$0xff]  }
 0x155   :  { %v1239_v4 = vshrl.u32 %v12556_v60, 16  ;;  %v1242_v5 = vshll.u32 %v12556_v60, 16  ;;  %v1282_v9 = vshrl.u32 %v12561_v63, 16  ;;  %v1285_v10 = vshll.u32 %v12561_v63, 16  ;;  %v13499_v13 = vpop.f32.mrb[12].mxu0  ;;  %14362 = vmatpush3.bf16.msra.mxu1 %v14938_v47 }
 0x156   :  { %v1265_v11 = vshrl.u32 %v12559_v0, 16  ;;  %v1268_v12 = vshll.u32 %v12559_v0, 16  ;;  %v1258_v14 = vrot.slane %v1256_v2, 7  ;;  %v708_v17 = vmax.f32 %v480_v1, 0.0  ;;  %v492_v18 = vpop.f32.mrb[13].mxu0 }
 0x157   :  { %v1241_v15 = vrot.slane %v1239_v4, 7  ;;  %v15737_v20 = vrot.slane %v1282_v9, 7  ;;  %v501_v23 = vadd.f32 %v13499_v13, %v15678_v19  ;;  %v493_v24 = vadd.f32 %v15678_v19, %v492_v18  ;;  %v13500_v25 = vpop.f32.mrb[14].mxu0  ;;  %v1874_v2 = vld [vmem:[#allocation2 + $0x44] sm:$0x1] }
 0x158   :  { %v15739_v22 = vrot.slane %v1265_v11, 7  ;;  %v1261_v26 = vor.u32 %v1259_v3, %v1258_v14  ;;  %v1263_v27 = vrot.slane %v1258_v14, 4  ;;  %v495_v31 = vpop.f32.mrb[15].mxu0  ;;  %v12562_v44 = vpack.c.bf16 %v710_v16, %v710_v16 }
 0x159   :  { %v1244_v28 = vor.u32 %v1242_v5, %v1241_v15  ;;  %v1246_v29 = vrot.slane %v1241_v15, 4  ;;  %v1287_v32 = vor.u32 %v1285_v10, %v15737_v20  ;;  %v1288_v33 = vrot.slane %v15737_v20, 4 }
 0x15a   :  { %v1270_v35 = vor.u32 %v1268_v12, %v15739_v22  ;;  %v1271_v36 = vrot.slane %v15739_v22, 4  ;;  %v1262_v37 = vsel %vm15699_vm11, %v1254_v48, %v1261_v26  ;;  %v1868_v38 = vsel %vm15588_vm2, %v1263_v27, %v1867_v7  ;;  %v1884_v26 = vld [vmem:[#allocation2 + $0x54] sm:$0xf] }
 0x15b   :  { %v1245_v40 = vsel %vm15699_vm11, %v1237_v54, %v1244_v28  ;;  %v1861_v41 = vsel %vm15588_vm2, %v1246_v29, %v1860_v8  ;;  %1866 = vst [vmem:[#allocation2 + $0x34] sm:$0xf] %v1262_v37  ;;  %1869 = vst [vmem:[#allocation2 + $0x38] sm:$0x1] %v1868_v38  ;;  %v1878_v42 = vsel %vm15692_vm10, %v1287_v32, %v1877_v21  ;;  %v713_v48 = vmax.f32 %v501_v23, 0.0  ;;  %v14939_v32 = vld [vmem:[#allocation8 + $0xf0] sm:$0xff]  }
 0x15c   :  { %1859 = vst [vmem:[#allocation2 + $0x28] sm:$0xf] %v1245_v40  ;;  %1862 = vst [vmem:[#allocation2 + $0x2c] sm:$0x1] %v1861_v41  ;;  %v1871_v43 = vsel %vm15692_vm10, %v1270_v35, %v1870_v30  ;;  %v12560_v46 = vpack.c.bf16 %v708_v17, %v708_v17  ;;  %v711_v49 = vmax.f32 %v493_v24, 0.0  ;;  %v504_v50 = vadd.f32 %v13500_v25, %v15678_v19 }
 0x15d   :  { %1879 = vst [vmem:[#allocation2 + $0x48] sm:$0xf] %v1878_v42  ;;  %1872 = vst [vmem:[#allocation2 + $0x3c] sm:$0xf] %v1871_v43  ;;  %v496_v51 = vadd.f32 %v15678_v19, %v495_v31  ;;  %v1290_v52 = vshrl.u32 %v12562_v44, 16  ;;  %v1293_v53 = vshll.u32 %v12562_v44, 16  ;;  %v12565_v59 = vpack.c.bf16 %v713_v48, %v713_v48  ;;  %14355 = vmatprep.subr.bf16.mxu1 %v14939_v32 }
 0x15e   :  { %v1273_v54 = vshrl.u32 %v12560_v46, 16  ;;  %v1276_v56 = vshll.u32 %v12560_v46, 16  ;;  %v13503_v57 = vpop.f32.mrb[16].mxu0  ;;  %v12563_v60 = vpack.c.bf16 %v711_v49, %v711_v49  ;;  %v714_v61 = vmax.f32 %v504_v50, 0.0  ;;  %v1891_v25 = vld [vmem:[#allocation2 + $0x60] sm:$0xf]  ;;  %14363 = vmatpush3.bf16.msra.mxu1 %v14939_v32 }
 0x15f   :  { %v712_v62 = vmax.f32 %v496_v51, 0.0  ;;  %v508_v63 = vpop.f32.mrb[17].mxu0  ;;  %v1292_v0 = vrot.slane %v1290_v52, 7  ;;  %v517_v3 = vadd.f32 %v13503_v57, %v15678_v19  ;;  %v1316_v7 = vshrl.u32 %v12565_v59, 16  ;;  %v2068_v31 = vld [vmem:[#allocation2 + $0xc] sm:$0xf] }
 0x160   :  { %v1275_v1 = vrot.slane %v1273_v54, 7  ;;  %v509_v4 = vadd.f32 %v15678_v19, %v508_v63  ;;  %v13504_v5 = vpop.f32.mrb[18].mxu0  ;;  %v1319_v8 = vshll.u32 %v12565_v59, 16  ;;  %v1299_v9 = vshrl.u32 %v12563_v60, 16  ;;  %v1895_v42 = vld [vmem:[#allocation2 + $0x68] sm:$0x1] }
 0x161   :  { %v1302_v10 = vshll.u32 %v12563_v60, 16  ;;  %v511_v11 = vpop.f32.mrb[19].mxu0  ;;  %v1295_v12 = vor.u32 %v1293_v53, %v1292_v0  ;;  %v1297_v13 = vrot.slane %v1292_v0, 4  ;;  %v1318_v16 = vrot.slane %v1316_v7, 7  ;;  %v1888_v43 = vld [vmem:[#allocation2 + $0x5c] sm:$0x1] }
 0x162   :  { %v1278_v14 = vor.u32 %v1276_v56, %v1275_v1  ;;  %v1280_v15 = vrot.slane %v1275_v1, 4  ;;  %v1301_v17 = vrot.slane %v1299_v9, 7  ;;  %v12566_v18 = vpack.c.bf16 %v714_v61, %v714_v61  ;;  %v2069_v56 = vld [vmem:[#allocation2 + $0x10] sm:$0xf]  ;;  %v1905_v9 = vld [vmem:[#allocation2 + $0x78] sm:$0xf] }
 0x163   :  { %v12564_v20 = vpack.c.bf16 %v712_v62, %v712_v62  ;;  %v1296_v21 = vsel %vm15699_vm11, %v1288_v33, %v1295_v12  ;;  %v1882_v22 = vsel %vm15588_vm2, %v1297_v13, %v1881_v58  ;;  %v1321_v27 = vor.u32 %v1319_v8, %v1318_v16 }
 0x164   :  { %v1279_v23 = vsel %vm15699_vm11, %v1271_v36, %v1278_v14  ;;  %v1875_v24 = vsel %vm15588_vm2, %v1280_v15, %v1874_v2  ;;  %1880 = vst [vmem:[#allocation2 + $0x4c] sm:$0xf] %v1296_v21  ;;  %1883 = vst [vmem:[#allocation2 + $0x50] sm:$0x1] %v1882_v22  ;;  %v1322_v28 = vrot.slane %v1318_v16, 4  ;;  %v1304_v29 = vor.u32 %v1302_v10, %v1301_v17 }
 0x165   :  { %1873 = vst [vmem:[#allocation2 + $0x40] sm:$0xf] %v1279_v23  ;;  %1876 = vst [vmem:[#allocation2 + $0x44] sm:$0x1] %v1875_v24  ;;  %v1305_v30 = vrot.slane %v1301_v17, 4  ;;  %v1324_v33 = vshrl.u32 %v12566_v18, 16  ;;  %v1892_v40 = vsel %vm15692_vm10, %v1321_v27, %v1891_v25  ;;  %v520_v50 = vadd.f32 %v13504_v5, %v15678_v19 }
 0x166   :  { %v1327_v35 = vshll.u32 %v12566_v18, 16  ;;  %v1307_v37 = vshrl.u32 %v12564_v20, 16  ;;  %v1310_v38 = vshll.u32 %v12564_v20, 16  ;;  %v15771_v36 = vpop.f32.mrb[20].mxu0  ;;  %v1885_v41 = vsel %vm15692_vm10, %v1304_v29, %v1884_v26  ;;  %1893 = vst [vmem:[#allocation2 + $0x60] sm:$0xf] %v1892_v40 }
 0x167   :  { %v717_v44 = vmax.f32 %v517_v3, 0.0  ;;  %v715_v46 = vmax.f32 %v509_v4, 0.0  ;;  %v15777_v47 = vpop.f32.mrb[21].mxu0  ;;  %1886 = vst [vmem:[#allocation2 + $0x54] sm:$0xf] %v1885_v41  ;;  %v1326_v48 = vrot.slane %v1324_v33, 7  ;;  %v512_v51 = vadd.f32 %v15678_v19, %v511_v11 }
 0x168   :  { %v1309_v49 = vrot.slane %v1307_v37, 7  ;;  %v15781_v52 = vpop.f32.mrb[22].mxu0  ;;  %v2206_v57 = vshrl.u32 %v2068_v31, 16  ;;  %v2209_v58 = vshll.u32 %v2068_v31, 16  ;;  %v1898_v10 = vld [vmem:[#allocation2 + $0x6c] sm:$0xf] }
 0x169   :  { %v12569_v53 = vpack.c.bf16 %v717_v44, %v717_v44  ;;  %v12567_v54 = vpack.c.bf16 %v715_v46, %v715_v46  ;;  %v15783_v59 = vpop.f32.mrb[23].mxu0  ;;  %v1329_v60 = vor.u32 %v1327_v35, %v1326_v48  ;;  %v1331_v61 = vrot.slane %v1326_v48, 4  ;;  %v2147_v15 = vld [vmem:[#allocation2 + $0x14] sm:$0x1]  ;;  %v2070_v31 = vld [vmem:[#allocation2 + $0x18] sm:$0xf] }
 0x16a   :  { %v1312_v62 = vor.u32 %v1310_v38, %v1309_v49  ;;  %v1314_v63 = vrot.slane %v1309_v49, 4  ;;  %v718_v13 = vmax.f32 %v520_v50, 0.0  ;;  %v716_v14 = vmax.f32 %v512_v51, 0.0  ;;  %v14940_v33 = vld [vmem:[#allocation8 + $0xf8] sm:$0xff]   ;;  %v2071_v41 = vld [vmem:[#allocation2 + $0x1c] sm:$0xf] }
 0x16b   :  { %v1350_v0 = vshrl.u32 %v12569_v53, 16  ;;  %v1353_v1 = vshll.u32 %v12569_v53, 16  ;;  %v1333_v2 = vshrl.u32 %v12567_v54, 16  ;;  %v1336_v3 = vshll.u32 %v12567_v54, 16  ;;  %14356 = vmatprep.subr.bf16.mxu1 %v14940_v33 }
 0x16c   :  { %v1330_v4 = vsel %vm15699_vm11, %v1322_v28, %v1329_v60  ;;  %v1896_v5 = vsel %vm15588_vm2, %v1331_v61, %v1895_v42  ;;  %v1313_v7 = vsel %vm15699_vm11, %v1305_v30, %v1312_v62  ;;  %v1889_v8 = vsel %vm15588_vm2, %v1314_v63, %v1888_v43  ;;  %14364 = vmatpush3.bf16.msra.mxu1 %v14940_v33  ;;  %v1902_v61 = vld [vmem:[#allocation2 + $0x74] sm:$0x1] }
 0x16d   :  { %1894 = vst [vmem:[#allocation2 + $0x64] sm:$0xf] %v1330_v4  ;;  %1897 = vst [vmem:[#allocation2 + $0x68] sm:$0x1] %v1896_v5  ;;  %v15793_v11 = vrot.slane %v1350_v0, 7  ;;  %v15795_v12 = vrot.slane %v1333_v2, 7  ;;  %v12570_v27 = vpack.c.bf16 %v718_v13, %v718_v13  ;;  %v12568_v28 = vpack.c.bf16 %v716_v14, %v716_v14 }
 0x16e   :  { %1887 = vst [vmem:[#allocation2 + $0x58] sm:$0xf] %v1313_v7  ;;  %1890 = vst [vmem:[#allocation2 + $0x5c] sm:$0x1] %v1889_v8  ;;  %v2208_v16 = vrot.slane %v2206_v57, 4  ;;  %v2211_v17 = vrot.slane %v2209_v58, 5  ;;  %v528_v33 = vadd.f32 %v15678_v19, %v15783_v59 }
 0x16f   :  { %v2215_v18 = vshll.u32 %v2069_v56, 16  ;;  %v2219_v20 = vshrl.u32 %v2069_v56, 16  ;;  %v15797_v21 = vpop.f32.mrb[24].mxu0  ;;  %v1355_v22 = vor.u32 %v1353_v1, %v15793_v11  ;;  %v1356_v23 = vrot.slane %v15793_v11, 4  ;;  %v1909_v56 = vld [vmem:[#allocation2 + $0x80] sm:$0x1] }
 0x170   :  { %v1338_v24 = vor.u32 %v1336_v3, %v15795_v12  ;;  %v1339_v25 = vrot.slane %v15795_v12, 4  ;;  %v15803_v26 = vpop.f32.mrb[25].mxu0  ;;  %v2212_v29 = vor.u32 %v2211_v17, %v2208_v16  ;;  %v2225_v40 = vshll.u32 %v2147_v15, 16  ;;  %v2148_v7 = vld [vmem:[#allocation2 + $0x20] sm:$0x1] }
 0x171   :  { %v2217_v30 = vrot.slane %v2215_v18, 5  ;;  %v15805_v32 = vpop.f32.mrb[26].mxu0  ;;  %v1906_v35 = vsel %vm15692_vm10, %v1355_v22, %v1905_v9  ;;  %v2221_v38 = vrot.slane %v2219_v20, 4  ;;  %v1358_v43 = vshrl.u32 %v12570_v27, 16  ;;  %v2072_v18 = vld [vmem:[#allocation2 + $0x24] sm:$0xf] }
 0x172   :  { %v1899_v37 = vsel %vm15692_vm10, %v1338_v24, %v1898_v10  ;;  %v15811_v42 = vpop.f32.mrb[27].mxu0  ;;  %1907 = vst [vmem:[#allocation2 + $0x78] sm:$0xf] %v1906_v35  ;;  %v1361_v44 = vshll.u32 %v12570_v27, 16  ;;  %v1341_v46 = vshrl.u32 %v12568_v28, 16  ;;  %v1344_v48 = vshll.u32 %v12568_v28, 16 }
 0x173   :  { %1900 = vst [vmem:[#allocation2 + $0x6c] sm:$0xf] %v1899_v37  ;;  %v2213_v49 = vrot.slane %v2212_v29, 4  ;;  %v2222_v50 = vor.u32 %v2221_v38, %v2217_v30  ;;  %v2227_v51 = vrot.slane %v2225_v40, 5  ;;  %v2230_v53 = vshrl.u32 %v2070_v31, 16  ;;  %v15831_v22 = vld [vmem:[#allocation8 + $0x100] sm:$0xff]  }
 0x174   :  { %v1360_v54 = vrot.slane %v1358_v43, 7  ;;  %v1343_v57 = vrot.slane %v1341_v46, 7  ;;  %v2233_v58 = vshll.u32 %v2070_v31, 16  ;;  %v2239_v60 = vshll.u32 %v2071_v41, 16  ;;  %13869 = vmatprep.subr.bf16.mxu1 %v15831_v22  ;;  %v2073_v46 = vld [vmem:[#allocation2 + $0x28] sm:$0xf] }
 0x175   :  { %v2218_v62 = vsel %vm15637_vm7, %v2213_v49, %v2217_v30  ;;  %v2223_v63 = vrot.slane %v2222_v50, 4  ;;  %v2232_v0 = vrot.slane %v2230_v53, 4  ;;  %v2243_v1 = vshrl.u32 %v2071_v41, 16  ;;  %v15815_v8 = vpop.f32.mrb[28].mxu0 }
 0x176   :  { %v1363_v2 = vor.u32 %v1361_v44, %v1360_v54  ;;  %v1365_v3 = vrot.slane %v1360_v54, 4  ;;  %v1346_v4 = vor.u32 %v1344_v48, %v1343_v57  ;;  %v1348_v5 = vrot.slane %v1343_v57, 4  ;;  %v15819_v13 = vpop.f32.mrb[29].mxu0  ;;  %v2149_v54 = vld [vmem:[#allocation2 + $0x2c] sm:$0x1] }
 0x177   :  { %v2228_v9 = vsel %vm15637_vm7, %v2223_v63, %v2227_v51  ;;  %v2235_v10 = vrot.slane %v2233_v58, 5  ;;  %v2241_v11 = vrot.slane %v2239_v60, 5  ;;  %v2245_v12 = vrot.slane %v2243_v1, 4  ;;  %v15829_v20 = vpop.f32.mrb[30].mxu0 }
 0x178   :  { %v1364_v14 = vsel %vm15699_vm11, %v1356_v23, %v1363_v2  ;;  %v1910_v15 = vsel %vm15588_vm2, %v1365_v3, %v1909_v56  ;;  %v1347_v16 = vsel %vm15699_vm11, %v1339_v25, %v1346_v4  ;;  %v1903_v17 = vsel %vm15588_vm2, %v1348_v5, %v1902_v61  ;;  %v15833_v29 = vpop.f32.mrb[31].mxu0 }
 0x179   :  { %1908 = vst [vmem:[#allocation2 + $0x7c] sm:$0xf] %v1364_v14  ;;  %1911 = vst [vmem:[#allocation2 + $0x80] sm:$0x1] %v1910_v15  ;;  %v12022_v24 = vcombine.low %v2218_v62, %v2228_v9  ;;  %v2236_v23 = vor.u32 %v2235_v10, %v2232_v0  ;;  %v2246_v27 = vor.u32 %v2245_v12, %v2241_v11  ;;  %v2249_v28 = vshll.u32 %v2148_v7, 16 }
 0x17a   :  { %1901 = vst [vmem:[#allocation2 + $0x70] sm:$0xf] %v1347_v16  ;;  %1904 = vst [vmem:[#allocation2 + $0x74] sm:$0x1] %v1903_v17  ;;  %v533_v25 = vadd.f32 %v15771_v36, %v15678_v19  ;;  %v525_v30 = vadd.f32 %v15678_v19, %v15777_v47  ;;  %v536_v31 = vadd.f32 %v15781_v52, %v15678_v19  ;;  %v2254_v40 = vshrl.u32 %v2072_v18, 16 }
 0x17b   :  { %13566 = vmatmul.mubr.bf16.vlgmr.msra.gmra.mrb[64].mxu0 %v12022_v24  ;;  %v2237_v35 = vrot.slane %v2236_v23, 4  ;;  %v2247_v37 = vrot.slane %v2246_v27, 4  ;;  %v2251_v38 = vrot.slane %v2249_v28, 5  ;;  %v720_v36 = vmax.f32 %v528_v33, 0.0  ;;  %v1919_v12 = vld [vmem:[#allocation2 + $0x90] sm:$0xf] }
 0x17c   :  { %v721_v41 = vmax.f32 %v533_v25, 0.0  ;;  %v719_v43 = vmax.f32 %v525_v30, 0.0  ;;  %v722_v44 = vmax.f32 %v536_v31, 0.0  ;;  %v2256_v48 = vrot.slane %v2254_v40, 4  ;;  %v1912_v17 = vld [vmem:[#allocation2 + $0x84] sm:$0xf] }
 0x17d   :  { %v2242_v47 = vsel %vm15637_vm7, %v2237_v35, %v2241_v11  ;;  %v2252_v52 = vsel %vm15637_vm7, %v2247_v37, %v2251_v38  ;;  %v2257_v59 = vshll.u32 %v2072_v18, 16  ;;  %v15848_v56 = vpop.f32.mrb[32].mxu0  ;;  %v12572_v57 = vpack.c.bf16 %v720_v36, %v720_v36  ;;  %v1923_v33 = vld [vmem:[#allocation2 + $0x98] sm:$0x1]  ;;  %v1916_v35 = vld [vmem:[#allocation2 + $0x8c] sm:$0x1] }
 0x17e   :  { %v12023_v49 = vcombine.low %v2242_v47, %v2252_v52  ;;  %v12573_v50 = vpack.c.bf16 %v721_v41, %v721_v41  ;;  %v12571_v51 = vpack.c.bf16 %v719_v43, %v719_v43  ;;  %v12574_v53 = vpack.c.bf16 %v722_v44, %v722_v44  ;;  %v15850_v62 = vpop.f32.mrb[33].mxu0  ;;  %v2074_v43 = vld [vmem:[#allocation2 + $0x30] sm:$0xf]  ;;  %v2075_v52 = vld [vmem:[#allocation2 + $0x34] sm:$0xf] }
 0x17f   :  { %v2259_v58 = vrot.slane %v2257_v59, 5  ;;  %v2263_v60 = vshll.u32 %v2073_v46, 16  ;;  %v2267_v61 = vshrl.u32 %v2073_v46, 16  ;;  %v15852_v3 = vpop.f32.mrb[34].mxu0  ;;  %v1375_v7 = vshrl.u32 %v12572_v57, 16 }
 0x180   :  { %13569 = vmatprep.mubr.bf16.mxu0 %v12023_v49  ;;  %v1384_v63 = vshrl.u32 %v12573_v50, 16  ;;  %v1387_v0 = vshll.u32 %v12573_v50, 16  ;;  %v1367_v1 = vshrl.u32 %v12571_v51, 16  ;;  %v1370_v2 = vshll.u32 %v12571_v51, 16  ;;  %v15854_v10 = vpop.f32.mrb[35].mxu0 }
 0x181   :  { %v1392_v4 = vshrl.u32 %v12574_v53, 16  ;;  %v1395_v5 = vshll.u32 %v12574_v53, 16  ;;  %v1378_v9 = vshll.u32 %v12572_v57, 16  ;;  %v2260_v15 = vor.u32 %v2259_v58, %v2256_v48  ;;  %v2150_v48 = vld [vmem:[#allocation2 + $0x38] sm:$0x1] }
 0x182   :  { %v1386_v11 = vrot.slane %v1384_v63, 7  ;;  %v1369_v14 = vrot.slane %v1367_v1, 7  ;;  %v2265_v16 = vrot.slane %v2263_v60, 5  ;;  %v1377_v24 = vrot.slane %v1375_v7, 7  ;;  %v2076_v63 = vld [vmem:[#allocation2 + $0x3c] sm:$0xf] }
 0x183   :  { %v1394_v18 = vrot.slane %v1392_v4, 7  ;;  %v2269_v23 = vrot.slane %v2267_v61, 4  ;;  %v2273_v27 = vshll.u32 %v2149_v54, 16  ;;  %v2261_v46 = vrot.slane %v2260_v15, 4 }
 0x184   :  { %v1389_v28 = vor.u32 %v1387_v0, %v1386_v11  ;;  %v1390_v25 = vrot.slane %v1386_v11, 4  ;;  %v1372_v30 = vor.u32 %v1370_v2, %v1369_v14  ;;  %v1373_v31 = vrot.slane %v1369_v14, 4 }
 0x185   :  { %v1397_v37 = vor.u32 %v1395_v5, %v1394_v18  ;;  %v1399_v38 = vrot.slane %v1394_v18, 4  ;;  %v1380_v40 = vor.u32 %v1378_v9, %v1377_v24  ;;  %v1382_v41 = vrot.slane %v1377_v24, 4  ;;  %v15860_v59 = vpop.f32.mrb[36].mxu0 }
 0x186   :  { %v1920_v44 = vsel %vm15692_vm10, %v1389_v28, %v1919_v12  ;;  %v1913_v36 = vsel %vm15692_vm10, %v1372_v30, %v1912_v17  ;;  %v2270_v47 = vor.u32 %v2269_v23, %v2265_v16  ;;  %v15870_v54 = vpop.f32.mrb[37].mxu0  ;;  %v2266_v57 = vsel %vm15637_vm7, %v2261_v46, %v2265_v16 }
 0x187   :  { %1921 = vst [vmem:[#allocation2 + $0x90] sm:$0xf] %v1920_v44  ;;  %1914 = vst [vmem:[#allocation2 + $0x84] sm:$0xf] %v1913_v36  ;;  %v1398_v49 = vsel %vm15699_vm11, %v1390_v25, %v1397_v37  ;;  %v1924_v50 = vsel %vm15588_vm2, %v1399_v38, %v1923_v33  ;;  %v1381_v51 = vsel %vm15699_vm11, %v1373_v31, %v1380_v40  ;;  %v2275_v60 = vrot.slane %v2273_v27, 5  ;;  %v15874_v0 = vpop.f32.mrb[38].mxu0 }
 0x188   :  { %v1917_v53 = vsel %vm15588_vm2, %v1382_v41, %v1916_v35  ;;  %1922 = vst [vmem:[#allocation2 + $0x94] sm:$0xf] %v1398_v49  ;;  %1925 = vst [vmem:[#allocation2 + $0x98] sm:$0x1] %v1924_v50  ;;  %v2271_v58 = vrot.slane %v2270_v47, 4  ;;  %v2278_v61 = vshrl.u32 %v2074_v43, 16  ;;  %v549_v12 = vadd.f32 %v15797_v21, %v15678_v19 }
 0x189   :  { %1915 = vst [vmem:[#allocation2 + $0x88] sm:$0xf] %v1381_v51  ;;  %1918 = vst [vmem:[#allocation2 + $0x8c] sm:$0x1] %v1917_v53  ;;  %v2281_v1 = vshll.u32 %v2074_v43, 16  ;;  %v2287_v2 = vshll.u32 %v2075_v52, 16  ;;  %v541_v14 = vadd.f32 %v15678_v19, %v15803_v26  ;;  %v552_v28 = vadd.f32 %v15805_v32, %v15678_v19 }
 0x18a   :  { %v2291_v4 = vshrl.u32 %v2075_v52, 16  ;;  %v2297_v5 = vshll.u32 %v2150_v48, 16  ;;  %v15876_v7 = vpop.f32.mrb[39].mxu0  ;;  %v2276_v9 = vsel %vm15637_vm7, %v2271_v58, %v2275_v60  ;;  %v2280_v11 = vrot.slane %v2278_v61, 4  ;;  %v2077_v50 = vld [vmem:[#allocation2 + $0x40] sm:$0xf] }
 0x18b   :  { %v12024_v15 = vcombine.low %v2266_v57, %v2276_v9  ;;  %v2283_v16 = vrot.slane %v2281_v1, 5  ;;  %v2289_v17 = vrot.slane %v2287_v2, 5  ;;  %v725_v23 = vmax.f32 %v549_v12, 0.0  ;;  %v2151_v51 = vld [vmem:[#allocation2 + $0x44] sm:$0x1] }
 0x18c   :  { %v2293_v18 = vrot.slane %v2291_v4, 4  ;;  %v2299_v24 = vrot.slane %v2297_v5, 5  ;;  %v723_v27 = vmax.f32 %v541_v14, 0.0  ;;  %v544_v31 = vadd.f32 %v15678_v19, %v15811_v42  ;;  %v1933_v19 = vld [vmem:[#allocation2 + $0xa8] sm:$0xf] }
 0x18d   :  { %13570 = vmatmul.mubr.bf16.gmra.mrb[68].mxu0 %v12024_v15  ;;  %v2284_v25 = vor.u32 %v2283_v16, %v2280_v11  ;;  %v2302_v21 = vshrl.u32 %v2076_v63, 16  ;;  %v12577_v33 = vpack.c.bf16 %v725_v23, %v725_v23  ;;  %v726_v26 = vmax.f32 %v552_v28, 0.0  ;;  %v1926_v42 = vld [vmem:[#allocation2 + $0x9c] sm:$0xf]  ;;  %v15892_v53 = vpop.f32.mrb[40].mxu0 }
 0x18e   :  { %v2294_v30 = vor.u32 %v2293_v18, %v2289_v17  ;;  %v12575_v35 = vpack.c.bf16 %v723_v27, %v723_v27  ;;  %v2305_v37 = vshll.u32 %v2076_v63, 16  ;;  %v724_v41 = vmax.f32 %v544_v31, 0.0  ;;  %v15894_v63 = vpop.f32.mrb[41].mxu0  ;;  %v1937_v16 = vld [vmem:[#allocation2 + $0xb0] sm:$0x1] }
 0x18f   :  { %v2285_v38 = vrot.slane %v2284_v25, 4  ;;  %v2304_v43 = vrot.slane %v2302_v21, 4  ;;  %v1418_v44 = vshrl.u32 %v12577_v33, 16  ;;  %v1421_v36 = vshll.u32 %v12577_v33, 16  ;;  %v15896_v9 = vpop.f32.mrb[42].mxu0 }
 0x190   :  { %v2295_v40 = vrot.slane %v2294_v30, 4  ;;  %v1401_v46 = vshrl.u32 %v12575_v35, 16  ;;  %v1404_v47 = vshll.u32 %v12575_v35, 16  ;;  %v12578_v48 = vpack.c.bf16 %v726_v26, %v726_v26  ;;  %v15898_v18 = vpop.f32.mrb[43].mxu0  ;;  %v2078_v25 = vld [vmem:[#allocation2 + $0x48] sm:$0xf] }
 0x191   :  { %v2290_v32 = vsel %vm15637_vm7, %v2285_v38, %v2289_v17  ;;  %v12576_v49 = vpack.c.bf16 %v724_v41, %v724_v41  ;;  %v1420_v58 = vrot.slane %v1418_v44, 7  ;;  %v2307_v61 = vrot.slane %v2305_v37, 5  ;;  %v1930_v17 = vld [vmem:[#allocation2 + $0xa4] sm:$0x1]  ;;  %v2079_v35 = vld [vmem:[#allocation2 + $0x4c] sm:$0xf] }
 0x192   :  { %v2300_v52 = vsel %vm15637_vm7, %v2295_v40, %v2299_v24  ;;  %v1403_v60 = vrot.slane %v1401_v46, 7  ;;  %v1426_v1 = vshrl.u32 %v12578_v48, 16  ;;  %v1429_v2 = vshll.u32 %v12578_v48, 16  ;;  %v2152_v26 = vld [vmem:[#allocation2 + $0x50] sm:$0x1] }
 0x193   :  { %v12025_v57 = vcombine.low %v2290_v32, %v2300_v52  ;;  %v1409_v4 = vshrl.u32 %v12576_v49, 16  ;;  %v1412_v5 = vshll.u32 %v12576_v49, 16  ;;  %v1423_v11 = vor.u32 %v1421_v36, %v1420_v58 }
 0x194   :  { %v1424_v12 = vrot.slane %v1420_v58, 4  ;;  %v1406_v14 = vor.u32 %v1404_v47, %v1403_v60  ;;  %v1407_v15 = vrot.slane %v1403_v60, 4  ;;  %v1428_v24 = vrot.slane %v1426_v1, 7 }
 0x195   :  { %13573 = vmatprep.mubr.bf16.mxu0 %v12025_v57  ;;  %v1411_v23 = vrot.slane %v1409_v4, 7  ;;  %v2308_v27 = vor.u32 %v2307_v61, %v2304_v43  ;;  %v2311_v28 = vshll.u32 %v2077_v50, 16  ;;  %v1934_v30 = vsel %vm15692_vm10, %v1423_v11, %v1933_v19  ;;  %v15904_v37 = vpop.f32.mrb[44].mxu0  ;;  %v15925_v4 = vld [vmem:[%s17671_s2] ss:$0 sm:$0xff] }
 0x196   :  { %v1927_v31 = vsel %vm15692_vm10, %v1406_v14, %v1926_v42  ;;  %v2315_v21 = vshrl.u32 %v2077_v50, 16  ;;  %v2321_v33 = vshll.u32 %v2151_v51, 16  ;;  %1935 = vst [vmem:[#allocation2 + $0xa8] sm:$0xf] %v1934_v30  ;;  %v1431_v38 = vor.u32 %v1429_v2, %v1428_v24  ;;  %v15906_v44 = vpop.f32.mrb[45].mxu0 }
 0x197   :  { %1928 = vst [vmem:[#allocation2 + $0x9c] sm:$0xf] %v1927_v31  ;;  %v1433_v40 = vrot.slane %v1428_v24, 4  ;;  %v1414_v41 = vor.u32 %v1412_v5, %v1411_v23  ;;  %v1416_v43 = vrot.slane %v1411_v23, 4  ;;  %v2309_v36 = vrot.slane %v2308_v27, 4  ;;  %v15908_v52 = vpop.f32.mrb[46].mxu0 }
 0x198   :  { %v2313_v46 = vrot.slane %v2311_v28, 5  ;;  %v2317_v47 = vrot.slane %v2315_v21, 4  ;;  %v2323_v32 = vrot.slane %v2321_v33, 5  ;;  %v1432_v19 = vsel %vm15699_vm11, %v1424_v12, %v1431_v38  ;;  %v15918_v50 = vpop.f32.mrb[47].mxu0 }
 0x199   :  { %v1938_v42 = vsel %vm15588_vm2, %v1433_v40, %v1937_v16  ;;  %v1415_v48 = vsel %vm15699_vm11, %v1407_v15, %v1414_v41  ;;  %v1931_v49 = vsel %vm15588_vm2, %v1416_v43, %v1930_v17  ;;  %1936 = vst [vmem:[#allocation2 + $0xac] sm:$0xf] %v1432_v19  ;;  %v2326_v58 = vshrl.u32 %v2078_v25, 16  ;;  %v15931_v16 = vld [vmem:[#allocation2 + $0x54] sm:$0xf] }
 0x19a   :  { %1939 = vst [vmem:[#allocation2 + $0xb0] sm:$0x1] %v1938_v42  ;;  %1929 = vst [vmem:[#allocation2 + $0xa0] sm:$0xf] %v1415_v48  ;;  %v2314_v51 = vsel %vm15637_vm7, %v2309_v36, %v2313_v46  ;;  %v2318_v57 = vor.u32 %v2317_v47, %v2313_v46  ;;  %v2329_v60 = vshll.u32 %v2078_v25, 16  ;;  %v2335_v61 = vshll.u32 %v2079_v35, 16 }
 0x19b   :  { %1932 = vst [vmem:[#allocation2 + $0xa4] sm:$0x1] %v1931_v49  ;;  %v2339_v1 = vshrl.u32 %v2079_v35, 16  ;;  %v2345_v2 = vshll.u32 %v2152_v26, 16  ;;  %v565_v5 = vadd.f32 %v15925_v4, %v15815_v8  ;;  %v2328_v12 = vrot.slane %v2326_v58, 4 }
 0x19c   :  { %v2319_v11 = vrot.slane %v2318_v57, 4  ;;  %v2331_v14 = vrot.slane %v2329_v60, 5  ;;  %v557_v15 = vadd.f32 %v15925_v4, %v15819_v13  ;;  %v2337_v17 = vrot.slane %v2335_v61, 5  ;;  %v1947_v42 = vld [vmem:[#allocation2 + $0xc0] sm:$0xf] }
 0x19d   :  { %v2341_v24 = vrot.slane %v2339_v1, 4  ;;  %v2347_v23 = vrot.slane %v2345_v2, 5  ;;  %v729_v27 = vmax.f32 %v565_v5, 0.0  ;;  %v568_v8 = vadd.f32 %v15925_v4, %v15829_v20  ;;  %v15937_v31 = vpop.f32.mrb[48].mxu0  ;;  %v1940_v58 = vld [vmem:[#allocation2 + $0xb4] sm:$0xf] }
 0x19e   :  { %v2324_v28 = vsel %vm15637_vm7, %v2319_v11, %v2323_v32  ;;  %v2332_v25 = vor.u32 %v2331_v14, %v2328_v12  ;;  %v727_v30 = vmax.f32 %v557_v15, 0.0  ;;  %v560_v13 = vadd.f32 %v15925_v4, %v15833_v29  ;;  %v15941_v26 = vpop.f32.mrb[49].mxu0  ;;  %v2081_v61 = vld [vmem:[#allocation2 + $0x58] sm:$0xf] }
 0x19f   :  { %v12026_v21 = vcombine.low %v2314_v51, %v2324_v28  ;;  %v2342_v33 = vor.u32 %v2341_v24, %v2337_v17  ;;  %v12581_v35 = vpack.c.bf16 %v729_v27, %v729_v27  ;;  %v730_v41 = vmax.f32 %v568_v8, 0.0  ;;  %v15944_v36 = vpop.f32.mrb[50].mxu0  ;;  %v1951_v24 = vld [vmem:[#allocation2 + $0xc8] sm:$0x1] }
 0x1a0   :  { %v2333_v38 = vrot.slane %v2332_v25, 4  ;;  %v12579_v40 = vpack.c.bf16 %v727_v30, %v727_v30  ;;  %v2350_v43 = vshrl.u32 %v15931_v16, 16  ;;  %v728_v32 = vmax.f32 %v560_v13, 0.0  ;;  %v15950_v2 = vpop.f32.mrb[51].mxu0  ;;  %v2153_v25 = vld [vmem:[#allocation2 + $0x5c] sm:$0x1] }
 0x1a1   :  { %13574 = vmatmul.mubr.bf16.gmra.mrb[72].mxu0 %v12026_v21  ;;  %v2343_v46 = vrot.slane %v2342_v33, 4  ;;  %v1452_v20 = vshrl.u32 %v12581_v35, 16  ;;  %v1455_v47 = vshll.u32 %v12581_v35, 16  ;;  %v12582_v49 = vpack.c.bf16 %v730_v41, %v730_v41  ;;  %v1944_v21 = vld [vmem:[#allocation2 + $0xbc] sm:$0x1] }
 0x1a2   :  { %v2338_v19 = vsel %vm15637_vm7, %v2333_v38, %v2337_v17  ;;  %v1435_v48 = vshrl.u32 %v12579_v40, 16  ;;  %v1438_v29 = vshll.u32 %v12579_v40, 16  ;;  %v12580_v60 = vpack.c.bf16 %v728_v32, %v728_v32  ;;  %v2082_v35 = vld [vmem:[#allocation2 + $0x60] sm:$0xf] }
 0x1a3   :  { %v2348_v51 = vsel %vm15637_vm7, %v2343_v46, %v2347_v23  ;;  %v1454_v57 = vrot.slane %v1452_v20, 7  ;;  %v2352_v1 = vrot.slane %v2350_v43, 4  ;;  %v1460_v12 = vshrl.u32 %v12582_v49, 16  ;;  %v2083_v46 = vld [vmem:[#allocation2 + $0x64] sm:$0xf] }
 0x1a4   :  { %v12027_v5 = vcombine.low %v2338_v19, %v2348_v51  ;;  %v1437_v11 = vrot.slane %v1435_v48, 7  ;;  %v1463_v14 = vshll.u32 %v12582_v49, 16  ;;  %v1443_v27 = vshrl.u32 %v12580_v60, 16 }
 0x1a5   :  { %v1457_v15 = vor.u32 %v1455_v47, %v1454_v57  ;;  %v1458_v17 = vrot.slane %v1454_v57, 4  ;;  %v1446_v28 = vshll.u32 %v12580_v60, 16  ;;  %v1462_v8 = vrot.slane %v1460_v12, 7  ;;  %v15953_v13 = vpop.f32.mrb[52].mxu0  ;;  %v2154_v57 = vld [vmem:[#allocation2 + $0x68] sm:$0x1] }
 0x1a6   :  { %13577 = vmatprep.mubr.bf16.mxu0 %v12027_v5  ;;  %v1440_v30 = vor.u32 %v1438_v29, %v1437_v11  ;;  %v1441_v23 = vrot.slane %v1437_v11, 4  ;;  %v2353_v33 = vshll.u32 %v15931_v16, 16  ;;  %v1445_v40 = vrot.slane %v1443_v27, 7  ;;  %v15957_v20 = vpop.f32.mrb[53].mxu0 }
 0x1a7   :  { %v1948_v38 = vsel %vm15692_vm10, %v1457_v15, %v1947_v42  ;;  %v2359_v41 = vshll.u32 %v2081_v61, 16  ;;  %v2363_v43 = vshrl.u32 %v2081_v61, 16  ;;  %v1465_v32 = vor.u32 %v1463_v14, %v1462_v8  ;;  %v15961_v16 = vpop.f32.mrb[54].mxu0 }
 0x1a8   :  { %1949 = vst [vmem:[#allocation2 + $0xc0] sm:$0xf] %v1948_v38  ;;  %v1941_v47 = vsel %vm15692_vm10, %v1440_v30, %v1940_v58  ;;  %v1467_v19 = vrot.slane %v1462_v8, 4  ;;  %v2355_v48 = vrot.slane %v2353_v33, 5  ;;  %v1448_v29 = vor.u32 %v1446_v28, %v1445_v40  ;;  %v15963_v60 = vpop.f32.mrb[55].mxu0 }
 0x1a9   :  { %1942 = vst [vmem:[#allocation2 + $0xb4] sm:$0xf] %v1941_v47  ;;  %v1450_v49 = vrot.slane %v1445_v40, 4  ;;  %v2361_v51 = vrot.slane %v2359_v41, 5  ;;  %v2365_v42 = vrot.slane %v2363_v43, 4  ;;  %v1466_v61 = vsel %vm15699_vm11, %v1458_v17, %v1465_v32 }
 0x1aa   :  { %v1952_v5 = vsel %vm15588_vm2, %v1467_v19, %v1951_v24  ;;  %v2356_v58 = vor.u32 %v2355_v48, %v2352_v1  ;;  %v2369_v11 = vshll.u32 %v2153_v25, 16  ;;  %1950 = vst [vmem:[#allocation2 + $0xc4] sm:$0xf] %v1466_v61  ;;  %v1449_v12 = vsel %vm15699_vm11, %v1441_v23, %v1448_v29  ;;  %v2084_v41 = vld [vmem:[#allocation2 + $0x6c] sm:$0xf] }
 0x1ab   :  { %1953 = vst [vmem:[#allocation2 + $0xc8] sm:$0x1] %v1952_v5  ;;  %v1945_v14 = vsel %vm15588_vm2, %v1450_v49, %v1944_v21  ;;  %v2366_v15 = vor.u32 %v2365_v42, %v2361_v51  ;;  %v2374_v27 = vshrl.u32 %v2082_v35, 16  ;;  %1943 = vst [vmem:[#allocation2 + $0xb8] sm:$0xf] %v1449_v12  ;;  %v2377_v17 = vshll.u32 %v2082_v35, 16 }
 0x1ac   :  { %1946 = vst [vmem:[#allocation2 + $0xbc] sm:$0x1] %v1945_v14  ;;  %v2357_v28 = vrot.slane %v2356_v58, 4  ;;  %v2371_v30 = vrot.slane %v2369_v11, 5  ;;  %v2383_v8 = vshll.u32 %v2083_v46, 16  ;;  %v2387_v1 = vshrl.u32 %v2083_v46, 16 }
 0x1ad   :  { %v2367_v33 = vrot.slane %v2366_v15, 4  ;;  %v2376_v24 = vrot.slane %v2374_v27, 4  ;;  %v2393_v25 = vshll.u32 %v2154_v57, 16  ;;  %v2379_v40 = vrot.slane %v2377_v17, 5  ;;  %v15977_v43 = vpop.f32.mrb[56].mxu0 }
 0x1ae   :  { %v2362_v38 = vsel %vm15637_vm7, %v2357_v28, %v2361_v51  ;;  %v2385_v23 = vrot.slane %v2383_v8, 5  ;;  %v581_v21 = vadd.f32 %v15925_v4, %v15848_v56  ;;  %v2389_v35 = vrot.slane %v2387_v1, 4  ;;  %v15983_v19 = vpop.f32.mrb[57].mxu0  ;;  %v1961_v1 = vld [vmem:[#allocation2 + $0xf0] sm:$0xf] }
 0x1af   :  { %v2372_v47 = vsel %vm15637_vm7, %v2367_v33, %v2371_v30  ;;  %v2395_v32 = vrot.slane %v2393_v25, 5  ;;  %v573_v46 = vadd.f32 %v15925_v4, %v15850_v62  ;;  %v2380_v29 = vor.u32 %v2379_v40, %v2376_v24  ;;  %v15987_v56 = vpop.f32.mrb[58].mxu0  ;;  %v2085_v24 = vld [vmem:[#allocation2 + $0x70] sm:$0xf] }
 0x1b0   :  { %v12028_v48 = vcombine.low %v2362_v38, %v2372_v47  ;;  %v733_v49 = vmax.f32 %v581_v21, 0.0  ;;  %v584_v51 = vadd.f32 %v15925_v4, %v15852_v3  ;;  %v2390_v42 = vor.u32 %v2389_v35, %v2385_v23  ;;  %v15991_v58 = vpop.f32.mrb[59].mxu0  ;;  %v1954_v47 = vld [vmem:[#allocation2 + $0xe4] sm:$0xf] }
 0x1b1   :  { %v731_v57 = vmax.f32 %v573_v46, 0.0  ;;  %v576_v61 = vadd.f32 %v15925_v4, %v15854_v10  ;;  %v2398_v5 = vshrl.u32 %v2084_v41, 16  ;;  %v2381_v62 = vrot.slane %v2380_v29, 4  ;;  %v1965_v29 = vld [vmem:[#allocation2 + $0xf8] sm:$0x1] }
 0x1b2   :  { %13578 = vmatmul.mubr.bf16.gmra.mrb[76].mxu0 %v12028_v48  ;;  %v12585_v11 = vpack.c.bf16 %v733_v49, %v733_v49  ;;  %v734_v12 = vmax.f32 %v584_v51, 0.0  ;;  %v2401_v14 = vshll.u32 %v2084_v41, 16  ;;  %v2391_v15 = vrot.slane %v2390_v42, 4  ;;  %v2155_v51 = vld [vmem:[#allocation2 + $0x74] sm:$0x1] }
 0x1b3   :  { %v12583_v27 = vpack.c.bf16 %v731_v57, %v731_v57  ;;  %v732_v28 = vmax.f32 %v576_v61, 0.0  ;;  %v2400_v30 = vrot.slane %v2398_v5, 4  ;;  %v2386_v3 = vsel %vm15637_vm7, %v2381_v62, %v2385_v23 }
 0x1b4   :  { %v1486_v17 = vshrl.u32 %v12585_v11, 16  ;;  %v1489_v8 = vshll.u32 %v12585_v11, 16  ;;  %v12586_v33 = vpack.c.bf16 %v734_v12, %v734_v12  ;;  %v2396_v10 = vsel %vm15637_vm7, %v2391_v15, %v2395_v32  ;;  %v1958_v32 = vld [vmem:[#allocation2 + $0xec] sm:$0x1]  ;;  %v2086_v11 = vld [vmem:[#allocation2 + $0x78] sm:$0xf] }
 0x1b5   :  { %v1469_v25 = vshrl.u32 %v12583_v27, 16  ;;  %v1472_v38 = vshll.u32 %v12583_v27, 16  ;;  %v12584_v40 = vpack.c.bf16 %v732_v28, %v732_v28  ;;  %v12029_v21 = vcombine.low %v2386_v3, %v2396_v10 }
 0x1b6   :  { %v1488_v41 = vrot.slane %v1486_v17, 7  ;;  %v1494_v35 = vshrl.u32 %v12586_v33, 16  ;;  %v1497_v46 = vshll.u32 %v12586_v33, 16  ;;  %v2403_v42 = vrot.slane %v2401_v14, 5 }
 0x1b7   :  { %v1471_v48 = vrot.slane %v1469_v25, 7  ;;  %v1477_v49 = vshrl.u32 %v12584_v40, 16  ;;  %v1480_v23 = vshll.u32 %v12584_v40, 16  ;;  %13581 = vmatprep.mubr.bf16.mxu0 %v12029_v21  ;;  %v2407_v62 = vshll.u32 %v2085_v24, 16  ;;  %v2087_v21 = vld [vmem:[#allocation2 + $0x7c] sm:$0xf] }
 0x1b8   :  { %v1491_v57 = vor.u32 %v1489_v8, %v1488_v41  ;;  %v1492_v61 = vrot.slane %v1488_v41, 4  ;;  %v1496_v5 = vrot.slane %v1494_v35, 7  ;;  %v2404_v28 = vor.u32 %v2403_v42, %v2400_v30  ;;  %v2156_v35 = vld [vmem:[#allocation2 + $0x80] sm:$0x1] }
 0x1b9   :  { %v1474_v12 = vor.u32 %v1472_v38, %v1471_v48  ;;  %v1475_v15 = vrot.slane %v1471_v48, 4  ;;  %v1479_v27 = vrot.slane %v1477_v49, 7  ;;  %v2409_v10 = vrot.slane %v2407_v62, 5 }
 0x1ba   :  { %v1962_v3 = vsel %vm15692_vm10, %v1491_v57, %v1961_v1  ;;  %v1499_v17 = vor.u32 %v1497_v46, %v1496_v5  ;;  %v1501_v33 = vrot.slane %v1496_v5, 4  ;;  %v2405_v40 = vrot.slane %v2404_v28, 4  ;;  %v16005_v46 = vpop.f32.mrb[60].mxu0 }
 0x1bb   :  { %1963 = vst [vmem:[#allocation2 + $0xf0] sm:$0xf] %v1962_v3  ;;  %v1955_v14 = vsel %vm15692_vm10, %v1474_v12, %v1954_v47  ;;  %v1482_v8 = vor.u32 %v1480_v23, %v1479_v27  ;;  %v1484_v25 = vrot.slane %v1479_v27, 4  ;;  %v2411_v41 = vshrl.u32 %v2085_v24, 16  ;;  %v991_v12 = vld [vmem:[#allocation2 + $0x110] sm:$0x1] }
 0x1bc   :  { %1956 = vst [vmem:[#allocation2 + $0xe4] sm:$0xf] %v1955_v14  ;;  %v1500_v38 = vsel %vm15699_vm11, %v1492_v61, %v1499_v17  ;;  %v1966_v30 = vsel %vm15588_vm2, %v1501_v33, %v1965_v29  ;;  %v2417_v1 = vshll.u32 %v2155_v51, 16  ;;  %v2410_v49 = vsel %vm15637_vm7, %v2405_v40, %v2409_v10 }
 0x1bd   :  { %1964 = vst [vmem:[#allocation2 + $0xf4] sm:$0xf] %v1500_v38  ;;  %1967 = vst [vmem:[#allocation2 + $0xf8] sm:$0x1] %v1966_v30  ;;  %v1483_v47 = vsel %vm15699_vm11, %v1475_v15, %v1482_v8  ;;  %v1959_v48 = vsel %vm15588_vm2, %v1484_v25, %v1958_v32  ;;  %v2422_v23 = vshrl.u32 %v2086_v11, 16  ;;  %v2413_v29 = vrot.slane %v2411_v41, 4 }
 0x1be   :  { %1957 = vst [vmem:[#allocation2 + $0xe8] sm:$0xf] %v1483_v47  ;;  %1960 = vst [vmem:[#allocation2 + $0xec] sm:$0x1] %v1959_v48  ;;  %v2419_v24 = vrot.slane %v2417_v1, 5  ;;  %v2425_v51 = vshll.u32 %v2086_v11, 16  ;;  %v597_v62 = vadd.f32 %v15925_v4, %v15860_v59  ;;  %v589_v3 = vadd.f32 %v15925_v4, %v15870_v54 }
 0x1bf   :  { %v2431_v42 = vshll.u32 %v2087_v21, 16  ;;  %v2424_v57 = vrot.slane %v2422_v23, 4  ;;  %v2435_v61 = vshrl.u32 %v2087_v21, 16  ;;  %v2441_v5 = vshll.u32 %v2156_v35, 16  ;;  %v16015_v15 = vpop.f32.mrb[61].mxu0 }
 0x1c0   :  { %v2414_v32 = vor.u32 %v2413_v29, %v2409_v10  ;;  %v2427_v27 = vrot.slane %v2425_v51, 5  ;;  %v16019_v17 = vpop.f32.mrb[62].mxu0  ;;  %v737_v14 = vmax.f32 %v597_v62, 0.0  ;;  %v600_v8 = vadd.f32 %v15925_v4, %v15874_v0  ;;  %v988_v25 = vld [vmem:[#allocation2 + $0x104] sm:$0x1] }
 0x1c1   :  { %v2433_v28 = vrot.slane %v2431_v42, 5  ;;  %v2437_v33 = vrot.slane %v2435_v61, 4  ;;  %v2443_v11 = vrot.slane %v2441_v5, 5  ;;  %v16023_v40 = vpop.f32.mrb[63].mxu0  ;;  %v735_v38 = vmax.f32 %v589_v3, 0.0 }
 0x1c2   :  { %v2415_v59 = vrot.slane %v2414_v32, 4  ;;  %v2428_v21 = vor.u32 %v2427_v27, %v2424_v57  ;;  %v992_v10 = vsel %vm15597_vm4, 0, %v991_v12  ;;  %v12589_v41 = vpack.c.bf16 %v737_v14, %v737_v14  ;;  %v2088_v23 = vld [vmem:[#allocation2 + $0x84] sm:$0xf]  ;;  %v1975_v62 = vld [vmem:[#allocation2 + $0x108] sm:$0xf] }
 0x1c3   :  { %v2438_v30 = vor.u32 %v2437_v33, %v2433_v28  ;;  %v738_v54 = vmax.f32 %v600_v8, 0.0  ;;  %993 = vst [vmem:[#allocation2 + $0x110] sm:$0x1] %v992_v10  ;;  %v592_v1 = vadd.f32 %v15925_v4, %v15876_v7  ;;  %v12587_v47 = vpack.c.bf16 %v735_v38, %v735_v38  ;;  %v14945_v27 = vld [vmem:[#allocation8 + $0x108] sm:$0xff]  }
 0x1c4   :  { %v2420_v35 = vsel %vm15637_vm7, %v2415_v59, %v2419_v24  ;;  %v2429_v0 = vrot.slane %v2428_v21, 4  ;;  %v989_v48 = vsel %vm15597_vm4, 0, %v988_v25  ;;  %v1520_v42 = vshrl.u32 %v12589_v41, 16  ;;  %v14943_v24 = vld [vmem:[#allocation2 + $0xf0] sm:$0xff]  }
 0x1c5   :  { %v12030_v29 = vcombine.low %v2410_v49, %v2420_v35  ;;  %v2439_v51 = vrot.slane %v2438_v30, 4  ;;  %v1523_v57 = vshll.u32 %v12589_v41, 16  ;;  %990 = vst [vmem:[#allocation2 + $0x104] sm:$0x1] %v989_v48  ;;  %v14941_v61 = vld [vmem:[#allocation2 + $0xe4] sm:$0xff]   ;;  %v1503_v7 = vshrl.u32 %v12587_v47, 16 }
 0x1c6   :  { %v2434_v5 = vsel %vm15637_vm7, %v2429_v0, %v2433_v28  ;;  %v1506_v12 = vshll.u32 %v12587_v47, 16  ;;  %v12590_v32 = vpack.c.bf16 %v738_v54, %v738_v54  ;;  %v1522_v33 = vrot.slane %v1520_v42, 7  ;;  %v1968_v49 = vld [vmem:[#allocation2 + $0xfc] sm:$0xf]  ;;  %13837 = vmatprep.mubr.bf16.mxu1 %v14941_v61  ;;  %v2089_v28 = vld [vmem:[#allocation2 + $0x88] sm:$0xf] }
 0x1c7   :  { %13582 = vmatmul.mubr.bf16.gmra.mrb[80].mxu0 %v12030_v29  ;;  %v2444_v3 = vsel %vm15637_vm7, %v2439_v51, %v2443_v11  ;;  %v736_v14 = vmax.f32 %v592_v1, 0.0  ;;  %v2446_v8 = vshrl.u32 %v2088_v23, 16  ;;  %v1505_v59 = vrot.slane %v1503_v7, 7  ;;  %13838 = vmatmul.mubr.bf16.vlgmr.msra.gmra.mrb[0].mxu1 %v14943_v24  ;;  %v2157_v54 = vld [vmem:[#allocation2 + $0x8c] sm:$0x1]  ;;  %v14948_v51 = vld [vmem:[#allocation8 + $0x110] sm:$0xff]  }
 0x1c8   :  { %v12031_v25 = vcombine.low %v2434_v5, %v2444_v3  ;;  %v1528_v21 = vshrl.u32 %v12590_v32, 16  ;;  %v1531_v38 = vshll.u32 %v12590_v32, 16  ;;  %v1525_v10 = vor.u32 %v1523_v57, %v1522_v33  ;;  %v2090_v0 = vld [vmem:[#allocation2 + $0x90] sm:$0xf]  ;;  %13870 = vmatpush3.bf16.msra.mxu1 %v15831_v22 }
 0x1c9   :  { %v1526_v30 = vrot.slane %v1522_v33, 4  ;;  %v12588_v41 = vpack.c.bf16 %v736_v14, %v736_v14  ;;  %v2448_v35 = vrot.slane %v2446_v8, 4  ;;  %v1508_v11 = vor.u32 %v1506_v12, %v1505_v59  ;;  %13871 = vmatprep.subr.bf16.mxu1 %v14945_v27  ;;  %v2091_v14 = vld [vmem:[#allocation2 + $0x94] sm:$0xf] }
 0x1ca   :  { %13585 = vmatprep.mubr.bf16.mxu0 %v12031_v25  ;;  %v1509_v47 = vrot.slane %v1505_v59, 4  ;;  %v1530_v1 = vrot.slane %v1528_v21, 7  ;;  %v1979_v48 = vld [vmem:[#allocation2 + $0x110] sm:$0x1]  ;;  %v2449_v29 = vshll.u32 %v2088_v23, 16  ;;  %v1976_v42 = vsel %vm15692_vm10, %v1525_v10, %v1975_v62 }
 0x1cb   :  { %v1511_v61 = vshrl.u32 %v12588_v41, 16  ;;  %v1514_v57 = vshll.u32 %v12588_v41, 16  ;;  %v2455_v5 = vshll.u32 %v2089_v28, 16  ;;  %1977 = vst [vmem:[#allocation2 + $0x108] sm:$0xf] %v1976_v42  ;;  %v1969_v7 = vsel %vm15692_vm10, %v1508_v11, %v1968_v49  ;;  %v14951_v49 = vld [vmem:[#allocation8 + $0x118] sm:$0xff]  }
 0x1cc   :  { %v1533_v32 = vor.u32 %v1531_v38, %v1530_v1  ;;  %v1535_v22 = vrot.slane %v1530_v1, 4  ;;  %v2451_v24 = vrot.slane %v2449_v29, 5  ;;  %1970 = vst [vmem:[#allocation2 + $0xfc] sm:$0xf] %v1969_v7  ;;  %v2459_v33 = vshrl.u32 %v2089_v28, 16  ;;  %13872 = vmatpush3.bf16.msra.mxu1 %v14945_v27 }
 0x1cd   :  { %v1513_v12 = vrot.slane %v1511_v61, 7  ;;  %v2457_v3 = vrot.slane %v2455_v5, 5  ;;  %v2465_v23 = vshll.u32 %v2157_v54, 16  ;;  %v1972_v25 = vld [vmem:[#allocation2 + $0x104] sm:$0x1]  ;;  %v2470_v21 = vshrl.u32 %v2090_v0, 16  ;;  %13873 = vmatprep.subr.bf16.mxu1 %v14948_v51 }
 0x1ce   :  { %v1534_v62 = vsel %vm15699_vm11, %v1526_v30, %v1533_v32  ;;  %v1980_v8 = vsel %vm15588_vm2, %v1535_v22, %v1979_v48  ;;  %v2452_v59 = vor.u32 %v2451_v24, %v2448_v35  ;;  %v2461_v41 = vrot.slane %v2459_v33, 4  ;;  %v2158_v54 = vld [vmem:[#allocation2 + $0x98] sm:$0x1]  ;;  %v887_v30 = vld [vmem:[#allocation2 + $0x120] sm:$0x1]  ;;  %v14954_v24 = vld [vmem:[#allocation8 + $0x120] sm:$0xff]  }
 0x1cf   :  { %1978 = vst [vmem:[#allocation2 + $0x10c] sm:$0xf] %v1534_v62  ;;  %1981 = vst [vmem:[#allocation2 + $0x110] sm:$0x1] %v1980_v8  ;;  %v1516_v38 = vor.u32 %v1514_v57, %v1513_v12  ;;  %v1518_v10 = vrot.slane %v1513_v12, 4  ;;  %v2467_v28 = vrot.slane %v2465_v23, 5  ;;  %v613_v33 = vadd.f32 %v15925_v4, %v15892_v53 }
 0x1d0   :  { %v2453_v11 = vrot.slane %v2452_v59, 4  ;;  %v2472_v27 = vrot.slane %v2470_v21, 4  ;;  %v2473_v1 = vshll.u32 %v2090_v0, 16  ;;  %v2479_v29 = vshll.u32 %v2091_v14, 16  ;;  %v884_v5 = vld [vmem:[#allocation2 + $0x114] sm:$0x1]  ;;  %13874 = vmatpush3.bf16.msra.mxu1 %v14948_v51 }
 0x1d1   :  { %v1517_v48 = vsel %vm15699_vm11, %v1509_v47, %v1516_v38  ;;  %v1973_v35 = vsel %vm15588_vm2, %v1518_v10, %v1972_v25  ;;  %v2462_v42 = vor.u32 %v2461_v41, %v2457_v3  ;;  %v2483_v61 = vshrl.u32 %v2091_v14, 16  ;;  %v997_v22 = vld [vmem:[#allocation2 + $0x128] sm:$0x1]  ;;  %13875 = vmatprep.subr.bf16.mxu1 %v14951_v49  ;;  %v14958_v51 = vld [vmem:[#allocation8] sm:$0xff]   ;;  %v994_v25 = vld [vmem:[#allocation2 + $0x11c] sm:$0x1] }
 0x1d2   :  { %1971 = vst [vmem:[#allocation2 + $0x100] sm:$0xf] %v1517_v48  ;;  %1974 = vst [vmem:[#allocation2 + $0x104] sm:$0x1] %v1973_v35  ;;  %v2458_v57 = vsel %vm15637_vm7, %v2453_v11, %v2457_v3  ;;  %v2475_v7 = vrot.slane %v2473_v1, 5  ;;  %v2481_v32 = vrot.slane %v2479_v29, 5  ;;  %v605_v3 = vadd.f32 %v15925_v4, %v15894_v63  ;;  %13629 = vmatprep.subr.bf16.mxu0 %v14958_v51 }
 0x1d3   :  { %v2489_v0 = vshll.u32 %v2158_v54, 16  ;;  %v2463_v12 = vrot.slane %v2462_v42, 4  ;;  %v2485_v47 = vrot.slane %v2483_v61, 4  ;;  %v888_v23 = vsel %vm15588_vm2, 0, %v887_v30  ;;  %v16064_v10 = vld [vmem:[#allocation2 + $0x9c] sm:$0xf]  ;;  %13630 = vmatpush3.bf16.msra.mxu0 %v14958_v51 }
 0x1d4   :  { %v2476_v14 = vor.u32 %v2475_v7, %v2472_v27  ;;  %889 = vst [vmem:[#allocation2 + $0x120] sm:$0x1] %v888_v23  ;;  %v885_v8 = vsel %vm15588_vm2, 0, %v884_v5  ;;  %v741_v38 = vmax.f32 %v613_v33, 0.0  ;;  %v616_v53 = vadd.f32 %v15925_v4, %v15896_v9  ;;  %13876 = vmatpush3.bf16.msra.mxu1 %v14951_v49  ;;  %v14957_v27 = vld [vmem:[#allocation8 + $0x128] sm:$0xff]   ;;  %v14962_v23 = vld [vmem:[#allocation8 + $0x130] sm:$0xff]  }
 0x1d5   :  { %v2491_v62 = vrot.slane %v2489_v0, 5  ;;  %v2468_v59 = vsel %vm15637_vm7, %v2463_v12, %v2467_v28  ;;  %v2486_v21 = vor.u32 %v2485_v47, %v2481_v32  ;;  %886 = vst [vmem:[#allocation2 + $0x114] sm:$0x1] %v885_v8  ;;  %v739_v63 = vmax.f32 %v605_v3, 0.0  ;;  %13877 = vmatprep.subr.bf16.mxu1 %v14954_v24  ;;  %v2093_v30 = vld [vmem:[#allocation2 + $0xa0] sm:$0xf] }
 0x1d6   :  { %v12032_v41 = vcombine.low %v2458_v57, %v2468_v59  ;;  %v2477_v54 = vrot.slane %v2476_v14, 4  ;;  %v998_v11 = vsel %vm15597_vm4, 0, %v997_v22  ;;  %v12593_v1 = vpack.c.bf16 %v741_v38, %v741_v38  ;;  %v14960_v61 = vld [vmem:[#allocation8 + $0x8] sm:$0xff]   ;;  %v14946_v33 = vld [vmem:[#allocation2 + $0x108] sm:$0xff]  }
 0x1d7   :  { %v2487_v28 = vrot.slane %v2486_v21, 4  ;;  %v742_v29 = vmax.f32 %v616_v53, 0.0  ;;  %999 = vst [vmem:[#allocation2 + $0x128] sm:$0x1] %v998_v11  ;;  %v608_v9 = vadd.f32 %v15925_v4, %v15898_v18  ;;  %v12591_v48 = vpack.c.bf16 %v739_v63, %v739_v63  ;;  %13631 = vmatprep.subr.bf16.mxu0 %v14960_v61  ;;  %v2159_v21 = vld [vmem:[#allocation2 + $0xa4] sm:$0x1] }
 0x1d8   :  { %13586 = vmatmul.mubr.bf16.gmra.mrb[84].mxu0 %v12032_v41  ;;  %v2482_v49 = vsel %vm15637_vm7, %v2477_v54, %v2481_v32  ;;  %v995_v35 = vsel %vm15597_vm4, 0, %v994_v25  ;;  %v2494_v42 = vshrl.u32 %v16064_v10, 16  ;;  %v1554_v57 = vshrl.u32 %v12593_v1, 16  ;;  %13878 = vmatpush3.bf16.msra.mxu1 %v14954_v24  ;;  %v14963_v53 = vld [vmem:[#allocation8 + $0x10] sm:$0xff]  }
 0x1d9   :  { %v2492_v5 = vsel %vm15637_vm7, %v2487_v28, %v2491_v62  ;;  %v1557_v7 = vshll.u32 %v12593_v1, 16  ;;  %v12594_v0 = vpack.c.bf16 %v742_v29, %v742_v29  ;;  %996 = vst [vmem:[#allocation2 + $0x11c] sm:$0x1] %v995_v35  ;;  %v14944_v18 = vld [vmem:[#allocation2 + $0xfc] sm:$0xff]   ;;  %v1537_v12 = vshrl.u32 %v12591_v48, 16  ;;  %13879 = vmatprep.subr.bf16.mxu1 %v14957_v27  ;;  %13632 = vmatpush3.bf16.msra.mxu0 %v14960_v61 }
 0x1da   :  { %v12033_v22 = vcombine.low %v2482_v49, %v2492_v5  ;;  %v1540_v47 = vshll.u32 %v12591_v48, 16  ;;  %v740_v32 = vmax.f32 %v608_v9, 0.0  ;;  %v1556_v51 = vrot.slane %v1554_v57, 7  ;;  %13841 = vmatprep.mubr.bf16.mxu1 %v14944_v18  ;;  %13633 = vmatprep.subr.bf16.mxu0 %v14963_v53  ;;  %v2094_v5 = vld [vmem:[#allocation2 + $0xa8] sm:$0xf] }
 0x1db   :  { %v1562_v14 = vshrl.u32 %v12594_v0, 16  ;;  %v1565_v3 = vshll.u32 %v12594_v0, 16  ;;  %v2496_v8 = vrot.slane %v2494_v42, 4  ;;  %v1989_v62 = vld [vmem:[#allocation2 + $0x120] sm:$0xf]  ;;  %v1539_v25 = vrot.slane %v1537_v12, 7  ;;  %13842 = vmatmul.mubr.bf16.gmra.mrb[4].mxu1 %v14946_v33 }
 0x1dc   :  { %13589 = vmatprep.mubr.bf16.mxu0 %v12033_v22  ;;  %v12592_v59 = vpack.c.bf16 %v740_v32, %v740_v32  ;;  %v2497_v24 = vshll.u32 %v16064_v10, 16  ;;  %v2503_v38 = vshll.u32 %v2093_v30, 16  ;;  %v1559_v41 = vor.u32 %v1557_v7, %v1556_v51  ;;  %v1982_v63 = vld [vmem:[#allocation2 + $0x114] sm:$0xf]  ;;  %13880 = vmatpush3.bf16.msra.mxu1 %v14957_v27  ;;  %v14965_v57 = vld [vmem:[#allocation8 + $0x18] sm:$0xff]  }
 0x1dd   :  { %v1560_v54 = vrot.slane %v1556_v51, 4  ;;  %v1564_v11 = vrot.slane %v1562_v14, 7  ;;  %v2507_v28 = vshrl.u32 %v2093_v30, 16  ;;  %v1542_v1 = vor.u32 %v1540_v47, %v1539_v25  ;;  %13881 = vmatprep.subr.bf16.mxu1 %v14962_v23  ;;  %13634 = vmatpush3.bf16.msra.mxu0 %v14963_v53  ;;  %v14967_v7 = vld [vmem:[#allocation8 + $0x138] sm:$0xff]   ;;  %v893_v14 = vld [vmem:[#allocation2 + $0x138] sm:$0x1] }
 0x1de   :  { %v1543_v29 = vrot.slane %v1539_v25, 4  ;;  %v1993_v9 = vld [vmem:[#allocation2 + $0x128] sm:$0x1]  ;;  %v1545_v49 = vshrl.u32 %v12592_v59, 16  ;;  %v1548_v48 = vshll.u32 %v12592_v59, 16  ;;  %v1990_v35 = vsel %vm15692_vm10, %v1559_v41, %v1989_v62  ;;  %13635 = vmatprep.subr.bf16.mxu0 %v14965_v57 }
 0x1df   :  { %v1567_v10 = vor.u32 %v1565_v3, %v1564_v11  ;;  %v1569_v42 = vrot.slane %v1564_v11, 4  ;;  %v2499_v61 = vrot.slane %v2497_v24, 5  ;;  %1991 = vst [vmem:[#allocation2 + $0x120] sm:$0xf] %v1990_v35  ;;  %v1983_v27 = vsel %vm15692_vm10, %v1542_v1, %v1982_v63  ;;  %v2095_v22 = vld [vmem:[#allocation2 + $0xac] sm:$0xf] }
 0x1e0   :  { %v1547_v30 = vrot.slane %v1545_v49, 7  ;;  %v2505_v0 = vrot.slane %v2503_v38, 5  ;;  %v2509_v18 = vrot.slane %v2507_v28, 4  ;;  %1984 = vst [vmem:[#allocation2 + $0x114] sm:$0xf] %v1983_v27  ;;  %v2513_v51 = vshll.u32 %v2159_v21, 16  ;;  %13882 = vmatpush3.bf16.msra.mxu1 %v14962_v23 }
 0x1e1   :  { %v1568_v12 = vsel %vm15699_vm11, %v1560_v54, %v1567_v10  ;;  %v1994_v47 = vsel %vm15588_vm2, %v1569_v42, %v1993_v9  ;;  %v1986_v32 = vld [vmem:[#allocation2 + $0x11c] sm:$0x1]  ;;  %v2500_v33 = vor.u32 %v2499_v61, %v2496_v8  ;;  %v2518_v59 = vshrl.u32 %v2094_v5, 16  ;;  %13883 = vmatprep.subr.bf16.mxu1 %v14967_v7  ;;  %v2160_v53 = vld [vmem:[#allocation2 + $0xb0] sm:$0x1]  ;;  %13636 = vmatpush3.bf16.msra.mxu0 %v14965_v57 }
 0x1e2   :  { %1992 = vst [vmem:[#allocation2 + $0x124] sm:$0xf] %v1568_v12  ;;  %1995 = vst [vmem:[#allocation2 + $0x128] sm:$0x1] %v1994_v47  ;;  %v1550_v3 = vor.u32 %v1548_v48, %v1547_v30  ;;  %v1552_v62 = vrot.slane %v1547_v30, 4  ;;  %v2510_v25 = vor.u32 %v2509_v18, %v2505_v0  ;;  %v2515_v38 = vrot.slane %v2513_v51, 5 }
 0x1e3   :  { %v2501_v24 = vrot.slane %v2500_v33, 4  ;;  %v2521_v41 = vshll.u32 %v2094_v5, 16  ;;  %v2527_v54 = vshll.u32 %v2095_v22, 16  ;;  %v2520_v63 = vrot.slane %v2518_v59, 4  ;;  %v14968_v11 = vld [vmem:[#allocation8 + $0x20] sm:$0xff]  }
 0x1e4   :  { %v1551_v8 = vsel %vm15699_vm11, %v1543_v29, %v1550_v3  ;;  %v1987_v23 = vsel %vm15588_vm2, %v1552_v62, %v1986_v32  ;;  %v2511_v21 = vrot.slane %v2510_v25, 4  ;;  %v2531_v49 = vshrl.u32 %v2095_v22, 16  ;;  %v890_v48 = vld [vmem:[#allocation2 + $0x12c] sm:$0x1]  ;;  %13884 = vmatpush3.bf16.msra.mxu1 %v14967_v7  ;;  %v1003_v61 = vld [vmem:[#allocation2 + $0x140] sm:$0x1]  ;;  %13637 = vmatprep.subr.bf16.mxu0 %v14968_v11 }
 0x1e5   :  { %1985 = vst [vmem:[#allocation2 + $0x118] sm:$0xf] %v1551_v8  ;;  %1988 = vst [vmem:[#allocation2 + $0x11c] sm:$0x1] %v1987_v23  ;;  %v2506_v28 = vsel %vm15637_vm7, %v2501_v24, %v2505_v0  ;;  %v2523_v1 = vrot.slane %v2521_v41, 5  ;;  %v2529_v9 = vrot.slane %v2527_v54, 5  ;;  %v629_v10 = vadd.f32 %v15925_v4, %v15904_v37  ;;  %13638 = vmatpush3.bf16.msra.mxu0 %v14968_v11 }
 0x1e6   :  { %v2516_v35 = vsel %vm15637_vm7, %v2511_v21, %v2515_v38  ;;  %v2537_v29 = vshll.u32 %v2160_v53, 16  ;;  %v894_v42 = vsel %vm15588_vm2, 0, %v893_v14  ;;  %v1000_v5 = vld [vmem:[#allocation2 + $0x134] sm:$0x1]  ;;  %v2533_v30 = vrot.slane %v2531_v49, 4 }
 0x1e7   :  { %v12034_v57 = vcombine.low %v2506_v28, %v2516_v35  ;;  %v2524_v27 = vor.u32 %v2523_v1, %v2520_v63  ;;  %895 = vst [vmem:[#allocation2 + $0x138] sm:$0x1] %v894_v42  ;;  %v621_v7 = vadd.f32 %v15925_v4, %v15906_v44  ;;  %v16100_v0 = vld [vmem:[#allocation2 + $0xb4] sm:$0xf]  ;;  %v745_v22 = vmax.f32 %v629_v10, 0.0  ;;  %v14970_v1 = vld [vmem:[#allocation8 + $0x28] sm:$0xff]  }
 0x1e8   :  { %v2539_v18 = vrot.slane %v2537_v29, 5  ;;  %v891_v37 = vsel %vm15588_vm2, 0, %v890_v48  ;;  %v632_v12 = vadd.f32 %v15925_v4, %v15908_v52  ;;  %v2534_v32 = vor.u32 %v2533_v30, %v2529_v9  ;;  %v16111_v3 = vld [vmem:[%s17671_s2] ss:$0 sm:$0xff]  ;;  %v2097_v24 = vld [vmem:[#allocation2 + $0xb8] sm:$0xf]  ;;  %13639 = vmatprep.subr.bf16.mxu0 %v14970_v1 }
 0x1e9   :  { %13590 = vmatmul.mubr.bf16.gmra.mrb[88].mxu0 %v12034_v57  ;;  %v2525_v47 = vrot.slane %v2524_v27, 4  ;;  %v743_v33 = vmax.f32 %v621_v7, 0.0  ;;  %892 = vst [vmem:[#allocation2 + $0x12c] sm:$0x1] %v891_v37  ;;  %v1004_v51 = vsel %vm15597_vm4, 0, %v1003_v61  ;;  %v12597_v44 = vpack.c.bf16 %v745_v22, %v745_v22  ;;  %v14949_v28 = vld [vmem:[#allocation2 + $0x120] sm:$0xff]  }
 0x1ea   :  { %v746_v14 = vmax.f32 %v632_v12, 0.0  ;;  %1005 = vst [vmem:[#allocation2 + $0x140] sm:$0x1] %v1004_v51  ;;  %v624_v62 = vadd.f32 %v16111_v3, %v15918_v50  ;;  %v1001_v52 = vsel %vm15597_vm4, 0, %v1000_v5  ;;  %v2535_v25 = vrot.slane %v2534_v32, 4  ;;  %v14971_v29 = vld [vmem:[#allocation8 + $0x140] sm:$0xff]   ;;  %13640 = vmatpush3.bf16.msra.mxu0 %v14970_v1 }
 0x1eb   :  { %v2530_v4 = vsel %vm15637_vm7, %v2525_v47, %v2529_v9  ;;  %v12595_v59 = vpack.c.bf16 %v743_v33, %v743_v33  ;;  %1002 = vst [vmem:[#allocation2 + $0x134] sm:$0x1] %v1001_v52  ;;  %v2542_v38 = vshrl.u32 %v16100_v0, 16  ;;  %v1588_v53 = vshrl.u32 %v12597_v44, 16  ;;  %v2161_v5 = vld [vmem:[#allocation2 + $0xbc] sm:$0x1]  ;;  %13949 = vmatprep.subr.bf16.mxu1 %v14971_v29 }
 0x1ec   :  { %v1591_v41 = vshll.u32 %v12597_v44, 16  ;;  %v12598_v54 = vpack.c.bf16 %v746_v14, %v746_v14  ;;  %v744_v8 = vmax.f32 %v624_v62, 0.0  ;;  %v14947_v23 = vld [vmem:[#allocation2 + $0x114] sm:$0xff]   ;;  %v2540_v50 = vsel %vm15637_vm7, %v2535_v25, %v2539_v18  ;;  %v14972_v12 = vld [vmem:[#allocation8 + $0x30] sm:$0xff]  }
 0x1ed   :  { %v1571_v21 = vshrl.u32 %v12595_v59, 16  ;;  %v1574_v63 = vshll.u32 %v12595_v59, 16  ;;  %v2544_v11 = vrot.slane %v2542_v38, 4  ;;  %v12035_v9 = vcombine.low %v2530_v4, %v2540_v50  ;;  %13845 = vmatprep.mubr.bf16.mxu1 %v14947_v23  ;;  %13641 = vmatprep.subr.bf16.mxu0 %v14972_v12  ;;  %v899_v38 = vld [vmem:[#allocation2 + $0x150] sm:$0x1] }
 0x1ee   :  { %v1590_v49 = vrot.slane %v1588_v53, 7  ;;  %v1596_v48 = vshrl.u32 %v12598_v54, 16  ;;  %v1599_v35 = vshll.u32 %v12598_v54, 16  ;;  %v2003_v10 = vld [vmem:[#allocation2 + $0x138] sm:$0xf]  ;;  %v12596_v61 = vpack.c.bf16 %v744_v8, %v744_v8  ;;  %13846 = vmatmul.mubr.bf16.gmra.mrb[8].mxu1 %v14949_v28  ;;  %13642 = vmatpush3.bf16.msra.mxu0 %v14972_v12 }
 0x1ef   :  { %v1573_v42 = vrot.slane %v1571_v21, 7  ;;  %v2545_v57 = vshll.u32 %v16100_v0, 16  ;;  %v2551_v27 = vshll.u32 %v2097_v24, 16  ;;  %13593 = vmatprep.mubr.bf16.mxu0 %v12035_v9  ;;  %v2555_v37 = vshrl.u32 %v2097_v24, 16  ;;  %v896_v50 = vld [vmem:[#allocation2 + $0x144] sm:$0x1] }
 0x1f0   :  { %v1593_v30 = vor.u32 %v1591_v41, %v1590_v49  ;;  %v1594_v7 = vrot.slane %v1590_v49, 4  ;;  %v1996_v18 = vld [vmem:[#allocation2 + $0x12c] sm:$0xf]  ;;  %v1598_v22 = vrot.slane %v1596_v48, 7  ;;  %v1579_v51 = vshrl.u32 %v12596_v61, 16 }
 0x1f1   :  { %v1576_v47 = vor.u32 %v1574_v63, %v1573_v42  ;;  %v1577_v32 = vrot.slane %v1573_v42, 4  ;;  %v2007_v33 = vld [vmem:[#allocation2 + $0x140] sm:$0x1]  ;;  %v1582_v44 = vshll.u32 %v12596_v61, 16  ;;  %v2547_v52 = vrot.slane %v2545_v57, 5 }
 0x1f2   :  { %v2004_v0 = vsel %vm15692_vm10, %v1593_v30, %v2003_v10  ;;  %v1601_v14 = vor.u32 %v1599_v35, %v1598_v22  ;;  %v1603_v62 = vrot.slane %v1598_v22, 4  ;;  %v1581_v25 = vrot.slane %v1579_v51, 7  ;;  %v2000_v54 = vld [vmem:[#allocation2 + $0x134] sm:$0x1]  ;;  %v869_v30 = vld [vmem:[#allocation2 + $0xd8] sm:$0x1] }
 0x1f3   :  { %2005 = vst [vmem:[#allocation2 + $0x138] sm:$0xf] %v2004_v0  ;;  %v1997_v4 = vsel %vm15692_vm10, %v1576_v47, %v1996_v18  ;;  %v2553_v59 = vrot.slane %v2551_v27, 5  ;;  %v2557_v24 = vrot.slane %v2555_v37, 4  ;;  %v2548_v8 = vor.u32 %v2547_v52, %v2544_v11  ;;  %v1009_v11 = vld [vmem:[#allocation2 + $0x158] sm:$0x1] }
 0x1f4   :  { %1998 = vst [vmem:[#allocation2 + $0x12c] sm:$0xf] %v1997_v4  ;;  %v1602_v53 = vsel %vm15699_vm11, %v1594_v7, %v1601_v14  ;;  %v2008_v41 = vsel %vm15588_vm2, %v1603_v62, %v2007_v33  ;;  %v2561_v23 = vshll.u32 %v2161_v5, 16  ;;  %v1584_v21 = vor.u32 %v1582_v44, %v1581_v25  ;;  %v1006_v5 = vld [vmem:[#allocation2 + $0x14c] sm:$0x1] }
 0x1f5   :  { %2006 = vst [vmem:[#allocation2 + $0x13c] sm:$0xf] %v1602_v53  ;;  %2009 = vst [vmem:[#allocation2 + $0x140] sm:$0x1] %v2008_v41  ;;  %v1586_v63 = vrot.slane %v1581_v25, 4  ;;  %v2558_v28 = vor.u32 %v2557_v24, %v2553_v59  ;;  %v645_v1 = vadd.f32 %v16111_v3, %v15937_v31  ;;  %v2549_v9 = vrot.slane %v2548_v8, 4 }
 0x1f6   :  { %v2563_v49 = vrot.slane %v2561_v23, 5  ;;  %v900_v48 = vsel %vm15588_vm2, 0, %v899_v38  ;;  %v637_v35 = vadd.f32 %v16111_v3, %v15941_v26  ;;  %v1585_v29 = vsel %vm15699_vm11, %v1577_v32, %v1584_v21  ;;  %v979_v12 = vld [vmem:[#allocation2 + $0xe0] sm:$0x1]  ;;  %v2099_v47 = vld [vmem:[#allocation2 + $0xdc] sm:$0xf] }
 0x1f7   :  { %v2001_v10 = vsel %vm15588_vm2, %v1586_v63, %v2000_v54  ;;  %v2559_v42 = vrot.slane %v2558_v28, 4  ;;  %v749_v61 = vmax.f32 %v645_v1, 0.0  ;;  %901 = vst [vmem:[#allocation2 + $0x150] sm:$0x1] %v900_v48  ;;  %1999 = vst [vmem:[#allocation2 + $0x130] sm:$0xf] %v1585_v29  ;;  %v2554_v31 = vsel %vm15637_vm7, %v2549_v9, %v2553_v59 }
 0x1f8   :  { %2002 = vst [vmem:[#allocation2 + $0x134] sm:$0x1] %v2001_v10  ;;  %v747_v57 = vmax.f32 %v637_v35, 0.0  ;;  %v897_v26 = vsel %vm15588_vm2, 0, %v896_v50  ;;  %v648_v27 = vadd.f32 %v16111_v3, %v15944_v36  ;;  %v1010_v22 = vsel %vm15597_vm4, 0, %v1009_v11  ;;  %v14973_v54 = vld [vmem:[#allocation8 + $0x38] sm:$0xff]  }
 0x1f9   :  { %v2564_v7 = vsel %vm15637_vm7, %v2559_v42, %v2563_v49  ;;  %v12601_v18 = vpack.c.bf16 %v749_v61, %v749_v61  ;;  %898 = vst [vmem:[#allocation2 + $0x144] sm:$0x1] %v897_v26  ;;  %v640_v37 = vadd.f32 %v16111_v3, %v15950_v2  ;;  %1011 = vst [vmem:[#allocation2 + $0x158] sm:$0x1] %v1010_v22  ;;  %v1007_v36 = vsel %vm15597_vm4, 0, %v1006_v5 }
 0x1fa   :  { %v12036_v32 = vcombine.low %v2554_v31, %v2564_v7  ;;  %v12599_v33 = vpack.c.bf16 %v747_v57, %v747_v57  ;;  %v750_v51 = vmax.f32 %v648_v27, 0.0  ;;  %v16155_v44 = vld [vmem:[#allocation2 + $0xe4] sm:$0xf]  ;;  %1008 = vst [vmem:[#allocation2 + $0x14c] sm:$0x1] %v1007_v36  ;;  %v870_v52 = vsel %vm15588_vm2, 0, %v869_v30  ;;  %13643 = vmatprep.subr.bf16.mxu0 %v14973_v54 }
 0x1fb   :  { %v1622_v0 = vshrl.u32 %v12601_v18, 16  ;;  %v1625_v14 = vshll.u32 %v12601_v18, 16  ;;  %v748_v62 = vmax.f32 %v640_v37, 0.0  ;;  %871 = vst [vmem:[#allocation2 + $0xd8] sm:$0x1] %v870_v52  ;;  %v980_v59 = vsel %vm15597_vm4, 0, %v979_v12  ;;  %13644 = vmatpush3.bf16.msra.mxu0 %v14973_v54 }
 0x1fc   :  { %13594 = vmatmul.mubr.bf16.gmra.mrb[92].mxu0 %v12036_v32  ;;  %v1605_v2 = vshrl.u32 %v12599_v33, 16  ;;  %v1608_v4 = vshll.u32 %v12599_v33, 16  ;;  %v12602_v25 = vpack.c.bf16 %v750_v51, %v750_v51  ;;  %981 = vst [vmem:[#allocation2 + $0xe0] sm:$0x1] %v980_v59  ;;  %v2575_v53 = vshll.u32 %v2099_v47, 16  ;;  %v14952_v5 = vld [vmem:[#allocation2 + $0x138] sm:$0xff]  }
 0x1fd   :  { %v1624_v24 = vrot.slane %v1622_v0, 7  ;;  %v12600_v38 = vpack.c.bf16 %v748_v62, %v748_v62  ;;  %v2579_v41 = vshrl.u32 %v2099_v47, 16  ;;  %v16161_v63 = vld [vmem:[#allocation2 + $0xe8] sm:$0xf]  ;;  %v2590_v28 = vshrl.u32 %v16155_v44, 16 }
 0x1fe   :  { %v2017_v8 = vld [vmem:[#allocation2 + $0x150] sm:$0xf]  ;;  %v1607_v23 = vrot.slane %v1605_v2, 7  ;;  %v1630_v50 = vshrl.u32 %v12602_v25, 16  ;;  %v1633_v21 = vshll.u32 %v12602_v25, 16  ;;  %v16164_v61 = vrot.slane %v2575_v53, 5 }
 0x1ff   :  { %v1627_v1 = vor.u32 %v1625_v14, %v1624_v24  ;;  %v1628_v9 = vrot.slane %v1624_v24, 4  ;;  %v1613_v49 = vshrl.u32 %v12600_v38, 16  ;;  %v1616_v48 = vshll.u32 %v12600_v38, 16  ;;  %v14950_v35 = vld [vmem:[#allocation2 + $0x12c] sm:$0xff]   ;;  %v2103_v53 = vld [vmem:[#allocation2 + $0xf4] sm:$0xf] }
 0x200   :  { %v1610_v11 = vor.u32 %v1608_v4, %v1607_v23  ;;  %v1611_v29 = vrot.slane %v1607_v23, 4  ;;  %v2010_v10 = vld [vmem:[#allocation2 + $0x144] sm:$0xf]  ;;  %v1632_v42 = vrot.slane %v1630_v50, 7  ;;  %v2021_v57 = vld [vmem:[#allocation2 + $0x158] sm:$0x1]  ;;  %13849 = vmatprep.mubr.bf16.mxu1 %v14950_v35 }
 0x201   :  { %v2018_v31 = vsel %vm15692_vm10, %v1627_v1, %v2017_v8  ;;  %v1615_v26 = vrot.slane %v1613_v49, 7  ;;  %v2581_v27 = vrot.slane %v2579_v41, 4  ;;  %v2592_v30 = vrot.slane %v2590_v28, 4  ;;  %v2014_v37 = vld [vmem:[#allocation2 + $0x14c] sm:$0x1]  ;;  %13850 = vmatmul.mubr.bf16.gmra.mrb[12].mxu1 %v14952_v5 }
 0x202   :  { %2019 = vst [vmem:[#allocation2 + $0x150] sm:$0xf] %v2018_v31  ;;  %v2011_v7 = vsel %vm15692_vm10, %v1610_v11, %v2010_v10  ;;  %v1635_v18 = vor.u32 %v1633_v21, %v1632_v42  ;;  %v1637_v22 = vrot.slane %v1632_v42, 4  ;;  %v2593_v12 = vshll.u32 %v16155_v44, 16  ;;  %v2098_v33 = vld [vmem:[#allocation2 + $0xd8] sm:$0xf] }
 0x203   :  { %2012 = vst [vmem:[#allocation2 + $0x144] sm:$0xf] %v2011_v7  ;;  %v1618_v47 = vor.u32 %v1616_v48, %v1615_v26  ;;  %v1620_v32 = vrot.slane %v1615_v26, 4  ;;  %v2582_v51 = vor.u32 %v2581_v27, %v16164_v61  ;;  %v2163_v36 = vld [vmem:[#allocation2 + $0xec] sm:$0x1]  ;;  %v2599_v0 = vshll.u32 %v16161_v63, 16 }
 0x204   :  { %v1636_v14 = vsel %vm15699_vm11, %v1628_v9, %v1635_v18  ;;  %v2022_v62 = vsel %vm15588_vm2, %v1637_v22, %v2021_v57  ;;  %v2162_v52 = vld [vmem:[#allocation2 + $0xe0] sm:$0x1]  ;;  %v2566_v2 = vshrl.u32 %v2098_v33, 16  ;;  %v2569_v4 = vshll.u32 %v2098_v33, 16  ;;  %v2102_v44 = vld [vmem:[#allocation2 + $0xf0] sm:$0xf] }
 0x205   :  { %2020 = vst [vmem:[#allocation2 + $0x154] sm:$0xf] %v1636_v14  ;;  %2023 = vst [vmem:[#allocation2 + $0x158] sm:$0x1] %v2022_v62  ;;  %v1619_v25 = vsel %vm15699_vm11, %v1611_v29, %v1618_v47  ;;  %v2015_v59 = vsel %vm15588_vm2, %v1620_v32, %v2014_v37  ;;  %v2583_v24 = vrot.slane %v2582_v51, 4  ;;  %v2585_v38 = vshll.u32 %v2162_v52, 16 }
 0x206   :  { %2013 = vst [vmem:[#allocation2 + $0x148] sm:$0xf] %v1619_v25  ;;  %2016 = vst [vmem:[#allocation2 + $0x14c] sm:$0x1] %v2015_v59  ;;  %v2568_v41 = vrot.slane %v2566_v2, 4  ;;  %v2571_v54 = vrot.slane %v2569_v4, 5  ;;  %v653_v4 = vadd.f32 %v16111_v3, %v15957_v20 }
 0x207   :  { %v2595_v8 = vrot.slane %v2593_v12, 5  ;;  %v2601_v23 = vrot.slane %v2599_v0, 5  ;;  %v2587_v50 = vrot.slane %v2585_v38, 5  ;;  %v2603_v21 = vshrl.u32 %v16161_v63, 16  ;;  %v2164_v48 = vld [vmem:[#allocation2 + $0xf8] sm:$0x1] }
 0x208   :  { %v2609_v28 = vshll.u32 %v2163_v36, 16  ;;  %v2614_v1 = vshrl.u32 %v2102_v44, 16  ;;  %v2572_v9 = vor.u32 %v2571_v54, %v2568_v41  ;;  %v2617_v35 = vshll.u32 %v2102_v44, 16  ;;  %v905_v29 = vld [vmem:[#allocation2 + $0x168] sm:$0x1] }
 0x209   :  { %v2596_v49 = vor.u32 %v2595_v8, %v2592_v30  ;;  %v2623_v11 = vshll.u32 %v2103_v53, 16  ;;  %v2588_v10 = vsel %vm15637_vm7, %v2583_v24, %v2587_v50  ;;  %v2605_v42 = vrot.slane %v2603_v21, 4  ;;  %v902_v37 = vld [vmem:[#allocation2 + $0x15c] sm:$0x1]  ;;  %v1015_v51 = vld [vmem:[#allocation2 + $0x170] sm:$0x1] }
 0x20a   :  { %v2611_v5 = vrot.slane %v2609_v28, 5  ;;  %v2616_v31 = vrot.slane %v2614_v1, 4  ;;  %v2573_v57 = vrot.slane %v2572_v9, 4  ;;  %v2619_v27 = vrot.slane %v2617_v35, 5  ;;  %v1012_v44 = vld [vmem:[#allocation2 + $0x164] sm:$0x1] }
 0x20b   :  { %v2597_v26 = vrot.slane %v2596_v49, 4  ;;  %v2625_v7 = vrot.slane %v2623_v11, 5  ;;  %v2606_v18 = vor.u32 %v2605_v42, %v2601_v23  ;;  %v2627_v63 = vshrl.u32 %v2103_v53, 16  ;;  %v2104_v41 = vld [vmem:[#allocation2 + $0xfc] sm:$0xf] }
 0x20c   :  { %v2633_v22 = vshll.u32 %v2164_v48, 16  ;;  %v661_v30 = vadd.f32 %v16111_v3, %v15953_v13  ;;  %v2578_v12 = vsel %vm15637_vm7, %v2573_v57, %v16164_v61  ;;  %v2620_v32 = vor.u32 %v2619_v27, %v2616_v31  ;;  %v14955_v25 = vld [vmem:[#allocation2 + $0x150] sm:$0xff]  }
 0x20d   :  { %v2602_v47 = vsel %vm15637_vm7, %v2597_v26, %v2601_v23  ;;  %v906_v33 = vsel %vm15588_vm2, 0, %v905_v29  ;;  %v12037_v36 = vcombine.low %v2578_v12, %v2588_v10  ;;  %v2607_v0 = vrot.slane %v2606_v18, 4  ;;  %v14953_v52 = vld [vmem:[#allocation2 + $0x144] sm:$0xff]  }
 0x20e   :  { %v2629_v14 = vrot.slane %v2627_v63, 4  ;;  %v2635_v62 = vrot.slane %v2633_v22, 5  ;;  %907 = vst [vmem:[#allocation2 + $0x168] sm:$0x1] %v906_v33  ;;  %v2621_v13 = vrot.slane %v2620_v32, 4  ;;  %v753_v2 = vmax.f32 %v661_v30, 0.0  ;;  %13853 = vmatprep.mubr.bf16.mxu1 %v14953_v52 }
 0x20f   :  { %v903_v61 = vsel %vm15588_vm2, 0, %v902_v37  ;;  %13597 = vmatprep.mubr.bf16.mxu0 %v12037_v36  ;;  %v2612_v59 = vsel %vm15637_vm7, %v2607_v0, %v2611_v5  ;;  %v664_v38 = vadd.f32 %v16111_v3, %v15961_v16  ;;  %v1016_v53 = vsel %vm15597_vm4, 0, %v1015_v51  ;;  %13854 = vmatmul.mubr.bf16.gmra.mrb[16].mxu1 %v14955_v25  ;;  %v2165_v12 = vld [vmem:[#allocation2 + $0x104] sm:$0x1] }
 0x210   :  { %v2630_v24 = vor.u32 %v2629_v14, %v2625_v7  ;;  %904 = vst [vmem:[#allocation2 + $0x15c] sm:$0x1] %v903_v61  ;;  %v12038_v20 = vcombine.low %v2602_v47, %v2612_v59  ;;  %v2626_v54 = vsel %vm15637_vm7, %v2621_v13, %v2625_v7  ;;  %v12605_v8 = vpack.c.bf16 %v753_v2, %v753_v2 }
 0x211   :  { %v751_v23 = vmax.f32 %v653_v4, 0.0  ;;  %1017 = vst [vmem:[#allocation2 + $0x170] sm:$0x1] %v1016_v53  ;;  %v754_v21 = vmax.f32 %v664_v38, 0.0  ;;  %v656_v28 = vadd.f32 %v16111_v3, %v15963_v60  ;;  %v1013_v16 = vsel %vm15597_vm4, 0, %v1012_v44 }
 0x212   :  { %v2631_v50 = vrot.slane %v2630_v24, 4  ;;  %13598 = vmatmul.mubr.bf16.gmra.mrb[96].mxu0 %v12038_v20  ;;  %v1656_v1 = vshrl.u32 %v12605_v8, 16  ;;  %v1659_v9 = vshll.u32 %v12605_v8, 16  ;;  %1014 = vst [vmem:[#allocation2 + $0x164] sm:$0x1] %v1013_v16  ;;  %v2638_v48 = vshrl.u32 %v2104_v41, 16 }
 0x213   :  { %v12603_v49 = vpack.c.bf16 %v751_v23, %v751_v23  ;;  %v12606_v11 = vpack.c.bf16 %v754_v21, %v754_v21  ;;  %v752_v29 = vmax.f32 %v656_v28, 0.0  ;;  %v2641_v10 = vshll.u32 %v2104_v41, 16  ;;  %v2105_v60 = vld [vmem:[#allocation2 + $0x100] sm:$0xf]  ;;  %v2106_v4 = vld [vmem:[#allocation2 + $0x108] sm:$0xf] }
 0x214   :  { %v2636_v35 = vsel %vm15637_vm7, %v2631_v50, %v2635_v62  ;;  %v1658_v5 = vrot.slane %v1656_v1, 7  ;;  %v2640_v63 = vrot.slane %v2638_v48, 4  ;;  %v2647_v0 = vshll.u32 %v2105_v60, 16  ;;  %v2107_v24 = vld [vmem:[#allocation2 + $0x10c] sm:$0xf] }
 0x215   :  { %v12039_v42 = vcombine.low %v2626_v54, %v2636_v35  ;;  %v1639_v31 = vshrl.u32 %v12603_v49, 16  ;;  %v1642_v57 = vshll.u32 %v12603_v49, 16  ;;  %v2031_v26 = vld [vmem:[#allocation2 + $0x168] sm:$0xf]  ;;  %v1664_v27 = vshrl.u32 %v12606_v11, 16 }
 0x216   :  { %v1667_v7 = vshll.u32 %v12606_v11, 16  ;;  %v12604_v18 = vpack.c.bf16 %v752_v29, %v752_v29  ;;  %v1661_v22 = vor.u32 %v1659_v9, %v1658_v5  ;;  %v1662_v30 = vrot.slane %v1658_v5, 4  ;;  %v2166_v28 = vld [vmem:[#allocation2 + $0x110] sm:$0x1]  ;;  %v911_v48 = vld [vmem:[#allocation2 + $0x180] sm:$0x1] }
 0x217   :  { %13601 = vmatprep.mubr.bf16.mxu0 %v12039_v42  ;;  %v1641_v37 = vrot.slane %v1639_v31, 7  ;;  %v2643_v47 = vrot.slane %v2641_v10, 5  ;;  %v2024_v32 = vld [vmem:[#allocation2 + $0x15c] sm:$0xf]  ;;  %v1666_v33 = vrot.slane %v1664_v27, 7  ;;  %v2649_v59 = vrot.slane %v2647_v0, 5 }
 0x218   :  { %v1647_v51 = vshrl.u32 %v12604_v18, 16  ;;  %v1650_v36 = vshll.u32 %v12604_v18, 16  ;;  %v2032_v14 = vsel %vm15692_vm10, %v1661_v22, %v2031_v26  ;;  %v2035_v13 = vld [vmem:[#allocation2 + $0x170] sm:$0x1]  ;;  %v2651_v20 = vshrl.u32 %v2105_v60, 16 }
 0x219   :  { %v1644_v62 = vor.u32 %v1642_v57, %v1641_v37  ;;  %v1645_v52 = vrot.slane %v1641_v37, 4  ;;  %v2644_v2 = vor.u32 %v2643_v47, %v2640_v63  ;;  %2033 = vst [vmem:[#allocation2 + $0x168] sm:$0xf] %v2032_v14  ;;  %v1669_v61 = vor.u32 %v1667_v7, %v1666_v33  ;;  %v2028_v53 = vld [vmem:[#allocation2 + $0x164] sm:$0x1] }
 0x21a   :  { %v1671_v44 = vrot.slane %v1666_v33, 4  ;;  %v1649_v25 = vrot.slane %v1647_v51, 7  ;;  %v2657_v54 = vshll.u32 %v2165_v12, 16  ;;  %v2653_v1 = vrot.slane %v2651_v20, 4  ;;  %v908_v60 = vld [vmem:[#allocation2 + $0x174] sm:$0x1] }
 0x21b   :  { %v2025_v38 = vsel %vm15692_vm10, %v1644_v62, %v2024_v32  ;;  %v2645_v41 = vrot.slane %v2644_v2, 4  ;;  %v1670_v8 = vsel %vm15699_vm11, %v1662_v30, %v1669_v61  ;;  %v2662_v49 = vshrl.u32 %v2106_v4, 16  ;;  %v1021_v63 = vld [vmem:[#allocation2 + $0x188] sm:$0x1] }
 0x21c   :  { %2026 = vst [vmem:[#allocation2 + $0x15c] sm:$0xf] %v2025_v38  ;;  %v2036_v23 = vsel %vm15588_vm2, %v1671_v44, %v2035_v13  ;;  %v1652_v50 = vor.u32 %v1650_v36, %v1649_v25  ;;  %v1654_v21 = vrot.slane %v1649_v25, 4  ;;  %2034 = vst [vmem:[#allocation2 + $0x16c] sm:$0xf] %v1670_v8  ;;  %v2659_v9 = vrot.slane %v2657_v54, 5 }
 0x21d   :  { %2037 = vst [vmem:[#allocation2 + $0x170] sm:$0x1] %v2036_v23  ;;  %v2650_v16 = vsel %vm15637_vm7, %v2645_v41, %v2649_v59  ;;  %v2665_v29 = vshll.u32 %v2106_v4, 16  ;;  %v2671_v10 = vshll.u32 %v2107_v24, 16  ;;  %v2654_v42 = vor.u32 %v2653_v1, %v2649_v59  ;;  %v2108_v25 = vld [vmem:[#allocation2 + $0x114] sm:$0xf] }
 0x21e   :  { %v1653_v35 = vsel %vm15699_vm11, %v1645_v52, %v1652_v50  ;;  %v2029_v11 = vsel %vm15588_vm2, %v1654_v21, %v2028_v53  ;;  %v2664_v5 = vrot.slane %v2662_v49, 4  ;;  %v2675_v31 = vshrl.u32 %v2107_v24, 16 }
 0x21f   :  { %2027 = vst [vmem:[#allocation2 + $0x160] sm:$0xf] %v1653_v35  ;;  %2030 = vst [vmem:[#allocation2 + $0x164] sm:$0x1] %v2029_v11  ;;  %v2681_v57 = vshll.u32 %v2166_v28, 16  ;;  %v2667_v26 = vrot.slane %v2665_v29, 5  ;;  %v677_v7 = vadd.f32 %v16111_v3, %v15977_v43  ;;  %v669_v12 = vadd.f32 %v16111_v3, %v15983_v19 }
 0x220   :  { %v2673_v27 = vrot.slane %v2671_v10, 5  ;;  %v912_v18 = vsel %vm15588_vm2, 0, %v911_v48  ;;  %v2655_v22 = vrot.slane %v2654_v42, 4  ;;  %v2677_v30 = vrot.slane %v2675_v31, 4  ;;  %v1018_v43 = vld [vmem:[#allocation2 + $0x17c] sm:$0x1] }
 0x221   :  { %v2683_v37 = vrot.slane %v2681_v57, 5  ;;  %913 = vst [vmem:[#allocation2 + $0x180] sm:$0x1] %v912_v18  ;;  %v2668_v47 = vor.u32 %v2667_v26, %v2664_v5  ;;  %v757_v32 = vmax.f32 %v677_v7, 0.0  ;;  %v909_v33 = vsel %vm15588_vm2, 0, %v908_v60 }
 0x222   :  { %v680_v51 = vadd.f32 %v16111_v3, %v15987_v56  ;;  %v2660_v36 = vsel %vm15637_vm7, %v2655_v22, %v2659_v9  ;;  %v2678_v0 = vor.u32 %v2677_v30, %v2673_v27  ;;  %v755_v14 = vmax.f32 %v669_v12, 0.0  ;;  %910 = vst [vmem:[#allocation2 + $0x174] sm:$0x1] %v909_v33  ;;  %v2167_v35 = vld [vmem:[#allocation2 + $0x11c] sm:$0x1] }
 0x223   :  { %v1022_v62 = vsel %vm15597_vm4, 0, %v1021_v63  ;;  %v12040_v52 = vcombine.low %v2650_v16, %v2660_v36  ;;  %v2669_v19 = vrot.slane %v2668_v47, 4  ;;  %v12609_v13 = vpack.c.bf16 %v757_v32, %v757_v32  ;;  %v14959_v50 = vld [vmem:[#allocation2 + $0x168] sm:$0xff]   ;;  %v2110_v12 = vld [vmem:[#allocation2 + $0x120] sm:$0xf] }
 0x224   :  { %v758_v2 = vmax.f32 %v680_v51, 0.0  ;;  %1023 = vst [vmem:[#allocation2 + $0x188] sm:$0x1] %v1022_v62  ;;  %v2679_v4 = vrot.slane %v2678_v0, 4  ;;  %v12607_v61 = vpack.c.bf16 %v755_v14, %v755_v14  ;;  %v672_v56 = vadd.f32 %v16111_v3, %v15991_v58  ;;  %v2109_v58 = vld [vmem:[#allocation2 + $0x118] sm:$0xf] }
 0x225   :  { %v1019_v44 = vsel %vm15597_vm4, 0, %v1018_v43  ;;  %13602 = vmatmul.mubr.bf16.gmra.mrb[100].mxu0 %v12040_v52  ;;  %v2674_v59 = vsel %vm15637_vm7, %v2669_v19, %v2673_v27  ;;  %v1690_v24 = vshrl.u32 %v12609_v13, 16  ;;  %v1693_v38 = vshll.u32 %v12609_v13, 16  ;;  %v2111_v43 = vld [vmem:[#allocation2 + $0x124] sm:$0xf] }
 0x226   :  { %v12610_v53 = vpack.c.bf16 %v758_v2, %v758_v2  ;;  %1020 = vst [vmem:[#allocation2 + $0x17c] sm:$0x1] %v1019_v44  ;;  %v14956_v41 = vld [vmem:[#allocation2 + $0x15c] sm:$0xff]   ;;  %v2684_v20 = vsel %vm15637_vm7, %v2679_v4, %v2683_v37  ;;  %v1673_v54 = vshrl.u32 %v12607_v61, 16  ;;  %v1676_v8 = vshll.u32 %v12607_v61, 16 }
 0x227   :  { %v756_v23 = vmax.f32 %v672_v56, 0.0  ;;  %v12041_v21 = vcombine.low %v2674_v59, %v2684_v20  ;;  %v1692_v28 = vrot.slane %v1690_v24, 7  ;;  %13857 = vmatprep.mubr.bf16.mxu1 %v14956_v41  ;;  %v2686_v11 = vshrl.u32 %v2108_v25, 16  ;;  %v917_v61 = vld [vmem:[#allocation2 + $0x198] sm:$0x1] }
 0x228   :  { %v1698_v16 = vshrl.u32 %v12610_v53, 16  ;;  %v1701_v1 = vshll.u32 %v12610_v53, 16  ;;  %v2045_v9 = vld [vmem:[#allocation2 + $0x180] sm:$0xf]  ;;  %v1675_v49 = vrot.slane %v1673_v54, 7  ;;  %v2689_v29 = vshll.u32 %v2108_v25, 16  ;;  %13858 = vmatmul.mubr.bf16.gmra.mrb[20].mxu1 %v14959_v50 }
 0x229   :  { %v12608_v48 = vpack.c.bf16 %v756_v23, %v756_v23  ;;  %13605 = vmatprep.mubr.bf16.mxu0 %v12041_v21  ;;  %v1695_v10 = vor.u32 %v1693_v38, %v1692_v28  ;;  %v1696_v42 = vrot.slane %v1692_v28, 4  ;;  %v2038_v5 = vld [vmem:[#allocation2 + $0x174] sm:$0xf]  ;;  %v2695_v57 = vshll.u32 %v2109_v58, 16  ;;  %v2168_v25 = vld [vmem:[#allocation2 + $0x128] sm:$0x1] }
 0x22a   :  { %v1700_v31 = vrot.slane %v1698_v16, 7  ;;  %v1678_v60 = vor.u32 %v1676_v8, %v1675_v49  ;;  %v1679_v26 = vrot.slane %v1675_v49, 4  ;;  %v2688_v37 = vrot.slane %v2686_v11, 4  ;;  %v914_v50 = vld [vmem:[#allocation2 + $0x18c] sm:$0x1] }
 0x22b   :  { %v2049_v27 = vld [vmem:[#allocation2 + $0x188] sm:$0x1]  ;;  %v1681_v7 = vshrl.u32 %v12608_v48, 16  ;;  %v1684_v18 = vshll.u32 %v12608_v48, 16  ;;  %v2046_v63 = vsel %vm15692_vm10, %v1695_v10, %v2045_v9  ;;  %v2691_v33 = vrot.slane %v2689_v29, 5 }
 0x22c   :  { %v1703_v22 = vor.u32 %v1701_v1, %v1700_v31  ;;  %v1705_v30 = vrot.slane %v1700_v31, 4  ;;  %2047 = vst [vmem:[#allocation2 + $0x180] sm:$0xf] %v2046_v63  ;;  %v2039_v47 = vsel %vm15692_vm10, %v1678_v60, %v2038_v5  ;;  %v2697_v51 = vrot.slane %v2695_v57, 5  ;;  %v1027_v11 = vld [vmem:[#allocation2 + $0x1a0] sm:$0x1] }
 0x22d   :  { %v1683_v32 = vrot.slane %v1681_v7, 7  ;;  %2040 = vst [vmem:[#allocation2 + $0x174] sm:$0xf] %v2039_v47  ;;  %v2042_v14 = vld [vmem:[#allocation2 + $0x17c] sm:$0x1]  ;;  %v2699_v62 = vshrl.u32 %v2109_v58, 16  ;;  %v2692_v2 = vor.u32 %v2691_v33, %v2688_v37  ;;  %v693_v16 = vadd.f32 %v16111_v3, %v16005_v46 }
 0x22e   :  { %v1704_v36 = vsel %vm15699_vm11, %v1696_v42, %v1703_v22  ;;  %v2050_v0 = vsel %vm15588_vm2, %v1705_v30, %v2049_v27  ;;  %v2705_v52 = vshll.u32 %v2167_v35, 16  ;;  %v2710_v4 = vshrl.u32 %v2110_v12, 16  ;;  %v2112_v37 = vld [vmem:[#allocation2 + $0x12c] sm:$0xf] }
 0x22f   :  { %2048 = vst [vmem:[#allocation2 + $0x184] sm:$0xf] %v1704_v36  ;;  %2051 = vst [vmem:[#allocation2 + $0x188] sm:$0x1] %v2050_v0  ;;  %v1686_v19 = vor.u32 %v1684_v18, %v1683_v32  ;;  %v1688_v13 = vrot.slane %v1683_v32, 4  ;;  %v2701_v56 = vrot.slane %v2699_v62, 4  ;;  %v685_v35 = vadd.f32 %v16111_v3, %v16015_v15 }
 0x230   :  { %v2707_v44 = vrot.slane %v2705_v52, 5  ;;  %v2713_v59 = vshll.u32 %v2110_v12, 16  ;;  %v2719_v24 = vshll.u32 %v2111_v43, 16  ;;  %v2693_v41 = vrot.slane %v2692_v2, 4  ;;  %v2113_v62 = vld [vmem:[#allocation2 + $0x130] sm:$0xf] }
 0x231   :  { %v1687_v38 = vsel %vm15699_vm11, %v1679_v26, %v1686_v19  ;;  %v2043_v53 = vsel %vm15588_vm2, %v1688_v13, %v2042_v14  ;;  %v2712_v20 = vrot.slane %v2710_v4, 4  ;;  %v2702_v54 = vor.u32 %v2701_v56, %v2697_v51  ;;  %v1024_v26 = vld [vmem:[#allocation2 + $0x194] sm:$0x1] }
 0x232   :  { %2041 = vst [vmem:[#allocation2 + $0x178] sm:$0xf] %v1687_v38  ;;  %2044 = vst [vmem:[#allocation2 + $0x17c] sm:$0x1] %v2043_v53  ;;  %v2715_v8 = vrot.slane %v2713_v59, 5  ;;  %v2721_v23 = vrot.slane %v2719_v24, 5  ;;  %v2698_v21 = vsel %vm15637_vm7, %v2693_v41, %v2697_v51  ;;  %v696_v5 = vadd.f32 %v16111_v3, %v16019_v17 }
 0x233   :  { %v2723_v58 = vshrl.u32 %v2111_v43, 16  ;;  %v2729_v28 = vshll.u32 %v2168_v25, 16  ;;  %v918_v1 = vsel %vm15588_vm2, 0, %v917_v61  ;;  %v2703_v9 = vrot.slane %v2702_v54, 4 }
 0x234   :  { %v2716_v49 = vor.u32 %v2715_v8, %v2712_v20  ;;  %919 = vst [vmem:[#allocation2 + $0x198] sm:$0x1] %v918_v1  ;;  %v761_v10 = vmax.f32 %v693_v16, 0.0  ;;  %v915_v42 = vsel %vm15588_vm2, 0, %v914_v50  ;;  %v759_v60 = vmax.f32 %v685_v35, 0.0 }
 0x235   :  { %v2725_v48 = vrot.slane %v2723_v58, 4  ;;  %v2731_v29 = vrot.slane %v2729_v28, 5  ;;  %v2708_v46 = vsel %vm15637_vm7, %v2703_v9, %v2707_v44  ;;  %916 = vst [vmem:[#allocation2 + $0x18c] sm:$0x1] %v915_v42  ;;  %v762_v15 = vmax.f32 %v696_v5, 0.0 }
 0x236   :  { %v2717_v31 = vrot.slane %v2716_v49, 4  ;;  %v12042_v27 = vcombine.low %v2698_v21, %v2708_v46  ;;  %v12613_v7 = vpack.c.bf16 %v761_v10, %v761_v10  ;;  %v1028_v18 = vsel %vm15597_vm4, 0, %v1027_v11  ;;  %v14964_v52 = vld [vmem:[#allocation2 + $0x180] sm:$0xff]   ;;  %v2114_v1 = vld [vmem:[#allocation2 + $0x138] sm:$0xf] }
 0x237   :  { %v2726_v57 = vor.u32 %v2725_v48, %v2721_v23  ;;  %v12611_v30 = vpack.c.bf16 %v759_v60, %v759_v60  ;;  %1029 = vst [vmem:[#allocation2 + $0x1a0] sm:$0x1] %v1028_v18  ;;  %v688_v17 = vadd.f32 %v16111_v3, %v16023_v40  ;;  %v12614_v32 = vpack.c.bf16 %v762_v15, %v762_v15  ;;  %v2115_v11 = vld [vmem:[#allocation2 + $0x13c] sm:$0xf]  ;;  %v2170_v60 = vld [vmem:[#allocation2 + $0x140] sm:$0x1] }
 0x238   :  { %v2722_v63 = vsel %vm15637_vm7, %v2717_v31, %v2721_v23  ;;  %13606 = vmatmul.mubr.bf16.gmra.mrb[104].mxu0 %v12042_v27  ;;  %v1724_v12 = vshrl.u32 %v12613_v7, 16  ;;  %v1727_v47 = vshll.u32 %v12613_v7, 16  ;;  %v1025_v33 = vsel %vm15597_vm4, 0, %v1024_v26  ;;  %v2169_v23 = vld [vmem:[#allocation2 + $0x134] sm:$0x1] }
 0x239   :  { %v2727_v22 = vrot.slane %v2726_v57, 4  ;;  %v14961_v51 = vld [vmem:[#allocation2 + $0x174] sm:$0xff]   ;;  %v1707_v36 = vshrl.u32 %v12611_v30, 16  ;;  %v1710_v0 = vshll.u32 %v12611_v30, 16  ;;  %v760_v14 = vmax.f32 %v688_v17, 0.0 }
 0x23a   :  { %1026 = vst [vmem:[#allocation2 + $0x194] sm:$0x1] %v1025_v33  ;;  %v1726_v40 = vrot.slane %v1724_v12, 7  ;;  %v1732_v3 = vshrl.u32 %v12614_v32, 16  ;;  %v1735_v13 = vshll.u32 %v12614_v32, 16  ;;  %13861 = vmatprep.mubr.bf16.mxu1 %v14961_v51  ;;  %v2734_v56 = vshrl.u32 %v2112_v37, 16 }
 0x23b   :  { %v2732_v43 = vsel %vm15637_vm7, %v2727_v22, %v2731_v29  ;;  %v2059_v2 = vld [vmem:[#allocation2 + $0x198] sm:$0xf]  ;;  %v1709_v4 = vrot.slane %v1707_v36, 7  ;;  %v12612_v61 = vpack.c.bf16 %v760_v14, %v760_v14  ;;  %v2737_v44 = vshll.u32 %v2112_v37, 16  ;;  %13862 = vmatmul.mubr.bf16.gmra.mrb[24].mxu1 %v14964_v52  ;;  %v2117_v12 = vld [vmem:[#allocation2 + $0x148] sm:$0xf] }
 0x23c   :  { %v12043_v19 = vcombine.low %v2722_v63, %v2732_v43  ;;  %v1729_v25 = vor.u32 %v1727_v47, %v1726_v40  ;;  %v1730_v59 = vrot.slane %v1726_v40, 4  ;;  %v2052_v24 = vld [vmem:[#allocation2 + $0x18c] sm:$0xf]  ;;  %v1734_v38 = vrot.slane %v1732_v3, 7  ;;  %v2116_v63 = vld [vmem:[#allocation2 + $0x144] sm:$0xf] }
 0x23d   :  { %v2743_v53 = vshll.u32 %v2113_v62, 16  ;;  %v1712_v41 = vor.u32 %v1710_v0, %v1709_v4  ;;  %v1713_v20 = vrot.slane %v1709_v4, 4  ;;  %v1715_v54 = vshrl.u32 %v12612_v61, 16  ;;  %v2171_v0 = vld [vmem:[#allocation2 + $0x14c] sm:$0x1] }
 0x23e   :  { %13609 = vmatprep.mubr.bf16.mxu0 %v12043_v19  ;;  %v1718_v8 = vshll.u32 %v12612_v61, 16  ;;  %v2060_v58 = vsel %vm15692_vm10, %v1729_v25, %v2059_v2  ;;  %v1737_v50 = vor.u32 %v1735_v13, %v1734_v38  ;;  %v1739_v21 = vrot.slane %v1734_v38, 4  ;;  %v2063_v28 = vld [vmem:[#allocation2 + $0x1a0] sm:$0x1] }
 0x23f   :  { %v2736_v16 = vrot.slane %v2734_v56, 4  ;;  %2061 = vst [vmem:[#allocation2 + $0x198] sm:$0xf] %v2060_v58  ;;  %v2053_v9 = vsel %vm15692_vm10, %v1712_v41, %v2052_v24  ;;  %v1717_v49 = vrot.slane %v1715_v54, 7  ;;  %v2739_v48 = vrot.slane %v2737_v44, 5 }
 0x240   :  { %v2745_v35 = vrot.slane %v2743_v53, 5  ;;  %2054 = vst [vmem:[#allocation2 + $0x18c] sm:$0xf] %v2053_v9  ;;  %v1738_v29 = vsel %vm15699_vm11, %v1730_v59, %v1737_v50  ;;  %v2064_v10 = vsel %vm15588_vm2, %v1739_v21, %v2063_v28  ;;  %v2747_v5 = vshrl.u32 %v2113_v62, 16  ;;  %v2118_v62 = vld [vmem:[#allocation2 + $0x150] sm:$0xf] }
 0x241   :  { %v2056_v42 = vld [vmem:[#allocation2 + $0x194] sm:$0x1]  ;;  %v2753_v46 = vshll.u32 %v2169_v23, 16  ;;  %2062 = vst [vmem:[#allocation2 + $0x19c] sm:$0xf] %v1738_v29  ;;  %v1720_v31 = vor.u32 %v1718_v8, %v1717_v49  ;;  %v1722_v57 = vrot.slane %v1717_v49, 4  ;;  %v2740_v55 = vor.u32 %v2739_v48, %v2736_v16 }
 0x242   :  { %2065 = vst [vmem:[#allocation2 + $0x1a0] sm:$0x1] %v2064_v10  ;;  %v2758_v26 = vshrl.u32 %v2114_v1, 16  ;;  %v2749_v27 = vrot.slane %v2747_v5, 4  ;;  %v2761_v15 = vshll.u32 %v2114_v1, 16  ;;  %v2767_v18 = vshll.u32 %v2115_v11, 16 }
 0x243   :  { %v2755_v7 = vrot.slane %v2753_v46, 5  ;;  %v1721_v22 = vsel %vm15699_vm11, %v1713_v20, %v1720_v31  ;;  %v2057_v30 = vsel %vm15588_vm2, %v1722_v57, %v2056_v42  ;;  %v2741_v17 = vrot.slane %v2740_v55, 4  ;;  %v2119_v24 = vld [vmem:[#allocation2 + $0x154] sm:$0xf]  ;;  %v2172_v54 = vld [vmem:[#allocation2 + $0x158] sm:$0x1] }
 0x244   :  { %v2760_v37 = vrot.slane %v2758_v26, 4  ;;  %2055 = vst [vmem:[#allocation2 + $0x190] sm:$0xf] %v1721_v22  ;;  %2058 = vst [vmem:[#allocation2 + $0x194] sm:$0x1] %v2057_v30  ;;  %v2750_v47 = vor.u32 %v2749_v27, %v2745_v35  ;;  %v2763_v32 = vrot.slane %v2761_v15, 5 }
 0x245   :  { %v2769_v33 = vrot.slane %v2767_v18, 5  ;;  %v2771_v51 = vshrl.u32 %v2115_v11, 16  ;;  %v2746_v43 = vsel %vm15637_vm7, %v2741_v17, %v2745_v35  ;;  %v2777_v36 = vshll.u32 %v2170_v60, 16  ;;  %v2120_v21 = vld [vmem:[#allocation2 + $0x15c] sm:$0xf] }
 0x246   :  { %v2782_v14 = vshrl.u32 %v2116_v63, 16  ;;  %v2785_v6 = vshll.u32 %v2116_v63, 16  ;;  %v2751_v52 = vrot.slane %v2750_v47, 4  ;;  %v2764_v19 = vor.u32 %v2763_v32, %v2760_v37  ;;  %v2121_v10 = vld [vmem:[#allocation2 + $0x160] sm:$0xf] }
 0x247   :  { %v2773_v40 = vrot.slane %v2771_v51, 4  ;;  %v2791_v3 = vshll.u32 %v2117_v12, 16  ;;  %v2779_v13 = vrot.slane %v2777_v36, 5  ;;  %v2795_v61 = vshrl.u32 %v2117_v12, 16  ;;  %v2173_v18 = vld [vmem:[#allocation2 + $0x164] sm:$0x1] }
 0x248   :  { %v2784_v2 = vrot.slane %v2782_v14, 4  ;;  %v2787_v4 = vrot.slane %v2785_v6, 5  ;;  %v2756_v56 = vsel %vm15637_vm7, %v2751_v52, %v2755_v7  ;;  %v2765_v44 = vrot.slane %v2764_v19, 4  ;;  %v14969_v42 = vld [vmem:[#allocation2 + $0x198] sm:$0xff]   ;;  %v2122_v7 = vld [vmem:[#allocation2 + $0x168] sm:$0xf] }
 0x249   :  { %v2774_v25 = vor.u32 %v2773_v40, %v2769_v33  ;;  %v2793_v59 = vrot.slane %v2791_v3, 5  ;;  %v12044_v38 = vcombine.low %v2746_v43, %v2756_v56  ;;  %v2797_v41 = vrot.slane %v2795_v61, 4  ;;  %v2123_v32 = vld [vmem:[#allocation2 + $0x16c] sm:$0xf]  ;;  %v2174_v40 = vld [vmem:[#allocation2 + $0x170] sm:$0x1] }
 0x24a   :  { %v2788_v53 = vor.u32 %v2787_v4, %v2784_v2  ;;  %v2801_v20 = vshll.u32 %v2171_v0, 16  ;;  %v2770_v8 = vsel %vm15637_vm7, %v2765_v44, %v2769_v33  ;;  %v2806_v58 = vshrl.u32 %v2118_v62, 16  ;;  %v2124_v2 = vld [vmem:[#allocation2 + $0x174] sm:$0xf] }
 0x24b   :  { %v2775_v23 = vrot.slane %v2774_v25, 4  ;;  %v2809_v50 = vshll.u32 %v2118_v62, 16  ;;  %13610 = vmatmul.mubr.bf16.gmra.mrb[108].mxu0 %v12044_v38  ;;  %v2798_v16 = vor.u32 %v2797_v41, %v2793_v59  ;;  %v2815_v9 = vshll.u32 %v2119_v24, 16  ;;  %v14966_v49 = vld [vmem:[#allocation2 + $0x18c] sm:$0xff]   ;;  %v2126_v41 = vld [vmem:[#allocation2 + $0x180] sm:$0xf] }
 0x24c   :  { %v2789_v28 = vrot.slane %v2788_v53, 4  ;;  %v2803_v1 = vrot.slane %v2801_v20, 5  ;;  %v2808_v35 = vrot.slane %v2806_v58, 4  ;;  %v2819_v29 = vshrl.u32 %v2119_v24, 16  ;;  %13865 = vmatprep.mubr.bf16.mxu1 %v14966_v49  ;;  %v2125_v53 = vld [vmem:[#allocation2 + $0x178] sm:$0xf] }
 0x24d   :  { %v2780_v48 = vsel %vm15637_vm7, %v2775_v23, %v2779_v13  ;;  %v2811_v11 = vrot.slane %v2809_v50, 5  ;;  %v2799_v31 = vrot.slane %v2798_v16, 4  ;;  %v2817_v57 = vrot.slane %v2815_v9, 5  ;;  %13866 = vmatmul.mubr.bf16.gmra.mrb[28].mxu1 %v14969_v42  ;;  %v2175_v23 = vld [vmem:[#allocation2 + $0x17c] sm:$0x1] }
 0x24e   :  { %v12045_v5 = vcombine.low %v2770_v8, %v2780_v48  ;;  %v2794_v46 = vsel %vm15637_vm7, %v2789_v28, %v2793_v59  ;;  %v2821_v60 = vrot.slane %v2819_v29, 4  ;;  %v2825_v26 = vshll.u32 %v2172_v54, 16  ;;  %v2127_v42 = vld [vmem:[#allocation2 + $0x184] sm:$0xf] }
 0x24f   :  { %v2812_v55 = vor.u32 %v2811_v11, %v2808_v35  ;;  %v2830_v27 = vshrl.u32 %v2120_v21, 16  ;;  %v2804_v15 = vsel %vm15637_vm7, %v2799_v31, %v2803_v1  ;;  %v2833_v63 = vshll.u32 %v2120_v21, 16 }
 0x250   :  { %13613 = vmatprep.mubr.bf16.mxu0 %v12045_v5  ;;  %v2839_v22 = vshll.u32 %v2121_v10, 16  ;;  %v2843_v30 = vshrl.u32 %v2121_v10, 16  ;;  %v12046_v17 = vcombine.low %v2794_v46, %v2804_v15  ;;  %v2822_v12 = vor.u32 %v2821_v60, %v2817_v57  ;;  %v5503_v5 = vld [vmem:[#allocation2 + $0xc] sm:$0xf]  ;;  %v2176_v15 = vld [vmem:[#allocation2 + $0x188] sm:$0x1] }
 0x251   :  { %v2813_v37 = vrot.slane %v2812_v55, 4  ;;  %v2827_v47 = vrot.slane %v2825_v26, 5  ;;  %v2832_v33 = vrot.slane %v2830_v27, 4  ;;  %v2835_v51 = vrot.slane %v2833_v63, 5 }
 0x252   :  { %v2841_v43 = vrot.slane %v2839_v22, 5  ;;  %v2845_v36 = vrot.slane %v2843_v30, 4  ;;  %v2823_v14 = vrot.slane %v2822_v12, 4  ;;  %v2849_v6 = vshll.u32 %v2173_v18, 16 }
 0x253   :  { %v2818_v0 = vsel %vm15637_vm7, %v2813_v37, %v2817_v57  ;;  %v2854_v62 = vshrl.u32 %v2122_v7, 16  ;;  %13614 = vmatmul.mubr.bf16.gmra.mrb[112].mxu0 %v12046_v17  ;;  %v2836_v52 = vor.u32 %v2835_v51, %v2832_v33  ;;  %v2857_v3 = vshll.u32 %v2122_v7, 16  ;;  %v5504_v17 = vld [vmem:[#allocation2 + $0x10] sm:$0xf]  ;;  %v5505_v33 = vld [vmem:[#allocation2 + $0x14] sm:$0x1] }
 0x254   :  { %v2846_v19 = vor.u32 %v2845_v36, %v2841_v43  ;;  %v2863_v13 = vshll.u32 %v2123_v32, 16  ;;  %v2828_v4 = vsel %vm15637_vm7, %v2823_v14, %v2827_v47  ;;  %v2851_v61 = vrot.slane %v2849_v6, 5 }
 0x255   :  { %v2856_v56 = vrot.slane %v2854_v62, 4  ;;  %v2867_v44 = vshrl.u32 %v2123_v32, 16  ;;  %v12047_v25 = vcombine.low %v2818_v0, %v2828_v4  ;;  %v2837_v59 = vrot.slane %v2836_v52, 4 }
 0x256   :  { %v2847_v24 = vrot.slane %v2846_v19, 4  ;;  %v2859_v38 = vrot.slane %v2857_v3, 5  ;;  %v2865_v20 = vrot.slane %v2863_v13, 5  ;;  %v2873_v8 = vshll.u32 %v2174_v40, 16 }
 0x257   :  { %v2869_v54 = vrot.slane %v2867_v44, 4  ;;  %v2878_v58 = vshrl.u32 %v2124_v2, 16  ;;  %13617 = vmatprep.mubr.bf16.mxu0 %v12047_v25  ;;  %v2842_v50 = vsel %vm15637_vm7, %v2837_v59, %v2841_v43  ;;  %v2881_v16 = vshll.u32 %v2124_v2, 16  ;;  %v2128_v2 = vld [vmem:[#allocation2 + $0x18c] sm:$0xf] }
 0x258   :  { %v2852_v21 = vsel %vm15637_vm7, %v2847_v24, %v2851_v61  ;;  %v2860_v28 = vor.u32 %v2859_v38, %v2856_v56  ;;  %v2875_v49 = vrot.slane %v2873_v8, 5  ;;  %v2887_v29 = vshll.u32 %v2125_v53, 16  ;;  %v2129_v25 = vld [vmem:[#allocation2 + $0x190] sm:$0xf] }
 0x259   :  { %v12048_v1 = vcombine.low %v2842_v50, %v2852_v21  ;;  %v2870_v9 = vor.u32 %v2869_v54, %v2865_v20  ;;  %v2880_v48 = vrot.slane %v2878_v58, 4  ;;  %v2883_v11 = vrot.slane %v2881_v16, 5  ;;  %v5506_v58 = vld [vmem:[#allocation2 + $0x18] sm:$0xf] }
 0x25a   :  { %v2861_v35 = vrot.slane %v2860_v28, 4  ;;  %v2891_v10 = vshrl.u32 %v2125_v53, 16  ;;  %v2897_v31 = vshll.u32 %v2175_v23, 16  ;;  %v2902_v57 = vshrl.u32 %v2126_v41, 16 }
 0x25b   :  { %v2871_v46 = vrot.slane %v2870_v9, 4  ;;  %v2905_v55 = vshll.u32 %v2126_v41, 16  ;;  %13618 = vmatmul.mubr.bf16.gmra.mrb[116].mxu0 %v12048_v1  ;;  %v2884_v26 = vor.u32 %v2883_v11, %v2880_v48  ;;  %v2889_v27 = vrot.slane %v2887_v29, 5  ;;  %v2177_v41 = vld [vmem:[#allocation2 + $0x194] sm:$0x1] }
 0x25c   :  { %v2866_v60 = vsel %vm15637_vm7, %v2861_v35, %v2865_v20  ;;  %v2893_v7 = vrot.slane %v2891_v10, 4  ;;  %v2899_v63 = vrot.slane %v2897_v31, 5  ;;  %v2904_v22 = vrot.slane %v2902_v57, 4  ;;  %v5507_v35 = vld [vmem:[#allocation2 + $0x1c] sm:$0xf] }
 0x25d   :  { %v2876_v18 = vsel %vm15637_vm7, %v2871_v46, %v2875_v49  ;;  %v2907_v30 = vrot.slane %v2905_v55, 5  ;;  %v2885_v12 = vrot.slane %v2884_v26, 4  ;;  %v2911_v32 = vshll.u32 %v2127_v42, 16  ;;  %v16327_v46 = vld [vmem:[#allocation8 + $0x80] sm:$0xff]   ;;  %v5509_v26 = vld [vmem:[#allocation2 + $0x24] sm:$0xf] }
 0x25e   :  { %v12049_v37 = vcombine.low %v2866_v60, %v2876_v18  ;;  %v2894_v47 = vor.u32 %v2893_v7, %v2889_v27  ;;  %v2915_v43 = vshrl.u32 %v2127_v42, 16  ;;  %v2921_v36 = vshll.u32 %v2176_v15, 16  ;;  %13709 = vmatprep.subr.bf16.mxu0 %v16327_v46 }
 0x25f   :  { %v2908_v51 = vor.u32 %v2907_v30, %v2904_v22  ;;  %v5600_v0 = vshrl.u32 %v5503_v5, 16  ;;  %v2890_v14 = vsel %vm15637_vm7, %v2885_v12, %v2889_v27  ;;  %v2913_v62 = vrot.slane %v2911_v32, 5 }
 0x260   :  { %13621 = vmatprep.mubr.bf16.mxu0 %v12049_v37  ;;  %v2895_v6 = vrot.slane %v2894_v47, 4  ;;  %v5603_v52 = vshll.u32 %v5503_v5, 16  ;;  %v2917_v40 = vrot.slane %v2915_v43, 4  ;;  %v2923_v3 = vrot.slane %v2921_v36, 5  ;;  %v5508_v5 = vld [vmem:[#allocation2 + $0x20] sm:$0x1] }
 0x261   :  { %v2909_v19 = vrot.slane %v2908_v51, 4  ;;  %v5602_v13 = vrot.slane %v5600_v0, 4  ;;  %v5609_v56 = vshll.u32 %v5504_v17, 16  ;;  %v5613_v44 = vshrl.u32 %v5504_v17, 16 }
 0x262   :  { %v2900_v4 = vsel %vm15637_vm7, %v2895_v6, %v2899_v63  ;;  %v5605_v61 = vrot.slane %v5603_v52, 5  ;;  %v2918_v38 = vor.u32 %v2917_v40, %v2913_v62  ;;  %v5619_v53 = vshll.u32 %v5505_v33, 16  ;;  %v5510_v33 = vld [vmem:[#allocation2 + $0x28] sm:$0xf] }
 0x263   :  { %v12050_v59 = vcombine.low %v2890_v14, %v2900_v4  ;;  %v2914_v24 = vsel %vm15637_vm7, %v2909_v19, %v2913_v62  ;;  %v5611_v54 = vrot.slane %v5609_v56, 5  ;;  %v5615_v8 = vrot.slane %v5613_v44, 4  ;;  %v5511_v62 = vld [vmem:[#allocation2 + $0x2c] sm:$0x1] }
 0x264   :  { %v5606_v20 = vor.u32 %v5605_v61, %v5602_v13  ;;  %v2926_v23 = vshrl.u32 %v2128_v2, 16  ;;  %v2919_v50 = vrot.slane %v2918_v38, 4  ;;  %v5621_v21 = vrot.slane %v5619_v53, 5 }
 0x265   :  { %13622 = vmatmul.mubr.bf16.gmra.mrb[120].mxu0 %v12050_v59  ;;  %v2929_v28 = vshll.u32 %v2128_v2, 16  ;;  %v2935_v16 = vshll.u32 %v2129_v25, 16  ;;  %v5616_v9 = vor.u32 %v5615_v8, %v5611_v54  ;;  %v2939_v48 = vshrl.u32 %v2129_v25, 16  ;;  %v5512_v25 = vld [vmem:[#allocation2 + $0x30] sm:$0xf] }
 0x266   :  { %v5607_v1 = vrot.slane %v5606_v20, 4  ;;  %v2928_v49 = vrot.slane %v2926_v23, 4  ;;  %v2924_v11 = vsel %vm15637_vm7, %v2919_v50, %v2923_v3  ;;  %v2945_v42 = vshll.u32 %v2177_v41, 16  ;;  %v5513_v41 = vld [vmem:[#allocation2 + $0x34] sm:$0xf] }
 0x267   :  { %v2931_v29 = vrot.slane %v2929_v28, 5  ;;  %v2937_v10 = vrot.slane %v2935_v16, 5  ;;  %v12051_v31 = vcombine.low %v2914_v24, %v2924_v11  ;;  %v5617_v55 = vrot.slane %v5616_v9, 4  ;;  %v15103_v8 = vld [vmem:[#allocation2] sm:$0xf] }
 0x268   :  { %v5612_v57 = vsel %vm15637_vm7, %v5607_v1, %v5611_v54  ;;  %v2941_v60 = vrot.slane %v2939_v48, 4  ;;  %v2947_v7 = vrot.slane %v2945_v42, 5  ;;  %v5624_v15 = vshrl.u32 %v5506_v58, 16  ;;  %v15104_v23 = vld [vmem:[#allocation2 + $0x4] sm:$0xf] }
 0x269   :  { %v2932_v27 = vor.u32 %v2931_v29, %v2928_v49  ;;  %v5627_v18 = vshll.u32 %v5506_v58, 16  ;;  %13625 = vmatprep.mubr.bf16.mxu0 %v12051_v31  ;;  %v5622_v63 = vsel %vm15637_vm7, %v5617_v55, %v5621_v21  ;;  %v5633_v30 = vshll.u32 %v5507_v35, 16  ;;  %v15105_v50 = vld [vmem:[#allocation2 + $0xc] sm:$0xf]  ;;  %v15106_v21 = vld [vmem:[#allocation2 + $0x10] sm:$0xf] }
 0x26a   :  { %v2942_v22 = vor.u32 %v2941_v60, %v2937_v10  ;;  %v5637_v17 = vshrl.u32 %v5507_v35, 16  ;;  %v12213_v37 = vcombine.low %v5612_v57, %v5622_v63  ;;  %v5626_v47 = vrot.slane %v5624_v15, 4  ;;  %v5514_v16 = vld [vmem:[#allocation2 + $0x38] sm:$0x1]  ;;  %v5515_v42 = vld [vmem:[#allocation2 + $0x3c] sm:$0xf] }
 0x26b   :  { %v2933_v12 = vrot.slane %v2932_v27, 4  ;;  %v5629_v32 = vrot.slane %v5627_v18, 5  ;;  %v5635_v43 = vrot.slane %v5633_v30, 5  ;;  %v5643_v0 = vshll.u32 %v5508_v5, 16  ;;  %v14977_v5 = vld [vmem:[#allocation8 + $0x148] sm:$0xff]  }
 0x26c   :  { %v2943_v51 = vrot.slane %v2942_v22, 4  ;;  %v5639_v36 = vrot.slane %v5637_v17, 4  ;;  %13885 = vmatprep.mubr.bf16.mxu1 %v12213_v37  ;;  %v5648_v52 = vshrl.u32 %v5509_v26, 16  ;;  %v5651_v19 = vshll.u32 %v5509_v26, 16  ;;  %v5516_v26 = vld [vmem:[#allocation2 + $0x40] sm:$0xf] }
 0x26d   :  { %v2938_v14 = vsel %vm15637_vm7, %v2933_v12, %v2937_v10  ;;  %v5630_v6 = vor.u32 %v5629_v32, %v5626_v47  ;;  %v5645_v13 = vrot.slane %v5643_v0, 5  ;;  %v5657_v2 = vshll.u32 %v5510_v33, 16  ;;  %v15107_v18 = vld [vmem:[#allocation2 + $0x18] sm:$0xf]  ;;  %v15108_v63 = vld [vmem:[#allocation2 + $0x1c] sm:$0xf] }
 0x26e   :  { %v2948_v40 = vsel %vm15637_vm7, %v2943_v51, %v2947_v7  ;;  %v5640_v3 = vor.u32 %v5639_v36, %v5635_v43  ;;  %v5650_v56 = vrot.slane %v5648_v52, 4  ;;  %v5653_v44 = vrot.slane %v5651_v19, 5  ;;  %v5517_v30 = vld [vmem:[#allocation2 + $0x44] sm:$0x1]  ;;  %v15109_v17 = vld [vmem:[#allocation8 + $0x140] sm:$0xff]  }
 0x26f   :  { %v12052_v4 = vcombine.low %v2938_v14, %v2948_v40  ;;  %v5631_v61 = vrot.slane %v5630_v6, 4  ;;  %v5659_v24 = vrot.slane %v5657_v2, 5  ;;  %v5661_v38 = vshrl.u32 %v5510_v33, 16  ;;  %v14982_v0 = vld [vmem:[#allocation8 + $0x150] sm:$0xff]   ;;  %v5518_v19 = vld [vmem:[#allocation2 + $0x48] sm:$0xf] }
 0x270   :  { %v5641_v59 = vrot.slane %v5640_v3, 4  ;;  %v5667_v53 = vshll.u32 %v5511_v62, 16  ;;  %v5654_v54 = vor.u32 %v5653_v44, %v5650_v56  ;;  %v12061_v58 = vcombine.low %v15103_v8, %v15104_v23  ;;  %v14987_v23 = vld [vmem:[#allocation8 + $0x158] sm:$0xff]  }
 0x271   :  { %13626 = vmatmul.mubr.bf16.gmra.mrb[124].mxu0 %v12052_v4  ;;  %v5636_v20 = vsel %vm15637_vm7, %v5631_v61, %v5635_v43  ;;  %v12062_v28 = vcombine.low %v15105_v50, %v15106_v21  ;;  %v5663_v9 = vrot.slane %v5661_v38, 4  ;;  %v5672_v48 = vshrl.u32 %v5512_v25, 16  ;;  %v5519_v4 = vld [vmem:[#allocation2 + $0x4c] sm:$0xf]  ;;  %v15008_v61 = vld [vmem:[#allocation8 + $0x88] sm:$0xff]  }
 0x272   :  { %v5646_v1 = vsel %vm15637_vm7, %v5641_v59, %v5645_v13  ;;  %v5669_v49 = vrot.slane %v5667_v53, 5  ;;  %v5655_v11 = vrot.slane %v5654_v54, 4  ;;  %13645 = vmatprep.mubr.bf16.mxu0 %v12061_v58  ;;  %v5675_v29 = vshll.u32 %v5512_v25, 16  ;;  %v15110_v59 = vld [vmem:[#allocation2 + $0x24] sm:$0xf] }
 0x273   :  { %v12214_v35 = vcombine.low %v5636_v20, %v5646_v1  ;;  %v5681_v10 = vshll.u32 %v5513_v41, 16  ;;  %v5664_v31 = vor.u32 %v5663_v9, %v5659_v24  ;;  %v5674_v57 = vrot.slane %v5672_v48, 4  ;;  %v5520_v20 = vld [vmem:[#allocation2 + $0x50] sm:$0x1] }
 0x274   :  { %v5685_v55 = vshrl.u32 %v5513_v41, 16  ;;  %v5691_v60 = vshll.u32 %v5514_v16, 16  ;;  %v5660_v27 = vsel %vm15637_vm7, %v5655_v11, %v5659_v24  ;;  %v5677_v7 = vrot.slane %v5675_v29, 5  ;;  %v15111_v24 = vld [vmem:[#allocation2 + $0x28] sm:$0xf] }
 0x275   :  { %13886 = vmatmul.mubr.bf16.vlgmr.msra.gmra.mrb[32].mxu1 %v12214_v35  ;;  %v5683_v15 = vrot.slane %v5681_v10, 5  ;;  %v12063_v22 = vcombine.low %v15107_v18, %v15108_v63  ;;  %v5665_v37 = vrot.slane %v5664_v31, 4  ;;  %v5696_v32 = vshrl.u32 %v5515_v42, 16  ;;  %v5521_v16 = vld [vmem:[#allocation2 + $0x54] sm:$0xf]  ;;  %v15011_v35 = vld [vmem:[#allocation8 + $0x90] sm:$0xff]  }
 0x276   :  { %13950 = vmatpush3.bf16.msra.mxu1 %v15109_v17  ;;  %v5687_v12 = vrot.slane %v5685_v55, 4  ;;  %v5693_v47 = vrot.slane %v5691_v60, 5  ;;  %v5678_v33 = vor.u32 %v5677_v7, %v5674_v57  ;;  %v5699_v51 = vshll.u32 %v5515_v42, 16  ;;  %v15112_v55 = vld [vmem:[#allocation2 + $0x30] sm:$0xf] }
 0x277   :  { %v5705_v43 = vshll.u32 %v5516_v26, 16  ;;  %v5709_v36 = vshrl.u32 %v5516_v26, 16  ;;  %13951 = vmatprep.subr.bf16.mxu1 %v14977_v5  ;;  %v5670_v14 = vsel %vm15637_vm7, %v5665_v37, %v5669_v49  ;;  %v5698_v62 = vrot.slane %v5696_v32, 4  ;;  %v15113_v60 = vld [vmem:[#allocation2 + $0x34] sm:$0xf]  ;;  %v15013_v32 = vld [vmem:[#allocation8 + $0x98] sm:$0xff]  }
 0x278   :  { %v5688_v6 = vor.u32 %v5687_v12, %v5683_v15  ;;  %v5715_v52 = vshll.u32 %v5517_v30, 16  ;;  %v12215_v40 = vcombine.low %v5660_v27, %v5670_v14  ;;  %v5679_v3 = vrot.slane %v5678_v33, 4  ;;  %v5523_v26 = vld [vmem:[#allocation2 + $0x5c] sm:$0x1]  ;;  %v14992_v7 = vld [vmem:[#allocation8 + $0x160] sm:$0xff]  }
 0x279   :  { %13646 = vmatmul.mubr.bf16.vlgmr.msra.gmra.mrb[64].mxu0 %v12062_v28  ;;  %v5701_v13 = vrot.slane %v5699_v51, 5  ;;  %v5707_v2 = vrot.slane %v5705_v43, 5  ;;  %v5711_v44 = vrot.slane %v5709_v36, 4  ;;  %v12064_v38 = vcombine.low %v15110_v59, %v15111_v24  ;;  %v5524_v30 = vld [vmem:[#allocation2 + $0x60] sm:$0xf] }
 0x27a   :  { %v5689_v56 = vrot.slane %v5688_v6, 4  ;;  %13649 = vmatprep.mubr.bf16.mxu0 %v12063_v22  ;;  %v5717_v25 = vrot.slane %v5715_v52, 5  ;;  %13952 = vmatpush3.bf16.msra.mxu1 %v14977_v5  ;;  %v5684_v53 = vsel %vm15637_vm7, %v5679_v3, %v5683_v15  ;;  %v5720_v54 = vshrl.u32 %v5518_v19, 16  ;;  %v5522_v5 = vld [vmem:[#allocation2 + $0x58] sm:$0xf] }
 0x27b   :  { %13889 = vmatprep.mubr.bf16.mxu1 %v12215_v40  ;;  %v5702_v41 = vor.u32 %v5701_v13, %v5698_v62  ;;  %v5723_v8 = vshll.u32 %v5518_v19, 16  ;;  %13953 = vmatprep.subr.bf16.mxu1 %v14982_v0  ;;  %v5712_v50 = vor.u32 %v5711_v44, %v5707_v2  ;;  %v5729_v21 = vshll.u32 %v5519_v4, 16  ;;  %v15114_v62 = vld [vmem:[#allocation2 + $0x3c] sm:$0xf]  ;;  %v15115_v52 = vld [vmem:[#allocation2 + $0x40] sm:$0xf] }
 0x27c   :  { %v5694_v58 = vsel %vm15637_vm7, %v5689_v56, %v5693_v47  ;;  %v5733_v28 = vshrl.u32 %v5519_v4, 16  ;;  %13710 = vmatpush3.bf16.msra.mxu0 %v16327_v46  ;;  %v5722_v49 = vrot.slane %v5720_v54, 4  ;;  %v5739_v42 = vshll.u32 %v5520_v20, 16  ;;  %v5526_v40 = vld [vmem:[#allocation2 + $0x68] sm:$0x1]  ;;  %v14997_v13 = vld [vmem:[#allocation8 + $0x168] sm:$0xff]  }
 0x27d   :  { %v12216_v1 = vcombine.low %v5684_v53, %v5694_v58  ;;  %v5703_v9 = vrot.slane %v5702_v41, 4  ;;  %v5725_v48 = vrot.slane %v5723_v8, 5  ;;  %13711 = vmatprep.subr.bf16.mxu0 %v15008_v61  ;;  %v5713_v11 = vrot.slane %v5712_v50, 4  ;;  %v5527_v44 = vld [vmem:[#allocation2 + $0x6c] sm:$0xf]  ;;  %v15015_v53 = vld [vmem:[#allocation8 + $0xa0] sm:$0xff]  }
 0x27e   :  { %v5731_v29 = vrot.slane %v5729_v21, 5  ;;  %v5735_v10 = vrot.slane %v5733_v28, 4  ;;  %13954 = vmatpush3.bf16.msra.mxu1 %v14982_v0  ;;  %v12065_v46 = vcombine.low %v15112_v55, %v15113_v60  ;;  %v5744_v27 = vshrl.u32 %v5521_v16, 16  ;;  %v5525_v0 = vld [vmem:[#allocation2 + $0x64] sm:$0xf] }
 0x27f   :  { %13890 = vmatmul.mubr.bf16.gmra.mrb[36].mxu1 %v12216_v1  ;;  %v5708_v31 = vsel %vm15637_vm7, %v5703_v9, %v5707_v2  ;;  %v5726_v57 = vor.u32 %v5725_v48, %v5722_v49  ;;  %13955 = vmatprep.subr.bf16.mxu1 %v14987_v23  ;;  %v5718_v15 = vsel %vm15637_vm7, %v5713_v11, %v5717_v25  ;;  %v5741_v63 = vrot.slane %v5739_v42, 5  ;;  %v15116_v21 = vld [vmem:[#allocation2 + $0x48] sm:$0xf]  ;;  %v15117_v28 = vld [vmem:[#allocation2 + $0x4c] sm:$0xf]  ;;  %v15002_v49 = vld [vmem:[#allocation8 + $0x170] sm:$0xff]  }
 0x280   :  { %v5736_v18 = vor.u32 %v5735_v10, %v5731_v29  ;;  %v5747_v22 = vshll.u32 %v5521_v16, 16  ;;  %13712 = vmatpush3.bf16.msra.mxu0 %v15008_v61  ;;  %v12217_v17 = vcombine.low %v5708_v31, %v5718_v15  ;;  %v5746_v12 = vrot.slane %v5744_v27, 4  ;;  %v5529_v1 = vld [vmem:[#allocation2 + $0x74] sm:$0x1]  ;;  %v5530_v27 = vld [vmem:[#allocation2 + $0x78] sm:$0xf] }
 0x281   :  { %13650 = vmatmul.mubr.bf16.gmra.mrb[68].mxu0 %v12064_v38  ;;  %v5727_v37 = vrot.slane %v5726_v57, 4  ;;  %v5753_v47 = vshll.u32 %v5522_v5, 16  ;;  %13713 = vmatprep.subr.bf16.mxu0 %v15011_v35  ;;  %v5757_v43 = vshrl.u32 %v5522_v5, 16  ;;  %v5763_v36 = vshll.u32 %v5523_v26, 16  ;;  %v15017_v57 = vld [vmem:[#allocation8 + $0xa8] sm:$0xff]  }
 0x282   :  { %v5737_v33 = vrot.slane %v5736_v18, 4  ;;  %13653 = vmatprep.mubr.bf16.mxu0 %v12065_v46  ;;  %v5749_v51 = vrot.slane %v5747_v22, 5  ;;  %13956 = vmatpush3.bf16.msra.mxu1 %v14987_v23  ;;  %v12066_v19 = vcombine.low %v15114_v62, %v15115_v52  ;;  %v5768_v3 = vshrl.u32 %v5524_v30, 16  ;;  %v5528_v23 = vld [vmem:[#allocation2 + $0x70] sm:$0xf] }
 0x283   :  { %13893 = vmatprep.mubr.bf16.mxu1 %v12217_v17  ;;  %v5732_v14 = vsel %vm15637_vm7, %v5727_v37, %v5731_v29  ;;  %v5755_v6 = vrot.slane %v5753_v47, 5  ;;  %13957 = vmatprep.subr.bf16.mxu1 %v14992_v7  ;;  %v5759_v61 = vrot.slane %v5757_v43, 4  ;;  %v5765_v56 = vrot.slane %v5763_v36, 5  ;;  %v5531_v22 = vld [vmem:[#allocation2 + $0x7c] sm:$0xf] }
 0x284   :  { %v5742_v2 = vsel %vm15637_vm7, %v5737_v33, %v5741_v63  ;;  %v5750_v4 = vor.u32 %v5749_v51, %v5746_v12  ;;  %13714 = vmatpush3.bf16.msra.mxu0 %v15011_v35  ;;  %v5770_v59 = vrot.slane %v5768_v3, 4  ;;  %v5771_v24 = vshll.u32 %v5524_v30, 16  ;;  %v15009_v30 = vld [vmem:[#allocation8 + $0x178] sm:$0xff]   ;;  %v15118_v47 = vld [vmem:[#allocation2 + $0x54] sm:$0xf]  ;;  %v15020_v3 = vld [vmem:[#allocation8 + $0xb0] sm:$0xff]  }
 0x285   :  { %v12218_v25 = vcombine.low %v5732_v14, %v5742_v2  ;;  %v5777_v38 = vshll.u32 %v5525_v0, 16  ;;  %13715 = vmatprep.subr.bf16.mxu0 %v15013_v32  ;;  %v5760_v20 = vor.u32 %v5759_v61, %v5755_v6  ;;  %v5781_v54 = vshrl.u32 %v5525_v0, 16  ;;  %v5532_v36 = vld [vmem:[#allocation2 + $0x80] sm:$0x1] }
 0x286   :  { %v5751_v41 = vrot.slane %v5750_v4, 4  ;;  %v5787_v8 = vshll.u32 %v5526_v40, 16  ;;  %13958 = vmatpush3.bf16.msra.mxu1 %v14992_v7  ;;  %v5773_v58 = vrot.slane %v5771_v24, 5  ;;  %v12067_v16 = vcombine.low %v15116_v21, %v15117_v28  ;;  %v5533_v40 = vld [vmem:[#allocation2 + $0x84] sm:$0xf] }
 0x287   :  { %13894 = vmatmul.mubr.bf16.gmra.mrb[40].mxu1 %v12218_v25  ;;  %v5779_v50 = vrot.slane %v5777_v38, 5  ;;  %v5792_v9 = vshrl.u32 %v5527_v44, 16  ;;  %13959 = vmatprep.subr.bf16.mxu1 %v14997_v13  ;;  %v5761_v35 = vrot.slane %v5760_v20, 4  ;;  %v5783_v11 = vrot.slane %v5781_v54, 4  ;;  %v5534_v38 = vld [vmem:[#allocation2 + $0x88] sm:$0xf] }
 0x288   :  { %v5756_v48 = vsel %vm15637_vm7, %v5751_v41, %v5755_v6  ;;  %v5789_v29 = vrot.slane %v5787_v8, 5  ;;  %13716 = vmatpush3.bf16.msra.mxu0 %v15013_v32  ;;  %v5774_v10 = vor.u32 %v5773_v58, %v5770_v59  ;;  %v5795_v5 = vshll.u32 %v5527_v44, 16  ;;  %v15119_v32 = vld [vmem:[#allocation2 + $0x58] sm:$0xf]  ;;  %v15120_v20 = vld [vmem:[#allocation2 + $0x60] sm:$0xf] }
 0x289   :  { %13654 = vmatmul.mubr.bf16.gmra.mrb[72].mxu0 %v12066_v19  ;;  %v5794_v42 = vrot.slane %v5792_v9, 4  ;;  %v5801_v31 = vshll.u32 %v5528_v23, 16  ;;  %13717 = vmatprep.subr.bf16.mxu0 %v15015_v53  ;;  %v5766_v55 = vsel %vm15637_vm7, %v5761_v35, %v5765_v56  ;;  %v5784_v60 = vor.u32 %v5783_v11, %v5779_v50  ;;  %v15018_v56 = vld [vmem:[#allocation8 + $0x180] sm:$0xff]   ;;  %v15121_v54 = vld [vmem:[#allocation2 + $0x64] sm:$0xf] }
 0x28a   :  { %13657 = vmatprep.mubr.bf16.mxu0 %v12067_v16  ;;  %v5805_v46 = vshrl.u32 %v5528_v23, 16  ;;  %v5811_v26 = vshll.u32 %v5529_v1, 16  ;;  %13960 = vmatpush3.bf16.msra.mxu1 %v14997_v13  ;;  %v12219_v7 = vcombine.low %v5756_v48, %v5766_v55  ;;  %v5775_v15 = vrot.slane %v5774_v10, 4  ;;  %v5535_v23 = vld [vmem:[#allocation2 + $0x8c] sm:$0x1] }
 0x28b   :  { %v5797_v18 = vrot.slane %v5795_v5, 5  ;;  %v5803_v63 = vrot.slane %v5801_v31, 5  ;;  %13961 = vmatprep.subr.bf16.mxu1 %v15002_v49  ;;  %v5785_v17 = vrot.slane %v5784_v60, 4  ;;  %v12068_v33 = vcombine.low %v15118_v47, %v15119_v32  ;;  %v5536_v9 = vld [vmem:[#allocation2 + $0x90] sm:$0xf] }
 0x28c   :  { %v5807_v37 = vrot.slane %v5805_v46, 4  ;;  %v5813_v12 = vrot.slane %v5811_v26, 5  ;;  %13718 = vmatpush3.bf16.msra.mxu0 %v15015_v53  ;;  %13897 = vmatprep.mubr.bf16.mxu1 %v12219_v7  ;;  %v5780_v51 = vsel %vm15637_vm7, %v5775_v15, %v5779_v50  ;;  %v5816_v0 = vshrl.u32 %v5530_v27, 16  ;;  %v15021_v50 = vld [vmem:[#allocation8 + $0xb8] sm:$0xff]   ;;  %v5537_v31 = vld [vmem:[#allocation2 + $0x94] sm:$0xf] }
 0x28d   :  { %v5798_v43 = vor.u32 %v5797_v18, %v5794_v42  ;;  %v5819_v14 = vshll.u32 %v5530_v27, 16  ;;  %13719 = vmatprep.subr.bf16.mxu0 %v15017_v57  ;;  %v5790_v6 = vsel %vm15637_vm7, %v5785_v17, %v5789_v29  ;;  %v5825_v52 = vshll.u32 %v5531_v22, 16  ;;  %v15122_v60 = vld [vmem:[#allocation2 + $0x6c] sm:$0xf]  ;;  %v15123_v46 = vld [vmem:[#allocation2 + $0x70] sm:$0xf] }
 0x28e   :  { %v5808_v62 = vor.u32 %v5807_v37, %v5803_v63  ;;  %v5829_v19 = vshrl.u32 %v5531_v22, 16  ;;  %13962 = vmatpush3.bf16.msra.mxu1 %v15002_v49  ;;  %v12220_v13 = vcombine.low %v5780_v51, %v5790_v6  ;;  %v5818_v4 = vrot.slane %v5816_v0, 4  ;;  %v5538_v27 = vld [vmem:[#allocation2 + $0x98] sm:$0x1] }
 0x28f   :  { %v5799_v2 = vrot.slane %v5798_v43, 4  ;;  %v5821_v61 = vrot.slane %v5819_v14, 5  ;;  %13963 = vmatprep.subr.bf16.mxu1 %v15009_v30  ;;  %v5827_v25 = vrot.slane %v5825_v52, 5  ;;  %v5835_v24 = vshll.u32 %v5532_v36, 16  ;;  %v5540_v36 = vld [vmem:[#allocation2 + $0xa0] sm:$0xf] }
 0x290   :  { %v5809_v44 = vrot.slane %v5808_v62, 4  ;;  %v5831_v59 = vrot.slane %v5829_v19, 4  ;;  %13720 = vmatpush3.bf16.msra.mxu0 %v15017_v57  ;;  %13898 = vmatmul.mubr.bf16.gmra.mrb[44].mxu1 %v12220_v13  ;;  %v12069_v8 = vcombine.low %v15120_v20, %v15121_v54  ;;  %v5840_v58 = vshrl.u32 %v5533_v40, 16  ;;  %v15124_v6 = vld [vmem:[#allocation2 + $0x78] sm:$0xf] }
 0x291   :  { %v5804_v53 = vsel %vm15637_vm7, %v5799_v2, %v5803_v63  ;;  %13658 = vmatmul.mubr.bf16.gmra.mrb[76].mxu0 %v12068_v33  ;;  %v5822_v41 = vor.u32 %v5821_v61, %v5818_v4  ;;  %v5837_v16 = vrot.slane %v5835_v24, 5  ;;  %v5843_v1 = vshll.u32 %v5533_v40, 16  ;;  %13721 = vmatprep.subr.bf16.mxu0 %v15020_v3  ;;  %v15125_v62 = vld [vmem:[#allocation2 + $0x7c] sm:$0xf]  ;;  %v5541_v19 = vld [vmem:[#allocation2 + $0xa4] sm:$0x1] }
 0x292   :  { %v5814_v21 = vsel %vm15637_vm7, %v5809_v44, %v5813_v12  ;;  %v5832_v28 = vor.u32 %v5831_v59, %v5827_v25  ;;  %13964 = vmatpush3.bf16.msra.mxu1 %v15009_v30  ;;  %13661 = vmatprep.mubr.bf16.mxu0 %v12069_v8  ;;  %v5842_v35 = vrot.slane %v5840_v58, 4  ;;  %v5849_v11 = vshll.u32 %v5534_v38, 16  ;;  %v5539_v30 = vld [vmem:[#allocation2 + $0x9c] sm:$0xf]  ;;  %v15126_v61 = vld [vmem:[#allocation8 + $0xc0] sm:$0xff]  }
 0x293   :  { %v12221_v49 = vcombine.low %v5804_v53, %v5814_v21  ;;  %v5823_v48 = vrot.slane %v5822_v41, 4  ;;  %14029 = vmatprep.subr.bf16.mxu1 %v15018_v56  ;;  %v5845_v10 = vrot.slane %v5843_v1, 5  ;;  %v5853_v42 = vshrl.u32 %v5534_v38, 16  ;;  %v5542_v20 = vld [vmem:[#allocation2 + $0xa8] sm:$0xf] }
 0x294   :  { %v5833_v29 = vrot.slane %v5832_v28, 4  ;;  %v5859_v5 = vshll.u32 %v5535_v23, 16  ;;  %13722 = vmatpush3.bf16.msra.mxu0 %v15020_v3  ;;  %v5851_v55 = vrot.slane %v5849_v11, 5  ;;  %v12070_v26 = vcombine.low %v15122_v60, %v15123_v46  ;;  %v15127_v1 = vld [vmem:[#allocation2 + $0x84] sm:$0xf] }
 0x295   :  { %13901 = vmatprep.mubr.bf16.mxu1 %v12221_v49  ;;  %v5828_v57 = vsel %vm15637_vm7, %v5823_v48, %v5827_v25  ;;  %v5864_v7 = vshrl.u32 %v5536_v9, 16  ;;  %13723 = vmatprep.subr.bf16.mxu0 %v15021_v50  ;;  %v5846_v18 = vor.u32 %v5845_v10, %v5842_v35  ;;  %v5855_v63 = vrot.slane %v5853_v42, 4  ;;  %v5544_v11 = vld [vmem:[#allocation2 + $0xb0] sm:$0x1] }
 0x296   :  { %v5838_v15 = vsel %vm15637_vm7, %v5833_v29, %v5837_v16  ;;  %v5861_v22 = vrot.slane %v5859_v5, 5  ;;  %v5867_v12 = vshll.u32 %v5536_v9, 16  ;;  %v5873_v47 = vshll.u32 %v5537_v31, 16  ;;  %v15128_v9 = vld [vmem:[#allocation2 + $0x88] sm:$0xf] }
 0x297   :  { %v12222_v17 = vcombine.low %v5828_v57, %v5838_v15  ;;  %v5866_v37 = vrot.slane %v5864_v7, 4  ;;  %v5847_v32 = vrot.slane %v5846_v18, 4  ;;  %v5856_v33 = vor.u32 %v5855_v63, %v5851_v55 }
 0x298   :  { %v5877_v51 = vshrl.u32 %v5537_v31, 16  ;;  %v5883_v43 = vshll.u32 %v5538_v27, 16  ;;  %13724 = vmatpush3.bf16.msra.mxu0 %v15021_v50  ;;  %v5869_v0 = vrot.slane %v5867_v12, 5  ;;  %v5875_v14 = vrot.slane %v5873_v47, 5  ;;  %v5543_v50 = vld [vmem:[#allocation2 + $0xac] sm:$0xf] }
 0x299   :  { %13902 = vmatmul.mubr.bf16.gmra.mrb[48].mxu1 %v12222_v17  ;;  %13662 = vmatmul.mubr.bf16.gmra.mrb[80].mxu0 %v12070_v26  ;;  %v12071_v52 = vcombine.low %v15124_v6, %v15125_v62  ;;  %v5888_v40 = vshrl.u32 %v5539_v30, 16  ;;  %v5852_v3 = vsel %vm15637_vm7, %v5847_v32, %v5851_v55  ;;  %v5857_v13 = vrot.slane %v5856_v33, 4  ;;  %v5545_v55 = vld [vmem:[#allocation2 + $0xb4] sm:$0xf]  ;;  %v5547_v32 = vld [vmem:[#allocation2 + $0xbc] sm:$0x1] }
 0x29a   :  { %v5879_v2 = vrot.slane %v5877_v51, 4  ;;  %v5885_v4 = vrot.slane %v5883_v43, 5  ;;  %13789 = vmatprep.subr.bf16.mxu0 %v15126_v61  ;;  %v5870_v56 = vor.u32 %v5869_v0, %v5866_v37  ;;  %v5891_v25 = vshll.u32 %v5539_v30, 16  ;;  %v15129_v37 = vld [vmem:[#allocation2 + $0x90] sm:$0xf] }
 0x29b   :  { %13665 = vmatprep.mubr.bf16.mxu0 %v12071_v52  ;;  %v5890_v44 = vrot.slane %v5888_v40, 4  ;;  %v5897_v59 = vshll.u32 %v5540_v36, 16  ;;  %v5862_v24 = vsel %vm15637_vm7, %v5857_v13, %v5861_v22  ;;  %v5901_v53 = vshrl.u32 %v5540_v36, 16  ;;  %v5546_v22 = vld [vmem:[#allocation2 + $0xb8] sm:$0xf] }
 0x29c   :  { %v5880_v38 = vor.u32 %v5879_v2, %v5875_v14  ;;  %v5907_v41 = vshll.u32 %v5541_v19, 16  ;;  %v12223_v54 = vcombine.low %v5852_v3, %v5862_v24  ;;  %v5871_v8 = vrot.slane %v5870_v56, 4  ;;  %v15130_v12 = vld [vmem:[#allocation2 + $0x94] sm:$0xf]  ;;  %v5550_v24 = vld [vmem:[#allocation2 + $0xc8] sm:$0x1] }
 0x29d   :  { %v5893_v23 = vrot.slane %v5891_v25, 5  ;;  %v5899_v58 = vrot.slane %v5897_v59, 5  ;;  %v5903_v28 = vrot.slane %v5901_v53, 4  ;;  %v12072_v49 = vcombine.low %v15127_v1, %v15128_v9  ;;  %v15132_v25 = vld [vmem:[#allocation2 + $0xa0] sm:$0xf] }
 0x29e   :  { %v5881_v21 = vrot.slane %v5880_v38, 4  ;;  %v5909_v16 = vrot.slane %v5907_v41, 5  ;;  %13905 = vmatprep.mubr.bf16.mxu1 %v12223_v54  ;;  %v5876_v48 = vsel %vm15637_vm7, %v5871_v8, %v5875_v14  ;;  %v5912_v29 = vshrl.u32 %v5542_v20, 16  ;;  %v5548_v14 = vld [vmem:[#allocation2 + $0xc0] sm:$0xf] }
 0x29f   :  { %v5894_v35 = vor.u32 %v5893_v23, %v5890_v44  ;;  %v5915_v10 = vshll.u32 %v5542_v20, 16  ;;  %v5904_v5 = vor.u32 %v5903_v28, %v5899_v58  ;;  %v5921_v31 = vshll.u32 %v5543_v50, 16  ;;  %v15131_v44 = vld [vmem:[#allocation2 + $0x9c] sm:$0xf]  ;;  %v5551_v8 = vld [vmem:[#allocation2 + $0xe4] sm:$0xf] }
 0x2a0   :  { %v5886_v42 = vsel %vm15637_vm7, %v5881_v21, %v5885_v4  ;;  %v5925_v57 = vshrl.u32 %v5543_v50, 16  ;;  %v5914_v26 = vrot.slane %v5912_v29, 4  ;;  %v5931_v63 = vshll.u32 %v5544_v11, 16  ;;  %v5549_v4 = vld [vmem:[#allocation2 + $0xc4] sm:$0xf] }
 0x2a1   :  { %v12224_v60 = vcombine.low %v5876_v48, %v5886_v42  ;;  %v5895_v46 = vrot.slane %v5894_v35, 4  ;;  %13666 = vmatmul.mubr.bf16.gmra.mrb[84].mxu0 %v12072_v49  ;;  %v5917_v27 = vrot.slane %v5915_v10, 5  ;;  %v5905_v7 = vrot.slane %v5904_v5, 4  ;;  %v5552_v49 = vld [vmem:[#allocation2 + $0xe8] sm:$0xf] }
 0x2a2   :  { %v5923_v15 = vrot.slane %v5921_v31, 5  ;;  %v5927_v18 = vrot.slane %v5925_v57, 4  ;;  %v12073_v47 = vcombine.low %v15129_v37, %v15130_v12  ;;  %v5936_v33 = vshrl.u32 %v5545_v55, 16  ;;  %v15133_v11 = vld [vmem:[#allocation2 + $0xa8] sm:$0xf] }
 0x2a3   :  { %13906 = vmatmul.mubr.bf16.gmra.mrb[52].mxu1 %v12224_v60  ;;  %v5900_v30 = vsel %vm15637_vm7, %v5895_v46, %v5899_v58  ;;  %v5918_v17 = vor.u32 %v5917_v27, %v5914_v26  ;;  %v5910_v51 = vsel %vm15637_vm7, %v5905_v7, %v5909_v16  ;;  %v5933_v36 = vrot.slane %v5931_v63, 5  ;;  %v15134_v29 = vld [vmem:[#allocation2 + $0xac] sm:$0xf] }
 0x2a4   :  { %v5928_v43 = vor.u32 %v5927_v18, %v5923_v15  ;;  %v5939_v0 = vshll.u32 %v5545_v55, 16  ;;  %v12225_v6 = vcombine.low %v5900_v30, %v5910_v51  ;;  %13669 = vmatprep.mubr.bf16.mxu0 %v12073_v47  ;;  %v5938_v52 = vrot.slane %v5936_v33, 4  ;;  %v5553_v42 = vld [vmem:[#allocation2 + $0xec] sm:$0x1]  ;;  %v5554_v30 = vld [vmem:[#allocation2 + $0xf0] sm:$0xf] }
 0x2a5   :  { %v5919_v62 = vrot.slane %v5918_v17, 4  ;;  %v5945_v19 = vshll.u32 %v5546_v22, 16  ;;  %v5949_v13 = vshrl.u32 %v5546_v22, 16  ;;  %v5955_v2 = vshll.u32 %v5547_v32, 16  ;;  %v5555_v32 = vld [vmem:[#allocation2 + $0xf4] sm:$0xf] }
 0x2a6   :  { %v5929_v40 = vrot.slane %v5928_v43, 4  ;;  %v5941_v3 = vrot.slane %v5939_v0, 5  ;;  %13909 = vmatprep.mubr.bf16.mxu1 %v12225_v6  ;;  %v12074_v59 = vcombine.low %v15131_v44, %v15132_v25  ;;  %v5960_v38 = vshrl.u32 %v5548_v14, 16  ;;  %v15136_v0 = vld [vmem:[#allocation2 + $0xb8] sm:$0xf] }
 0x2a7   :  { %v5924_v61 = vsel %vm15637_vm7, %v5919_v62, %v5923_v15  ;;  %v5947_v56 = vrot.slane %v5945_v19, 5  ;;  %v5951_v20 = vrot.slane %v5949_v13, 4  ;;  %v5957_v54 = vrot.slane %v5955_v2, 5 }
 0x2a8   :  { %v5934_v53 = vsel %vm15637_vm7, %v5929_v40, %v5933_v36  ;;  %v5942_v41 = vor.u32 %v5941_v3, %v5938_v52  ;;  %v5962_v58 = vrot.slane %v5960_v38, 4  ;;  %v5963_v50 = vshll.u32 %v5548_v14, 16  ;;  %v15135_v36 = vld [vmem:[#allocation2 + $0xb4] sm:$0xf]  ;;  %v5556_v52 = vld [vmem:[#allocation2 + $0xf8] sm:$0x1] }
 0x2a9   :  { %v12226_v23 = vcombine.low %v5924_v61, %v5934_v53  ;;  %13670 = vmatmul.mubr.bf16.gmra.mrb[88].mxu0 %v12074_v59  ;;  %v5969_v21 = vshll.u32 %v5549_v4, 16  ;;  %v5952_v16 = vor.u32 %v5951_v20, %v5947_v56  ;;  %v5973_v1 = vshrl.u32 %v5549_v4, 16  ;;  %v5557_v61 = vld [vmem:[#allocation2 + $0xfc] sm:$0xf] }
 0x2aa   :  { %v5943_v28 = vrot.slane %v5942_v41, 4  ;;  %v5979_v9 = vshll.u32 %v5550_v24, 16  ;;  %v5965_v48 = vrot.slane %v5963_v50, 5  ;;  %v12075_v10 = vcombine.low %v15133_v11, %v15134_v29  ;;  %v5558_v24 = vld [vmem:[#allocation2 + $0x100] sm:$0xf] }
 0x2ab   :  { %13910 = vmatmul.mubr.bf16.gmra.mrb[56].mxu1 %v12226_v23  ;;  %v5971_v35 = vrot.slane %v5969_v21, 5  ;;  %v5984_v5 = vshrl.u32 %v5551_v8, 16  ;;  %v5953_v57 = vrot.slane %v5952_v16, 4  ;;  %v5975_v55 = vrot.slane %v5973_v1, 4  ;;  %v5559_v23 = vld [vmem:[#allocation2 + $0x104] sm:$0x1] }
 0x2ac   :  { %v5948_v31 = vsel %vm15637_vm7, %v5943_v28, %v5947_v56  ;;  %v5981_v60 = vrot.slane %v5979_v9, 5  ;;  %v5966_v46 = vor.u32 %v5965_v48, %v5962_v58  ;;  %13673 = vmatprep.mubr.bf16.mxu0 %v12075_v10  ;;  %v5987_v27 = vshll.u32 %v5551_v8, 16  ;;  %v5560_v11 = vld [vmem:[#allocation2 + $0x108] sm:$0xf] }
 0x2ad   :  { %v5986_v26 = vrot.slane %v5984_v5, 4  ;;  %v5993_v7 = vshll.u32 %v5552_v49, 16  ;;  %v5958_v15 = vsel %vm15637_vm7, %v5953_v57, %v5957_v54  ;;  %v5976_v18 = vor.u32 %v5975_v55, %v5971_v35 }
 0x2ae   :  { %v5997_v63 = vshrl.u32 %v5552_v49, 16  ;;  %v6003_v22 = vshll.u32 %v5553_v42, 16  ;;  %v12227_v17 = vcombine.low %v5948_v31, %v5958_v15  ;;  %v5967_v37 = vrot.slane %v5966_v46, 4  ;;  %v5561_v31 = vld [vmem:[#allocation2 + $0x10c] sm:$0xf] }
 0x2af   :  { %v5989_v12 = vrot.slane %v5987_v27, 5  ;;  %v5995_v47 = vrot.slane %v5993_v7, 5  ;;  %v5977_v33 = vrot.slane %v5976_v18, 4  ;;  %v12076_v14 = vcombine.low %v15135_v36, %v15136_v0  ;;  %v15138_v46 = vld [vmem:[#allocation2 + $0xd8] sm:$0xf] }
 0x2b0   :  { %v5999_v51 = vrot.slane %v5997_v63, 4  ;;  %v6005_v43 = vrot.slane %v6003_v22, 5  ;;  %13913 = vmatprep.mubr.bf16.mxu1 %v12227_v17  ;;  %v5972_v6 = vsel %vm15637_vm7, %v5967_v37, %v5971_v35  ;;  %v6008_v19 = vshrl.u32 %v5554_v30, 16  ;;  %v15139_v27 = vld [vmem:[#allocation2 + $0xe4] sm:$0xf] }
 0x2b1   :  { %v5990_v62 = vor.u32 %v5989_v12, %v5986_v26  ;;  %v6011_v40 = vshll.u32 %v5554_v30, 16  ;;  %v5982_v3 = vsel %vm15637_vm7, %v5977_v33, %v5981_v60  ;;  %13674 = vmatmul.mubr.bf16.gmra.mrb[92].mxu0 %v12076_v14  ;;  %v6017_v2 = vshll.u32 %v5555_v32, 16  ;;  %v15137_v60 = vld [vmem:[#allocation2 + $0xdc] sm:$0xf]  ;;  %v15140_v7 = vld [vmem:[#allocation2 + $0xe8] sm:$0xf] }
 0x2b2   :  { %v6000_v13 = vor.u32 %v5999_v51, %v5995_v47  ;;  %v6021_v4 = vshrl.u32 %v5555_v32, 16  ;;  %v12228_v56 = vcombine.low %v5972_v6, %v5982_v3  ;;  %v6010_v25 = vrot.slane %v6008_v19, 4  ;;  %v5562_v18 = vld [vmem:[#allocation2 + $0x110] sm:$0x1]  ;;  %v5563_v33 = vld [vmem:[#allocation2 + $0x114] sm:$0xf] }
 0x2b3   :  { %v5991_v44 = vrot.slane %v5990_v62, 4  ;;  %v6013_v59 = vrot.slane %v6011_v40, 5  ;;  %v6019_v53 = vrot.slane %v6017_v2, 5  ;;  %v6027_v20 = vshll.u32 %v5556_v52, 16  ;;  %v5564_v14 = vld [vmem:[#allocation2 + $0x118] sm:$0xf] }
 0x2b4   :  { %v6001_v38 = vrot.slane %v6000_v13, 4  ;;  %v6023_v41 = vrot.slane %v6021_v4, 4  ;;  %13914 = vmatmul.mubr.bf16.gmra.mrb[60].mxu1 %v12228_v56  ;;  %v6032_v58 = vshrl.u32 %v5557_v61, 16  ;;  %v6035_v50 = vshll.u32 %v5557_v61, 16  ;;  %v15141_v19 = vld [vmem:[#allocation2 + $0xf0] sm:$0xf] }
 0x2b5   :  { %v5996_v54 = vsel %vm15637_vm7, %v5991_v44, %v5995_v47  ;;  %v6014_v8 = vor.u32 %v6013_v59, %v6010_v25  ;;  %v6029_v16 = vrot.slane %v6027_v20, 5  ;;  %v6041_v1 = vshll.u32 %v5558_v24, 16  ;;  %v15142_v40 = vld [vmem:[#allocation2 + $0xf4] sm:$0xf]  ;;  %v5565_v13 = vld [vmem:[#allocation2 + $0x11c] sm:$0x1] }
 0x2b6   :  { %v6006_v21 = vsel %vm15637_vm7, %v6001_v38, %v6005_v43  ;;  %v6024_v28 = vor.u32 %v6023_v41, %v6019_v53  ;;  %v6034_v48 = vrot.slane %v6032_v58, 4  ;;  %v6037_v35 = vrot.slane %v6035_v50, 5 }
 0x2b7   :  { %v12229_v9 = vcombine.low %v5996_v54, %v6006_v21  ;;  %v6015_v49 = vrot.slane %v6014_v8, 4  ;;  %v6043_v10 = vrot.slane %v6041_v1, 5  ;;  %v6045_v42 = vshrl.u32 %v5558_v24, 16  ;;  %v5566_v54 = vld [vmem:[#allocation2 + $0x120] sm:$0xf] }
 0x2b8   :  { %v6025_v29 = vrot.slane %v6024_v28, 4  ;;  %v6051_v5 = vshll.u32 %v5559_v23, 16  ;;  %v6038_v55 = vor.u32 %v6037_v35, %v6034_v48  ;;  %v12077_v26 = vcombine.low %v15138_v46, %v15137_v60  ;;  %v5567_v21 = vld [vmem:[#allocation2 + $0x124] sm:$0xf]  ;;  %v5569_v60 = vld [vmem:[#allocation2 + $0x12c] sm:$0xf] }
 0x2b9   :  { %13917 = vmatprep.mubr.bf16.mxu1 %v12229_v9  ;;  %v6020_v57 = vsel %vm15637_vm7, %v6015_v49, %v6019_v53  ;;  %v12078_v15 = vcombine.low %v15139_v27, %v15140_v7  ;;  %v6047_v22 = vrot.slane %v6045_v42, 4  ;;  %v6056_v17 = vshrl.u32 %v5560_v11, 16  ;;  %v15143_v9 = vld [vmem:[#allocation2 + $0xfc] sm:$0xf]  ;;  %v15144_v49 = vld [vmem:[#allocation2 + $0x100] sm:$0xf] }
 0x2ba   :  { %v6030_v63 = vsel %vm15637_vm7, %v6025_v29, %v6029_v16  ;;  %v6053_v30 = vrot.slane %v6051_v5, 5  ;;  %v6039_v12 = vrot.slane %v6038_v55, 4  ;;  %13677 = vmatprep.mubr.bf16.mxu0 %v12077_v26  ;;  %v6059_v47 = vshll.u32 %v5560_v11, 16  ;;  %v5568_v29 = vld [vmem:[#allocation2 + $0x128] sm:$0x1] }
 0x2bb   :  { %v12230_v37 = vcombine.low %v6020_v57, %v6030_v63  ;;  %v6065_v32 = vshll.u32 %v5561_v31, 16  ;;  %v6048_v51 = vor.u32 %v6047_v22, %v6043_v10  ;;  %13678 = vmatmul.mubr.bf16.gmra.mrb[96].mxu0 %v12078_v15  ;;  %v6058_v43 = vrot.slane %v6056_v17, 4 }
 0x2bc   :  { %v6069_v36 = vshrl.u32 %v5561_v31, 16  ;;  %v6075_v0 = vshll.u32 %v5562_v18, 16  ;;  %v6044_v6 = vsel %vm15637_vm7, %v6039_v12, %v6043_v10  ;;  %v6061_v62 = vrot.slane %v6059_v47, 5  ;;  %v15145_v12 = vld [vmem:[#allocation2 + $0x108] sm:$0xf] }
 0x2bd   :  { %13918 = vmatmul.mubr.bf16.gmra.mrb[0].mxu1 %v12230_v37  ;;  %v6067_v52 = vrot.slane %v6065_v32, 5  ;;  %v12079_v3 = vcombine.low %v15141_v19, %v15142_v40  ;;  %v6049_v2 = vrot.slane %v6048_v51, 4  ;;  %v6080_v56 = vshrl.u32 %v5563_v33, 16  ;;  %v15146_v47 = vld [vmem:[#allocation2 + $0x10c] sm:$0xf] }
 0x2be   :  { %v6071_v4 = vrot.slane %v6069_v36, 4  ;;  %v6077_v61 = vrot.slane %v6075_v0, 5  ;;  %v6062_v44 = vor.u32 %v6061_v62, %v6058_v43  ;;  %v6083_v25 = vshll.u32 %v5563_v33, 16  ;;  %v5571_v33 = vld [vmem:[#allocation2 + $0x134] sm:$0x1] }
 0x2bf   :  { %13681 = vmatprep.mubr.bf16.mxu0 %v12079_v3  ;;  %v6089_v59 = vshll.u32 %v5564_v14, 16  ;;  %v6093_v24 = vshrl.u32 %v5564_v14, 16  ;;  %v6054_v38 = vsel %vm15637_vm7, %v6049_v2, %v6053_v30  ;;  %v6082_v41 = vrot.slane %v6080_v56, 4  ;;  %v5570_v30 = vld [vmem:[#allocation2 + $0x130] sm:$0xf] }
 0x2c0   :  { %v6072_v53 = vor.u32 %v6071_v4, %v6067_v52  ;;  %v6099_v20 = vshll.u32 %v5565_v13, 16  ;;  %v12231_v8 = vcombine.low %v6044_v6, %v6054_v38  ;;  %v6063_v23 = vrot.slane %v6062_v44, 4  ;;  %v5572_v6 = vld [vmem:[#allocation2 + $0x138] sm:$0xf]  ;;  %v5574_v38 = vld [vmem:[#allocation2 + $0x140] sm:$0x1] }
 0x2c1   :  { %v6085_v58 = vrot.slane %v6083_v25, 5  ;;  %v6091_v50 = vrot.slane %v6089_v59, 5  ;;  %v6095_v16 = vrot.slane %v6093_v24, 4  ;;  %v12080_v48 = vcombine.low %v15143_v9, %v15144_v49  ;;  %v15147_v25 = vld [vmem:[#allocation2 + $0x114] sm:$0xf] }
 0x2c2   :  { %v6073_v28 = vrot.slane %v6072_v53, 4  ;;  %v6101_v1 = vrot.slane %v6099_v20, 5  ;;  %13921 = vmatprep.mubr.bf16.mxu1 %v12231_v8  ;;  %v6068_v35 = vsel %vm15637_vm7, %v6063_v23, %v6067_v52  ;;  %v6104_v10 = vshrl.u32 %v5566_v54, 16  ;;  %v15148_v59 = vld [vmem:[#allocation2 + $0x118] sm:$0xf] }
 0x2c3   :  { %v6086_v11 = vor.u32 %v6085_v58, %v6082_v41  ;;  %v6107_v42 = vshll.u32 %v5566_v54, 16  ;;  %v6096_v31 = vor.u32 %v6095_v16, %v6091_v50  ;;  %13682 = vmatmul.mubr.bf16.gmra.mrb[100].mxu0 %v12080_v48  ;;  %v6113_v57 = vshll.u32 %v5567_v21, 16  ;;  %v5575_v23 = vld [vmem:[#allocation2 + $0x144] sm:$0xf]  ;;  %v5576_v48 = vld [vmem:[#allocation2 + $0x148] sm:$0xf] }
 0x2c4   :  { %v6078_v5 = vsel %vm15637_vm7, %v6073_v28, %v6077_v61  ;;  %v6117_v55 = vshrl.u32 %v5567_v21, 16  ;;  %v6106_v27 = vrot.slane %v6104_v10, 4  ;;  %v6123_v22 = vshll.u32 %v5568_v29, 16  ;;  %v5573_v61 = vld [vmem:[#allocation2 + $0x13c] sm:$0xf] }
 0x2c5   :  { %v12232_v46 = vcombine.low %v6068_v35, %v6078_v5  ;;  %v6087_v26 = vrot.slane %v6086_v11, 4  ;;  %v6109_v7 = vrot.slane %v6107_v42, 5  ;;  %v6097_v15 = vrot.slane %v6096_v31, 4  ;;  %v15149_v29 = vld [vmem:[#allocation2 + $0x120] sm:$0xf] }
 0x2c6   :  { %v6115_v18 = vrot.slane %v6113_v57, 5  ;;  %v6119_v63 = vrot.slane %v6117_v55, 4  ;;  %v12081_v32 = vcombine.low %v15145_v12, %v15146_v47  ;;  %v6128_v51 = vshrl.u32 %v5569_v60, 16  ;;  %v15150_v10 = vld [vmem:[#allocation2 + $0x124] sm:$0xf] }
 0x2c7   :  { %13922 = vmatmul.mubr.bf16.gmra.mrb[4].mxu1 %v12232_v46  ;;  %v6092_v17 = vsel %vm15637_vm7, %v6087_v26, %v6091_v50  ;;  %v6110_v37 = vor.u32 %v6109_v7, %v6106_v27  ;;  %v6102_v43 = vsel %vm15637_vm7, %v6097_v15, %v6101_v1  ;;  %v6125_v0 = vrot.slane %v6123_v22, 5  ;;  %v5577_v5 = vld [vmem:[#allocation2 + $0x14c] sm:$0x1] }
 0x2c8   :  { %v6120_v36 = vor.u32 %v6119_v63, %v6115_v18  ;;  %v6131_v14 = vshll.u32 %v5569_v60, 16  ;;  %v12233_v62 = vcombine.low %v6092_v17, %v6102_v43  ;;  %13685 = vmatprep.mubr.bf16.mxu0 %v12081_v32  ;;  %v6130_v19 = vrot.slane %v6128_v51, 4  ;;  %v5578_v17 = vld [vmem:[#allocation2 + $0x150] sm:$0xf] }
 0x2c9   :  { %v6111_v52 = vrot.slane %v6110_v37, 4  ;;  %v6137_v40 = vshll.u32 %v5570_v30, 16  ;;  %v6141_v2 = vshrl.u32 %v5570_v30, 16  ;;  %v6147_v4 = vshll.u32 %v5571_v33, 16  ;;  %v5579_v33 = vld [vmem:[#allocation2 + $0x154] sm:$0xf] }
 0x2ca   :  { %v6121_v3 = vrot.slane %v6120_v36, 4  ;;  %v6133_v13 = vrot.slane %v6131_v14, 5  ;;  %13925 = vmatprep.mubr.bf16.mxu1 %v12233_v62  ;;  %v12082_v24 = vcombine.low %v15147_v25, %v15148_v59  ;;  %v6152_v53 = vshrl.u32 %v5572_v6, 16  ;;  %v15152_v14 = vld [vmem:[#allocation2 + $0x130] sm:$0xf] }
 0x2cb   :  { %v6116_v56 = vsel %vm15637_vm7, %v6111_v52, %v6115_v18  ;;  %v6139_v44 = vrot.slane %v6137_v40, 5  ;;  %v6143_v54 = vrot.slane %v6141_v2, 4  ;;  %v6149_v8 = vrot.slane %v6147_v4, 5 }
 0x2cc   :  { %v6126_v41 = vsel %vm15637_vm7, %v6121_v3, %v6125_v0  ;;  %v6134_v20 = vor.u32 %v6133_v13, %v6130_v19  ;;  %13686 = vmatmul.mubr.bf16.gmra.mrb[104].mxu0 %v12082_v24  ;;  %v6154_v50 = vrot.slane %v6152_v53, 4  ;;  %v6155_v21 = vshll.u32 %v5572_v6, 16  ;;  %v15151_v0 = vld [vmem:[#allocation2 + $0x12c] sm:$0xf]  ;;  %v5580_v19 = vld [vmem:[#allocation2 + $0x158] sm:$0x1] }
 0x2cd   :  { %v12234_v58 = vcombine.low %v6116_v56, %v6126_v41  ;;  %v6161_v28 = vshll.u32 %v5573_v61, 16  ;;  %v6144_v1 = vor.u32 %v6143_v54, %v6139_v44  ;;  %v6165_v9 = vshrl.u32 %v5573_v61, 16  ;;  %v5581_v56 = vld [vmem:[#allocation2 + $0x15c] sm:$0xf]  ;;  %v5582_v54 = vld [vmem:[#allocation2 + $0x160] sm:$0xf] }
 0x2ce   :  { %v6135_v16 = vrot.slane %v6134_v20, 4  ;;  %v6171_v49 = vshll.u32 %v5574_v38, 16  ;;  %v6157_v35 = vrot.slane %v6155_v21, 5  ;;  %v12083_v42 = vcombine.low %v15149_v29, %v15150_v10 }
 0x2cf   :  { %13926 = vmatmul.mubr.bf16.gmra.mrb[8].mxu1 %v12234_v58  ;;  %v6163_v11 = vrot.slane %v6161_v28, 5  ;;  %v6176_v31 = vshrl.u32 %v5575_v23, 16  ;;  %v6145_v55 = vrot.slane %v6144_v1, 4  ;;  %v6167_v60 = vrot.slane %v6165_v9, 4  ;;  %v15153_v58 = vld [vmem:[#allocation2 + $0x138] sm:$0xf] }
 0x2d0   :  { %v6140_v57 = vsel %vm15637_vm7, %v6135_v16, %v6139_v44  ;;  %v6173_v46 = vrot.slane %v6171_v49, 5  ;;  %v6158_v26 = vor.u32 %v6157_v35, %v6154_v50  ;;  %13689 = vmatprep.mubr.bf16.mxu0 %v12083_v42  ;;  %v6179_v7 = vshll.u32 %v5575_v23, 16  ;;  %v15154_v50 = vld [vmem:[#allocation2 + $0x13c] sm:$0xf]  ;;  %v5583_v28 = vld [vmem:[#allocation2 + $0x164] sm:$0x1] }
 0x2d1   :  { %v6178_v27 = vrot.slane %v6176_v31, 4  ;;  %v6185_v15 = vshll.u32 %v5576_v48, 16  ;;  %v6150_v18 = vsel %vm15637_vm7, %v6145_v55, %v6149_v8  ;;  %v6168_v63 = vor.u32 %v6167_v60, %v6163_v11  ;;  %v5584_v35 = vld [vmem:[#allocation2 + $0x168] sm:$0xf]  ;;  %v5585_v60 = vld [vmem:[#allocation2 + $0x16c] sm:$0xf] }
 0x2d2   :  { %v6189_v22 = vshrl.u32 %v5576_v48, 16  ;;  %v6195_v30 = vshll.u32 %v5577_v5, 16  ;;  %v12235_v37 = vcombine.low %v6140_v57, %v6150_v18  ;;  %v6159_v12 = vrot.slane %v6158_v26, 4  ;;  %v5586_v18 = vld [vmem:[#allocation2 + $0x170] sm:$0x1] }
 0x2d3   :  { %v6181_v47 = vrot.slane %v6179_v7, 5  ;;  %v6187_v32 = vrot.slane %v6185_v15, 5  ;;  %v6169_v51 = vrot.slane %v6168_v63, 4  ;;  %v12084_v6 = vcombine.low %v15151_v0, %v15152_v14  ;;  %v15156_v7 = vld [vmem:[#allocation2 + $0x148] sm:$0xf] }
 0x2d4   :  { %v6191_v43 = vrot.slane %v6189_v22, 4  ;;  %v6197_v36 = vrot.slane %v6195_v30, 5  ;;  %13929 = vmatprep.mubr.bf16.mxu1 %v12235_v37  ;;  %v6164_v62 = vsel %vm15637_vm7, %v6159_v12, %v6163_v11  ;;  %v6200_v40 = vshrl.u32 %v5578_v17, 16  ;;  %v5587_v12 = vld [vmem:[#allocation2 + $0x174] sm:$0xf] }
 0x2d5   :  { %v6182_v52 = vor.u32 %v6181_v47, %v6178_v27  ;;  %v6203_v3 = vshll.u32 %v5578_v17, 16  ;;  %v6174_v13 = vsel %vm15637_vm7, %v6169_v51, %v6173_v46  ;;  %13690 = vmatmul.mubr.bf16.gmra.mrb[108].mxu0 %v12084_v6  ;;  %v6209_v4 = vshll.u32 %v5579_v33, 16  ;;  %v15155_v27 = vld [vmem:[#allocation2 + $0x144] sm:$0xf]  ;;  %v5588_v6 = vld [vmem:[#allocation2 + $0x178] sm:$0xf] }
 0x2d6   :  { %v6192_v2 = vor.u32 %v6191_v43, %v6187_v32  ;;  %v6213_v61 = vshrl.u32 %v5579_v33, 16  ;;  %v12236_v44 = vcombine.low %v6164_v62, %v6174_v13  ;;  %v6202_v59 = vrot.slane %v6200_v40, 4  ;;  %v15158_v40 = vld [vmem:[#allocation2 + $0x154] sm:$0xf]  ;;  %v5589_v13 = vld [vmem:[#allocation2 + $0x17c] sm:$0x1] }
 0x2d7   :  { %v6183_v25 = vrot.slane %v6182_v52, 4  ;;  %v6205_v24 = vrot.slane %v6203_v3, 5  ;;  %v6211_v53 = vrot.slane %v6209_v4, 5  ;;  %v6219_v20 = vshll.u32 %v5580_v19, 16  ;;  %v15157_v19 = vld [vmem:[#allocation2 + $0x150] sm:$0xf] }
 0x2d8   :  { %v6193_v38 = vrot.slane %v6192_v2, 4  ;;  %v6215_v41 = vrot.slane %v6213_v61, 4  ;;  %13930 = vmatmul.mubr.bf16.gmra.mrb[12].mxu1 %v12236_v44  ;;  %v12085_v21 = vcombine.low %v15153_v58, %v15154_v50  ;;  %v6224_v16 = vshrl.u32 %v5581_v56, 16 }
 0x2d9   :  { %v6188_v8 = vsel %vm15637_vm7, %v6183_v25, %v6187_v32  ;;  %v6206_v23 = vor.u32 %v6205_v24, %v6202_v59  ;;  %v6221_v49 = vrot.slane %v6219_v20, 5  ;;  %v6227_v48 = vshll.u32 %v5581_v56, 16 }
 0x2da   :  { %v6198_v1 = vsel %vm15637_vm7, %v6193_v38, %v6197_v36  ;;  %v6216_v9 = vor.u32 %v6215_v41, %v6211_v53  ;;  %13693 = vmatprep.mubr.bf16.mxu0 %v12085_v21  ;;  %v6226_v10 = vrot.slane %v6224_v16, 4  ;;  %v6233_v42 = vshll.u32 %v5582_v54, 16 }
 0x2db   :  { %v12237_v11 = vcombine.low %v6188_v8, %v6198_v1  ;;  %v6207_v29 = vrot.slane %v6206_v23, 4  ;;  %v6229_v31 = vrot.slane %v6227_v48, 5  ;;  %v6237_v57 = vshrl.u32 %v5582_v54, 16  ;;  %v5590_v8 = vld [vmem:[#allocation2 + $0x180] sm:$0xf] }
 0x2dc   :  { %v6217_v5 = vrot.slane %v6216_v9, 4  ;;  %v6243_v55 = vshll.u32 %v5583_v28, 16  ;;  %v6235_v26 = vrot.slane %v6233_v42, 5  ;;  %v12086_v15 = vcombine.low %v15155_v27, %v15156_v7  ;;  %v5591_v28 = vld [vmem:[#allocation2 + $0x184] sm:$0xf] }
 0x2dd   :  { %13933 = vmatprep.mubr.bf16.mxu1 %v12237_v11  ;;  %v6212_v46 = vsel %vm15637_vm7, %v6207_v29, %v6211_v53  ;;  %v6248_v63 = vshrl.u32 %v5584_v35, 16  ;;  %v6230_v30 = vor.u32 %v6229_v31, %v6226_v10  ;;  %v6239_v17 = vrot.slane %v6237_v57, 4  ;;  %v15160_v48 = vld [vmem:[#allocation2 + $0x160] sm:$0xf]  ;;  %v5592_v10 = vld [vmem:[#allocation2 + $0x188] sm:$0x1] }
 0x2de   :  { %v6222_v22 = vsel %vm15637_vm7, %v6217_v5, %v6221_v49  ;;  %v6245_v37 = vrot.slane %v6243_v55, 5  ;;  %13694 = vmatmul.mubr.bf16.gmra.mrb[112].mxu0 %v12086_v15  ;;  %v6251_v33 = vshll.u32 %v5584_v35, 16  ;;  %v6257_v51 = vshll.u32 %v5585_v60, 16  ;;  %v15159_v49 = vld [vmem:[#allocation2 + $0x15c] sm:$0xf] }
 0x2df   :  { %v12238_v47 = vcombine.low %v6212_v46, %v6222_v22  ;;  %v6250_v32 = vrot.slane %v6248_v63, 4  ;;  %v6231_v43 = vrot.slane %v6230_v30, 4  ;;  %v6240_v36 = vor.u32 %v6239_v17, %v6235_v26  ;;  %v5593_v46 = vld [vmem:[#allocation2 + $0x18c] sm:$0xf]  ;;  %v5594_v17 = vld [vmem:[#allocation2 + $0x190] sm:$0xf] }
 0x2e0   :  { %v6261_v0 = vshrl.u32 %v5585_v60, 16  ;;  %v6267_v14 = vshll.u32 %v5586_v18, 16  ;;  %v6253_v62 = vrot.slane %v6251_v33, 5  ;;  %v6259_v52 = vrot.slane %v6257_v51, 5 }
 0x2e1   :  { %13934 = vmatmul.mubr.bf16.gmra.mrb[16].mxu1 %v12238_v47  ;;  %v12087_v3 = vcombine.low %v15157_v19, %v15158_v40  ;;  %v6272_v2 = vshrl.u32 %v5587_v12, 16  ;;  %v6236_v4 = vsel %vm15637_vm7, %v6231_v43, %v6235_v26  ;;  %v6241_v61 = vrot.slane %v6240_v36, 4  ;;  %v15162_v47 = vld [vmem:[#allocation2 + $0x16c] sm:$0xf] }
 0x2e2   :  { %v6263_v56 = vrot.slane %v6261_v0, 4  ;;  %v6269_v44 = vrot.slane %v6267_v14, 5  ;;  %v6254_v25 = vor.u32 %v6253_v62, %v6250_v32  ;;  %v6275_v24 = vshll.u32 %v5587_v12, 16  ;;  %v15161_v12 = vld [vmem:[#allocation2 + $0x168] sm:$0xf] }
 0x2e3   :  { %13697 = vmatprep.mubr.bf16.mxu0 %v12087_v3  ;;  %v6274_v59 = vrot.slane %v6272_v2, 4  ;;  %v6281_v38 = vshll.u32 %v5588_v6, 16  ;;  %v6246_v53 = vsel %vm15637_vm7, %v6241_v61, %v6245_v37  ;;  %v6285_v20 = vshrl.u32 %v5588_v6, 16  ;;  %v5595_v0 = vld [vmem:[#allocation2 + $0x194] sm:$0x1] }
 0x2e4   :  { %v6264_v41 = vor.u32 %v6263_v56, %v6259_v52  ;;  %v6291_v54 = vshll.u32 %v5589_v13, 16  ;;  %v12239_v23 = vcombine.low %v6236_v4, %v6246_v53  ;;  %v6255_v58 = vrot.slane %v6254_v25, 4  ;;  %v5596_v6 = vld [vmem:[#allocation2 + $0x198] sm:$0xf]  ;;  %v5597_v61 = vld [vmem:[#allocation2 + $0x19c] sm:$0xf] }
 0x2e5   :  { %v6277_v50 = vrot.slane %v6275_v24, 5  ;;  %v6283_v21 = vrot.slane %v6281_v38, 5  ;;  %v6287_v1 = vrot.slane %v6285_v20, 4  ;;  %v12088_v35 = vcombine.low %v15159_v49, %v15160_v48  ;;  %v15163_v25 = vld [vmem:[#allocation2 + $0x174] sm:$0xf] }
 0x2e6   :  { %v6265_v16 = vrot.slane %v6264_v41, 4  ;;  %v6293_v9 = vrot.slane %v6291_v54, 5  ;;  %13937 = vmatprep.mubr.bf16.mxu1 %v12239_v23  ;;  %v6260_v11 = vsel %vm15637_vm7, %v6255_v58, %v6259_v52  ;;  %v6296_v42 = vshrl.u32 %v5590_v8, 16  ;;  %v5598_v23 = vld [vmem:[#allocation2 + $0x1a0] sm:$0x1] }
 0x2e7   :  { %v6278_v29 = vor.u32 %v6277_v50, %v6274_v59  ;;  %v6299_v5 = vshll.u32 %v5590_v8, 16  ;;  %v6288_v57 = vor.u32 %v6287_v1, %v6283_v21  ;;  %13698 = vmatmul.mubr.bf16.gmra.mrb[116].mxu0 %v12088_v35  ;;  %v6305_v55 = vshll.u32 %v5591_v28, 16  ;;  %v15164_v59 = vld [vmem:[#allocation2 + $0x178] sm:$0xf]  ;;  %v15165_v35 = vld [vmem:[#allocation2 + $0x180] sm:$0xf] }
 0x2e8   :  { %v6270_v31 = vsel %vm15637_vm7, %v6265_v16, %v6269_v44  ;;  %v6309_v60 = vshrl.u32 %v5591_v28, 16  ;;  %v6298_v7 = vrot.slane %v6296_v42, 4  ;;  %v6315_v30 = vshll.u32 %v5592_v10, 16 }
 0x2e9   :  { %v12240_v26 = vcombine.low %v6260_v11, %v6270_v31  ;;  %v6279_v27 = vrot.slane %v6278_v29, 4  ;;  %v6301_v15 = vrot.slane %v6299_v5, 5  ;;  %v6289_v18 = vrot.slane %v6288_v57, 4  ;;  %v15166_v11 = vld [vmem:[#allocation2 + $0x184] sm:$0xf] }
 0x2ea   :  { %v6307_v63 = vrot.slane %v6305_v55, 5  ;;  %v6311_v22 = vrot.slane %v6309_v60, 4  ;;  %v12089_v32 = vcombine.low %v15161_v12, %v15162_v47  ;;  %v6320_v33 = vshrl.u32 %v5593_v46, 16  ;;  %v6913_v57 = vld [vmem:[#allocation2 + $0xc] sm:$0xe] }
 0x2eb   :  { %13938 = vmatmul.mubr.bf16.gmra.mrb[20].mxu1 %v12240_v26  ;;  %v6302_v37 = vor.u32 %v6301_v15, %v6298_v7  ;;  %v6284_v51 = vsel %vm15637_vm7, %v6279_v27, %v6283_v21  ;;  %v6294_v43 = vsel %vm15637_vm7, %v6289_v18, %v6293_v9  ;;  %v6323_v14 = vshll.u32 %v5593_v46, 16  ;;  %v15167_v55 = vld [vmem:[#allocation2 + $0x10] sm:$0xf]  ;;  %v15168_v7 = vld [vmem:[#allocation2 + $0x14] sm:$0x1] }
 0x2ec   :  { %v6312_v36 = vor.u32 %v6311_v22, %v6307_v63  ;;  %v12241_v62 = vcombine.low %v6284_v51, %v6294_v43  ;;  %13701 = vmatprep.mubr.bf16.mxu0 %v12089_v32  ;;  %v6322_v19 = vrot.slane %v6320_v33, 4  ;;  %v6329_v40 = vshll.u32 %v5594_v17, 16  ;;  %v15171_v51 = vld [vmem:[#allocation2 + $0x1c] sm:$0xf] }
 0x2ed   :  { %v6303_v52 = vrot.slane %v6302_v37, 4  ;;  %v6317_v13 = vrot.slane %v6315_v30, 5  ;;  %v6325_v2 = vrot.slane %v6323_v14, 5  ;;  %v6333_v4 = vshrl.u32 %v5594_v17, 16  ;;  %v15169_v17 = vld [vmem:[#allocation2 + $0x18c] sm:$0xf] }
 0x2ee   :  { %v6313_v3 = vrot.slane %v6312_v36, 4  ;;  %13941 = vmatprep.mubr.bf16.mxu1 %v12241_v62  ;;  %v6331_v56 = vrot.slane %v6329_v40, 5  ;;  %v6339_v44 = vshll.u32 %v5595_v0, 16  ;;  %v12090_v24 = vcombine.low %v15163_v25, %v15164_v59  ;;  %v15170_v37 = vld [vmem:[#allocation2 + $0x190] sm:$0xf] }
 0x2ef   :  { %v6344_v38 = vshrl.u32 %v5596_v6, 16  ;;  %v6308_v53 = vsel %vm15637_vm7, %v6303_v52, %v6307_v63  ;;  %v6326_v20 = vor.u32 %v6325_v2, %v6322_v19  ;;  %v6335_v54 = vrot.slane %v6333_v4, 4  ;;  %v15172_v0 = vld [vmem:[#allocation2 + $0x28] sm:$0xf]  ;;  %v6914_v40 = vld [vmem:[#allocation2 + $0x18] sm:$0xe] }
 0x2f0   :  { %v6318_v41 = vsel %vm15637_vm7, %v6313_v3, %v6317_v13  ;;  %13702 = vmatmul.mubr.bf16.gmra.mrb[120].mxu0 %v12090_v24  ;;  %v6347_v50 = vshll.u32 %v5596_v6, 16  ;;  %v6353_v21 = vshll.u32 %v5597_v61, 16  ;;  %v6357_v1 = vshrl.u32 %v5597_v61, 16  ;;  %v3960_v6 = vld [vmem:[#allocation2] sm:$0xe] }
 0x2f1   :  { %v12242_v8 = vcombine.low %v6308_v53, %v6318_v41  ;;  %v6346_v58 = vrot.slane %v6344_v38, 4  ;;  %v6327_v28 = vrot.slane %v6326_v20, 4  ;;  %v6336_v16 = vor.u32 %v6335_v54, %v6331_v56  ;;  %v6915_v2 = vld [vmem:[#allocation2 + $0x24] sm:$0xe]  ;;  %v15174_v25 = vld [vmem:[#allocation2 + $0x8] sm:$0x1] }
 0x2f2   :  { %v6341_v9 = vrot.slane %v6339_v44, 5  ;;  %v6349_v49 = vrot.slane %v6347_v50, 5  ;;  %v6355_v48 = vrot.slane %v6353_v21, 5  ;;  %v12091_v29 = vcombine.low %v15165_v35, %v15166_v11  ;;  %v3961_v24 = vld [vmem:[#allocation2 + $0xc] sm:$0xe] }
 0x2f3   :  { %13942 = vmatmul.mubr.bf16.gmra.mrb[24].mxu1 %v12242_v8  ;;  %v6337_v10 = vrot.slane %v6336_v16, 4  ;;  %v6359_v42 = vrot.slane %v6357_v1, 4  ;;  %v6363_v5 = vshll.u32 %v5598_v23, 16  ;;  %v7043_v60 = vrot.slane %v15167_v55, 5  ;;  %v15175_v53 = vld [vmem:[#allocation2 + $0x20] sm:$0x1] }
 0x2f4   :  { %v6350_v31 = vor.u32 %v6349_v49, %v6346_v58  ;;  %13705 = vmatprep.mubr.bf16.mxu0 %v12091_v29  ;;  %v6332_v46 = vsel %vm15637_vm7, %v6327_v28, %v6331_v56  ;;  %v7046_v15 = vrot.slane %v15168_v7, 5  ;;  %v12092_v12 = vcombine.low %v15169_v17, %v15170_v37  ;;  %v15173_v56 = vld [vmem:[#allocation2 + $0x4] sm:$0xf]  ;;  %v15176_v54 = vld [vmem:[#allocation2 + $0x10] sm:$0xf] }
 0x2f5   :  { %v6342_v26 = vsel %vm15637_vm7, %v6337_v10, %v6341_v9  ;;  %v6360_v27 = vor.u32 %v6359_v42, %v6355_v48  ;;  %v7045_v30 = vrot.slane %v7043_v60, 4  ;;  %v6365_v32 = vrot.slane %v6363_v5, 5  ;;  %v15177_v58 = vld [vmem:[#allocation2 + $0x2c] sm:$0x1]  ;;  %v15178_v9 = vld [vmem:[#allocation2 + $0x14] sm:$0x1] }
 0x2f6   :  { %v12243_v18 = vcombine.low %v6332_v46, %v6342_v26  ;;  %v6351_v63 = vrot.slane %v6350_v31, 4  ;;  %v12253_v33 = vrot.slane %v6913_v57, 9  ;;  %v7050_v43 = vrot.slane %v15171_v51, 5  ;;  %v3962_v11 = vld [vmem:[#allocation2 + $0x18] sm:$0xe] }
 0x2f7   :  { %v6361_v47 = vrot.slane %v6360_v27, 4  ;;  %v7047_v36 = vsel %vm16459_vm14, %v7045_v30, %v7046_v15  ;;  %v7057_v14 = vrot.slane %v15172_v0, 5  ;;  %v12101_v61 = vrot.slane %v3960_v6, 9  ;;  %v15180_v5 = vld [vmem:[#allocation2 + $0x1c] sm:$0xf] }
 0x2f8   :  { %13945 = vmatprep.mubr.bf16.mxu1 %v12243_v18  ;;  %13706 = vmatmul.mubr.bf16.gmra.mrb[124].mxu0 %v12092_v12  ;;  %v6356_v62 = vsel %vm15637_vm7, %v6351_v63, %v6355_v48  ;;  %v7044_v19 = vsel %vm16459_vm14, %v12253_v33, %v7043_v60  ;;  %v7052_v4 = vrot.slane %v7050_v43, 4  ;;  %v4061_v44 = vrot.slane %v15173_v56, 5  ;;  %v15179_v48 = vld [vmem:[#allocation2 + $0x34] sm:$0xf]  ;;  %v6916_v27 = vld [vmem:[#allocation2 + $0x30] sm:$0xe] }
 0x2f9   :  { %v6366_v52 = vsel %vm15637_vm7, %v6361_v47, %v6365_v32  ;;  %v12285_v13 = vcombine.low %v7044_v19, %v7047_v36  ;;  %v4064_v59 = vrot.slane %v15174_v25, 5  ;;  %v12254_v38 = vrot.slane %v6914_v40, 9  ;;  %v15181_v18 = vld [vmem:[#allocation2 + $0x20] sm:$0x1]  ;;  %v15022_v32 = vld [vmem:[#allocation8 + $0x188] sm:$0xff]  }
 0x2fa   :  { %v12244_v3 = vcombine.low %v6356_v62, %v6366_v52  ;;  %v7053_v41 = vrot.slane %v15175_v53, 5  ;;  %v7059_v20 = vrot.slane %v7057_v14, 4  ;;  %v4068_v8 = vrot.slane %v15176_v54, 5  ;;  %v15182_v12 = vld [vmem:[#allocation2 + $0x40] sm:$0xf] }
 0x2fb   :  { %v12255_v23 = vrot.slane %v6915_v2, 9  ;;  %v7060_v50 = vrot.slane %v15177_v58, 5  ;;  %v4062_v21 = vsel %vm16459_vm14, %v12101_v61, %v4061_v44  ;;  %v4063_v28 = vrot.slane %v4061_v44, 4  ;;  %v3963_v33 = vld [vmem:[#allocation2 + $0x24] sm:$0xe] }
 0x2fc   :  { %13946 = vmatmul.mubr.bf16.gmra.mrb[28].mxu1 %v12244_v3  ;;  %v12102_v16 = vrot.slane %v3961_v24, 9  ;;  %v4070_v1 = vrot.slane %v4068_v8, 4  ;;  %v4071_v49 = vrot.slane %v15178_v9, 5  ;;  %v7064_v35 = vrot.slane %v15179_v48, 5  ;;  %v15183_v0 = vld [vmem:[#allocation2 + $0x28] sm:$0xf] }
 0x2fd   :  { %13965 = vmatprep.mubr.bf16.mxu1 %v12285_v13  ;;  %v7051_v29 = vsel %vm16459_vm14, %v12254_v38, %v7050_v43  ;;  %v7054_v10 = vsel %vm16459_vm14, %v7052_v4, %v7053_v41  ;;  %v4065_v42 = vsel %vm16459_vm14, %v4063_v28, %v4064_v59  ;;  %v4075_v31 = vrot.slane %v15180_v5, 5  ;;  %v15184_v62 = vld [vmem:[#allocation2 + $0x38] sm:$0x1]  ;;  %v6917_v19 = vld [vmem:[#allocation2 + $0x3c] sm:$0xe]  ;;  %v15185_v3 = vld [vmem:[#allocation8 + $0xc0] sm:$0xff]  }
 0x2fe   :  { %v7061_v57 = vsel %vm16459_vm14, %v7059_v20, %v7060_v50  ;;  %v12133_v55 = vcombine.low %v4062_v21, %v4065_v42  ;;  %v4069_v60 = vsel %vm16459_vm14, %v12102_v16, %v4068_v8  ;;  %v4072_v46 = vsel %vm16459_vm14, %v4070_v1, %v4071_v49  ;;  %v15186_v13 = vld [vmem:[#allocation8 + $0x180] sm:$0xff]   ;;  %v15187_v56 = vld [vmem:[#allocation2 + $0x2c] sm:$0x1]  ;;  %v15188_v24 = vld [vmem:[#allocation2 + $0x44] sm:$0x1] }
 0x2ff   :  { %v12134_v26 = vcombine.low %v4069_v60, %v4072_v46  ;;  %v12103_v7 = vrot.slane %v3962_v11, 9  ;;  %v4077_v15 = vrot.slane %v4075_v31, 4  ;;  %v4078_v63 = vrot.slane %v15181_v18, 5  ;;  %v3964_v25 = vld [vmem:[#allocation2 + $0x30] sm:$0xe]  ;;  %v15023_v8 = vld [vmem:[#allocation8 + $0x190] sm:$0xff]  }
 0x300   :  { %v12286_v30 = vcombine.low %v7051_v29, %v7054_v10  ;;  %v7058_v17 = vsel %vm16459_vm14, %v12255_v23, %v7057_v14  ;;  %13725 = vmatprep.mubr.bf16.mxu0 %v12133_v55  ;;  %v7066_v37 = vrot.slane %v7064_v35, 4  ;;  %v7071_v47 = vrot.slane %v15182_v12, 5  ;;  %v15189_v53 = vld [vmem:[#allocation2 + $0x4c] sm:$0xf]  ;;  %v15190_v20 = vld [vmem:[#allocation2 + $0x34] sm:$0xf] }
 0x301   :  { %v12287_v51 = vcombine.low %v7058_v17, %v7061_v57  ;;  %13726 = vmatmul.mubr.bf16.vlgmr.msra.gmra.mrb[64].mxu0 %v12134_v26  ;;  %v4076_v43 = vsel %vm16459_vm14, %v12103_v7, %v4075_v31  ;;  %v4079_v36 = vsel %vm16459_vm14, %v4077_v15, %v4078_v63  ;;  %v4082_v6 = vrot.slane %v15183_v0, 5  ;;  %v15191_v28 = vld [vmem:[#allocation8 + $0xc8] sm:$0xff]   ;;  %v6918_v1 = vld [vmem:[#allocation2 + $0x48] sm:$0xe]  ;;  %v15194_v31 = vld [vmem:[#allocation8 + $0xd0] sm:$0xff]  }
 0x302   :  { %v7067_v52 = vrot.slane %v15184_v62, 5  ;;  %v12135_v14 = vcombine.low %v4076_v43, %v4079_v36  ;;  %v7073_v40 = vrot.slane %v7071_v47, 4  ;;  %13790 = vmatpush3.bf16.msra.mxu0 %v15185_v3  ;;  %v12256_v2 = vrot.slane %v6916_v27, 9  ;;  %v15192_v48 = vld [vmem:[#allocation2 + $0x38] sm:$0x1] }
 0x303   :  { %v12104_v4 = vrot.slane %v3963_v33, 9  ;;  %v4084_v61 = vrot.slane %v4082_v6, 4  ;;  %v4085_v44 = vrot.slane %v15187_v56, 5  ;;  %v7074_v38 = vrot.slane %v15188_v24, 5  ;;  %13791 = vmatprep.subr.bf16.mxu0 %v15191_v28  ;;  %v16503_v42 = vld [vmem:[#allocation2 + $0x58] sm:$0xf] }
 0x304   :  { %13966 = vmatmul.mubr.bf16.vlgmr.msra.gmra.mrb[32].mxu1 %v12286_v30  ;;  %v7068_v59 = vsel %vm16459_vm14, %v7066_v37, %v7067_v52  ;;  %13729 = vmatprep.mubr.bf16.mxu0 %v12135_v14  ;;  %v7078_v41 = vrot.slane %v15189_v53, 5  ;;  %v4089_v54 = vrot.slane %v15190_v20, 5  ;;  %v7065_v23 = vsel %vm16459_vm14, %v12256_v2, %v7064_v35  ;;  %v15195_v46 = vld [vmem:[#allocation2 + $0x40] sm:$0xf]  ;;  %v3966_v27 = vld [vmem:[#allocation2 + $0x48] sm:$0xe] }
 0x305   :  { %14030 = vmatpush3.bf16.msra.mxu1 %v15186_v13  ;;  %13969 = vmatprep.mubr.bf16.mxu1 %v12287_v51  ;;  %v12257_v58 = vrot.slane %v6917_v19, 9  ;;  %v4083_v50 = vsel %vm16459_vm14, %v12104_v4, %v4082_v6  ;;  %v4086_v21 = vsel %vm16459_vm14, %v4084_v61, %v4085_v44  ;;  %v7075_v16 = vsel %vm16459_vm14, %v7073_v40, %v7074_v38  ;;  %v15196_v18 = vld [vmem:[#allocation2 + $0x50] sm:$0x1]  ;;  %v3965_v17 = vld [vmem:[#allocation2 + $0x3c] sm:$0xe]  ;;  %v15024_v37 = vld [vmem:[#allocation8 + $0x198] sm:$0xff]  }
 0x306   :  { %14031 = vmatprep.subr.bf16.mxu1 %v15022_v32  ;;  %v12105_v9 = vrot.slane %v3964_v25, 9  ;;  %v4091_v49 = vrot.slane %v4089_v54, 4  ;;  %v4092_v11 = vrot.slane %v15192_v48, 5  ;;  %13792 = vmatpush3.bf16.msra.mxu0 %v15191_v28  ;;  %v12288_v29 = vcombine.low %v7065_v23, %v7068_v59  ;;  %v6919_v12 = vld [vmem:[#allocation2 + $0x54] sm:$0xe]  ;;  %v15201_v13 = vld [vmem:[#allocation8 + $0xd8] sm:$0xff]  }
 0x307   :  { %v7072_v35 = vsel %vm16459_vm14, %v12257_v58, %v7071_v47  ;;  %v12136_v10 = vcombine.low %v4083_v50, %v4086_v21  ;;  %v7085_v5 = vrot.slane %v16503_v42, 5  ;;  %13793 = vmatprep.subr.bf16.mxu0 %v15194_v31  ;;  %v7080_v57 = vrot.slane %v7078_v41, 4  ;;  %v15197_v33 = vld [vmem:[#allocation2 + $0x44] sm:$0x1]  ;;  %v15199_v6 = vld [vmem:[#allocation2 + $0x4c] sm:$0xf] }
 0x308   :  { %v4090_v55 = vsel %vm16459_vm14, %v12105_v9, %v4089_v54  ;;  %v4093_v60 = vsel %vm16459_vm14, %v4091_v49, %v4092_v11  ;;  %v4096_v26 = vrot.slane %v15195_v46, 5  ;;  %v12289_v7 = vcombine.low %v7072_v35, %v7075_v16  ;;  %v16510_v43 = vld [vmem:[#allocation2 + $0x64] sm:$0xf]  ;;  %v15200_v14 = vld [vmem:[#allocation2 + $0x5c] sm:$0x1]  ;;  %v15025_v25 = vld [vmem:[#allocation8 + $0x1a0] sm:$0xff]  }
 0x309   :  { %14032 = vmatpush3.bf16.msra.mxu1 %v15022_v32  ;;  %13730 = vmatmul.mubr.bf16.gmra.mrb[68].mxu0 %v12136_v10  ;;  %v12258_v15 = vrot.slane %v6918_v1, 9  ;;  %v7081_v63 = vrot.slane %v15196_v18, 5  ;;  %v12137_v30 = vcombine.low %v4090_v55, %v4093_v60  ;;  %v7087_v47 = vrot.slane %v7085_v5, 4  ;;  %v15202_v56 = vld [vmem:[#allocation2 + $0x50] sm:$0x1]  ;;  %v15026_v10 = vld [vmem:[#allocation8 + $0x1a8] sm:$0xff]  }
 0x30a   :  { %14033 = vmatprep.subr.bf16.mxu1 %v15023_v8  ;;  %v4098_v32 = vrot.slane %v4096_v26, 4  ;;  %v4099_v51 = vrot.slane %v15197_v33, 5  ;;  %v7092_v36 = vrot.slane %v16510_v43, 5  ;;  %13794 = vmatpush3.bf16.msra.mxu0 %v15194_v31  ;;  %v4103_v62 = vrot.slane %v15199_v6, 5  ;;  %v16525_v53 = vld [vmem:[#allocation2 + $0x70] sm:$0xf] }
 0x30b   :  { %v7079_v0 = vsel %vm16459_vm14, %v12258_v15, %v7078_v41  ;;  %13733 = vmatprep.mubr.bf16.mxu0 %v12137_v30  ;;  %v7082_v52 = vsel %vm16459_vm14, %v7080_v57, %v7081_v63  ;;  %v7088_v19 = vrot.slane %v15200_v14, 5  ;;  %v12106_v40 = vrot.slane %v3965_v17, 9  ;;  %13795 = vmatprep.subr.bf16.mxu0 %v15201_v13  ;;  %v15204_v23 = vld [vmem:[#allocation2 + $0x58] sm:$0xf]  ;;  %v15205_v50 = vld [vmem:[#allocation8 + $0xe0] sm:$0xff]   ;;  %v15027_v6 = vld [vmem:[#allocation8 + $0x1b0] sm:$0xff]  }
 0x30c   :  { %13970 = vmatmul.mubr.bf16.gmra.mrb[36].mxu1 %v12288_v29  ;;  %v4100_v3 = vsel %vm16459_vm14, %v4098_v32, %v4099_v51  ;;  %v12259_v2 = vrot.slane %v6919_v12, 9  ;;  %v12107_v4 = vrot.slane %v3966_v27, 9  ;;  %v4105_v61 = vrot.slane %v4103_v62, 4  ;;  %v6920_v16 = vld [vmem:[#allocation2 + $0x60] sm:$0xe] }
 0x30d   :  { %13973 = vmatprep.mubr.bf16.mxu1 %v12289_v7  ;;  %14034 = vmatpush3.bf16.msra.mxu1 %v15023_v8  ;;  %v4106_v44 = vrot.slane %v15202_v56, 5  ;;  %v7089_v59 = vsel %vm16459_vm14, %v7087_v47, %v7088_v19  ;;  %v4097_v24 = vsel %vm16459_vm14, %v12106_v40, %v4096_v26  ;;  %v7094_v38 = vrot.slane %v7092_v36, 4  ;;  %v3967_v9 = vld [vmem:[#allocation2 + $0x54] sm:$0xe]  ;;  %v15206_v48 = vld [vmem:[#allocation2 + $0x68] sm:$0x1] }
 0x30e   :  { %14035 = vmatprep.subr.bf16.mxu1 %v15024_v37  ;;  %v7099_v41 = vrot.slane %v16525_v53, 5  ;;  %13796 = vmatpush3.bf16.msra.mxu0 %v15201_v13  ;;  %v12138_v20 = vcombine.low %v4097_v24, %v4100_v3  ;;  %v4104_v54 = vsel %vm16459_vm14, %v12107_v4, %v4103_v62  ;;  %v4110_v58 = vrot.slane %v15204_v23, 5  ;;  %v3968_v35 = vld [vmem:[#allocation2 + $0x60] sm:$0xe]  ;;  %v6921_v42 = vld [vmem:[#allocation2 + $0x6c] sm:$0xe] }
 0x30f   :  { %v4107_v8 = vsel %vm16459_vm14, %v4105_v61, %v4106_v44  ;;  %13797 = vmatprep.subr.bf16.mxu0 %v15205_v50  ;;  %v12290_v21 = vcombine.low %v7079_v0, %v7082_v52  ;;  %v7086_v28 = vsel %vm16459_vm14, %v12259_v2, %v7085_v5  ;;  %v7095_v11 = vrot.slane %v15206_v48, 5  ;;  %v15207_v57 = vld [vmem:[#allocation2 + $0x5c] sm:$0x1]  ;;  %v15208_v55 = vld [vmem:[#allocation2 + $0x64] sm:$0xf] }
 0x310   :  { %v12139_v1 = vcombine.low %v4104_v54, %v4107_v8  ;;  %v12291_v49 = vcombine.low %v7086_v28, %v7089_v59  ;;  %v4112_v29 = vrot.slane %v4110_v58, 4  ;;  %v7101_v31 = vrot.slane %v7099_v41, 4  ;;  %v15209_v27 = vld [vmem:[#allocation2 + $0x74] sm:$0x1]  ;;  %v15210_v63 = vld [vmem:[#allocation2 + $0x7c] sm:$0xf] }
 0x311   :  { %14036 = vmatpush3.bf16.msra.mxu1 %v15024_v37  ;;  %13734 = vmatmul.mubr.bf16.gmra.mrb[72].mxu0 %v12138_v20  ;;  %v4113_v5 = vrot.slane %v15207_v57, 5  ;;  %v4117_v60 = vrot.slane %v15208_v55, 5  ;;  %v12260_v46 = vrot.slane %v6920_v16, 9  ;;  %v7096_v26 = vsel %vm16459_vm14, %v7094_v38, %v7095_v11  ;;  %v15211_v37 = vld [vmem:[#allocation2 + $0x68] sm:$0x1]  ;;  %v15212_v47 = vld [vmem:[#allocation8 + $0xe8] sm:$0xff]  }
 0x312   :  { %14037 = vmatprep.subr.bf16.mxu1 %v15025_v25  ;;  %13737 = vmatprep.mubr.bf16.mxu0 %v12139_v1  ;;  %v7102_v7 = vrot.slane %v15209_v27, 5  ;;  %v12108_v15 = vrot.slane %v3967_v9, 9  ;;  %v7106_v30 = vrot.slane %v15210_v63, 5  ;;  %v4120_v12 = vrot.slane %v15211_v37, 5  ;;  %v6922_v52 = vld [vmem:[#allocation2 + $0x78] sm:$0xe] }
 0x313   :  { %13798 = vmatpush3.bf16.msra.mxu0 %v15205_v50  ;;  %v4114_v18 = vsel %vm16459_vm14, %v4112_v29, %v4113_v5  ;;  %v4119_v17 = vrot.slane %v4117_v60, 4  ;;  %v7093_v32 = vsel %vm16459_vm14, %v12260_v46, %v7092_v36  ;;  %v12261_v33 = vrot.slane %v6921_v42, 9  ;;  %v16550_v19 = vld [vmem:[#allocation2 + $0x88] sm:$0xf]  ;;  %v15214_v40 = vld [vmem:[#allocation2 + $0x70] sm:$0xf] }
 0x314   :  { %13974 = vmatmul.mubr.bf16.gmra.mrb[40].mxu1 %v12290_v21  ;;  %13799 = vmatprep.subr.bf16.mxu0 %v15212_v47  ;;  %v4111_v51 = vsel %vm16459_vm14, %v12108_v15, %v4110_v58  ;;  %v12109_v0 = vrot.slane %v3968_v35, 9  ;;  %v7103_v62 = vsel %vm16459_vm14, %v7101_v31, %v7102_v7  ;;  %v7113_v43 = vrot.slane %v16550_v19, 5  ;;  %v3969_v38 = vld [vmem:[#allocation2 + $0x6c] sm:$0xe]  ;;  %v15216_v20 = vld [vmem:[#allocation2 + $0x7c] sm:$0xf] }
 0x315   :  { %13977 = vmatprep.mubr.bf16.mxu1 %v12291_v49  ;;  %14038 = vmatpush3.bf16.msra.mxu1 %v15025_v25  ;;  %v4121_v14 = vsel %vm16459_vm14, %v4119_v17, %v4120_v12  ;;  %v4124_v36 = vrot.slane %v15214_v40, 5  ;;  %v12292_v3 = vcombine.low %v7093_v32, %v7096_v26  ;;  %v12140_v13 = vcombine.low %v4111_v51, %v4114_v18  ;;  %v15215_v25 = vld [vmem:[#allocation8 + $0xf0] sm:$0xff]   ;;  %v15028_v8 = vld [vmem:[#allocation8 + $0x1b8] sm:$0xff]   ;;  %v15218_v58 = vld [vmem:[#allocation2 + $0x74] sm:$0x1] }
 0x316   :  { %14039 = vmatprep.subr.bf16.mxu1 %v15026_v10  ;;  %v4118_v2 = vsel %vm16459_vm14, %v12109_v0, %v4117_v60  ;;  %v7100_v4 = vsel %vm16459_vm14, %v12261_v33, %v7099_v41  ;;  %v7108_v61 = vrot.slane %v7106_v30, 4  ;;  %v12262_v24 = vrot.slane %v6922_v52, 9  ;;  %v15217_v23 = vld [vmem:[#allocation2 + $0x80] sm:$0x1]  ;;  %v3970_v21 = vld [vmem:[#allocation2 + $0x78] sm:$0xe] }
 0x317   :  { %13800 = vmatpush3.bf16.msra.mxu0 %v15212_v47  ;;  %v12141_v56 = vcombine.low %v4118_v2, %v4121_v14  ;;  %v4126_v44 = vrot.slane %v4124_v36, 4  ;;  %v12293_v59 = vcombine.low %v7100_v4, %v7103_v62  ;;  %v4131_v54 = vrot.slane %v15216_v20, 5  ;;  %v6923_v16 = vld [vmem:[#allocation2 + $0x84] sm:$0xe]  ;;  %v15219_v9 = vld [vmem:[#allocation2 + $0x80] sm:$0x1] }
 0x318   :  { %13801 = vmatprep.subr.bf16.mxu0 %v15215_v25  ;;  %v7109_v53 = vrot.slane %v15217_v23, 5  ;;  %v7115_v41 = vrot.slane %v7113_v43, 4  ;;  %v4127_v50 = vrot.slane %v15218_v58, 5  ;;  %v7107_v28 = vsel %vm16459_vm14, %v12262_v24, %v7106_v30  ;;  %v15220_v11 = vld [vmem:[#allocation2 + $0x8c] sm:$0x1]  ;;  %v16569_v26 = vld [vmem:[#allocation8 + $0x1c0] sm:$0xff]  }
 0x319   :  { %14040 = vmatpush3.bf16.msra.mxu1 %v15026_v10  ;;  %13738 = vmatmul.mubr.bf16.gmra.mrb[76].mxu0 %v12140_v13  ;;  %v4133_v1 = vrot.slane %v4131_v54, 4  ;;  %v4134_v49 = vrot.slane %v15219_v9, 5  ;;  %v7116_v29 = vrot.slane %v15220_v11, 5  ;;  %v12110_v35 = vrot.slane %v3969_v38, 9  ;;  %v15221_v42 = vld [vmem:[#allocation8 + $0xf8] sm:$0xff]  }
 0x31a   :  { %14041 = vmatprep.subr.bf16.mxu1 %v15027_v6  ;;  %13741 = vmatprep.mubr.bf16.mxu0 %v12141_v56  ;;  %v7110_v48 = vsel %vm16459_vm14, %v7108_v61, %v7109_v53  ;;  %v4128_v10 = vsel %vm16459_vm14, %v4126_v44, %v4127_v50  ;;  %v15222_v31 = vld [vmem:[#allocation2 + $0x94] sm:$0xf]  ;;  %v12111_v5 = vrot.slane %v3970_v21, 9  ;;  %v15223_v60 = vld [vmem:[#allocation2 + $0x88] sm:$0xf]  ;;  %v12263_v27 = vrot.slane %v6923_v16, 9 }
 0x31b   :  { %13802 = vmatpush3.bf16.msra.mxu0 %v15215_v25  ;;  %v7120_v57 = vrot.slane %v15222_v31, 5  ;;  %v4135_v55 = vsel %vm16459_vm14, %v4133_v1, %v4134_v49  ;;  %v4138_v46 = vrot.slane %v15223_v60, 5  ;;  %v7117_v7 = vsel %vm16459_vm14, %v7115_v41, %v7116_v29  ;;  %v15224_v18 = vld [vmem:[#allocation2 + $0xa0] sm:$0xf]  ;;  %v6924_v47 = vld [vmem:[#allocation2 + $0x90] sm:$0xe] }
 0x31c   :  { %13978 = vmatmul.mubr.bf16.gmra.mrb[44].mxu1 %v12292_v3  ;;  %13803 = vmatprep.subr.bf16.mxu0 %v15221_v42  ;;  %v4125_v15 = vsel %vm16459_vm14, %v12110_v35, %v4124_v36  ;;  %v7127_v63 = vrot.slane %v15224_v18, 5  ;;  %v12294_v30 = vcombine.low %v7107_v28, %v7110_v48  ;;  %v4132_v37 = vsel %vm16459_vm14, %v12111_v5, %v4131_v54  ;;  %v15225_v51 = vld [vmem:[#allocation2 + $0x94] sm:$0xf]  ;;  %v3971_v52 = vld [vmem:[#allocation2 + $0x84] sm:$0xe] }
 0x31d   :  { %13981 = vmatprep.mubr.bf16.mxu1 %v12293_v59  ;;  %14042 = vmatpush3.bf16.msra.mxu1 %v15027_v6  ;;  %v12142_v17 = vcombine.low %v4125_v15, %v4128_v10  ;;  %v7114_v12 = vsel %vm16459_vm14, %v12263_v27, %v7113_v43  ;;  %v12143_v32 = vcombine.low %v4132_v37, %v4135_v55  ;;  %v4140_v33 = vrot.slane %v4138_v46, 4  ;;  %v15226_v40 = vld [vmem:[#allocation2 + $0x8c] sm:$0x1]  ;;  %v3972_v36 = vld [vmem:[#allocation2 + $0x90] sm:$0xe] }
 0x31e   :  { %14043 = vmatprep.subr.bf16.mxu1 %v15028_v8  ;;  %v4145_v0 = vrot.slane %v15225_v51, 5  ;;  %v12295_v6 = vcombine.low %v7114_v12, %v7117_v7  ;;  %v7122_v62 = vrot.slane %v7120_v57, 4  ;;  %v7129_v14 = vrot.slane %v7127_v63, 4  ;;  %v15227_v13 = vld [vmem:[#allocation2 + $0x98] sm:$0x1] }
 0x31f   :  { %13804 = vmatpush3.bf16.msra.mxu0 %v15221_v42  ;;  %v4141_v19 = vrot.slane %v15226_v40, 5  ;;  %v12264_v43 = vrot.slane %v6924_v47, 9  ;;  %v7123_v2 = vrot.slane %v15227_v13, 5  ;;  %v6925_v4 = vld [vmem:[#allocation2 + $0x9c] sm:$0xe]  ;;  %v12112_v38 = vrot.slane %v3971_v52, 9 }
 0x320   :  { %v4147_v3 = vrot.slane %v4145_v0, 4  ;;  %v15228_v61 = vld [vmem:[#allocation2 + $0xac] sm:$0xf]  ;;  %v15229_v44 = vld [vmem:[#allocation2 + $0x98] sm:$0x1]  ;;  %v12113_v41 = vrot.slane %v3972_v36, 9 }
 0x321   :  { %14044 = vmatpush3.bf16.msra.mxu1 %v15028_v8  ;;  %13742 = vmatmul.mubr.bf16.gmra.mrb[80].mxu0 %v12142_v17  ;;  %v7134_v56 = vrot.slane %v15228_v61, 5  ;;  %v4148_v25 = vrot.slane %v15229_v44, 5  ;;  %v15230_v59 = vld [vmem:[#allocation2 + $0xa4] sm:$0x1]  ;;  %v4142_v20 = vsel %vm16459_vm14, %v4140_v33, %v4141_v19  ;;  %v15231_v54 = vld [vmem:[#allocation2 + $0xa0] sm:$0xf]  ;;  %v7121_v23 = vsel %vm16459_vm14, %v12264_v43, %v7120_v57 }
 0x322   :  { %14109 = vmatprep.subr.bf16.mxu1 %v16569_v26  ;;  %13745 = vmatprep.mubr.bf16.mxu0 %v12143_v32  ;;  %v7130_v24 = vrot.slane %v15230_v59, 5  ;;  %v4152_v8 = vrot.slane %v15231_v54, 5  ;;  %v7124_v53 = vsel %vm16459_vm14, %v7122_v62, %v7123_v2  ;;  %v12265_v50 = vrot.slane %v6925_v4, 9  ;;  %v15232_v16 = vld [vmem:[#allocation2 + $0xb8] sm:$0xf] }
 0x323   :  { %v4149_v58 = vsel %vm16459_vm14, %v4147_v3, %v4148_v25  ;;  %v4139_v28 = vsel %vm16459_vm14, %v12112_v38, %v4138_v46  ;;  %v7141_v1 = vrot.slane %v15232_v16, 5  ;;  %v7136_v49 = vrot.slane %v7134_v56, 4  ;;  %v15233_v11 = vld [vmem:[#allocation2 + $0xac] sm:$0xf]  ;;  %v6926_v42 = vld [vmem:[#allocation2 + $0xa8] sm:$0xe] }
 0x324   :  { %13982 = vmatmul.mubr.bf16.gmra.mrb[48].mxu1 %v12294_v30  ;;  %v7131_v21 = vsel %vm16459_vm14, %v7129_v14, %v7130_v24  ;;  %v12144_v9 = vcombine.low %v4139_v28, %v4142_v20  ;;  %v4146_v48 = vsel %vm16459_vm14, %v12113_v41, %v4145_v0  ;;  %v4159_v29 = vrot.slane %v15233_v11, 5  ;;  %v15234_v55 = vld [vmem:[#allocation2 + $0xb0] sm:$0x1]  ;;  %v3973_v46 = vld [vmem:[#allocation2 + $0x9c] sm:$0xe] }
 0x325   :  { %13985 = vmatprep.mubr.bf16.mxu1 %v12295_v6  ;;  %v12296_v35 = vcombine.low %v7121_v23, %v7124_v53  ;;  %v7128_v10 = vsel %vm16459_vm14, %v12265_v50, %v7127_v63  ;;  %v12145_v31 = vcombine.low %v4146_v48, %v4149_v58  ;;  %v4154_v57 = vrot.slane %v4152_v8, 4  ;;  %v15235_v15 = vld [vmem:[#allocation2 + $0xa4] sm:$0x1]  ;;  %v3974_v30 = vld [vmem:[#allocation2 + $0xa8] sm:$0xe] }
 0x326   :  { %v12297_v5 = vcombine.low %v7128_v10, %v7131_v21  ;;  %v7137_v60 = vrot.slane %v15234_v55, 5  ;;  %v4161_v27 = vrot.slane %v4159_v29, 4  ;;  %v7143_v7 = vrot.slane %v7141_v1, 4  ;;  %v6927_v37 = vld [vmem:[#allocation2 + $0xb4] sm:$0xe] }
 0x327   :  { %v4155_v18 = vrot.slane %v15235_v15, 5  ;;  %v12266_v17 = vrot.slane %v6926_v42, 9  ;;  %v16600_v12 = vld [vmem:[#allocation2 + $0xc4] sm:$0xf]  ;;  %v15237_v32 = vld [vmem:[#allocation2 + $0xb0] sm:$0x1] }
 0x328   :  { %v7138_v63 = vsel %vm16459_vm14, %v7136_v49, %v7137_v60  ;;  %v7148_v47 = vrot.slane %v16600_v12, 5  ;;  %v4162_v33 = vrot.slane %v15237_v32, 5  ;;  %v15238_v51 = vld [vmem:[#allocation2 + $0xbc] sm:$0x1]  ;;  %v12114_v6 = vrot.slane %v3973_v46, 9 }
 0x329   :  { %13746 = vmatmul.mubr.bf16.gmra.mrb[84].mxu0 %v12144_v9  ;;  %v7144_v0 = vrot.slane %v15238_v51, 5  ;;  %v4156_v62 = vsel %vm16459_vm14, %v4154_v57, %v4155_v18  ;;  %v15239_v52 = vld [vmem:[#allocation2 + $0xb8] sm:$0xf]  ;;  %v7135_v40 = vsel %vm16459_vm14, %v12266_v17, %v7134_v56  ;;  %v12115_v19 = vrot.slane %v3974_v30, 9  ;;  %v15240_v2 = vld [vmem:[#allocation2 + $0xe8] sm:$0xf] }
 0x32a   :  { %13749 = vmatprep.mubr.bf16.mxu0 %v12145_v31  ;;  %v4166_v14 = vrot.slane %v15239_v52, 5  ;;  %v4163_v36 = vsel %vm16459_vm14, %v4161_v27, %v4162_v33  ;;  %v12267_v3 = vrot.slane %v6927_v37, 9  ;;  %v4153_v13 = vsel %vm16459_vm14, %v12114_v6, %v4152_v8  ;;  %v3976_v61 = vld [vmem:[#allocation2 + $0xd8] sm:$0xe]  ;;  %v6928_v38 = vld [vmem:[#allocation2 + $0xc0] sm:$0xe] }
 0x32b   :  { %v7145_v43 = vsel %vm16459_vm14, %v7143_v7, %v7144_v0  ;;  %v7155_v4 = vrot.slane %v15240_v2, 5  ;;  %v12298_v44 = vcombine.low %v7135_v40, %v7138_v63  ;;  %v12146_v25 = vcombine.low %v4153_v13, %v4156_v62  ;;  %v15241_v20 = vld [vmem:[#allocation2 + $0xc8] sm:$0x1]  ;;  %v3975_v41 = vld [vmem:[#allocation2 + $0xb4] sm:$0xe] }
 0x32c   :  { %13986 = vmatmul.mubr.bf16.gmra.mrb[52].mxu1 %v12296_v35  ;;  %v7150_v59 = vrot.slane %v7148_v47, 4  ;;  %v4160_v56 = vsel %vm16459_vm14, %v12115_v19, %v4159_v29  ;;  %v7142_v24 = vsel %vm16459_vm14, %v12267_v3, %v7141_v1  ;;  %v7151_v54 = vrot.slane %v15241_v20, 5  ;;  %v15242_v50 = vld [vmem:[#allocation2 + $0xdc] sm:$0xf]  ;;  %v15243_v28 = vld [vmem:[#allocation2 + $0xe0] sm:$0x1] }
 0x32d   :  { %13989 = vmatprep.mubr.bf16.mxu1 %v12297_v5  ;;  %v12147_v23 = vcombine.low %v4160_v56, %v4163_v36  ;;  %v4168_v53 = vrot.slane %v4166_v14, 4  ;;  %v12299_v8 = vcombine.low %v7142_v24, %v7145_v43  ;;  %v12117_v58 = vrot.slane %v3976_v61, 9  ;;  %v6929_v9 = vld [vmem:[#allocation2 + $0xe4] sm:$0xe]  ;;  %v15244_v48 = vld [vmem:[#allocation2 + $0xbc] sm:$0x1] }
 0x32e   :  { %v4173_v21 = vrot.slane %v15242_v50, 5  ;;  %v4176_v16 = vrot.slane %v15243_v28, 5  ;;  %v7157_v49 = vrot.slane %v7155_v4, 4  ;;  %v4169_v11 = vrot.slane %v15244_v48, 5  ;;  %v15245_v42 = vld [vmem:[#allocation2 + $0xec] sm:$0x1] }
 0x32f   :  { %v12268_v1 = vrot.slane %v6928_v38, 9  ;;  %v7152_v29 = vsel %vm16459_vm14, %v7150_v59, %v7151_v54  ;;  %v7158_v31 = vrot.slane %v15245_v42, 5  ;;  %v12116_v57 = vrot.slane %v3975_v41, 9  ;;  %v15246_v55 = vld [vmem:[#allocation2 + $0xe8] sm:$0xf] }
 0x330   :  { %v4174_v35 = vsel %vm16459_vm14, %v12117_v58, %v4173_v21  ;;  %v4175_v10 = vrot.slane %v4173_v21, 4  ;;  %v4170_v5 = vsel %vm16459_vm14, %v4168_v53, %v4169_v11  ;;  %v4180_v60 = vrot.slane %v15246_v55, 5  ;;  %v15247_v27 = vld [vmem:[#allocation2 + $0xf4] sm:$0xf]  ;;  %v15249_v37 = vld [vmem:[#allocation2 + $0x100] sm:$0xf] }
 0x331   :  { %13750 = vmatmul.mubr.bf16.gmra.mrb[88].mxu0 %v12146_v25  ;;  %v12269_v46 = vrot.slane %v6929_v9, 9  ;;  %v7162_v7 = vrot.slane %v15247_v27, 5  ;;  %v15248_v18 = vld [vmem:[#allocation2 + $0xf4] sm:$0xf]  ;;  %v7159_v17 = vsel %vm16459_vm14, %v7157_v49, %v7158_v31  ;;  %v4167_v63 = vsel %vm16459_vm14, %v12116_v57, %v4166_v14  ;;  %v6930_v52 = vld [vmem:[#allocation2 + $0xf0] sm:$0xe] }
 0x332   :  { %13753 = vmatprep.mubr.bf16.mxu0 %v12147_v23  ;;  %v4177_v15 = vsel %vm16459_vm14, %v4175_v10, %v4176_v16  ;;  %v4187_v30 = vrot.slane %v15248_v18, 5  ;;  %v7169_v32 = vrot.slane %v15249_v37, 5  ;;  %v7149_v51 = vsel %vm16459_vm14, %v12268_v1, %v7148_v47  ;;  %v3977_v3 = vld [vmem:[#allocation2 + $0xe4] sm:$0xe]  ;;  %v15250_v13 = vld [vmem:[#allocation2 + $0xec] sm:$0x1] }
 0x333   :  { %v12149_v33 = vcombine.low %v4174_v35, %v4177_v15  ;;  %v12148_v0 = vcombine.low %v4167_v63, %v4170_v5  ;;  %v12300_v6 = vcombine.low %v7149_v51, %v7152_v29  ;;  %v7156_v62 = vsel %vm16459_vm14, %v12269_v46, %v7155_v4  ;;  %v3978_v2 = vld [vmem:[#allocation2 + $0xf0] sm:$0xe]  ;;  %v15251_v61 = vld [vmem:[#allocation2 + $0xf8] sm:$0x1]  ;;  %v6931_v25 = vld [vmem:[#allocation2 + $0xfc] sm:$0xe] }
 0x334   :  { %13990 = vmatmul.mubr.bf16.gmra.mrb[56].mxu1 %v12298_v44  ;;  %v4182_v40 = vrot.slane %v4180_v60, 4  ;;  %v12301_v19 = vcombine.low %v7156_v62, %v7159_v17  ;;  %v7164_v36 = vrot.slane %v7162_v7, 4  ;;  %v4189_v14 = vrot.slane %v4187_v30, 4  ;;  %v16637_v59 = vld [vmem:[#allocation2 + $0x10c] sm:$0xf] }
 0x335   :  { %13993 = vmatprep.mubr.bf16.mxu1 %v12299_v8  ;;  %v7171_v43 = vrot.slane %v7169_v32, 4  ;;  %v4183_v12 = vrot.slane %v15250_v13, 5  ;;  %v12270_v47 = vrot.slane %v6930_v52, 9  ;;  %v7165_v44 = vrot.slane %v15251_v61, 5  ;;  %v15253_v56 = vld [vmem:[#allocation2 + $0xf8] sm:$0x1] }
 0x336   :  { %v7176_v4 = vrot.slane %v16637_v59, 5  ;;  %v4190_v24 = vrot.slane %v15253_v56, 5  ;;  %v15254_v38 = vld [vmem:[#allocation2 + $0x104] sm:$0x1]  ;;  %v12118_v54 = vrot.slane %v3977_v3, 9  ;;  %v12119_v58 = vrot.slane %v3978_v2, 9 }
 0x337   :  { %v7172_v20 = vrot.slane %v15254_v38, 5  ;;  %v4184_v23 = vsel %vm16459_vm14, %v4182_v40, %v4183_v12  ;;  %v15255_v53 = vld [vmem:[#allocation2 + $0x100] sm:$0xf]  ;;  %v7166_v41 = vsel %vm16459_vm14, %v7164_v36, %v7165_v44  ;;  %v15256_v21 = vld [vmem:[#allocation2 + $0x10c] sm:$0xf]  ;;  %v12271_v16 = vrot.slane %v6931_v25, 9 }
 0x338   :  { %v4194_v8 = vrot.slane %v15255_v53, 5  ;;  %v4191_v50 = vsel %vm16459_vm14, %v4189_v14, %v4190_v24  ;;  %v4201_v28 = vrot.slane %v15256_v21, 5  ;;  %v4181_v49 = vsel %vm16459_vm14, %v12118_v54, %v4180_v60  ;;  %v15257_v48 = vld [vmem:[#allocation2 + $0x118] sm:$0xf]  ;;  %v6932_v57 = vld [vmem:[#allocation2 + $0x108] sm:$0xe] }
 0x339   :  { %13754 = vmatmul.mubr.bf16.gmra.mrb[92].mxu0 %v12148_v0  ;;  %v7173_v9 = vsel %vm16459_vm14, %v7171_v43, %v7172_v20  ;;  %v7183_v11 = vrot.slane %v15257_v48, 5  ;;  %v7163_v1 = vsel %vm16459_vm14, %v12270_v47, %v7162_v7  ;;  %v12150_v29 = vcombine.low %v4181_v49, %v4184_v23  ;;  %v15258_v46 = vld [vmem:[#allocation2 + $0x110] sm:$0x1]  ;;  %v3979_v15 = vld [vmem:[#allocation2 + $0xfc] sm:$0xe] }
 0x33a   :  { %13757 = vmatprep.mubr.bf16.mxu0 %v12149_v33  ;;  %v7178_v35 = vrot.slane %v7176_v4, 4  ;;  %v4188_v10 = vsel %vm16459_vm14, %v12119_v58, %v4187_v30  ;;  %v12302_v42 = vcombine.low %v7163_v1, %v7166_v41  ;;  %v7170_v31 = vsel %vm16459_vm14, %v12271_v16, %v7169_v32  ;;  %v15259_v17 = vld [vmem:[#allocation2 + $0x104] sm:$0x1]  ;;  %v3980_v37 = vld [vmem:[#allocation2 + $0x108] sm:$0xe] }
 0x33b   :  { %v12151_v5 = vcombine.low %v4188_v10, %v4191_v50  ;;  %v4196_v55 = vrot.slane %v4194_v8, 4  ;;  %v12303_v60 = vcombine.low %v7170_v31, %v7173_v9  ;;  %v7179_v27 = vrot.slane %v15258_v46, 5  ;;  %v6933_v33 = vld [vmem:[#allocation2 + $0x114] sm:$0xe]  ;;  %v15260_v51 = vld [vmem:[#allocation2 + $0x110] sm:$0x1] }
 0x33c   :  { %13994 = vmatmul.mubr.bf16.gmra.mrb[60].mxu1 %v12300_v6  ;;  %v4203_v7 = vrot.slane %v4201_v28, 4  ;;  %v7185_v18 = vrot.slane %v7183_v11, 4  ;;  %v4197_v63 = vrot.slane %v15259_v17, 5  ;;  %v12272_v30 = vrot.slane %v6932_v57, 9  ;;  %v15261_v6 = vld [vmem:[#allocation2 + $0x11c] sm:$0x1] }
 0x33d   :  { %13997 = vmatprep.mubr.bf16.mxu1 %v12301_v19  ;;  %v7180_v32 = vsel %vm16459_vm14, %v7178_v35, %v7179_v27  ;;  %v4204_v0 = vrot.slane %v15260_v51, 5  ;;  %v7186_v62 = vrot.slane %v15261_v6, 5  ;;  %v12120_v52 = vrot.slane %v3979_v15, 9  ;;  %v15262_v19 = vld [vmem:[#allocation2 + $0x118] sm:$0xf] }
 0x33e   :  { %v4198_v40 = vsel %vm16459_vm14, %v4196_v55, %v4197_v63  ;;  %v4208_v36 = vrot.slane %v15262_v19, 5  ;;  %v15263_v3 = vld [vmem:[#allocation2 + $0x124] sm:$0xf]  ;;  %v12121_v43 = vrot.slane %v3980_v37, 9  ;;  %v12273_v47 = vrot.slane %v6933_v33, 9 }
 0x33f   :  { %v7190_v14 = vrot.slane %v15263_v3, 5  ;;  %v4205_v13 = vsel %vm16459_vm14, %v4203_v7, %v4204_v0  ;;  %v15264_v12 = vld [vmem:[#allocation2 + $0x124] sm:$0xf]  ;;  %v7187_v61 = vsel %vm16459_vm14, %v7185_v18, %v7186_v62  ;;  %v4195_v44 = vsel %vm16459_vm14, %v12120_v52, %v4194_v8  ;;  %v15265_v25 = vld [vmem:[#allocation2 + $0x130] sm:$0xf] }
 0x340   :  { %v4215_v2 = vrot.slane %v15264_v12, 5  ;;  %v7197_v56 = vrot.slane %v15265_v25, 5  ;;  %v7177_v24 = vsel %vm16459_vm14, %v12272_v30, %v7176_v4  ;;  %v12152_v38 = vcombine.low %v4195_v44, %v4198_v40  ;;  %v6934_v53 = vld [vmem:[#allocation2 + $0x120] sm:$0xe]  ;;  %v3981_v21 = vld [vmem:[#allocation2 + $0x114] sm:$0xe] }
 0x341   :  { %13758 = vmatmul.mubr.bf16.gmra.mrb[96].mxu0 %v12150_v29  ;;  %v4202_v20 = vsel %vm16459_vm14, %v12121_v43, %v4201_v28  ;;  %v12304_v54 = vcombine.low %v7177_v24, %v7180_v32  ;;  %v7184_v23 = vsel %vm16459_vm14, %v12273_v47, %v7183_v11  ;;  %v4210_v58 = vrot.slane %v4208_v36, 4  ;;  %v15266_v4 = vld [vmem:[#allocation2 + $0x11c] sm:$0x1]  ;;  %v3982_v49 = vld [vmem:[#allocation2 + $0x120] sm:$0xe] }
 0x342   :  { %13761 = vmatprep.mubr.bf16.mxu0 %v12151_v5  ;;  %v12153_v41 = vcombine.low %v4202_v20, %v4205_v13  ;;  %v12305_v50 = vcombine.low %v7184_v23, %v7187_v61  ;;  %v7192_v8 = vrot.slane %v7190_v14, 4  ;;  %v4217_v16 = vrot.slane %v4215_v2, 4  ;;  %v15267_v48 = vld [vmem:[#allocation2 + $0x128] sm:$0x1]  ;;  %v6935_v29 = vld [vmem:[#allocation2 + $0x12c] sm:$0xe] }
 0x343   :  { %v7199_v59 = vrot.slane %v7197_v56, 4  ;;  %v4211_v9 = vrot.slane %v15266_v4, 5  ;;  %v12274_v28 = vrot.slane %v6934_v53, 9  ;;  %v7193_v1 = vrot.slane %v15267_v48, 5  ;;  %v16676_v11 = vld [vmem:[#allocation2 + $0x13c] sm:$0xf] }
 0x344   :  { %13998 = vmatmul.mubr.bf16.gmra.mrb[0].mxu1 %v12302_v42  ;;  %v7204_v35 = vrot.slane %v16676_v11, 5  ;;  %v15269_v10 = vld [vmem:[#allocation2 + $0x128] sm:$0x1]  ;;  %v15270_v31 = vld [vmem:[#allocation2 + $0x134] sm:$0x1]  ;;  %v12122_v5 = vrot.slane %v3981_v21, 9 }
 0x345   :  { %14001 = vmatprep.mubr.bf16.mxu1 %v12303_v60  ;;  %v4218_v42 = vrot.slane %v15269_v10, 5  ;;  %v7200_v57 = vrot.slane %v15270_v31, 5  ;;  %v4212_v55 = vsel %vm16459_vm14, %v4210_v58, %v4211_v9  ;;  %v15271_v60 = vld [vmem:[#allocation2 + $0x130] sm:$0xf]  ;;  %v7194_v27 = vsel %vm16459_vm14, %v7192_v8, %v7193_v1  ;;  %v15272_v18 = vld [vmem:[#allocation2 + $0x13c] sm:$0xf] }
 0x346   :  { %v4222_v46 = vrot.slane %v15271_v60, 5  ;;  %v12123_v15 = vrot.slane %v3982_v49, 9  ;;  %v4229_v17 = vrot.slane %v15272_v18, 5  ;;  %v12275_v63 = vrot.slane %v6935_v29, 9  ;;  %v15273_v32 = vld [vmem:[#allocation2 + $0x148] sm:$0xf] }
 0x347   :  { %v4219_v7 = vsel %vm16459_vm14, %v4217_v16, %v4218_v42  ;;  %v7201_v37 = vsel %vm16459_vm14, %v7199_v59, %v7200_v57  ;;  %v4209_v30 = vsel %vm16459_vm14, %v12122_v5, %v4208_v36  ;;  %v7211_v33 = vrot.slane %v15273_v32, 5  ;;  %v6936_v19 = vld [vmem:[#allocation2 + $0x138] sm:$0xe]  ;;  %v15274_v13 = vld [vmem:[#allocation2 + $0x140] sm:$0x1] }
 0x348   :  { %v7191_v51 = vsel %vm16459_vm14, %v12274_v28, %v7190_v14  ;;  %v12154_v0 = vcombine.low %v4209_v30, %v4212_v55  ;;  %v7206_v6 = vrot.slane %v7204_v35, 4  ;;  %v4216_v62 = vsel %vm16459_vm14, %v12123_v15, %v4215_v2  ;;  %v3983_v47 = vld [vmem:[#allocation2 + $0x12c] sm:$0xe]  ;;  %v15275_v44 = vld [vmem:[#allocation2 + $0x134] sm:$0x1] }
 0x349   :  { %13762 = vmatmul.mubr.bf16.gmra.mrb[100].mxu0 %v12152_v38  ;;  %v12306_v52 = vcombine.low %v7191_v51, %v7194_v27  ;;  %v7198_v40 = vsel %vm16459_vm14, %v12275_v63, %v7197_v56  ;;  %v12155_v3 = vcombine.low %v4216_v62, %v4219_v7  ;;  %v4224_v43 = vrot.slane %v4222_v46, 4  ;;  %v3984_v24 = vld [vmem:[#allocation2 + $0x138] sm:$0xe]  ;;  %v6937_v38 = vld [vmem:[#allocation2 + $0x144] sm:$0xe] }
 0x34a   :  { %13765 = vmatprep.mubr.bf16.mxu0 %v12153_v41  ;;  %v12307_v36 = vcombine.low %v7198_v40, %v7201_v37  ;;  %v7207_v12 = vrot.slane %v15274_v13, 5  ;;  %v4231_v14 = vrot.slane %v4229_v17, 4  ;;  %v7213_v61 = vrot.slane %v7211_v33, 4  ;;  %v15276_v20 = vld [vmem:[#allocation2 + $0x140] sm:$0x1] }
 0x34b   :  { %v4225_v25 = vrot.slane %v15275_v44, 5  ;;  %v12276_v2 = vrot.slane %v6936_v19, 9  ;;  %v15277_v23 = vld [vmem:[#allocation2 + $0x14c] sm:$0x1]  ;;  %v12124_v41 = vrot.slane %v3983_v47, 9  ;;  %v12125_v59 = vrot.slane %v3984_v24, 9 }
 0x34c   :  { %14002 = vmatmul.mubr.bf16.gmra.mrb[4].mxu1 %v12304_v54  ;;  %v7208_v56 = vsel %vm16459_vm14, %v7206_v6, %v7207_v12  ;;  %v4232_v54 = vrot.slane %v15276_v20, 5  ;;  %v7214_v53 = vrot.slane %v15277_v23, 5  ;;  %v15279_v21 = vld [vmem:[#allocation2 + $0x154] sm:$0xf]  ;;  %v12277_v28 = vrot.slane %v6937_v38, 9 }
 0x34d   :  { %14005 = vmatprep.mubr.bf16.mxu1 %v12305_v50  ;;  %v4226_v58 = vsel %vm16459_vm14, %v4224_v43, %v4225_v25  ;;  %v15278_v50 = vld [vmem:[#allocation2 + $0x148] sm:$0xf]  ;;  %v7218_v16 = vrot.slane %v15279_v21, 5  ;;  %v15280_v9 = vld [vmem:[#allocation2 + $0x154] sm:$0xf]  ;;  %v4223_v1 = vsel %vm16459_vm14, %v12124_v41, %v4222_v46  ;;  %v7205_v42 = vsel %vm16459_vm14, %v12276_v2, %v7204_v35 }
 0x34e   :  { %v4236_v8 = vrot.slane %v15278_v50, 5  ;;  %v4233_v4 = vsel %vm16459_vm14, %v4231_v14, %v4232_v54  ;;  %v4243_v49 = vrot.slane %v15280_v9, 5  ;;  %v7215_v48 = vsel %vm16459_vm14, %v7213_v61, %v7214_v53  ;;  %v15281_v29 = vld [vmem:[#allocation2 + $0x160] sm:$0xf]  ;;  %v6938_v60 = vld [vmem:[#allocation2 + $0x150] sm:$0xe] }
 0x34f   :  { %v7225_v10 = vrot.slane %v15281_v29, 5  ;;  %v12156_v31 = vcombine.low %v4223_v1, %v4226_v58  ;;  %v4230_v57 = vsel %vm16459_vm14, %v12125_v59, %v4229_v17  ;;  %v12308_v5 = vcombine.low %v7205_v42, %v7208_v56  ;;  %v3985_v18 = vld [vmem:[#allocation2 + $0x144] sm:$0xe]  ;;  %v15282_v35 = vld [vmem:[#allocation2 + $0x14c] sm:$0x1] }
 0x350   :  { %v7212_v55 = vsel %vm16459_vm14, %v12277_v28, %v7211_v33  ;;  %v12157_v27 = vcombine.low %v4230_v57, %v4233_v4  ;;  %v4238_v15 = vrot.slane %v4236_v8, 4  ;;  %v7220_v46 = vrot.slane %v7218_v16, 4  ;;  %v3986_v30 = vld [vmem:[#allocation2 + $0x150] sm:$0xe]  ;;  %v15283_v32 = vld [vmem:[#allocation2 + $0x158] sm:$0x1] }
 0x351   :  { %13766 = vmatmul.mubr.bf16.gmra.mrb[104].mxu0 %v12154_v0  ;;  %v12309_v7 = vcombine.low %v7212_v55, %v7215_v48  ;;  %v4245_v63 = vrot.slane %v4243_v49, 4  ;;  %v7227_v11 = vrot.slane %v7225_v10, 4  ;;  %v4239_v37 = vrot.slane %v15282_v35, 5  ;;  %v6939_v0 = vld [vmem:[#allocation2 + $0x15c] sm:$0xe] }
 0x352   :  { %13769 = vmatprep.mubr.bf16.mxu0 %v12155_v3  ;;  %v12278_v17 = vrot.slane %v6938_v60, 9  ;;  %v7221_v51 = vrot.slane %v15283_v32, 5  ;;  %v16715_v33 = vld [vmem:[#allocation2 + $0x16c] sm:$0xf]  ;;  %v15285_v62 = vld [vmem:[#allocation2 + $0x158] sm:$0x1] }
 0x353   :  { %v7232_v6 = vrot.slane %v16715_v33, 5  ;;  %v15286_v40 = vld [vmem:[#allocation2 + $0x164] sm:$0x1]  ;;  %v12126_v3 = vrot.slane %v3985_v18, 9  ;;  %v4240_v43 = vsel %vm16459_vm14, %v4238_v15, %v4239_v37  ;;  %v12127_v47 = vrot.slane %v3986_v30, 9 }
 0x354   :  { %14006 = vmatmul.mubr.bf16.gmra.mrb[8].mxu1 %v12306_v52  ;;  %v4246_v52 = vrot.slane %v15285_v62, 5  ;;  %v7228_v19 = vrot.slane %v15286_v40, 5  ;;  %v7222_v12 = vsel %vm16459_vm14, %v7220_v46, %v7221_v51  ;;  %v15288_v61 = vld [vmem:[#allocation2 + $0x16c] sm:$0xf]  ;;  %v12279_v25 = vrot.slane %v6939_v0, 9 }
 0x355   :  { %14009 = vmatprep.mubr.bf16.mxu1 %v12307_v36  ;;  %v15287_v36 = vld [vmem:[#allocation2 + $0x160] sm:$0xf]  ;;  %v4257_v44 = vrot.slane %v15288_v61, 5  ;;  %v4237_v2 = vsel %vm16459_vm14, %v12126_v3, %v4236_v8  ;;  %v15289_v56 = vld [vmem:[#allocation2 + $0x178] sm:$0xf]  ;;  %v7219_v20 = vsel %vm16459_vm14, %v12278_v17, %v7218_v16  ;;  %v7234_v23 = vrot.slane %v7232_v6, 4 }
 0x356   :  { %v4250_v13 = vrot.slane %v15287_v36, 5  ;;  %v4247_v14 = vsel %vm16459_vm14, %v4245_v63, %v4246_v52  ;;  %v7229_v24 = vsel %vm16459_vm14, %v7227_v11, %v7228_v19  ;;  %v7239_v38 = vrot.slane %v15289_v56, 5  ;;  %v6940_v50 = vld [vmem:[#allocation2 + $0x168] sm:$0xe]  ;;  %v866_v8 = vld [vmem:[#allocation2 + $0xcc] sm:$0x1] }
 0x357   :  { %v12158_v54 = vcombine.low %v4237_v2, %v4240_v43  ;;  %v4244_v53 = vsel %vm16459_vm14, %v12127_v47, %v4243_v49  ;;  %v12310_v41 = vcombine.low %v7219_v20, %v7222_v12  ;;  %v7226_v58 = vsel %vm16459_vm14, %v12279_v25, %v7225_v10  ;;  %v15290_v9 = vld [vmem:[#allocation2 + $0x170] sm:$0x1]  ;;  %v3987_v16 = vld [vmem:[#allocation2 + $0x15c] sm:$0xe]  ;;  %v15291_v29 = vld [vmem:[#allocation2 + $0x164] sm:$0x1] }
 0x358   :  { %v12159_v21 = vcombine.low %v4244_v53, %v4247_v14  ;;  %v4252_v59 = vrot.slane %v4250_v13, 4  ;;  %v12311_v4 = vcombine.low %v7226_v58, %v7229_v24  ;;  %v7235_v28 = vrot.slane %v15290_v9, 5  ;;  %v3988_v49 = vld [vmem:[#allocation2 + $0x168] sm:$0xe]  ;;  %v6941_v57 = vld [vmem:[#allocation2 + $0x174] sm:$0xe] }
 0x359   :  { %13770 = vmatmul.mubr.bf16.gmra.mrb[108].mxu0 %v12156_v31  ;;  %v4259_v48 = vrot.slane %v4257_v44, 4  ;;  %v7241_v1 = vrot.slane %v7239_v38, 4  ;;  %v4253_v42 = vrot.slane %v15291_v29, 5  ;;  %v12280_v31 = vrot.slane %v6940_v50, 9  ;;  %v15294_v18 = vld [vmem:[#allocation2 + $0x178] sm:$0xf] }
 0x35a   :  { %13773 = vmatprep.mubr.bf16.mxu0 %v12157_v27  ;;  %v7236_v10 = vsel %vm16459_vm14, %v7234_v23, %v7235_v28  ;;  %v867_v60 = vsel %vm15588_vm2, 0, %v866_v8  ;;  %v15293_v27 = vld [vmem:[#allocation2 + $0x17c] sm:$0x1]  ;;  %v4264_v63 = vrot.slane %v15294_v18, 5  ;;  %v15295_v11 = vld [vmem:[#allocation2 + $0x184] sm:$0xf] }
 0x35b   :  { %v7242_v15 = vrot.slane %v15293_v27, 5  ;;  %v4254_v46 = vsel %vm16459_vm14, %v4252_v59, %v4253_v42  ;;  %868 = vst [vmem:[#allocation2 + $0xcc] sm:$0x1] %v867_v60  ;;  %v7246_v35 = vrot.slane %v15295_v11, 5  ;;  %v12129_v37 = vrot.slane %v3988_v49, 9 }
 0x35c   :  { %14010 = vmatmul.mubr.bf16.gmra.mrb[12].mxu1 %v12308_v5  ;;  %v15292_v5 = vld [vmem:[#allocation2 + $0x170] sm:$0x1]  ;;  %v15296_v17 = vld [vmem:[#allocation2 + $0x184] sm:$0xf]  ;;  %v12281_v51 = vrot.slane %v6941_v57, 9  ;;  %v7233_v19 = vsel %vm16459_vm14, %v12280_v31, %v7232_v6  ;;  %v4266_v61 = vrot.slane %v4264_v63, 4 }
 0x35d   :  { %14013 = vmatprep.mubr.bf16.mxu1 %v12309_v7  ;;  %v4260_v55 = vrot.slane %v15292_v5, 5  ;;  %v12128_v7 = vrot.slane %v3987_v16, 9  ;;  %v4271_v32 = vrot.slane %v15296_v17, 5  ;;  %v7243_v0 = vsel %vm16459_vm14, %v7241_v1, %v7242_v15  ;;  %v15297_v52 = vld [vmem:[#allocation2 + $0x190] sm:$0xf] }
 0x35e   :  { %v7253_v40 = vrot.slane %v15297_v52, 5  ;;  %v4258_v43 = vsel %vm16459_vm14, %v12129_v37, %v4257_v44  ;;  %v12312_v36 = vcombine.low %v7233_v19, %v7236_v10  ;;  %v7240_v12 = vsel %vm16459_vm14, %v12281_v51, %v7239_v38  ;;  %v6942_v47 = vld [vmem:[#allocation2 + $0x180] sm:$0xe]  ;;  %v3989_v24 = vld [vmem:[#allocation2 + $0x174] sm:$0xe] }
 0x35f   :  { %v4261_v30 = vsel %vm16459_vm14, %v4259_v48, %v4260_v55  ;;  %v4251_v62 = vsel %vm16459_vm14, %v12128_v7, %v4250_v13  ;;  %v12313_v25 = vcombine.low %v7240_v12, %v7243_v0  ;;  %v7248_v13 = vrot.slane %v7246_v35, 4  ;;  %v6943_v33 = vld [vmem:[#allocation2 + $0x18c] sm:$0xe]  ;;  %v15298_v56 = vld [vmem:[#allocation2 + $0x17c] sm:$0x1]  ;;  %v15031_v12 = vld [vmem:[#allocation2 + $0x24] sm:$0xff]  }
 0x360   :  { %v12160_v3 = vcombine.low %v4251_v62, %v4254_v46  ;;  %v12161_v14 = vcombine.low %v4258_v43, %v4261_v30  ;;  %v4273_v2 = vrot.slane %v4271_v32, 4  ;;  %v7255_v6 = vrot.slane %v7253_v40, 4  ;;  %v15299_v23 = vld [vmem:[#allocation2 + $0x188] sm:$0x1]  ;;  %v15301_v58 = vld [vmem:[#allocation2 + $0x194] sm:$0x1] }
 0x361   :  { %13774 = vmatmul.mubr.bf16.gmra.mrb[112].mxu0 %v12158_v54  ;;  %v4267_v20 = vrot.slane %v15298_v56, 5  ;;  %v3990_v54 = vld [vmem:[#allocation2 + $0x180] sm:$0xe]  ;;  %v12282_v44 = vrot.slane %v6942_v47, 9  ;;  %v7249_v53 = vrot.slane %v15299_v23, 5  ;;  %v7256_v50 = vrot.slane %v15301_v58, 5 }
 0x362   :  { %13777 = vmatprep.mubr.bf16.mxu0 %v12159_v21  ;;  %v15300_v38 = vld [vmem:[#allocation2 + $0x188] sm:$0x1]  ;;  %v12130_v21 = vrot.slane %v3989_v24, 9  ;;  %v15302_v8 = vld [vmem:[#allocation2 + $0x190] sm:$0xf]  ;;  %v12131_v48 = vrot.slane %v3990_v54, 9 }
 0x363   :  { %v4268_v59 = vsel %vm16459_vm14, %v4266_v61, %v4267_v20  ;;  %v7250_v9 = vsel %vm16459_vm14, %v7248_v13, %v7249_v53  ;;  %v15303_v28 = vld [vmem:[#allocation2 + $0x19c] sm:$0xf]  ;;  %v12283_v29 = vrot.slane %v6943_v33, 9  ;;  %v7257_v42 = vsel %vm16459_vm14, %v7255_v6, %v7256_v50  ;;  %v3991_v46 = vld [vmem:[#allocation2 + $0x18c] sm:$0xe]  ;;  %v15036_v47 = vld [vmem:[#allocation2 + $0x24] sm:$0xff]  }
 0x364   :  { %14014 = vmatmul.mubr.bf16.gmra.mrb[16].mxu1 %v12310_v41  ;;  %v4274_v41 = vrot.slane %v15300_v38, 5  ;;  %v7260_v16 = vrot.slane %v15303_v28, 5  ;;  %v4265_v49 = vsel %vm16459_vm14, %v12130_v21, %v4264_v63  ;;  %v7247_v31 = vsel %vm16459_vm14, %v12282_v44, %v7246_v35  ;;  %v6944_v18 = vld [vmem:[#allocation2 + $0x198] sm:$0xe]  ;;  %v15304_v63 = vld [vmem:[#allocation2 + $0x194] sm:$0x1] }
 0x365   :  { %14017 = vmatprep.mubr.bf16.mxu1 %v12311_v4  ;;  %v4278_v4 = vrot.slane %v15302_v8, 5  ;;  %v12162_v10 = vcombine.low %v4265_v49, %v4268_v59  ;;  %v4272_v57 = vsel %vm16459_vm14, %v12131_v48, %v4271_v32  ;;  %v12314_v5 = vcombine.low %v7247_v31, %v7250_v9  ;;  %v15305_v35 = vld [vmem:[#allocation2 + $0x1a0] sm:$0x1]  ;;  %v920_v30 = vld [vmem:[#allocation2 + $0x1a4] sm:$0x1]  ;;  %v15032_v43 = vld [vmem:[#allocation2 + $0xc] sm:$0xff]  }
 0x366   :  { %v4275_v1 = vsel %vm16459_vm14, %v4273_v2, %v4274_v41  ;;  %v7254_v55 = vsel %vm16459_vm14, %v12283_v29, %v7253_v40  ;;  %v7262_v7 = vrot.slane %v7260_v16, 4  ;;  %v4281_v11 = vrot.slane %v15304_v63, 5  ;;  %v15033_v61 = vld [vmem:[#allocation2 + $0x30] sm:$0xff]   ;;  %v15035_v24 = vld [vmem:[#allocation2 + $0x3c] sm:$0xff]   ;;  %v15056_v33 = vld [vmem:[#allocation8 + $0x1d8] sm:$0xff]  }
 0x367   :  { %v12163_v60 = vcombine.low %v4272_v57, %v4275_v1  ;;  %v4280_v27 = vrot.slane %v4278_v4, 4  ;;  %v12315_v15 = vcombine.low %v7254_v55, %v7257_v42  ;;  %v7263_v37 = vrot.slane %v15305_v35, 5  ;;  %v15039_v13 = vld [vmem:[#allocation2 + $0x30] sm:$0xff]   ;;  %v15041_v2 = vld [vmem:[#allocation2 + $0x3c] sm:$0xff]   ;;  %v15037_v6 = vld [vmem:[#allocation2 + $0x48] sm:$0xff]  }
 0x368   :  { %v12132_v17 = vrot.slane %v3991_v46, 9  ;;  %v921_v51 = vsel %vm15588_vm2, 0, %v920_v30  ;;  %v12284_v0 = vrot.slane %v6944_v18, 9  ;;  %v15065_v56 = vld [vmem:[#allocation8 + $0x1e0] sm:$0xff]   ;;  %v15043_v20 = vld [vmem:[#allocation2 + $0x48] sm:$0xff]   ;;  %v15071_v44 = vld [vmem:[#allocation8 + $0x1e8] sm:$0xff]  }
 0x369   :  { %13778 = vmatmul.mubr.bf16.gmra.mrb[116].mxu0 %v12160_v3  ;;  %v4282_v32 = vsel %vm16459_vm14, %v4280_v27, %v4281_v11  ;;  %v7264_v62 = vsel %vm16459_vm14, %v7262_v7, %v7263_v37  ;;  %922 = vst [vmem:[#allocation2 + $0x1a4] sm:$0x1] %v921_v51  ;;  %v15045_v54 = vld [vmem:[#allocation2 + $0x54] sm:$0xff]   ;;  %v15042_v23 = vld [vmem:[#allocation2 + $0x60] sm:$0xff]   ;;  %v15044_v41 = vld [vmem:[#allocation2 + $0x6c] sm:$0xff]  }
 0x36a   :  { %13781 = vmatprep.mubr.bf16.mxu0 %v12161_v14  ;;  %v4279_v52 = vsel %vm16459_vm14, %v12132_v17, %v4278_v4  ;;  %v7261_v40 = vsel %vm16459_vm14, %v12284_v0, %v7260_v16  ;;  %v15038_v14 = vld [vmem:[#allocation8 + $0x1c8] sm:$0xff]   ;;  %v15076_v53 = vld [vmem:[#allocation8 + $0x1f0] sm:$0xff]   ;;  %v15050_v58 = vld [vmem:[#allocation2 + $0x6c] sm:$0xff]  }
 0x36b   :  { %v12164_v19 = vcombine.low %v4279_v52, %v4282_v32  ;;  %v12316_v3 = vcombine.low %v7261_v40, %v7264_v62  ;;  %v15048_v38 = vld [vmem:[#allocation2 + $0x60] sm:$0xff]   ;;  %v15081_v50 = vld [vmem:[#allocation8 + $0x1f8] sm:$0xff]   ;;  %v15046_v21 = vld [vmem:[#allocation2 + $0x78] sm:$0xff]  }
 0x36c   :  { %14018 = vmatmul.mubr.bf16.gmra.mrb[20].mxu1 %v12312_v36  ;;  %v15029_v36 = vld [vmem:[#allocation2 + $0x18] sm:$0xff]   ;;  %v16783_v59 = vld [vmem:[#allocation8 + $0x200] sm:$0xff]   ;;  %v15049_v4 = vld [vmem:[#allocation2 + $0x84] sm:$0xff]  }
 0x36d   :  { %14021 = vmatprep.mubr.bf16.mxu1 %v12313_v25  ;;  %v15047_v25 = vld [vmem:[#allocation8 + $0x1d0] sm:$0xff]   ;;  %v15052_v8 = vld [vmem:[#allocation2 + $0x78] sm:$0xff]   ;;  %v15051_v28 = vld [vmem:[#allocation2 + $0x90] sm:$0xff]  }
 0x36e   :  { %v15054_v9 = vld [vmem:[#allocation2 + $0x84] sm:$0xff]   ;;  %v15057_v16 = vld [vmem:[#allocation2 + $0x90] sm:$0xff]   ;;  %v15053_v48 = vld [vmem:[#allocation2 + $0x9c] sm:$0xff]  }
 0x36f   :  { %v15059_v1 = vld [vmem:[#allocation2 + $0x9c] sm:$0xff]   ;;  %v15055_v29 = vld [vmem:[#allocation2 + $0xa8] sm:$0xff]   ;;  %v15058_v49 = vld [vmem:[#allocation2 + $0xb4] sm:$0xff]  }
 0x370   :  { %v15061_v42 = vld [vmem:[#allocation2 + $0xa8] sm:$0xff]   ;;  %v15063_v31 = vld [vmem:[#allocation2 + $0xb4] sm:$0xff]   ;;  %v15070_v18 = vld [vmem:[#allocation2 + $0x120] sm:$0xff]  }
 0x371   :  { %13782 = vmatmul.mubr.bf16.gmra.mrb[120].mxu0 %v12162_v10  ;;  %v15060_v10 = vld [vmem:[#allocation2 + $0xc0] sm:$0xff]   ;;  %v976_v57 = vld [vmem:[#allocation2 + $0xd4] sm:$0x1]  ;;  %v15062_v55 = vld [vmem:[#allocation2 + $0xcc] sm:$0xff]  }
 0x372   :  { %13785 = vmatprep.mubr.bf16.mxu0 %v12163_v60  ;;  %v15066_v60 = vld [vmem:[#allocation2 + $0xc0] sm:$0xff]   ;;  %v15064_v27 = vld [vmem:[#allocation2 + $0xf0] sm:$0xff]   ;;  %v15068_v7 = vld [vmem:[#allocation2 + $0x108] sm:$0xff]  }
 0x373   :  { %v15069_v46 = vld [vmem:[#allocation2 + $0x114] sm:$0xff]   ;;  %v15072_v63 = vld [vmem:[#allocation2 + $0x12c] sm:$0xff]   ;;  %v15074_v35 = vld [vmem:[#allocation2 + $0x144] sm:$0xff]  }
 0x374   :  { %14022 = vmatmul.mubr.bf16.gmra.mrb[24].mxu1 %v12314_v5  ;;  %v977_v5 = vsel %vm15597_vm4, 0, %v976_v57  ;;  %v15073_v11 = vld [vmem:[#allocation2 + $0x138] sm:$0xff]   ;;  %v15075_v37 = vld [vmem:[#allocation2 + $0x150] sm:$0xff]   ;;  %v8489_v32 = vld [vmem:[#allocation2 + $0x24] sm:$0xf] }
 0x375   :  { %14025 = vmatprep.mubr.bf16.mxu1 %v12315_v15  ;;  %978 = vst [vmem:[#allocation2 + $0xd4] sm:$0x1] %v977_v5  ;;  %v15067_v15 = vld [vmem:[#allocation2 + $0xfc] sm:$0xff]   ;;  %v8486_v30 = vld [vmem:[#allocation2 + $0x18] sm:$0xf] }
 0x376   :  { %v8487_v17 = vld [vmem:[#allocation2 + $0x1c] sm:$0xf]  ;;  %v8490_v51 = vld [vmem:[#allocation2 + $0x28] sm:$0xf]  ;;  %v8583_v0 = vshrl.u32 %v8486_v30, 16  ;;  %v8586_v62 = vshll.u32 %v8486_v30, 16 }
 0x377   :  { %v8592_v52 = vshll.u32 %v8487_v17, 16  ;;  %v8596_v40 = vshrl.u32 %v8487_v17, 16 }
 0x379   :  { %13786 = vmatmul.mubr.bf16.gmra.mrb[124].mxu0 %v12164_v19  ;;  %v8607_v19 = vshrl.u32 %v8489_v32, 16 }
 0x37a   :  { %13805 = vmatprep.mubr.bf16.mxu0 %v15032_v43  ;;  %v8616_v43 = vshll.u32 %v8490_v51, 16 }
 0x37c   :  { %14026 = vmatmul.mubr.bf16.gmra.mrb[28].mxu1 %v12316_v3  ;;  %v8610_v3 = vshll.u32 %v8489_v32, 16 }
 0x37d   :  { %14045 = vmatprep.mubr.bf16.mxu1 %v15029_v36  ;;  %v8620_v36 = vshrl.u32 %v8490_v51, 16 }
 0x381   :  { %13806 = vmatmul.mubr.bf16.vlgmr.msra.gmra.mrb[64].mxu0 %v15034_v34  ;;  %v8492_v34 = vld [vmem:[#allocation2 + $0x30] sm:$0xf] }
 0x382   :  { %13809 = vmatprep.mubr.bf16.mxu0 %v15036_v47  ;;  %v8493_v47 = vld [vmem:[#allocation2 + $0x34] sm:$0xf] }
 0x384   :  { %14046 = vmatmul.mubr.bf16.vlgmr.msra.gmra.mrb[32].mxu1 %v15031_v12  ;;  %v15077_v12 = vld [vmem:[#allocation2 + $0x15c] sm:$0xff]  }
 0x385   :  { %14110 = vmatpush3.bf16.msra.mxu1 %v16569_v26  ;;  %14049 = vmatprep.mubr.bf16.mxu1 %v15033_v61  ;;  %v15040_v26 = vld [vmem:[#allocation2 + $0x54] sm:$0xff]   ;;  %v8585_v61 = vrot.slane %v8583_v0, 4 }
 0x386   :  { %14111 = vmatprep.subr.bf16.mxu1 %v15038_v14 }
 0x389   :  { %14112 = vmatpush3.bf16.msra.mxu1 %v15038_v14  ;;  %13810 = vmatmul.mubr.bf16.gmra.mrb[68].mxu0 %v15039_v13  ;;  %v15078_v14 = vld [vmem:[#allocation2 + $0x168] sm:$0xff]   ;;  %v16788_v13 = vrot.slane %v8592_v52, 5 }
 0x38a   :  { %14113 = vmatprep.subr.bf16.mxu1 %v15047_v25  ;;  %13813 = vmatprep.mubr.bf16.mxu0 %v15041_v2  ;;  %v8609_v2 = vrot.slane %v8607_v19, 4  ;;  %v8499_v19 = vld [vmem:[#allocation2 + $0x4c] sm:$0xf] }
 0x38c   :  { %14050 = vmatmul.mubr.bf16.gmra.mrb[36].mxu1 %v15035_v24  ;;  %v8598_v24 = vrot.slane %v8596_v40, 4 }
 0x38d   :  { %14053 = vmatprep.mubr.bf16.mxu1 %v15037_v6  ;;  %14114 = vmatpush3.bf16.msra.mxu1 %v15047_v25  ;;  %v8588_v25 = vrot.slane %v8586_v62, 5  ;;  %v8631_v6 = vshrl.u32 %v8492_v34, 16 }
 0x38e   :  { %14115 = vmatprep.subr.bf16.mxu1 %v15056_v33 }
 0x391   :  { %14116 = vmatpush3.bf16.msra.mxu1 %v15056_v33  ;;  %13814 = vmatmul.mubr.bf16.gmra.mrb[72].mxu0 %v15043_v20  ;;  %v8612_v33 = vrot.slane %v8610_v3, 5  ;;  %v16790_v20 = vrot.slane %v8616_v43, 5 }
 0x392   :  { %14117 = vmatprep.subr.bf16.mxu1 %v15065_v56  ;;  %13817 = vmatprep.mubr.bf16.mxu0 %v15045_v54  ;;  %v8640_v54 = vshll.u32 %v8493_v47, 16 }
 0x394   :  { %14054 = vmatmul.mubr.bf16.gmra.mrb[40].mxu1 %v15040_v26  ;;  %v8622_v26 = vrot.slane %v8620_v36, 4 }
 0x395   :  { %14057 = vmatprep.mubr.bf16.mxu1 %v15042_v23  ;;  %14118 = vmatpush3.bf16.msra.mxu1 %v15065_v56  ;;  %v8634_v56 = vshll.u32 %v8492_v34, 16  ;;  %v8495_v23 = vld [vmem:[#allocation2 + $0x3c] sm:$0xf] }
 0x396   :  { %14119 = vmatprep.subr.bf16.mxu1 %v15071_v44 }
 0x399   :  { %14120 = vmatpush3.bf16.msra.mxu1 %v15071_v44  ;;  %13818 = vmatmul.mubr.bf16.gmra.mrb[76].mxu0 %v15048_v38  ;;  %v8644_v44 = vshrl.u32 %v8493_v47, 16  ;;  %v8488_v38 = vld [vmem:[#allocation2 + $0x20] sm:$0x1]  ;;  %v15083_v47 = vld [vmem:[#allocation2 + $0x198] sm:$0xff]  }
 0x39a   :  { %14121 = vmatprep.subr.bf16.mxu1 %v15076_v53  ;;  %13821 = vmatprep.mubr.bf16.mxu0 %v15050_v58  ;;  %v8599_v58 = vor.u32 %v8598_v24, %v16788_v13  ;;  %v8602_v57 = vshll.u32 %v8488_v38, 16  ;;  %v8502_v24 = vld [vmem:[#allocation2 + $0x58] sm:$0xf] }
 0x39c   :  { %14058 = vmatmul.mubr.bf16.gmra.mrb[44].mxu1 %v15044_v41  ;;  %v8589_v41 = vor.u32 %v8588_v25, %v8585_v61  ;;  %v8604_v32 = vrot.slane %v8602_v57, 5 }
 0x39d   :  { %14061 = vmatprep.mubr.bf16.mxu1 %v15046_v21  ;;  %14122 = vmatpush3.bf16.msra.mxu1 %v15076_v53  ;;  %v8496_v53 = vld [vmem:[#allocation2 + $0x40] sm:$0xf]  ;;  %v8633_v21 = vrot.slane %v8631_v6, 4  ;;  %v8688_v6 = vshll.u32 %v8499_v19, 16 }
 0x39e   :  { %14123 = vmatprep.subr.bf16.mxu1 %v15081_v50 }
 0x3a1   :  { %14124 = vmatpush3.bf16.msra.mxu1 %v15081_v50  ;;  %13822 = vmatmul.mubr.bf16.gmra.mrb[80].mxu0 %v15052_v8  ;;  %v8491_v50 = vld [vmem:[#allocation2 + $0x2c] sm:$0x1]  ;;  %v8636_v8 = vrot.slane %v8634_v56, 5  ;;  %v8692_v56 = vshrl.u32 %v8499_v19, 16  ;;  %v8511_v19 = vld [vmem:[#allocation2 + $0x7c] sm:$0xf] }
 0x3a2   :  { %14189 = vmatprep.subr.bf16.mxu1 %v16783_v59  ;;  %13825 = vmatprep.mubr.bf16.mxu0 %v15054_v9  ;;  %v8613_v9 = vor.u32 %v8612_v33, %v8609_v2  ;;  %v8626_v5 = vshll.u32 %v8491_v50, 16  ;;  %v8716_v50 = vshrl.u32 %v8502_v24, 16 }
 0x3a4   :  { %14062 = vmatmul.mubr.bf16.gmra.mrb[48].mxu1 %v15049_v4  ;;  %v15079_v4 = vld [vmem:[#allocation2 + $0x174] sm:$0xff]   ;;  %v8628_v51 = vrot.slane %v8626_v5, 5 }
 0x3a5   :  { %14065 = vmatprep.mubr.bf16.mxu1 %v15051_v28  ;;  %v8623_v28 = vor.u32 %v8622_v26, %v16790_v20  ;;  %v8505_v26 = vld [vmem:[#allocation2 + $0x64] sm:$0xf] }
 0x3a9   :  { %13826 = vmatmul.mubr.bf16.gmra.mrb[84].mxu0 %v15057_v16  ;;  %v16794_v16 = vrot.slane %v8640_v54, 5 }
 0x3aa   :  { %13829 = vmatprep.mubr.bf16.mxu0 %v15059_v1  ;;  %v8494_v1 = vld [vmem:[#allocation2 + $0x38] sm:$0x1] }
 0x3ac   :  { %14066 = vmatmul.mubr.bf16.gmra.mrb[52].mxu1 %v15053_v48  ;;  %v8646_v48 = vrot.slane %v8644_v44, 4 }
 0x3ad   :  { %14069 = vmatprep.mubr.bf16.mxu1 %v15055_v29  ;;  %v8655_v29 = vshrl.u32 %v8495_v23, 16 }
 0x3b1   :  { %13830 = vmatmul.mubr.bf16.gmra.mrb[88].mxu0 %v15061_v42  ;;  %v8658_v42 = vshll.u32 %v8495_v23, 16 }
 0x3b2   :  { %13833 = vmatprep.mubr.bf16.mxu0 %v15063_v31  ;;  %v8668_v31 = vshrl.u32 %v8496_v53, 16 }
 0x3b4   :  { %14070 = vmatmul.mubr.bf16.gmra.mrb[56].mxu1 %v15058_v49  ;;  %v8664_v49 = vshll.u32 %v8496_v53, 16  ;;  %v8670_v17 = vrot.slane %v8668_v31, 4  ;;  %v8501_v53 = vld [vmem:[#allocation2 + $0x54] sm:$0xf]  ;;  %v8507_v31 = vld [vmem:[#allocation2 + $0x6c] sm:$0xf] }
 0x3b5   :  { %14073 = vmatprep.mubr.bf16.mxu1 %v15060_v10  ;;  %v15080_v10 = vld [vmem:[#allocation2 + $0x180] sm:$0xff]   ;;  %v8703_v57 = vshrl.u32 %v8501_v53, 16  ;;  %v8706_v5 = vshll.u32 %v8501_v53, 16 }
 0x3b6   :  { %v16797_v30 = vrot.slane %v8664_v49, 5  ;;  %v8694_v49 = vrot.slane %v8692_v56, 4  ;;  %v8788_v56 = vshrl.u32 %v8511_v19, 16 }
 0x3b9   :  { %13834 = vmatmul.mubr.bf16.gmra.mrb[92].mxu0 %v15066_v60  ;;  %v8600_v60 = vrot.slane %v8599_v58, 4  ;;  %v8712_v58 = vshll.u32 %v8502_v24, 16  ;;  %v8509_v24 = vld [vmem:[#allocation2 + $0x74] sm:$0x1] }
 0x3bb   :  { %v8605_v3 = vsel %vm15637_vm7, %v8600_v60, %v8604_v32 }
 0x3bc   :  { %14074 = vmatmul.mubr.bf16.gmra.mrb[60].mxu1 %v15062_v55  ;;  %v8590_v55 = vrot.slane %v8589_v41, 4 }
 0x3bd   :  { %14077 = vmatprep.mubr.bf16.mxu1 %v15064_v27  ;;  %v8637_v27 = vor.u32 %v8636_v8, %v8633_v21  ;;  %v1030_v21 = vld [vmem:[#allocation2 + $0x1ac] sm:$0x1] }
 0x3be   :  { %v8595_v52 = vsel %vm15637_vm7, %v8590_v55, %v16788_v13  ;;  %v8671_v13 = vor.u32 %v8670_v17, %v16797_v30 }
 0x3bf   :  { %v8638_v40 = vrot.slane %v8637_v27, 4  ;;  %v12365_v54 = vcombine.low %v8595_v52, %v8605_v3  ;;  %v16827_v27 = vrot.slane %v8712_v58, 5  ;;  %v8503_v3 = vld [vmem:[#allocation2 + $0x5c] sm:$0x1] }
 0x3c1   :  { %v8643_v23 = vsel %vm15637_vm7, %v8638_v40, %v16794_v16 }
 0x3c4   :  { %14078 = vmatmul.mubr.bf16.gmra.mrb[0].mxu1 %v15067_v15  ;;  %v8498_v15 = vld [vmem:[#allocation2 + $0x48] sm:$0xf] }
 0x3c5   :  { %14081 = vmatprep.mubr.bf16.mxu1 %v15068_v7  ;;  %v8614_v7 = vrot.slane %v8613_v9, 4  ;;  %v8679_v0 = vshrl.u32 %v8498_v15, 16  ;;  %v8682_v62 = vshll.u32 %v8498_v15, 16  ;;  %v8504_v9 = vld [vmem:[#allocation2 + $0x60] sm:$0xf]  ;;  %v8718_v15 = vrot.slane %v8716_v50, 4 }
 0x3c7   :  { %v8681_v2 = vrot.slane %v8679_v0, 4  ;;  %v8684_v33 = vrot.slane %v8682_v62, 5 }
 0x3cc   :  { %14082 = vmatmul.mubr.bf16.gmra.mrb[4].mxu1 %v15069_v46  ;;  %v8624_v46 = vrot.slane %v8623_v28, 4  ;;  %v8736_v28 = vshll.u32 %v8505_v26, 16 }
 0x3cd   :  { %14085 = vmatprep.mubr.bf16.mxu1 %v15070_v18  ;;  %v8647_v18 = vor.u32 %v8646_v48, %v16794_v16  ;;  %v8740_v48 = vshrl.u32 %v8505_v26, 16  ;;  %v1031_v16 = vsel %vm15597_vm4, 0, %v1030_v21  ;;  %v8513_v21 = vld [vmem:[#allocation2 + $0x84] sm:$0xf] }
 0x3ce   :  { %v8629_v43 = vsel %vm15637_vm7, %v8624_v46, %v8628_v51  ;;  %1032 = vst [vmem:[#allocation2 + $0x1ac] sm:$0x1] %v1031_v16  ;;  %v8730_v46 = vshll.u32 %v8504_v9, 16  ;;  %v16829_v39 = vrot.slane %v8736_v28, 5  ;;  %v8510_v51 = vld [vmem:[#allocation2 + $0x78] sm:$0xf] }
 0x3cf   :  { %v8648_v36 = vrot.slane %v8647_v18, 4  ;;  %v8742_v18 = vrot.slane %v8740_v48, 4  ;;  %v8770_v16 = vshll.u32 %v8509_v24, 16 }
 0x3d4   :  { %14086 = vmatmul.mubr.bf16.gmra.mrb[8].mxu1 %v15072_v63  ;;  %v8650_v63 = vshll.u32 %v8494_v1, 16  ;;  %v16823_v1 = vrot.slane %v8671_v13, 4 }
 0x3d5   :  { %14089 = vmatprep.mubr.bf16.mxu1 %v15073_v11  ;;  %v8497_v11 = vld [vmem:[#allocation2 + $0x44] sm:$0x1] }
 0x3d6   :  { %v8674_v34 = vshll.u32 %v8497_v11, 16  ;;  %v8652_v61 = vrot.slane %v8650_v63, 5  ;;  %v8751_v63 = vshrl.u32 %v8507_v31, 16  ;;  %v8754_v11 = vshll.u32 %v8507_v31, 16 }
 0x3d8   :  { %v8653_v38 = vsel %vm15637_vm7, %v8648_v36, %v8652_v61  ;;  %v16817_v41 = vrot.slane %v8674_v34, 5  ;;  %v8708_v36 = vrot.slane %v8706_v5, 5  ;;  %v8743_v61 = vor.u32 %v8742_v18, %v16829_v39 }
 0x3d9   :  { %v8756_v13 = vrot.slane %v8754_v11, 5 }
 0x3da   :  { %v8677_v17 = vsel %vm15637_vm7, %v16823_v1, %v16817_v41  ;;  %v8744_v28 = vrot.slane %v8743_v61, 4  ;;  %v8516_v61 = vld [vmem:[#allocation2 + $0x90] sm:$0xf]  ;;  %v8515_v1 = vld [vmem:[#allocation2 + $0x8c] sm:$0x1] }
 0x3dc   :  { %14090 = vmatmul.mubr.bf16.gmra.mrb[12].mxu1 %v15074_v35  ;;  %v8657_v35 = vrot.slane %v8655_v29, 4  ;;  %v8685_v29 = vor.u32 %v8684_v33, %v8681_v2  ;;  %v8775_v2 = vshrl.u32 %v8510_v51, 16  ;;  %v8778_v33 = vshll.u32 %v8510_v51, 16 }
 0x3dd   :  { %14093 = vmatprep.mubr.bf16.mxu1 %v15075_v37  ;;  %v8660_v37 = vrot.slane %v8658_v42, 5  ;;  %v16825_v42 = vrot.slane %v8688_v6, 5  ;;  %v8784_v6 = vshll.u32 %v8511_v19, 16 }
 0x3de   :  { %v16839_v0 = vrot.slane %v8685_v29, 4  ;;  %v8512_v29 = vld [vmem:[#allocation2 + $0x80] sm:$0x1]  ;;  %v8780_v31 = vrot.slane %v8778_v33, 5 }
 0x3df   :  { %v8661_v25 = vor.u32 %v8660_v37, %v8657_v35  ;;  %v12367_v35 = vcombine.low %v8643_v23, %v8653_v38  ;;  %v8695_v62 = vor.u32 %v8694_v49, %v16825_v42  ;;  %v8722_v23 = vshll.u32 %v8503_v3, 16 }
 0x3e0   :  { %v8691_v26 = vsel %vm15637_vm7, %v16839_v0, %v16825_v42  ;;  %v8777_v49 = vrot.slane %v8775_v2, 4  ;;  %v8790_v42 = vrot.slane %v8788_v56, 4  ;;  %v8794_v51 = vshll.u32 %v8512_v29, 16  ;;  %v15087_v0 = vld [vmem:[#allocation8 + $0x210] sm:$0xff]  }
 0x3e1   :  { %v16819_v8 = vrot.slane %v8661_v25, 4  ;;  %v8753_v25 = vrot.slane %v8751_v63, 4 }
 0x3e3   :  { %v8667_v37 = vsel %vm15637_vm7, %v16819_v8, %v16797_v30  ;;  %v8757_v48 = vor.u32 %v8756_v13, %v8753_v25  ;;  %v8517_v25 = vld [vmem:[#allocation2 + $0x94] sm:$0xf]  ;;  %v8796_v8 = vrot.slane %v8794_v51, 5  ;;  %v15090_v51 = vld [vmem:[#allocation8 + $0x228] sm:$0xff]  }
 0x3e4   :  { %14094 = vmatmul.mubr.bf16.gmra.mrb[16].mxu1 %v15077_v12  ;;  %v15082_v12 = vld [vmem:[#allocation2 + $0x18c] sm:$0xff]  }
 0x3e5   :  { %14097 = vmatprep.mubr.bf16.mxu1 %v15078_v14  ;;  %v8619_v14 = vsel %vm15637_vm7, %v8614_v7, %v16790_v20  ;;  %v8508_v20 = vld [vmem:[#allocation2 + $0x70] sm:$0xf]  ;;  %v8727_v7 = vshrl.u32 %v8504_v9, 16 }
 0x3e6   :  { %v16810_v44 = vcombine.low %v8619_v14, %v8629_v43  ;;  %v8760_v55 = vshll.u32 %v8508_v20, 16  ;;  %v8764_v60 = vshrl.u32 %v8508_v20, 16  ;;  %v8705_v43 = vrot.slane %v8703_v57, 4  ;;  %v8506_v14 = vld [vmem:[#allocation2 + $0x68] sm:$0x1] }
 0x3e7   :  { %v8729_v34 = vrot.slane %v8727_v7, 4  ;;  %v8696_v20 = vrot.slane %v8695_v62, 4  ;;  %v8746_v50 = vshll.u32 %v8506_v14, 16  ;;  %v8724_v57 = vrot.slane %v8722_v23, 5  ;;  %v8522_v23 = vld [vmem:[#allocation2 + $0xa8] sm:$0xf] }
 0x3e8   :  { %v16842_v52 = vrot.slane %v8760_v55, 5  ;;  %v8766_v40 = vrot.slane %v8764_v60, 4  ;;  %v8709_v38 = vor.u32 %v8708_v36, %v8705_v43  ;;  %v8514_v55 = vld [vmem:[#allocation2 + $0x88] sm:$0xf]  ;;  %v8799_v60 = vshrl.u32 %v8513_v21, 16 }
 0x3e9   :  { %v8748_v63 = vrot.slane %v8746_v50, 5  ;;  %v8812_v36 = vshrl.u32 %v8514_v55, 16  ;;  %v8871_v29 = vshrl.u32 %v8522_v23, 16 }
 0x3ea   :  { %v8767_v53 = vor.u32 %v8766_v40, %v16842_v52  ;;  %v8781_v40 = vor.u32 %v8780_v31, %v8777_v49  ;;  %v16864_v3 = vrot.slane %v8799_v60, 4  ;;  %v8874_v49 = vshll.u32 %v8522_v23, 16  ;;  %v8525_v60 = vld [vmem:[#allocation2 + $0xb4] sm:$0xf] }
 0x3eb   :  { %v8749_v62 = vsel %vm15637_vm7, %v8744_v28, %v8748_v63  ;;  %v15089_v28 = vld [vmem:[#allocation8 + $0x220] sm:$0xff]  }
 0x3ec   :  { %14098 = vmatmul.mubr.bf16.gmra.mrb[20].mxu1 %v15079_v4  ;;  %v8500_v4 = vld [vmem:[#allocation2 + $0x50] sm:$0x1]  ;;  %v8768_v5 = vrot.slane %v8767_v53, 4  ;;  %v8782_v2 = vrot.slane %v8781_v40, 4  ;;  %v8832_v53 = vshll.u32 %v8517_v25, 16 }
 0x3ed   :  { %14101 = vmatprep.mubr.bf16.mxu1 %v15080_v10  ;;  %v15084_v10 = vld [vmem:[#allocation2 + $0x1a4] sm:$0xff]   ;;  %v8698_v32 = vshll.u32 %v8500_v4, 16  ;;  %v15086_v4 = vld [vmem:[#allocation8 + $0x208] sm:$0xff]  }
 0x3ee   :  { %v8526_v40 = vld [vmem:[#allocation2 + $0xb8] sm:$0xf] }
 0x3f4   :  { %14102 = vmatmul.mubr.bf16.gmra.mrb[24].mxu1 %v15082_v12  ;;  %v8732_v12 = vrot.slane %v8730_v46, 5  ;;  %v8710_v46 = vrot.slane %v8709_v38, 4 }
 0x3f5   :  { %14105 = vmatprep.mubr.bf16.mxu1 %v15083_v47  ;;  %v8719_v47 = vor.u32 %v8718_v15, %v16827_v27  ;;  %v8802_v15 = vshll.u32 %v8513_v21, 16 }
 0x3f6   :  { %v8733_v58 = vor.u32 %v8732_v12, %v8729_v34  ;;  %v12368_v34 = vcombine.low %v8667_v37, %v8677_v17  ;;  %v8519_v37 = vld [vmem:[#allocation2 + $0x9c] sm:$0xf]  ;;  %v8523_v17 = vld [vmem:[#allocation2 + $0xac] sm:$0xf] }
 0x3f7   :  { %v8720_v9 = vrot.slane %v8719_v47, 4  ;;  %v16866_v43 = vrot.slane %v8802_v15, 5  ;;  %v8715_v47 = vsel %vm15637_vm7, %v8710_v46, %v16827_v27  ;;  %v15088_v27 = vld [vmem:[#allocation8 + $0x218] sm:$0xff]   ;;  %v8847_v38 = vshrl.u32 %v8519_v37, 16  ;;  %v8521_v46 = vld [vmem:[#allocation2 + $0xa4] sm:$0x1] }
 0x3f8   :  { %v8734_v18 = vrot.slane %v8733_v58, 4  ;;  %v8850_v58 = vshll.u32 %v8519_v37, 16  ;;  %v16901_v15 = vrot.slane %v8832_v53, 5 }
 0x3f9   :  { %v8725_v11 = vsel %vm15637_vm7, %v8720_v9, %v8724_v57  ;;  %v8805_v56 = vor.u32 %v16866_v43, %v16864_v3  ;;  %v8884_v9 = vshrl.u32 %v8523_v17, 16  ;;  %v8518_v57 = vld [vmem:[#allocation2 + $0x98] sm:$0x1]  ;;  %v15092_v43 = vld [vmem:[#allocation8 + $0x238] sm:$0xff]  }
 0x3fa   :  { %v8739_v14 = vsel %vm15637_vm7, %v8734_v18, %v16829_v39  ;;  %v12370_v13 = vcombine.low %v8715_v47, %v8725_v11  ;;  %v8849_v18 = vrot.slane %v8847_v38, 4  ;;  %v8852_v63 = vrot.slane %v8850_v58, 5  ;;  %v8524_v47 = vld [vmem:[#allocation2 + $0xb0] sm:$0x1]  ;;  %v8527_v38 = vld [vmem:[#allocation2 + $0xbc] sm:$0x1] }
 0x3fb   :  { %v16884_v41 = vcombine.low %v8739_v14, %v8749_v62  ;;  %v8876_v62 = vrot.slane %v8874_v49, 5  ;;  %v8806_v53 = vrot.slane %v8805_v56, 4 }
 0x3fc   :  { %14106 = vmatmul.mubr.bf16.gmra.mrb[28].mxu1 %v15084_v10  ;;  %v16851_v10 = vrot.slane %v8784_v6, 5  ;;  %v8520_v6 = vld [vmem:[#allocation2 + $0xa0] sm:$0xf] }
 0x3fd   :  { %14125 = vmatprep.mubr.bf16.mxu1 %v12365_v54  ;;  %v8700_v54 = vrot.slane %v8698_v32, 5  ;;  %v8758_v32 = vrot.slane %v8757_v48, 4  ;;  %v8856_v50 = vshll.u32 %v8520_v6, 16  ;;  %v8860_v21 = vshrl.u32 %v8520_v6, 16 }
 0x3fe   :  { %v8787_v48 = vsel %vm15637_vm7, %v8782_v2, %v16851_v10  ;;  %v15091_v2 = vld [vmem:[#allocation8 + $0x230] sm:$0xff]   ;;  %v8890_v6 = vshll.u32 %v8524_v47, 16 }
 0x3ff   :  { %v8701_v7 = vsel %vm15637_vm7, %v8696_v20, %v8700_v54  ;;  %v8763_v30 = vsel %vm15637_vm7, %v8758_v32, %v16842_v52  ;;  %v8823_v54 = vshrl.u32 %v8516_v61, 16  ;;  %v8826_v52 = vshll.u32 %v8516_v61, 16 }
 0x400   :  { %v12369_v12 = vcombine.low %v8691_v26, %v8701_v7  ;;  %v8814_v26 = vrot.slane %v8812_v36, 4  ;;  %v8836_v20 = vshrl.u32 %v8517_v25, 16  ;;  %v8862_v11 = vrot.slane %v8860_v21, 4 }
 0x401   :  { %v8853_v25 = vor.u32 %v8852_v63, %v8849_v18 }
 0x402   :  { %v8838_v7 = vrot.slane %v8836_v20, 4 }
 0x403   :  { %v8854_v56 = vrot.slane %v8853_v25, 4 }
 0x404   :  { %14126 = vmatmul.mubr.bf16.vlgmr.msra.gmra.mrb[32].mxu1 %v16810_v44  ;;  %v8772_v44 = vrot.slane %v8770_v16, 5  ;;  %v8818_v16 = vshll.u32 %v8515_v1, 16  ;;  %v8839_v61 = vor.u32 %v8838_v7, %v16901_v15 }
 0x405   :  { %14190 = vmatpush3.bf16.msra.mxu1 %v16783_v59  ;;  %14129 = vmatprep.mubr.bf16.mxu1 %v12367_v35  ;;  %v8791_v59 = vor.u32 %v8790_v42, %v16851_v10  ;;  %v8808_v35 = vshll.u32 %v8514_v55, 16  ;;  %v8828_v55 = vrot.slane %v8826_v52, 5  ;;  %v16903_v10 = vrot.slane %v8856_v50, 5  ;;  %v8529_v52 = vld [vmem:[#allocation2 + $0xc4] sm:$0xf] }
 0x406   :  { %14191 = vmatprep.subr.bf16.mxu1 %v15086_v4  ;;  %v8773_v19 = vsel %vm15637_vm7, %v8768_v5, %v8772_v44  ;;  %v8825_v5 = vrot.slane %v8823_v54, 4  ;;  %v8886_v44 = vrot.slane %v8884_v9, 4  ;;  %v8840_v9 = vrot.slane %v8839_v61, 4 }
 0x407   :  { %v16889_v24 = vcombine.low %v8763_v30, %v8773_v19  ;;  %v8792_v33 = vrot.slane %v8791_v59, 4  ;;  %v16891_v39 = vrot.slane %v8808_v35, 5  ;;  %v8895_v59 = vshrl.u32 %v8525_v60, 16 }
 0x408   :  { %v8898_v35 = vshll.u32 %v8525_v60, 16  ;;  %v8829_v14 = vor.u32 %v8828_v55, %v8825_v5  ;;  %v8866_v30 = vshll.u32 %v8521_v46, 16  ;;  %v8914_v5 = vshll.u32 %v8527_v38, 16 }
 0x409   :  { %14192 = vmatpush3.bf16.msra.mxu1 %v15086_v4  ;;  %v8880_v4 = vshll.u32 %v8523_v17, 16  ;;  %v8797_v31 = vsel %vm15637_vm7, %v8792_v33, %v8796_v8  ;;  %v8815_v42 = vor.u32 %v8814_v26, %v16891_v39  ;;  %v8528_v8 = vld [vmem:[#allocation2 + $0xc0] sm:$0xf]  ;;  %v8904_v17 = vshll.u32 %v8526_v40, 16 }
 0x40a   :  { %14193 = vmatprep.subr.bf16.mxu1 %v15087_v0  ;;  %v12373_v19 = vcombine.low %v8787_v48, %v8797_v31  ;;  %v8897_v26 = vrot.slane %v8895_v59, 4  ;;  %v8900_v54 = vrot.slane %v8898_v35, 5  ;;  %v8919_v58 = vshrl.u32 %v8528_v8, 16 }
 0x40b   :  { %v16905_v32 = vrot.slane %v8880_v4, 5  ;;  %v16907_v36 = vrot.slane %v8815_v42, 4  ;;  %v8922_v50 = vshll.u32 %v8528_v8, 16  ;;  %v8830_v4 = vrot.slane %v8829_v14, 4 }
 0x40c   :  { %14130 = vmatmul.mubr.bf16.gmra.mrb[36].mxu1 %v12368_v34  ;;  %v16909_v34 = vrot.slane %v8818_v16, 5  ;;  %v8868_v48 = vrot.slane %v8866_v30, 5  ;;  %v16930_v49 = vrot.slane %v8904_v17, 5  ;;  %v8892_v42 = vrot.slane %v8890_v6, 5  ;;  %v8531_v17 = vld [vmem:[#allocation2 + $0xcc] sm:$0xf] }
 0x40d   :  { %14133 = vmatprep.mubr.bf16.mxu1 %v12369_v12  ;;  %14194 = vmatpush3.bf16.msra.mxu1 %v15087_v0  ;;  %v8873_v0 = vrot.slane %v8871_v29, 4  ;;  %v8842_v12 = vshll.u32 %v8518_v57, 16  ;;  %v8887_v37 = vor.u32 %v8886_v44, %v16905_v32  ;;  %v8901_v57 = vor.u32 %v8900_v54, %v8897_v26 }
 0x40e   :  { %14195 = vmatprep.subr.bf16.mxu1 %v15088_v27  ;;  %v8821_v20 = vsel %vm15637_vm7, %v16907_v36, %v16909_v34  ;;  %v8921_v55 = vrot.slane %v8919_v58, 4  ;;  %v8924_v60 = vrot.slane %v8922_v50, 5  ;;  %v8928_v7 = vshll.u32 %v8529_v52, 16  ;;  %v8535_v36 = vld [vmem:[#allocation2 + $0xf4] sm:$0xf] }
 0x40f   :  { %v8888_v29 = vrot.slane %v8887_v37, 4  ;;  %v8811_v46 = vsel %vm15637_vm7, %v8806_v53, %v16891_v39  ;;  %v8932_v18 = vshrl.u32 %v8529_v52, 16  ;;  %v8835_v39 = vsel %vm15637_vm7, %v8830_v4, %v16901_v15  ;;  %v16953_v34 = vld [vmem:[#allocation2 + $0x19c] sm:$0xf]  ;;  %v16962_v15 = vld [vmem:[#allocation2 + $0x1a0] sm:$0x1] }
 0x410   :  { %v8859_v35 = vsel %vm15637_vm7, %v8854_v56, %v16903_v10  ;;  %v8916_v14 = vrot.slane %v8914_v5, 5  ;;  %v8925_v61 = vor.u32 %v8924_v60, %v8921_v55  ;;  %v16960_v25 = vrot.slane %v8928_v7, 5  ;;  %v8537_v55 = vld [vmem:[#allocation2 + $0xfc] sm:$0xf]  ;;  %v8540_v60 = vld [vmem:[#allocation2 + $0x108] sm:$0xf] }
 0x411   :  { %14196 = vmatpush3.bf16.msra.mxu1 %v15088_v27  ;;  %v8908_v27 = vshrl.u32 %v8526_v40, 16  ;;  %v12374_v40 = vcombine.low %v8811_v46, %v8821_v20  ;;  %v8934_v37 = vrot.slane %v8932_v18, 4  ;;  %v8976_v52 = vshll.u32 %v8535_v36, 16 }
 0x412   :  { %14197 = vmatprep.subr.bf16.mxu1 %v15089_v28  ;;  %v8980_v53 = vshrl.u32 %v8535_v36, 16  ;;  %v10236_v20 = vrot.slane %v16953_v34, 5  ;;  %v16970_v38 = vrot.slane %v8925_v61, 4  ;;  %v8943_v58 = vshrl.u32 %v8531_v17, 16 }
 0x413   :  { %v8910_v3 = vrot.slane %v8908_v27, 4  ;;  %v8532_v27 = vld [vmem:[#allocation2 + $0xd0] sm:$0xf]  ;;  %v8946_v50 = vshll.u32 %v8531_v17, 16 }
 0x414   :  { %14134 = vmatmul.mubr.bf16.gmra.mrb[40].mxu1 %v12370_v13  ;;  %v16913_v1 = vpop.f32.mrb[96].mxu0  ;;  %v8863_v13 = vor.u32 %v8862_v11, %v16903_v10  ;;  %v8952_v4 = vshll.u32 %v8532_v27, 16  ;;  %v8982_v5 = vrot.slane %v8980_v53, 4 }
 0x415   :  { %14137 = vmatprep.mubr.bf16.mxu1 %v16884_v41  ;;  %14198 = vmatpush3.bf16.msra.mxu1 %v15089_v28  ;;  %17689 = vst [vmem:[#allocation16_spill] sm:$0xff] %v16913_v1  ;;  %v16917_v33 = vpop.f32.mrb[97].mxu0  ;;  %v8877_v41 = vor.u32 %v8876_v62, %v8873_v0  ;;  %v8844_v28 = vrot.slane %v8842_v12, 5  ;;  %v8530_v0 = vld [vmem:[#allocation2 + $0xc8] sm:$0x1] }
 0x416   :  { %14199 = vmatprep.subr.bf16.mxu1 %v15090_v51  ;;  %17690 = vst [vmem:[#allocation17_spill] sm:$0xff] %v16917_v33  ;;  %v16919_v23 = vpop.f32.mrb[98].mxu0  ;;  %v8864_v16 = vrot.slane %v8863_v13, 4  ;;  %v8534_v62 = vld [vmem:[#allocation2 + $0xf0] sm:$0xf] }
 0x417   :  { %17691 = vst [vmem:[#allocation18_spill] sm:$0xff] %v16919_v23  ;;  %v16928_v21 = vpop.f32.mrb[99].mxu0  ;;  %v8878_v31 = vrot.slane %v8877_v41, 4  ;;  %v8845_v63 = vsel %vm15637_vm7, %v8840_v9, %v8844_v28  ;;  %v8938_v41 = vshll.u32 %v8530_v0, 16  ;;  %v8967_v6 = vshrl.u32 %v8534_v62, 16 }
 0x418   :  { %17692 = vst [vmem:[#allocation19_spill] sm:$0xff] %v16928_v21  ;;  %v8869_v44 = vsel %vm15637_vm7, %v8864_v16, %v8868_v48  ;;  %v12375_v30 = vcombine.low %v8835_v39, %v8845_v63  ;;  %v8970_v26 = vshll.u32 %v8534_v62, 16  ;;  %v8956_v9 = vshrl.u32 %v8532_v27, 16  ;;  %v8538_v28 = vld [vmem:[#allocation2 + $0x100] sm:$0xf] }
 0x419   :  { %14200 = vmatpush3.bf16.msra.mxu1 %v15090_v51  ;;  %v8911_v51 = vor.u32 %v8910_v3, %v16930_v49  ;;  %v8883_v47 = vsel %vm15637_vm7, %v8878_v31, %v16905_v32  ;;  %v12376_v10 = vcombine.low %v8859_v35, %v8869_v44  ;;  %v9926_v32 = vld [vmem:[#allocation2 + $0x198] sm:$0xe]  ;;  %v10238_v16 = vrot.slane %v10236_v20, 4 }
 0x41a   :  { %14201 = vmatprep.subr.bf16.mxu1 %v15091_v2  ;;  %v12435_v48 = vrot.slane %v9926_v32, 9  ;;  %v8969_v56 = vrot.slane %v8967_v6, 4  ;;  %v8972_v31 = vrot.slane %v8970_v26, 5  ;;  %v8940_v63 = vrot.slane %v8938_v41, 5 }
 0x41b   :  { %v9000_v44 = vshll.u32 %v8538_v28, 16  ;;  %v8948_v39 = vrot.slane %v8946_v50, 5  ;;  %v16996_v35 = vrot.slane %v8952_v4, 5  ;;  %v8994_v27 = vshll.u32 %v8537_v55, 16  ;;  %v8539_v50 = vld [vmem:[#allocation2 + $0x104] sm:$0x1] }
 0x41c   :  { %14138 = vmatmul.mubr.bf16.gmra.mrb[44].mxu1 %v16889_v24  ;;  %v16938_v11 = vpop.f32.mrb[100].mxu0  ;;  %v8893_v24 = vsel %vm15637_vm7, %v8888_v29, %v8892_v42  ;;  %v10239_v29 = vrot.slane %v16962_v15, 5  ;;  %v16984_v7 = vsel %vm16459_vm14, %v12435_v48, %v10236_v20  ;;  %v8973_v61 = vor.u32 %v8972_v31, %v8969_v56  ;;  %v8543_v4 = vld [vmem:[#allocation2 + $0x114] sm:$0xf] }
 0x41d   :  { %14141 = vmatprep.mubr.bf16.mxu1 %v12373_v19  ;;  %14202 = vmatpush3.bf16.msra.mxu1 %v15091_v2  ;;  %17693 = vst [vmem:[#allocation20_spill] sm:$0xff] %v16938_v11  ;;  %v16948_v59 = vpop.f32.mrb[101].mxu0  ;;  %v8902_v19 = vrot.slane %v8901_v57, 4  ;;  %v12377_v13 = vcombine.low %v8883_v47, %v8893_v24  ;;  %v8912_v2 = vrot.slane %v8911_v51, 4  ;;  %v16980_v57 = vrot.slane %v8976_v52, 5 }
 0x41e   :  { %14203 = vmatprep.subr.bf16.mxu1 %v15092_v43  ;;  %17694 = vst [vmem:[#allocation21_spill] sm:$0xff] %v16948_v59  ;;  %v16955_v12 = vpop.f32.mrb[102].mxu0  ;;  %v16988_v46 = vsel %vm16459_vm14, %v10238_v16, %v10239_v29  ;;  %v9004_v24 = vshrl.u32 %v8538_v28, 16  ;;  %v8541_v51 = vld [vmem:[#allocation2 + $0x10c] sm:$0xf]  ;;  %v16999_v6 = vrot.slane %v9000_v44, 5 }
 0x41f   :  { %17695 = vst [vmem:[#allocation22_spill] sm:$0xff] %v16955_v12  ;;  %v16964_v8 = vpop.f32.mrb[103].mxu0  ;;  %v8907_v54 = vsel %vm15637_vm7, %v8902_v19, %v16930_v49  ;;  %v8917_v49 = vsel %vm15637_vm7, %v8912_v2, %v8916_v14  ;;  %v8958_v19 = vrot.slane %v8956_v9, 4  ;;  %v8533_v14 = vld [vmem:[#allocation2 + $0xd4] sm:$0x1]  ;;  %v8983_v17 = vor.u32 %v8982_v5, %v16980_v57 }
 0x420   :  { %17696 = vst [vmem:[#allocation23_spill] sm:$0xff] %v16964_v8  ;;  %v12378_v36 = vcombine.low %v8907_v54, %v8917_v49  ;;  %v9024_v2 = vshll.u32 %v8541_v51, 16  ;;  %v9028_v41 = vshrl.u32 %v8541_v51, 16  ;;  %v9006_v26 = vrot.slane %v9004_v24, 4  ;;  %v8542_v5 = vld [vmem:[#allocation2 + $0x110] sm:$0x1] }
 0x421   :  { %14204 = vmatpush3.bf16.msra.mxu1 %v15092_v43  ;;  %v8935_v43 = vor.u32 %v8934_v37, %v16960_v25  ;;  %v8536_v37 = vld [vmem:[#allocation2 + $0xf8] sm:$0x1]  ;;  %v9015_v32 = vshrl.u32 %v8540_v60, 16  ;;  %v9018_v52 = vshll.u32 %v8540_v60, 16  ;;  %v8931_v54 = vsel %vm15637_vm7, %v16970_v38, %v16960_v25 }
 0x422   :  { %v8959_v20 = vor.u32 %v8958_v19, %v16996_v35  ;;  %v8974_v28 = vrot.slane %v8973_v61, 4  ;;  %v8986_v48 = vshll.u32 %v8536_v37, 16  ;;  %v8984_v49 = vrot.slane %v8983_v17, 4 }
 0x423   :  { %v8936_v47 = vrot.slane %v8935_v43, 4  ;;  %v8996_v43 = vrot.slane %v8994_v27, 5  ;;  %v17012_v25 = vrot.slane %v9024_v2, 5  ;;  %v9030_v38 = vrot.slane %v9028_v41, 4  ;;  %v8547_v2 = vld [vmem:[#allocation2 + $0x124] sm:$0xf] }
 0x424   :  { %14142 = vmatmul.mubr.bf16.gmra.mrb[48].mxu1 %v12374_v40  ;;  %v16973_v3 = vpop.f32.mrb[104].mxu0  ;;  %v8945_v40 = vrot.slane %v8943_v58, 4  ;;  %v8962_v58 = vshll.u32 %v8533_v14, 16  ;;  %v9007_v31 = vor.u32 %v9006_v26, %v16999_v6  ;;  %v9020_v60 = vrot.slane %v9018_v52, 5 }
 0x425   :  { %14145 = vmatprep.mubr.bf16.mxu1 %v12375_v30  ;;  %17697 = vst [vmem:[#allocation24_spill] sm:$0xff] %v16973_v3  ;;  %v16978_v42 = vpop.f32.mrb[105].mxu0  ;;  %v8991_v30 = vshrl.u32 %v8537_v55, 16  ;;  %v9017_v55 = vrot.slane %v9015_v32, 4  ;;  %v8960_v51 = vrot.slane %v8959_v20, 4  ;;  %v9010_v14 = vshll.u32 %v8539_v50, 16 }
 0x426   :  { %17698 = vst [vmem:[#allocation25_spill] sm:$0xff] %v16978_v42  ;;  %v16990_v18 = vpop.f32.mrb[106].mxu0  ;;  %v8949_v53 = vor.u32 %v8948_v39, %v8945_v40  ;;  %v8964_v40 = vrot.slane %v8962_v58, 5  ;;  %v9042_v39 = vshll.u32 %v8543_v4, 16  ;;  %v9031_v17 = vor.u32 %v9030_v38, %v17012_v25  ;;  %v8545_v20 = vld [vmem:[#allocation2 + $0x11c] sm:$0x1] }
 0x427   :  { %17699 = vst [vmem:[#allocation26_spill] sm:$0xff] %v16990_v18  ;;  %v16994_v62 = vpop.f32.mrb[107].mxu0  ;;  %v8993_v16 = vrot.slane %v8991_v30, 4  ;;  %v8979_v30 = vsel %vm15637_vm7, %v8974_v28, %v16980_v57  ;;  %v9008_v26 = vrot.slane %v9007_v31, 4  ;;  %v9021_v32 = vor.u32 %v9020_v60, %v9017_v55 }
 0x428   :  { %17700 = vst [vmem:[#allocation27_spill] sm:$0xff] %v16994_v62  ;;  %v8950_v24 = vrot.slane %v8949_v53, 4  ;;  %v9034_v52 = vshll.u32 %v8542_v5, 16  ;;  %v8965_v57 = vsel %vm15637_vm7, %v8960_v51, %v8964_v40  ;;  %v9044_v50 = vrot.slane %v9042_v39, 5  ;;  %v17187_v62 = vld [vmem:[#allocation2 + $0x17c] sm:$0x1] }
 0x429   :  { %v8997_v37 = vor.u32 %v8996_v43, %v8993_v16  ;;  %v9076_v16 = vshrl.u32 %v8547_v2, 16  ;;  %v9022_v51 = vrot.slane %v9021_v32, 4  ;;  %v17052_v32 = vld [vmem:[#allocation2 + $0x128] sm:$0x1] }
 0x42a   :  { %v8955_v53 = vsel %vm15637_vm7, %v8950_v24, %v16996_v35  ;;  %v9036_v40 = vrot.slane %v9034_v52, 5 }
 0x42b   :  { %v12380_v31 = vcombine.low %v8955_v53, %v8965_v57  ;;  %v8998_v60 = vrot.slane %v8997_v37, 4  ;;  %v9027_v57 = vsel %vm15637_vm7, %v9022_v51, %v17012_v25  ;;  %v17067_v25 = vld [vmem:[#allocation2 + $0x134] sm:$0x1] }
 0x42c   :  { %14146 = vmatmul.mubr.bf16.gmra.mrb[52].mxu1 %v12376_v10  ;;  %v8941_v10 = vsel %vm15637_vm7, %v8936_v47, %v8940_v63  ;;  %v17008_v9 = vpop.f32.mrb[108].mxu0  ;;  %v9039_v63 = vshrl.u32 %v8543_v4, 16  ;;  %v8988_v47 = vrot.slane %v8986_v48, 5  ;;  %v8549_v4 = vld [vmem:[#allocation2 + $0x12c] sm:$0xf]  ;;  %v9072_v48 = vshll.u32 %v8547_v2, 16 }
 0x42d   :  { %14149 = vmatprep.mubr.bf16.mxu1 %v12377_v13  ;;  %17701 = vst [vmem:[#allocation28_spill] sm:$0xff] %v17008_v9  ;;  %v8544_v13 = vld [vmem:[#allocation2 + $0x118] sm:$0xf]  ;;  %v17010_v29 = vpop.f32.mrb[109].mxu0  ;;  %v12379_v19 = vcombine.low %v8931_v54, %v8941_v10  ;;  %v8546_v54 = vld [vmem:[#allocation2 + $0x120] sm:$0xf] }
 0x42e   :  { %17702 = vst [vmem:[#allocation29_spill] sm:$0xff] %v17010_v29  ;;  %v17014_v56 = vpop.f32.mrb[110].mxu0  ;;  %v9048_v61 = vshll.u32 %v8544_v13, 16  ;;  %v9052_v27 = vshrl.u32 %v8544_v13, 16  ;;  %v8989_v41 = vsel %vm15637_vm7, %v8984_v49, %v8988_v47  ;;  %v9041_v58 = vrot.slane %v9039_v63, 4 }
 0x42f   :  { %17703 = vst [vmem:[#allocation30_spill] sm:$0xff] %v17014_v56  ;;  %v17017_v44 = vpop.f32.mrb[111].mxu0  ;;  %v9012_v10 = vrot.slane %v9010_v14, 5  ;;  %v9032_v49 = vrot.slane %v9031_v17, 4  ;;  %v9063_v38 = vshrl.u32 %v8546_v54, 16  ;;  %v9066_v35 = vshll.u32 %v8546_v54, 16 }
 0x430   :  { %17704 = vst [vmem:[#allocation31_spill] sm:$0xff] %v17017_v44  ;;  %v17032_v28 = vrot.slane %v9048_v61, 5  ;;  %v9054_v43 = vrot.slane %v9052_v27, 4  ;;  %v12381_v5 = vcombine.low %v8979_v30, %v8989_v41  ;;  %v9045_v39 = vor.u32 %v9044_v50, %v9041_v58  ;;  %v17042_v47 = vld [vmem:[#allocation2 + $0x130] sm:$0xf] }
 0x431   :  { %v9013_v63 = vsel %vm15637_vm7, %v9008_v26, %v9012_v10  ;;  %v17044_v14 = vrot.slane %v9072_v48, 5  ;;  %v9078_v61 = vrot.slane %v9076_v16, 4  ;;  %v9087_v17 = vshrl.u32 %v8549_v4, 16  ;;  %v8552_v58 = vld [vmem:[#allocation2 + $0x138] sm:$0xf] }
 0x432   :  { %v9090_v27 = vshll.u32 %v8549_v4, 16  ;;  %v9037_v30 = vsel %vm15637_vm7, %v9032_v49, %v9036_v40  ;;  %v9055_v37 = vor.u32 %v9054_v43, %v17032_v28  ;;  %v9065_v2 = vrot.slane %v9063_v38, 4  ;;  %v17059_v50 = vld [vmem:[#allocation2 + $0x13c] sm:$0xf]  ;;  %v8555_v49 = vld [vmem:[#allocation2 + $0x144] sm:$0xf] }
 0x433   :  { %v9068_v41 = vrot.slane %v9066_v35, 5  ;;  %v9003_v26 = vsel %vm15637_vm7, %v8998_v60, %v16999_v6  ;;  %v9096_v52 = vshll.u32 %v17042_v47, 16  ;;  %v9100_v54 = vshrl.u32 %v17042_v47, 16  ;;  %v17069_v60 = vld [vmem:[#allocation2 + $0x148] sm:$0xf] }
 0x434   :  { %14150 = vmatmul.mubr.bf16.gmra.mrb[56].mxu1 %v12378_v36  ;;  %v17030_v36 = vpop.f32.mrb[112].mxu0  ;;  %v12382_v53 = vcombine.low %v9003_v26, %v9013_v63  ;;  %v12383_v4 = vcombine.low %v9027_v57, %v9037_v30  ;;  %v9079_v6 = vor.u32 %v9078_v61, %v17044_v14  ;;  %v9089_v48 = vrot.slane %v9087_v17, 4 }
 0x435   :  { %14153 = vmatprep.mubr.bf16.mxu1 %v12379_v19  ;;  %17705 = vst [vmem:[#allocation32_spill] sm:$0xff] %v17030_v36  ;;  %v17034_v13 = vpop.f32.mrb[113].mxu0  ;;  %v9058_v19 = vshll.u32 %v8545_v20, 16  ;;  %v9046_v20 = vrot.slane %v9045_v39, 4  ;;  %v9092_v16 = vrot.slane %v9090_v27, 5  ;;  %v9056_v38 = vrot.slane %v9055_v37, 4 }
 0x436   :  { %17706 = vst [vmem:[#allocation33_spill] sm:$0xff] %v17034_v13  ;;  %v17036_v55 = vpop.f32.mrb[114].mxu0  ;;  %v17073_v51 = vrot.slane %v9096_v52, 5  ;;  %v9102_v40 = vrot.slane %v9100_v54, 4  ;;  %v9120_v39 = vshll.u32 %v17059_v50, 16  ;;  %v9124_v61 = vshrl.u32 %v17059_v50, 16 }
 0x437   :  { %17707 = vst [vmem:[#allocation34_spill] sm:$0xff] %v17036_v55  ;;  %v17040_v24 = vpop.f32.mrb[115].mxu0  ;;  %v9060_v35 = vrot.slane %v9058_v19, 5  ;;  %v9111_v27 = vshrl.u32 %v8552_v58, 16  ;;  %v9114_v19 = vshll.u32 %v8552_v58, 16  ;;  %v9135_v30 = vshrl.u32 %v8555_v49, 16 }
 0x438   :  { %17708 = vst [vmem:[#allocation35_spill] sm:$0xff] %v17040_v24  ;;  %v9138_v37 = vshll.u32 %v8555_v49, 16  ;;  %v9144_v26 = vshll.u32 %v17069_v60, 16  ;;  %v9148_v57 = vshrl.u32 %v17069_v60, 16  ;;  %v9051_v52 = vsel %vm15637_vm7, %v9046_v20, %v17032_v28  ;;  %v8564_v24 = vld [vmem:[#allocation2 + $0x168] sm:$0xf] }
 0x439   :  { %v9061_v54 = vsel %vm15637_vm7, %v9056_v38, %v9060_v35  ;;  %v9103_v58 = vor.u32 %v9102_v40, %v17073_v51  ;;  %v9106_v49 = vshll.u32 %v17067_v25, 16  ;;  %v17096_v35 = vld [vmem:[#allocation2 + $0x140] sm:$0x1] }
 0x43a   :  { %v9140_v28 = vrot.slane %v9138_v37, 5  ;;  %v12384_v40 = vcombine.low %v9051_v52, %v9061_v54  ;;  %v9130_v54 = vshll.u32 %v17096_v35, 16 }
 0x43b   :  { %v9108_v37 = vrot.slane %v9106_v49, 5 }
 0x43c   :  { %14154 = vmatmul.mubr.bf16.gmra.mrb[60].mxu1 %v12380_v31  ;;  %v17061_v10 = vpop.f32.mrb[116].mxu0  ;;  %v9069_v31 = vor.u32 %v9068_v41, %v9065_v2  ;;  %v9080_v2 = vrot.slane %v9079_v6, 4  ;;  %v9093_v41 = vor.u32 %v9092_v16, %v9089_v48  ;;  %v17088_v6 = vrot.slane %v9120_v39, 5  ;;  %v17090_v16 = vld [vmem:[#allocation2 + $0x154] sm:$0xf] }
 0x43d   :  { %14157 = vmatprep.mubr.bf16.mxu1 %v12381_v5  ;;  %17709 = vst [vmem:[#allocation36_spill] sm:$0xff] %v17061_v10  ;;  %v17064_v43 = vpop.f32.mrb[117].mxu0  ;;  %v9082_v5 = vshll.u32 %v17052_v32, 16  ;;  %v9126_v48 = vrot.slane %v9124_v61, 4  ;;  %v9137_v10 = vrot.slane %v9135_v30, 4  ;;  %v9104_v30 = vrot.slane %v9103_v58, 4 }
 0x43e   :  { %17710 = vst [vmem:[#allocation37_spill] sm:$0xff] %v17064_v43  ;;  %v17071_v63 = vpop.f32.mrb[118].mxu0  ;;  %v9070_v0 = vrot.slane %v9069_v31, 4  ;;  %v9116_v43 = vrot.slane %v9114_v19, 5  ;;  %v17098_v31 = vrot.slane %v9144_v26, 5 }
 0x43f   :  { %17711 = vst [vmem:[#allocation38_spill] sm:$0xff] %v17071_v63  ;;  %v17077_v17 = vpop.f32.mrb[119].mxu0  ;;  %v9084_v63 = vrot.slane %v9082_v5, 5  ;;  %v9150_v5 = vrot.slane %v9148_v57, 4  ;;  %v8558_v61 = vld [vmem:[#allocation2 + $0x150] sm:$0xf] }
 0x440   :  { %17712 = vst [vmem:[#allocation39_spill] sm:$0xff] %v17077_v17  ;;  %v9113_v17 = vrot.slane %v9111_v27, 4  ;;  %v9172_v27 = vshrl.u32 %v17090_v16, 16  ;;  %v9159_v49 = vshrl.u32 %v8558_v61, 16 }
 0x441   :  { %v9085_v20 = vsel %vm15637_vm7, %v9080_v2, %v9084_v63  ;;  %v9075_v63 = vsel %vm15637_vm7, %v9070_v0, %v17044_v14  ;;  %v9127_v2 = vor.u32 %v9126_v48, %v17088_v6  ;;  %v17118_v14 = vld [vmem:[#allocation2 + $0x14c] sm:$0x1]  ;;  %v9151_v58 = vor.u32 %v9150_v5, %v17098_v31 }
 0x442   :  { %v12385_v26 = vcombine.low %v9075_v63, %v9085_v20  ;;  %v9117_v52 = vor.u32 %v9116_v43, %v9113_v17  ;;  %v9162_v48 = vshll.u32 %v8558_v61, 16  ;;  %v9174_v20 = vrot.slane %v9172_v27, 4  ;;  %v17125_v17 = vld [vmem:[#allocation2 + $0x16c] sm:$0xf] }
 0x443   :  { %v9154_v27 = vshll.u32 %v17118_v14, 16  ;;  %v9161_v13 = vrot.slane %v9159_v49, 4 }
 0x444   :  { %14158 = vmatmul.mubr.bf16.gmra.mrb[0].mxu1 %v12382_v53  ;;  %v17094_v38 = vpop.f32.mrb[120].mxu0  ;;  %v9094_v53 = vrot.slane %v9093_v41, 4  ;;  %v17110_v41 = vld [vmem:[#allocation2 + $0x160] sm:$0xf]  ;;  %v9118_v61 = vrot.slane %v9117_v52, 4  ;;  %v9164_v36 = vrot.slane %v9162_v48, 5 }
 0x445   :  { %14161 = vmatprep.mubr.bf16.mxu1 %v12383_v4  ;;  %17713 = vst [vmem:[#allocation40_spill] sm:$0xff] %v17094_v38  ;;  %v17100_v39 = vpop.f32.mrb[121].mxu0  ;;  %v9168_v4 = vshll.u32 %v17090_v16, 16  ;;  %v8561_v38 = vld [vmem:[#allocation2 + $0x15c] sm:$0xf]  ;;  %v9192_v63 = vshll.u32 %v17110_v41, 16 }
 0x446   :  { %17714 = vst [vmem:[#allocation41_spill] sm:$0xff] %v17100_v39  ;;  %v17107_v19 = vpop.f32.mrb[122].mxu0  ;;  %v9141_v39 = vor.u32 %v9140_v28, %v9137_v10  ;;  %v9099_v0 = vsel %vm15637_vm7, %v9094_v53, %v17073_v51  ;;  %v9196_v43 = vshrl.u32 %v17110_v41, 16  ;;  %v9109_v10 = vsel %vm15637_vm7, %v9104_v30, %v9108_v37  ;;  %v17129_v28 = vld [vmem:[#allocation2 + $0x158] sm:$0x1] }
 0x447   :  { %17715 = vst [vmem:[#allocation42_spill] sm:$0xff] %v17107_v19  ;;  %v17112_v57 = vpop.f32.mrb[123].mxu0  ;;  %v17121_v19 = vrot.slane %v9168_v4, 5  ;;  %v9128_v51 = vrot.slane %v9127_v2, 4  ;;  %v9183_v53 = vshrl.u32 %v8561_v38, 16  ;;  %v9186_v5 = vshll.u32 %v8561_v38, 16 }
 0x448   :  { %17716 = vst [vmem:[#allocation43_spill] sm:$0xff] %v17112_v57  ;;  %v9132_v4 = vrot.slane %v9130_v54, 5  ;;  %v9142_v57 = vrot.slane %v9141_v39, 4  ;;  %v9220_v30 = vshrl.u32 %v17125_v17, 16  ;;  %v9152_v2 = vrot.slane %v9151_v58, 4 }
 0x449   :  { %v9175_v38 = vor.u32 %v9174_v20, %v17121_v19  ;;  %v9198_v52 = vrot.slane %v9196_v43, 4  ;;  %v9178_v49 = vshll.u32 %v17129_v28, 16  ;;  %v9185_v48 = vrot.slane %v9183_v53, 4 }
 0x44a   :  { %v9133_v39 = vsel %vm15637_vm7, %v9128_v51, %v9132_v4  ;;  %v12386_v44 = vcombine.low %v9099_v0, %v9109_v10  ;;  %v9156_v29 = vrot.slane %v9154_v27, 5  ;;  %v9207_v58 = vshrl.u32 %v8564_v24, 16 }
 0x44b   :  { %v9210_v20 = vshll.u32 %v8564_v24, 16  ;;  %v9165_v43 = vor.u32 %v9164_v36, %v9161_v13  ;;  %v9222_v4 = vrot.slane %v9220_v30, 4  ;;  %v9176_v10 = vrot.slane %v9175_v38, 4  ;;  %v17162_v13 = vld [vmem:[#allocation2 + $0x170] sm:$0x1] }
 0x44c   :  { %14162 = vmatmul.mubr.bf16.gmra.mrb[4].mxu1 %v12384_v40  ;;  %v17132_v55 = vpop.f32.mrb[124].mxu0  ;;  %v9216_v40 = vshll.u32 %v17125_v17, 16  ;;  %v9157_v0 = vsel %vm15637_vm7, %v9152_v2, %v9156_v29  ;;  %v9147_v24 = vsel %vm15637_vm7, %v9142_v57, %v17098_v31  ;;  %v17166_v2 = vld [vmem:[#allocation2 + $0x184] sm:$0xf] }
 0x44d   :  { %14165 = vmatprep.mubr.bf16.mxu1 %v12385_v26  ;;  %17717 = vst [vmem:[#allocation44_spill] sm:$0xff] %v17132_v55  ;;  %v17136_v37 = vpop.f32.mrb[125].mxu0  ;;  %v17139_v26 = vrot.slane %v9192_v63, 5  ;;  %v9188_v55 = vrot.slane %v9186_v5, 5  ;;  %v9123_v63 = vsel %vm15637_vm7, %v9118_v61, %v17088_v6  ;;  %v9180_v5 = vrot.slane %v9178_v49, 5 }
 0x44e   :  { %17718 = vst [vmem:[#allocation45_spill] sm:$0xff] %v17136_v37  ;;  %v17143_v54 = vpop.f32.mrb[126].mxu0  ;;  %v17148_v37 = vld [vmem:[#allocation2 + $0x164] sm:$0x1]  ;;  %v17153_v51 = vrot.slane %v9216_v40, 5  ;;  %v12387_v9 = vcombine.low %v9123_v63, %v9133_v39  ;;  %v9209_v61 = vrot.slane %v9207_v58, 4 }
 0x44f   :  { %17719 = vst [vmem:[#allocation46_spill] sm:$0xff] %v17143_v54  ;;  %v17146_v56 = vpop.f32.mrb[127].mxu0  ;;  %v8567_v54 = vld [vmem:[#allocation2 + $0x174] sm:$0xf]  ;;  %v9199_v53 = vor.u32 %v9198_v52, %v17139_v26  ;;  %v9189_v27 = vor.u32 %v9188_v55, %v9185_v48  ;;  %v9202_v36 = vshll.u32 %v17148_v37, 16  ;;  %v9212_v40 = vrot.slane %v9210_v20, 5 }
 0x450   :  { %17720 = vst [vmem:[#allocation47_spill] sm:$0xff] %v17146_v56  ;;  %v17164_v6 = vld [vmem:[#allocation2 + $0x178] sm:$0xf]  ;;  %v9231_v29 = vshrl.u32 %v8567_v54, 16  ;;  %v9234_v30 = vshll.u32 %v8567_v54, 16  ;;  %v9166_v38 = vrot.slane %v9165_v43, 4  ;;  %v9223_v31 = vor.u32 %v9222_v4, %v17153_v51 }
 0x451   :  { %v9181_v55 = vsel %vm15637_vm7, %v9176_v10, %v9180_v5  ;;  %v9200_v39 = vrot.slane %v9199_v53, 4  ;;  %v9244_v49 = vshrl.u32 %v17164_v6, 16  ;;  %v8570_v48 = vld [vmem:[#allocation2 + $0x180] sm:$0xf]  ;;  %v9204_v58 = vrot.slane %v9202_v36, 5 }
 0x452   :  { %v9226_v20 = vshll.u32 %v17162_v13, 16  ;;  %v9264_v63 = vshll.u32 %v17166_v2, 16  ;;  %v9268_v43 = vshrl.u32 %v17166_v2, 16  ;;  %v9213_v10 = vor.u32 %v9212_v40, %v9209_v61 }
 0x453   :  { %v9236_v53 = vrot.slane %v9234_v30, 5  ;;  %v9171_v5 = vsel %vm15637_vm7, %v9166_v38, %v17121_v19  ;;  %v9224_v56 = vrot.slane %v9223_v31, 4  ;;  %v9255_v36 = vshrl.u32 %v8570_v48, 16  ;;  %v17195_v30 = vld [vmem:[#allocation2 + $0x190] sm:$0xf] }
 0x454   :  { %14166 = vmatmul.mubr.bf16.gmra.mrb[8].mxu1 %v12386_v44  ;;  %v12388_v44 = vcombine.low %v9147_v24, %v9157_v0  ;;  %v17168_v52 = vpop.f32.mrb[64].mxu0  ;;  %v9190_v0 = vrot.slane %v9189_v27, 4  ;;  %v9233_v24 = vrot.slane %v9231_v29, 4  ;;  %v9258_v18 = vshll.u32 %v8570_v48, 16  ;;  %v8573_v27 = vld [vmem:[#allocation2 + $0x18c] sm:$0xf] }
 0x455   :  { %14169 = vmatprep.mubr.bf16.mxu1 %v12387_v9  ;;  %v17173_v57 = vpop.f32.mrb[65].mxu0  ;;  %v9240_v9 = vshll.u32 %v17164_v6, 16  ;;  %v12389_v42 = vcombine.low %v9171_v5, %v9181_v55  ;;  %v9205_v3 = vsel %vm15637_vm7, %v9200_v39, %v9204_v58  ;;  %v9246_v12 = vrot.slane %v9244_v49, 4  ;;  %v17205_v49 = vld [vmem:[#allocation2 + $0x188] sm:$0x1] }
 0x456   :  { %v17177_v54 = vpop.f32.mrb[66].mxu0  ;;  %v9228_v61 = vrot.slane %v9226_v20, 5  ;;  %v17193_v40 = vrot.slane %v9264_v63, 5  ;;  %v9270_v29 = vrot.slane %v9268_v43, 4  ;;  %v9195_v19 = vsel %vm15637_vm7, %v9190_v0, %v17139_v26  ;;  %v8576_v0 = vld [vmem:[#allocation2 + $0x198] sm:$0xf] }
 0x457   :  { %v17182_v4 = vpop.f32.mrb[67].mxu0  ;;  %v17191_v8 = vrot.slane %v9240_v9, 5  ;;  %v9214_v38 = vrot.slane %v9213_v10, 4  ;;  %v9237_v31 = vor.u32 %v9236_v53, %v9233_v24  ;;  %v9250_v55 = vshll.u32 %v17187_v62, 16 }
 0x458   :  { %v12390_v39 = vcombine.low %v9195_v19, %v9205_v3  ;;  %v9229_v9 = vsel %vm15637_vm7, %v9224_v56, %v9228_v61  ;;  %v9257_v48 = vrot.slane %v9255_v36, 4  ;;  %v9260_v58 = vrot.slane %v9258_v18, 5 }
 0x459   :  { %v9279_v63 = vshrl.u32 %v8573_v27, 16  ;;  %v9288_v26 = vshll.u32 %v17195_v30, 16  ;;  %v9292_v43 = vshrl.u32 %v17195_v30, 16  ;;  %v9271_v56 = vor.u32 %v9270_v29, %v17193_v40  ;;  %v8579_v29 = vld [vmem:[#allocation2 + $0x1a4] sm:$0xf] }
 0x45a   :  { %v9282_v10 = vshll.u32 %v8573_v27, 16  ;;  %v9312_v24 = vshll.u32 %v16953_v34, 16  ;;  %v9316_v53 = vshrl.u32 %v16953_v34, 16  ;;  %v9219_v18 = vsel %vm15637_vm7, %v9214_v38, %v17153_v51  ;;  %v17223_v27 = vld [vmem:[#allocation2 + $0x1a8] sm:$0xf] }
 0x45b   :  { %v9238_v5 = vrot.slane %v9237_v31, 4  ;;  %v9252_v36 = vrot.slane %v9250_v55, 5  ;;  %v9274_v61 = vshll.u32 %v17205_v49, 16  ;;  %v12391_v19 = vcombine.low %v9219_v18, %v9229_v9  ;;  %v17225_v31 = vld [vmem:[#allocation2 + $0x194] sm:$0x1] }
 0x45c   :  { %14170 = vmatmul.mubr.bf16.gmra.mrb[12].mxu1 %v12388_v44  ;;  %v17203_v44 = vpop.f32.mrb[68].mxu0  ;;  %v9261_v59 = vor.u32 %v9260_v58, %v9257_v48  ;;  %v9303_v11 = vshrl.u32 %v8576_v0, 16  ;;  %v9306_v21 = vshll.u32 %v8576_v0, 16  ;;  %v9281_v33 = vrot.slane %v9279_v63, 4 }
 0x45d   :  { %14173 = vmatprep.mubr.bf16.mxu1 %v12389_v42  ;;  %v17207_v20 = vpop.f32.mrb[69].mxu0  ;;  %v9247_v42 = vor.u32 %v9246_v12, %v17191_v8  ;;  %v9290_v34 = vrot.slane %v9288_v26, 5  ;;  %v9294_v1 = vrot.slane %v9292_v43, 4  ;;  %v9284_v51 = vrot.slane %v9282_v10, 5 }
 0x45e   :  { %v17212_v3 = vpop.f32.mrb[70].mxu0  ;;  %v9314_v38 = vrot.slane %v9312_v24, 5  ;;  %v9327_v55 = vshrl.u32 %v8579_v29, 16  ;;  %v9330_v9 = vshll.u32 %v8579_v29, 16  ;;  %v9336_v48 = vshll.u32 %v17223_v27, 16 }
 0x45f   :  { %17721 = vst [vmem:[#allocation48_spill] sm:$0xff] %v17212_v3  ;;  %v17220_v12 = vpop.f32.mrb[71].mxu0  ;;  %v9248_v23 = vrot.slane %v9247_v42, 4  ;;  %v9272_v3 = vrot.slane %v9271_v56, 4  ;;  %v9340_v58 = vshrl.u32 %v17223_v27, 16  ;;  %v9262_v0 = vrot.slane %v9261_v59, 4 }
 0x460   :  { %17722 = vst [vmem:[#allocation49_spill] sm:$0xff] %v17220_v12  ;;  %v9318_v12 = vrot.slane %v9316_v53, 4  ;;  %v9276_v18 = vrot.slane %v9274_v61, 5  ;;  %v9305_v63 = vrot.slane %v9303_v11, 4  ;;  %v9308_v26 = vrot.slane %v9306_v21, 5 }
 0x461   :  { %v9253_v43 = vsel %vm15637_vm7, %v9248_v23, %v9252_v36  ;;  %v9295_v10 = vor.u32 %v9294_v1, %v9290_v34  ;;  %v9285_v59 = vor.u32 %v9284_v51, %v9281_v33  ;;  %v9298_v61 = vshll.u32 %v17225_v31, 16  ;;  %v17249_v36 = vld [vmem:[#allocation2 + $0x1ac] sm:$0x1] }
 0x462   :  { %v9277_v24 = vsel %vm15637_vm7, %v9272_v3, %v9276_v18  ;;  %v9319_v11 = vor.u32 %v9318_v12, %v9314_v38  ;;  %v9332_v29 = vrot.slane %v9330_v9, 5  ;;  %v9267_v1 = vsel %vm15637_vm7, %v9262_v0, %v17193_v40 }
 0x463   :  { %v9309_v23 = vor.u32 %v9308_v26, %v9305_v63  ;;  %v9322_v3 = vshll.u32 %v16962_v15, 16  ;;  %v12393_v33 = vcombine.low %v9267_v1, %v9277_v24  ;;  %v9296_v51 = vrot.slane %v9295_v10, 4  ;;  %v15306_v63 = vld [vmem:[#allocation2 + $0x1c] sm:$0xf] }
 0x464   :  { %14174 = vmatmul.mubr.bf16.gmra.mrb[16].mxu1 %v12390_v39  ;;  %v17229_v42 = vpop.f32.mrb[72].mxu0  ;;  %v9243_v39 = vsel %vm15637_vm7, %v9238_v5, %v17191_v8  ;;  %v9338_v8 = vrot.slane %v9336_v48, 5  ;;  %v9342_v5 = vrot.slane %v9340_v58, 4  ;;  %v9300_v12 = vrot.slane %v9298_v61, 5 }
 0x465   :  { %14177 = vmatprep.mubr.bf16.mxu1 %v12391_v19  ;;  %17723 = vst [vmem:[#allocation50_spill] sm:$0xff] %v17229_v42  ;;  %v17236_v56 = vpop.f32.mrb[73].mxu0  ;;  %v9329_v19 = vrot.slane %v9327_v55, 4  ;;  %v12392_v42 = vcombine.low %v9243_v39, %v9253_v43  ;;  %v9320_v18 = vrot.slane %v9319_v11, 4  ;;  %v9286_v55 = vrot.slane %v9285_v59, 4 }
 0x466   :  { %v17240_v53 = vpop.f32.mrb[74].mxu0  ;;  %v9343_v48 = vor.u32 %v9342_v5, %v9338_v8  ;;  %v9346_v58 = vshll.u32 %v17249_v36, 16  ;;  %v9310_v39 = vrot.slane %v9309_v23, 4  ;;  %v9324_v43 = vrot.slane %v9322_v3, 5 }
 0x467   :  { %v17243_v21 = vpop.f32.mrb[75].mxu0  ;;  %v9333_v9 = vor.u32 %v9332_v29, %v9329_v19  ;;  %v9301_v15 = vsel %vm15637_vm7, %v9296_v51, %v9300_v12  ;;  %v10026_v26 = vrot.slane %v15306_v63, 5  ;;  %v9291_v10 = vsel %vm15637_vm7, %v9286_v55, %v9290_v34  ;;  %v9896_v34 = vld [vmem:[#allocation2 + $0x18] sm:$0xe]  ;;  %v15308_v55 = vld [vmem:[#allocation2 + $0x28] sm:$0xf] }
 0x468   :  { %17724 = vst [vmem:[#allocation51_spill] sm:$0xff] %v17243_v21  ;;  %v9325_v0 = vsel %vm15637_vm7, %v9320_v18, %v9324_v43  ;;  %v9344_v61 = vrot.slane %v9343_v48, 4  ;;  %v9348_v11 = vrot.slane %v9346_v58, 5  ;;  %v12394_v19 = vcombine.low %v9291_v10, %v9301_v15  ;;  %v9897_v10 = vld [vmem:[#allocation2 + $0x24] sm:$0xe] }
 0x469   :  { %v9334_v59 = vrot.slane %v9333_v9, 4  ;;  %v9315_v29 = vsel %vm15637_vm7, %v9310_v39, %v9314_v38  ;;  %v10028_v1 = vrot.slane %v10026_v26, 4  ;;  %v10033_v9 = vrot.slane %v15308_v55, 5 }
 0x46a   :  { %v12395_v5 = vcombine.low %v9315_v29, %v9325_v0  ;;  %v9349_v3 = vsel %vm15637_vm7, %v9344_v61, %v9348_v11  ;;  %v12405_v48 = vrot.slane %v9896_v34, 9  ;;  %v15093_v61 = vld [vmem:[#allocation9] sm:$0xff]   ;;  %v15094_v11 = vld [vmem:[#allocation9 + $0x8] sm:$0xff]   ;;  %v12406_v34 = vrot.slane %v9897_v10, 9 }
 0x46b   :  { %v9339_v23 = vsel %vm15637_vm7, %v9334_v59, %v9338_v8  ;;  %v15309_v8 = vld [vmem:[#allocation2 + $0x34] sm:$0xf]  ;;  %v10035_v63 = vrot.slane %v10033_v9, 4  ;;  %14269 = vmatprep.subr.bf16.mxu0 %v15093_v61 }
 0x46c   :  { %14178 = vmatmul.mubr.bf16.gmra.mrb[20].mxu1 %v12392_v42  ;;  %v17252_v21 = vpop.f32.mrb[76].mxu0  ;;  %v12396_v38 = vcombine.low %v9339_v23, %v9349_v3  ;;  %v10040_v43 = vrot.slane %v15309_v8, 5  ;;  %v10027_v15 = vsel %vm16459_vm14, %v12405_v48, %v10026_v26  ;;  %14270 = vmatpush3.bf16.msra.mxu0 %v15093_v61  ;;  %v15313_v8 = vld [vmem:[#allocation2 + $0x4c] sm:$0xf]  ;;  %v10034_v10 = vsel %vm16459_vm14, %v12406_v34, %v10033_v9 }
 0x46d   :  { %14181 = vmatprep.mubr.bf16.mxu1 %v12393_v33  ;;  %v17256_v40 = vpop.f32.mrb[77].mxu0  ;;  %v15307_v33 = vld [vmem:[#allocation2 + $0x20] sm:$0x1]  ;;  %14271 = vmatprep.subr.bf16.mxu0 %v15094_v11 }
 0x46e   :  { %v17260_v42 = vpop.f32.mrb[78].mxu0  ;;  %v10029_v51 = vrot.slane %v15307_v33, 5  ;;  %v10042_v59 = vrot.slane %v10040_v43, 4 }
 0x46f   :  { %v17264_v24 = vpop.f32.mrb[79].mxu0 }
 0x470   :  { %v10030_v58 = vsel %vm16459_vm14, %v10028_v1, %v10029_v51  ;;  %v15311_v1 = vld [vmem:[#allocation2 + $0x38] sm:$0x1]  ;;  %v15312_v51 = vld [vmem:[#allocation2 + $0x40] sm:$0xf]  ;;  %14272 = vmatpush3.bf16.msra.mxu0 %v15094_v11 }
 0x471   :  { %v12437_v0 = vcombine.low %v10027_v15, %v10030_v58  ;;  %v10043_v23 = vrot.slane %v15311_v1, 5  ;;  %v10047_v55 = vrot.slane %v15312_v51, 5  ;;  %v10054_v15 = vrot.slane %v15313_v8, 5  ;;  %v15314_v51 = vld [vmem:[#allocation2 + $0x44] sm:$0x1] }
 0x472   :  { %v10050_v8 = vrot.slane %v15314_v51, 5  ;;  %v15316_v11 = vld [vmem:[#allocation2 + $0x58] sm:$0xf] }
 0x473   :  { %v10044_v48 = vsel %vm16459_vm14, %v10042_v59, %v10043_v23  ;;  %v9899_v59 = vld [vmem:[#allocation2 + $0x3c] sm:$0xe]  ;;  %v10056_v1 = vrot.slane %v10054_v15, 4  ;;  %v15096_v23 = vld [vmem:[#allocation9 + $0x18] sm:$0xff]  }
 0x474   :  { %14182 = vmatmul.mubr.bf16.gmra.mrb[24].mxu1 %v12394_v19  ;;  %v17272_v12 = vpop.f32.mrb[80].mxu0  ;;  %v15310_v19 = vld [vmem:[#allocation2 + $0x2c] sm:$0x1] }
 0x475   :  { %14185 = vmatprep.mubr.bf16.mxu1 %v12395_v5  ;;  %v17274_v18 = vpop.f32.mrb[81].mxu0  ;;  %v10036_v29 = vrot.slane %v15310_v19, 5  ;;  %v9898_v5 = vld [vmem:[#allocation2 + $0x30] sm:$0xe] }
 0x476   :  { %v17278_v39 = vpop.f32.mrb[82].mxu0 }
 0x477   :  { %v17280_v45 = vpop.f32.mrb[83].mxu0  ;;  %v10037_v26 = vsel %vm16459_vm14, %v10035_v63, %v10036_v29 }
 0x478   :  { %v12438_v63 = vcombine.low %v10034_v10, %v10037_v26  ;;  %v12408_v26 = vrot.slane %v9899_v59, 9 }
 0x47a   :  { %v10048_v59 = vsel %vm16459_vm14, %v12408_v26, %v10047_v55 }
 0x47c   :  { %14186 = vmatmul.mubr.bf16.gmra.mrb[28].mxu1 %v12396_v38  ;;  %v17284_v3 = vpop.f32.mrb[84].mxu0  ;;  %v12407_v38 = vrot.slane %v9898_v5, 9  ;;  %v10049_v5 = vrot.slane %v10047_v55, 4 }
 0x47d   :  { %14205 = vmatprep.mubr.bf16.mxu1 %v12437_v0  ;;  %17725 = vst [vmem:[#allocation52_spill] sm:$0xff] %v17284_v3  ;;  %v17288_v33 = vpop.f32.mrb[85].mxu0  ;;  %v15095_v0 = vld [vmem:[#allocation9 + $0x10] sm:$0xff]  }
 0x47e   :  { %17726 = vst [vmem:[#allocation53_spill] sm:$0xff] %v17288_v33  ;;  %v17292_v58 = vpop.f32.mrb[86].mxu0  ;;  %v10041_v29 = vsel %vm16459_vm14, %v12407_v38, %v10040_v43  ;;  %14273 = vmatprep.subr.bf16.mxu0 %v15095_v0  ;;  %v15315_v33 = vld [vmem:[#allocation2 + $0x50] sm:$0x1]  ;;  %v10051_v43 = vsel %vm16459_vm14, %v10049_v5, %v10050_v8 }
 0x47f   :  { %17727 = vst [vmem:[#allocation54_spill] sm:$0xff] %v17292_v58  ;;  %v17296_v19 = vpop.f32.mrb[87].mxu0  ;;  %v12439_v61 = vcombine.low %v10041_v29, %v10044_v48  ;;  %v9900_v58 = vld [vmem:[#allocation2 + $0x48] sm:$0xe]  ;;  %v10057_v9 = vrot.slane %v15315_v33, 5  ;;  %v10061_v48 = vrot.slane %v15316_v11, 5  ;;  %14274 = vmatpush3.bf16.msra.mxu0 %v15095_v0  ;;  %v12440_v5 = vcombine.low %v10048_v59, %v10051_v43 }
 0x480   :  { %17728 = vst [vmem:[#allocation55_spill] sm:$0xff] %v17296_v19  ;;  %v12409_v10 = vrot.slane %v9900_v58, 9  ;;  %14275 = vmatprep.subr.bf16.mxu0 %v15096_v23  ;;  %v15097_v33 = vld [vmem:[#allocation9 + $0x20] sm:$0xff]   ;;  %v15098_v11 = vld [vmem:[#allocation9 + $0x28] sm:$0xff]   ;;  %v15319_v19 = vld [vmem:[#allocation2 + $0x68] sm:$0x1] }
 0x481   :  { %v10063_v58 = vrot.slane %v10061_v48, 4  ;;  %v10071_v55 = vrot.slane %v15319_v19, 5  ;;  %v15099_v19 = vld [vmem:[#allocation9 + $0x30] sm:$0xff]  }
 0x482   :  { %v10055_v8 = vsel %vm16459_vm14, %v12409_v10, %v10054_v15 }
 0x483   :  { %14276 = vmatpush3.bf16.msra.mxu0 %v15096_v23  ;;  %v15320_v23 = vld [vmem:[#allocation2 + $0x70] sm:$0xf] }
 0x484   :  { %14206 = vmatmul.mubr.bf16.vlgmr.msra.gmra.mrb[32].mxu1 %v12438_v63  ;;  %v17300_v34 = vpop.f32.mrb[88].mxu0  ;;  %v10058_v63 = vsel %vm16459_vm14, %v10056_v1, %v10057_v9  ;;  %v9901_v1 = vld [vmem:[#allocation2 + $0x54] sm:$0xe]  ;;  %14277 = vmatprep.subr.bf16.mxu0 %v15097_v33 }
 0x485   :  { %14209 = vmatprep.mubr.bf16.mxu1 %v12439_v61  ;;  %17729 = vst [vmem:[#allocation56_spill] sm:$0xff] %v17300_v34  ;;  %v17304_v38 = vpop.f32.mrb[89].mxu0  ;;  %v15317_v61 = vld [vmem:[#allocation2 + $0x64] sm:$0xf]  ;;  %v12441_v0 = vcombine.low %v10055_v8, %v10058_v63  ;;  %v12410_v43 = vrot.slane %v9901_v1, 9  ;;  %v10075_v63 = vrot.slane %v15320_v23, 5 }
 0x486   :  { %17730 = vst [vmem:[#allocation57_spill] sm:$0xff] %v17304_v38  ;;  %v17308_v29 = vpop.f32.mrb[90].mxu0  ;;  %v10068_v51 = vrot.slane %v15317_v61, 5  ;;  %v15318_v61 = vld [vmem:[#allocation2 + $0x5c] sm:$0x1] }
 0x487   :  { %17731 = vst [vmem:[#allocation58_spill] sm:$0xff] %v17308_v29  ;;  %v17312_v34 = vpop.f32.mrb[91].mxu0  ;;  %v10064_v29 = vrot.slane %v15318_v61, 5  ;;  %v9902_v38 = vld [vmem:[#allocation2 + $0x60] sm:$0xe]  ;;  %14278 = vmatpush3.bf16.msra.mxu0 %v15097_v33  ;;  %v10062_v1 = vsel %vm16459_vm14, %v12410_v43, %v10061_v48 }
 0x488   :  { %17732 = vst [vmem:[#allocation59_spill] sm:$0xff] %v17312_v34  ;;  %v10070_v9 = vrot.slane %v10068_v51, 4  ;;  %v12411_v59 = vrot.slane %v9902_v38, 9  ;;  %14279 = vmatprep.subr.bf16.mxu0 %v15098_v11  ;;  %v10077_v38 = vrot.slane %v10075_v63, 4  ;;  %v15322_v23 = vld [vmem:[#allocation2 + $0x74] sm:$0x1] }
 0x489   :  { %v10065_v15 = vsel %vm16459_vm14, %v10063_v58, %v10064_v29 }
 0x48a   :  { %v12442_v29 = vcombine.low %v10062_v1, %v10065_v15  ;;  %v10069_v58 = vsel %vm16459_vm14, %v12411_v59, %v10068_v51  ;;  %v15324_v15 = vld [vmem:[#allocation2 + $0x88] sm:$0xf]  ;;  %v15325_v59 = vld [vmem:[#allocation2 + $0x94] sm:$0xf] }
 0x48b   :  { %14280 = vmatpush3.bf16.msra.mxu0 %v15098_v11  ;;  %v10089_v1 = vrot.slane %v15324_v15, 5  ;;  %v15327_v15 = vld [vmem:[#allocation2 + $0x98] sm:$0x1] }
 0x48c   :  { %14210 = vmatmul.mubr.bf16.gmra.mrb[36].mxu1 %v12440_v5  ;;  %v17316_v26 = vpop.f32.mrb[92].mxu0  ;;  %v10072_v5 = vsel %vm16459_vm14, %v10070_v9, %v10071_v55  ;;  %v9903_v9 = vld [vmem:[#allocation2 + $0x6c] sm:$0xe]  ;;  %14281 = vmatprep.subr.bf16.mxu0 %v15099_v19 }
 0x48d   :  { %14213 = vmatprep.mubr.bf16.mxu1 %v12441_v0  ;;  %17733 = vst [vmem:[#allocation60_spill] sm:$0xff] %v17316_v26  ;;  %v17320_v10 = vpop.f32.mrb[93].mxu0  ;;  %v15321_v0 = vld [vmem:[#allocation2 + $0x7c] sm:$0xf]  ;;  %v12443_v33 = vcombine.low %v10069_v58, %v10072_v5  ;;  %v12412_v48 = vrot.slane %v9903_v9, 9  ;;  %v10096_v5 = vrot.slane %v15325_v59, 5 }
 0x48e   :  { %17734 = vst [vmem:[#allocation61_spill] sm:$0xff] %v17320_v10  ;;  %v17324_v8 = vpop.f32.mrb[94].mxu0  ;;  %v10082_v61 = vrot.slane %v15321_v0, 5  ;;  %v10078_v0 = vrot.slane %v15322_v23, 5  ;;  %v15323_v10 = vld [vmem:[#allocation2 + $0x80] sm:$0x1] }
 0x48f   :  { %17735 = vst [vmem:[#allocation62_spill] sm:$0xff] %v17324_v8  ;;  %v17328_v26 = vpop.f32.mrb[95].mxu0  ;;  %v9904_v8 = vld [vmem:[#allocation2 + $0x78] sm:$0xe]  ;;  %v10085_v34 = vrot.slane %v15323_v10, 5  ;;  %14282 = vmatpush3.bf16.msra.mxu0 %v15099_v19  ;;  %v10091_v9 = vrot.slane %v10089_v1, 4 }
 0x490   :  { %17736 = vst [vmem:[#allocation63_spill] sm:$0xff] %v17328_v26  ;;  %v10084_v55 = vrot.slane %v10082_v61, 4  ;;  %v10079_v43 = vsel %vm16459_vm14, %v10077_v38, %v10078_v0  ;;  %v12413_v51 = vrot.slane %v9904_v8, 9  ;;  %v9905_v38 = vld [vmem:[#allocation2 + $0x84] sm:$0xe]  ;;  %v10098_v23 = vrot.slane %v10096_v5, 4 }
 0x491   :  { %v15326_v19 = vld [vmem:[#allocation2 + $0x8c] sm:$0x1]  ;;  %v9906_v0 = vld [vmem:[#allocation2 + $0x90] sm:$0xe]  ;;  %v9911_v26 = vld [vmem:[#allocation2 + $0xcc] sm:$0xe] }
 0x492   :  { %v10086_v11 = vsel %vm16459_vm14, %v10084_v55, %v10085_v34  ;;  %v10083_v10 = vsel %vm16459_vm14, %v12413_v51, %v10082_v61  ;;  %v10092_v8 = vrot.slane %v15326_v19, 5  ;;  %v10099_v34 = vrot.slane %v15327_v15, 5  ;;  %v15329_v51 = vld [vmem:[#allocation2 + $0xac] sm:$0xf]  ;;  %v9907_v19 = vld [vmem:[#allocation2 + $0x9c] sm:$0xe] }
 0x493   :  { %v12414_v55 = vrot.slane %v9905_v38, 9  ;;  %v9908_v15 = vld [vmem:[#allocation2 + $0xa8] sm:$0xe] }
 0x494   :  { %14214 = vmatmul.mubr.bf16.gmra.mrb[40].mxu1 %v12442_v29  ;;  %v10076_v29 = vsel %vm16459_vm14, %v12412_v48, %v10075_v63  ;;  %v10093_v59 = vsel %vm16459_vm14, %v10091_v9, %v10092_v8  ;;  %v15328_v63 = vld [vmem:[#allocation2 + $0xa0] sm:$0xf]  ;;  %v10100_v61 = vsel %vm16459_vm14, %v10098_v23, %v10099_v34  ;;  %v15330_v8 = vld [vmem:[#allocation2 + $0xa4] sm:$0x1]  ;;  %v12416_v34 = vrot.slane %v9907_v19, 9 }
 0x495   :  { %14217 = vmatprep.mubr.bf16.mxu1 %v12443_v33  ;;  %v12444_v58 = vcombine.low %v10076_v29, %v10079_v43  ;;  %v12445_v33 = vcombine.low %v10083_v10, %v10086_v11  ;;  %v10103_v48 = vrot.slane %v15328_v63, 5  ;;  %v12415_v43 = vrot.slane %v9906_v0, 9  ;;  %v15331_v63 = vld [vmem:[#allocation2 + $0xb0] sm:$0x1] }
 0x496   :  { %v10110_v11 = vrot.slane %v15329_v51, 5  ;;  %v10090_v29 = vsel %vm16459_vm14, %v12414_v55, %v10089_v1  ;;  %v10106_v0 = vrot.slane %v15330_v8, 5  ;;  %v10113_v23 = vrot.slane %v15331_v63, 5  ;;  %v15332_v1 = vld [vmem:[#allocation2 + $0xb8] sm:$0xf] }
 0x497   :  { %v10097_v10 = vsel %vm16459_vm14, %v12415_v43, %v10096_v5  ;;  %v10105_v38 = vrot.slane %v10103_v48, 4  ;;  %v10117_v55 = vrot.slane %v15332_v1, 5  ;;  %v15333_v43 = vld [vmem:[#allocation2 + $0xc4] sm:$0xf]  ;;  %v9909_v8 = vld [vmem:[#allocation2 + $0xb4] sm:$0xe] }
 0x498   :  { %v10112_v9 = vrot.slane %v10110_v11, 4  ;;  %v9910_v63 = vld [vmem:[#allocation2 + $0xc0] sm:$0xe]  ;;  %v15335_v1 = vld [vmem:[#allocation2 + $0xd0] sm:$0xf]  ;;  %v12418_v3 = vrot.slane %v9909_v8, 9 }
 0x499   :  { %v10107_v51 = vsel %vm16459_vm14, %v10105_v38, %v10106_v0  ;;  %v10119_v19 = vrot.slane %v10117_v55, 4  ;;  %v15334_v0 = vld [vmem:[#allocation2 + $0xbc] sm:$0x1] }
 0x49a   :  { %v10114_v5 = vsel %vm16459_vm14, %v10112_v9, %v10113_v23  ;;  %v10131_v9 = vrot.slane %v15335_v1, 5  ;;  %v15336_v23 = vld [vmem:[#allocation2 + $0xc8] sm:$0x1] }
 0x49c   :  { %14218 = vmatmul.mubr.bf16.gmra.mrb[44].mxu1 %v12444_v58  ;;  %v12446_v58 = vcombine.low %v10090_v29, %v10093_v59  ;;  %v12417_v59 = vrot.slane %v9908_v15, 9  ;;  %v10104_v29 = vsel %vm16459_vm14, %v12416_v34, %v10103_v48  ;;  %v10120_v15 = vrot.slane %v15334_v0, 5 }
 0x49d   :  { %14221 = vmatprep.mubr.bf16.mxu1 %v12445_v33  ;;  %v12447_v33 = vcombine.low %v10097_v10, %v10100_v61  ;;  %v10124_v61 = vrot.slane %v15333_v43, 5  ;;  %v10127_v43 = vrot.slane %v15336_v23, 5  ;;  %v12419_v34 = vrot.slane %v9910_v63, 9  ;;  %v9912_v63 = vld [vmem:[#allocation2 + $0xf0] sm:$0xe] }
 0x49e   :  { %v10111_v10 = vsel %vm16459_vm14, %v12417_v59, %v10110_v11  ;;  %v10121_v48 = vsel %vm16459_vm14, %v10119_v19, %v10120_v15 }
 0x49f   :  { %v10126_v38 = vrot.slane %v10124_v61, 4  ;;  %v10125_v8 = vsel %vm16459_vm14, %v12419_v34, %v10124_v61  ;;  %v15341_v34 = vld [vmem:[#allocation2 + $0x10c] sm:$0xf] }
 0x4a1   :  { %v10128_v11 = vsel %vm16459_vm14, %v10126_v38, %v10127_v43 }
 0x4a2   :  { %v12451_v1 = vcombine.low %v10125_v8, %v10128_v11  ;;  %v10152_v11 = vrot.slane %v15341_v34, 5  ;;  %v15343_v8 = vld [vmem:[#allocation2 + $0x110] sm:$0x1] }
 0x4a4   :  { %14222 = vmatmul.mubr.bf16.gmra.mrb[48].mxu1 %v12446_v58  ;;  %v12448_v58 = vcombine.low %v10104_v29, %v10107_v51  ;;  %v15337_v51 = vld [vmem:[#allocation2 + $0xf4] sm:$0xf]  ;;  %v12420_v29 = vrot.slane %v9911_v26, 9 }
 0x4a5   :  { %14225 = vmatprep.mubr.bf16.mxu1 %v12447_v33  ;;  %v12449_v33 = vcombine.low %v10111_v10, %v10114_v5  ;;  %v10138_v59 = vrot.slane %v15337_v51, 5  ;;  %v10118_v5 = vsel %vm16459_vm14, %v12418_v3, %v10117_v55  ;;  %v15338_v10 = vld [vmem:[#allocation2 + $0xd4] sm:$0x1]  ;;  %v15339_v3 = vld [vmem:[#allocation2 + $0xf8] sm:$0x1] }
 0x4a6   :  { %v12450_v0 = vcombine.low %v10118_v5, %v10121_v48  ;;  %v10132_v38 = vsel %vm16459_vm14, %v12420_v29, %v10131_v9  ;;  %v10141_v26 = vrot.slane %v15339_v3, 5  ;;  %v15340_v55 = vld [vmem:[#allocation2 + $0x100] sm:$0xf]  ;;  %v12421_v48 = vrot.slane %v9912_v63, 9  ;;  %v9913_v29 = vld [vmem:[#allocation2 + $0xfc] sm:$0xe] }
 0x4a7   :  { %v10140_v19 = vrot.slane %v10138_v59, 4  ;;  %v10145_v23 = vrot.slane %v15340_v55, 5 }
 0x4a8   :  { %v10139_v51 = vsel %vm16459_vm14, %v12421_v48, %v10138_v59 }
 0x4a9   :  { %v10142_v61 = vsel %vm16459_vm14, %v10140_v19, %v10141_v26  ;;  %v15345_v26 = vld [vmem:[#allocation2 + $0x124] sm:$0xf] }
 0x4aa   :  { %v12453_v5 = vcombine.low %v10139_v51, %v10142_v61  ;;  %v10166_v55 = vrot.slane %v15345_v26, 5  ;;  %v9917_v26 = vld [vmem:[#allocation2 + $0x12c] sm:$0xe] }
 0x4ac   :  { %14226 = vmatmul.mubr.bf16.gmra.mrb[52].mxu1 %v12448_v58  ;;  %v10133_v58 = vrot.slane %v10131_v9, 4  ;;  %v10147_v9 = vrot.slane %v10145_v23, 4 }
 0x4ad   :  { %14229 = vmatprep.mubr.bf16.mxu1 %v12449_v33  ;;  %v10134_v33 = vrot.slane %v15338_v10, 5  ;;  %v15342_v10 = vld [vmem:[#allocation2 + $0x104] sm:$0x1] }
 0x4af   :  { %v10135_v15 = vsel %vm16459_vm14, %v10133_v58, %v10134_v33  ;;  %v10154_v58 = vrot.slane %v10152_v11, 4  ;;  %v10148_v33 = vrot.slane %v15342_v10, 5 }
 0x4b0   :  { %v12452_v43 = vcombine.low %v10132_v38, %v10135_v15  ;;  %v12422_v38 = vrot.slane %v9913_v29, 9  ;;  %v15344_v15 = vld [vmem:[#allocation2 + $0x118] sm:$0xf]  ;;  %v15346_v29 = vld [vmem:[#allocation2 + $0x11c] sm:$0x1] }
 0x4b1   :  { %v10149_v19 = vsel %vm16459_vm14, %v10147_v9, %v10148_v33  ;;  %v10159_v63 = vrot.slane %v15344_v15, 5  ;;  %v10168_v9 = vrot.slane %v10166_v55, 4  ;;  %v10162_v10 = vrot.slane %v15346_v29, 5  ;;  %v9916_v33 = vld [vmem:[#allocation2 + $0x120] sm:$0xe] }
 0x4b3   :  { %v10161_v51 = vrot.slane %v10159_v63, 4 }
 0x4b4   :  { %14230 = vmatmul.mubr.bf16.gmra.mrb[56].mxu1 %v12450_v0  ;;  %v9914_v0 = vld [vmem:[#allocation2 + $0x108] sm:$0xe] }
 0x4b5   :  { %14233 = vmatprep.mubr.bf16.mxu1 %v12451_v1  ;;  %v10155_v1 = vrot.slane %v15343_v8, 5  ;;  %v12423_v3 = vrot.slane %v9914_v0, 9  ;;  %v10163_v8 = vsel %vm16459_vm14, %v10161_v51, %v10162_v10 }
 0x4b7   :  { %v10156_v59 = vsel %vm16459_vm14, %v10154_v58, %v10155_v1  ;;  %v10153_v61 = vsel %vm16459_vm14, %v12423_v3, %v10152_v11  ;;  %v10169_v58 = vrot.slane %v17052_v32, 5  ;;  %v12425_v1 = vrot.slane %v9916_v33, 9  ;;  %v9919_v33 = vld [vmem:[#allocation2 + $0x144] sm:$0xe] }
 0x4b8   :  { %v12455_v34 = vcombine.low %v10153_v61, %v10156_v59  ;;  %v10183_v61 = vrot.slane %v17096_v35, 5 }
 0x4b9   :  { %v10170_v11 = vsel %vm16459_vm14, %v10168_v9, %v10169_v58  ;;  %v10167_v3 = vsel %vm16459_vm14, %v12425_v1, %v10166_v55  ;;  %v12428_v1 = vrot.slane %v9919_v33, 9 }
 0x4ba   :  { %v12457_v32 = vcombine.low %v10167_v3, %v10170_v11 }
 0x4bc   :  { %14234 = vmatmul.mubr.bf16.gmra.mrb[60].mxu1 %v12452_v43  ;;  %v10146_v43 = vsel %vm16459_vm14, %v12422_v38, %v10145_v23  ;;  %v10173_v23 = vrot.slane %v17042_v47, 5  ;;  %v10180_v38 = vrot.slane %v17059_v50, 5  ;;  %v10176_v47 = vrot.slane %v17067_v25, 5 }
 0x4bd   :  { %14237 = vmatprep.mubr.bf16.mxu1 %v12453_v5  ;;  %v12454_v48 = vcombine.low %v10146_v43, %v10149_v19  ;;  %v9915_v5 = vld [vmem:[#allocation2 + $0x114] sm:$0xe] }
 0x4be   :  { %v12424_v0 = vrot.slane %v9915_v5, 9  ;;  %v10175_v59 = vrot.slane %v10173_v23, 4  ;;  %v10182_v43 = vrot.slane %v10180_v38, 4  ;;  %v10194_v5 = vrot.slane %v17090_v16, 5 }
 0x4c0   :  { %v10160_v19 = vsel %vm16459_vm14, %v12424_v0, %v10159_v63  ;;  %v10177_v50 = vsel %vm16459_vm14, %v10175_v59, %v10176_v47  ;;  %v10187_v63 = vrot.slane %v17069_v60, 5  ;;  %v10184_v55 = vsel %vm16459_vm14, %v10182_v43, %v10183_v61  ;;  %v9920_v0 = vld [vmem:[#allocation2 + $0x150] sm:$0xe]  ;;  %v9921_v59 = vld [vmem:[#allocation2 + $0x15c] sm:$0xe] }
 0x4c1   :  { %v12456_v15 = vcombine.low %v10160_v19, %v10163_v8  ;;  %v10196_v58 = vrot.slane %v10194_v5, 4  ;;  %v10190_v60 = vrot.slane %v17118_v14, 5  ;;  %v10197_v8 = vrot.slane %v17129_v28, 5  ;;  %v9922_v43 = vld [vmem:[#allocation2 + $0x168] sm:$0xe] }
 0x4c2   :  { %v10189_v10 = vrot.slane %v10187_v63, 4  ;;  %v12429_v11 = vrot.slane %v9920_v0, 9  ;;  %v10208_v19 = vrot.slane %v17125_v17, 5  ;;  %v10211_v47 = vrot.slane %v17162_v13, 5 }
 0x4c3   :  { %v10215_v61 = vrot.slane %v17164_v6, 5  ;;  %v9923_v6 = vld [vmem:[#allocation2 + $0x174] sm:$0xe] }
 0x4c4   :  { %14238 = vmatmul.mubr.bf16.gmra.mrb[0].mxu1 %v12454_v48  ;;  %v9918_v48 = vld [vmem:[#allocation2 + $0x138] sm:$0xe]  ;;  %v10191_v16 = vsel %vm16459_vm14, %v10189_v10, %v10190_v60  ;;  %v10195_v14 = vsel %vm16459_vm14, %v12429_v11, %v10194_v5  ;;  %v12432_v10 = vrot.slane %v9923_v6, 9  ;;  %v10232_v11 = vrot.slane %v17225_v31, 5 }
 0x4c5   :  { %14241 = vmatprep.mubr.bf16.mxu1 %v12455_v34  ;;  %v12426_v34 = vrot.slane %v9917_v26, 9  ;;  %v12427_v51 = vrot.slane %v9918_v48, 9  ;;  %v10210_v26 = vrot.slane %v10208_v19, 4  ;;  %v12430_v48 = vrot.slane %v9921_v59, 9 }
 0x4c7   :  { %v10174_v9 = vsel %vm16459_vm14, %v12426_v34, %v10173_v23  ;;  %v10181_v25 = vsel %vm16459_vm14, %v12427_v51, %v10180_v38  ;;  %v10201_v23 = vrot.slane %v17110_v41, 5  ;;  %v10198_v38 = vsel %vm16459_vm14, %v10196_v58, %v10197_v8  ;;  %v15100_v51 = vld [vmem:[#allocation9 + $0x38] sm:$0xff]  }
 0x4c8   :  { %v12458_v29 = vcombine.low %v10174_v9, %v10177_v50  ;;  %v12459_v35 = vcombine.low %v10181_v25, %v10184_v55  ;;  %v12461_v28 = vcombine.low %v10195_v14, %v10198_v38  ;;  %v10204_v41 = vrot.slane %v17148_v37, 5  ;;  %14283 = vmatprep.subr.bf16.mxu0 %v15100_v51  ;;  %v9927_v38 = vld [vmem:[#allocation2 + $0x1a4] sm:$0xe] }
 0x4c9   :  { %v12431_v34 = vrot.slane %v9922_v43, 9  ;;  %v10212_v50 = vsel %vm16459_vm14, %v10210_v26, %v10211_v47  ;;  %v10202_v55 = vsel %vm16459_vm14, %v12430_v48, %v10201_v23  ;;  %v10217_v9 = vrot.slane %v10215_v61, 4  ;;  %14284 = vmatpush3.bf16.msra.mxu0 %v15100_v51  ;;  %v17455_v47 = vld [vmem:[%s17673_s4] ss:$0 sm:$0xff] }
 0x4ca   :  { %v10218_v25 = vrot.slane %v17187_v62, 5  ;;  %v10229_v58 = vrot.slane %v17195_v30, 5  ;;  %v10216_v8 = vsel %vm16459_vm14, %v12432_v10, %v10215_v61  ;;  %v10243_v30 = vrot.slane %v17223_v27, 5 }
 0x4cb   :  { %v10209_v13 = vsel %vm16459_vm14, %v12431_v34, %v10208_v19  ;;  %v12436_v14 = vrot.slane %v9927_v38, 9  ;;  %v17737_v26 = vcombine.low %v16984_v7, %v16988_v46 }
 0x4cc   :  { %14242 = vmatmul.mubr.bf16.gmra.mrb[4].mxu1 %v12456_v15  ;;  %v10188_v15 = vsel %vm16459_vm14, %v12428_v1, %v10187_v63  ;;  %v10222_v63 = vrot.slane %v17166_v2, 5  ;;  %v12463_v5 = vcombine.low %v10209_v13, %v10212_v50  ;;  %v10225_v2 = vrot.slane %v17205_v49, 5  ;;  %v9925_v49 = vld [vmem:[#allocation2 + $0x18c] sm:$0xe] }
 0x4cd   :  { %14245 = vmatprep.mubr.bf16.mxu1 %v12457_v32  ;;  %v12460_v3 = vcombine.low %v10188_v15, %v10191_v16  ;;  %v10203_v32 = vrot.slane %v10201_v23, 4  ;;  %v10219_v33 = vsel %vm16459_vm14, %v10217_v9, %v10218_v25  ;;  %v10231_v23 = vrot.slane %v10229_v58, 4 }
 0x4ce   :  { %v12464_v1 = vcombine.low %v10216_v8, %v10219_v33  ;;  %v12434_v19 = vrot.slane %v9925_v49, 9  ;;  %v10244_v27 = vsel %vm16459_vm14, %v12436_v14, %v10243_v30 }
 0x4cf   :  { %v10205_v17 = vsel %vm16459_vm14, %v10203_v32, %v10204_v41  ;;  %v10233_v15 = vsel %vm16459_vm14, %v10231_v23, %v10232_v11  ;;  %v10246_v32 = vrot.slane %v17249_v36, 5  ;;  %v17740_v23 = vld [vmem:[#allocation50_spill] sm:$0xff] }
 0x4d0   :  { %v12462_v37 = vcombine.low %v10202_v55, %v10205_v17 }
 0x4d4   :  { %14246 = vmatmul.mubr.bf16.gmra.mrb[8].mxu1 %v12458_v29  ;;  %v10224_v29 = vrot.slane %v10222_v63, 4 }
 0x4d5   :  { %14249 = vmatprep.mubr.bf16.mxu1 %v12459_v35  ;;  %v9924_v35 = vld [vmem:[#allocation2 + $0x180] sm:$0xe] }
 0x4d6   :  { %v12433_v60 = vrot.slane %v9924_v35, 9  ;;  %v10226_v0 = vsel %vm16459_vm14, %v10224_v29, %v10225_v2 }
 0x4d8   :  { %v10223_v62 = vsel %vm16459_vm14, %v12433_v60, %v10222_v63 }
 0x4d9   :  { %v12465_v16 = vcombine.low %v10223_v62, %v10226_v0 }
 0x4dc   :  { %14250 = vmatmul.mubr.bf16.gmra.mrb[12].mxu1 %v12460_v3  ;;  %v10230_v3 = vsel %vm16459_vm14, %v12434_v19, %v10229_v58  ;;  %v17739_v58 = vld [vmem:[#allocation49_spill] sm:$0xff] }
 0x4dd   :  { %14253 = vmatprep.mubr.bf16.mxu1 %v12461_v28  ;;  %v10245_v28 = vrot.slane %v10243_v30, 4  ;;  %v12466_v59 = vcombine.low %v10230_v3, %v10233_v15 }
 0x4df   :  { %v10247_v31 = vsel %vm16459_vm14, %v10245_v28, %v10246_v32 }
 0x4e0   :  { %v12468_v41 = vcombine.low %v10244_v27, %v10247_v31 }
 0x4e4   :  { %14254 = vmatmul.mubr.bf16.gmra.mrb[16].mxu1 %v12462_v37 }
 0x4e5   :  { %14257 = vmatprep.mubr.bf16.mxu1 %v12463_v5 }
 0x4ec   :  { %14258 = vmatmul.mubr.bf16.gmra.mrb[20].mxu1 %v12464_v1 }
 0x4ed   :  { %14261 = vmatprep.mubr.bf16.mxu1 %v12465_v16 }
 0x4f4   :  { %14262 = vmatmul.mubr.bf16.gmra.mrb[24].mxu1 %v12466_v59  ;;  %v17741_v59 = vld [vmem:[#allocation51_spill] sm:$0xff] }
 0x4f5   :  { %14265 = vmatprep.mubr.bf16.mxu1 %v17737_v26 }
 0x4fc   :  { %14266 = vmatmul.mubr.bf16.gmra.mrb[28].mxu1 %v12468_v41 }
 0x557   :  { %v14207_v43 = vpop.f32.mrb[32].mxu1 }
 0x558   :  { %v14365_v36 = vadd.f32 %v14207_v43, %v17168_v52  ;;  %v10475_v48 = vpop.f32.mrb[33].mxu1 }
 0x559   :  { %v14366_v7 = vadd.f32 %v10475_v48, %v17173_v57  ;;  %v14208_v46 = vpop.f32.mrb[34].mxu1 }
 0x55a   :  { %v10803_v17 = vadd.f32 %v14365_v36, %v17455_v47  ;;  %v14367_v61 = vadd.f32 %v14208_v46, %v17177_v54  ;;  %v10478_v22 = vpop.f32.mrb[35].mxu1 }
 0x55b   :  { %v10801_v34 = vadd.f32 %v14366_v7, %v17455_v47  ;;  %v14368_v50 = vadd.f32 %v10478_v22, %v17182_v4  ;;  %v17738_v4 = vld [vmem:[#allocation48_spill] sm:$0xff] }
 0x55c   :  { %v10804_v63 = vadd.f32 %v14367_v61, %v17455_v47  ;;  %v10867_v55 = vmax.f32 %v10803_v17, 0.0 }
 0x55d   :  { %v10802_v51 = vadd.f32 %v14368_v50, %v17455_v47  ;;  %v10865_v52 = vmax.f32 %v10801_v34, 0.0 }
 0x55e   :  { %v10868_v37 = vmax.f32 %v10804_v63, 0.0 }
 0x55f   :  { %v10866_v13 = vmax.f32 %v10802_v51, 0.0  ;;  %v14211_v5 = vpop.f32.mrb[36].mxu1 }
 0x560   :  { %v10930_v57 = vpack.c.bf16 %v10868_v37, %v10867_v55  ;;  %v14369_v9 = vadd.f32 %v14211_v5, %v17203_v44  ;;  %v10491_v6 = vpop.f32.mrb[37].mxu1 }
 0x561   :  { %v14370_v54 = vadd.f32 %v10491_v6, %v17207_v20  ;;  %v14212_v29 = vpop.f32.mrb[38].mxu1  ;;  %v10929_v25 = vpack.c.bf16 %v10866_v13, %v10865_v52 }
 0x562   :  { %v10807_v35 = vadd.f32 %v14369_v9, %v17455_v47  ;;  %v14371_v2 = vadd.f32 %v14212_v29, %v17738_v4  ;;  %v10494_v10 = vpop.f32.mrb[39].mxu1 }
 0x563   :  { %v10805_v33 = vadd.f32 %v14370_v54, %v17455_v47  ;;  %v14372_v60 = vadd.f32 %v10494_v10, %v17739_v58  ;;  %14285 = vmatprep.mubr.bf16.mxu0 %v10929_v25 }
 0x564   :  { %v10808_v0 = vadd.f32 %v14371_v2, %v17455_v47  ;;  %14286 = vmatmul.mubr.bf16.vlgmr.msra.gmra.mrb[128].mxu0 %v10930_v57  ;;  %v10871_v8 = vmax.f32 %v10807_v35, 0.0 }
 0x565   :  { %v10806_v44 = vadd.f32 %v14372_v60, %v17455_v47  ;;  %v10869_v20 = vmax.f32 %v10805_v33, 0.0 }
 0x566   :  { %v10872_v1 = vmax.f32 %v10808_v0, 0.0 }
 0x567   :  { %v10870_v62 = vmax.f32 %v10806_v44, 0.0  ;;  %v14215_v16 = vpop.f32.mrb[40].mxu1 }
 0x568   :  { %v14373_v49 = vadd.f32 %v14215_v16, %v17740_v23  ;;  %v10507_v11 = vpop.f32.mrb[41].mxu1  ;;  %v10932_v30 = vpack.c.bf16 %v10872_v1, %v10871_v8  ;;  %v17742_v8 = vld [vmem:[#allocation52_spill] sm:$0xff] }
 0x569   :  { %v14374_v38 = vadd.f32 %v10507_v11, %v17236_v56  ;;  %v14216_v19 = vpop.f32.mrb[42].mxu1  ;;  %v10931_v15 = vpack.c.bf16 %v10870_v62, %v10869_v20  ;;  %v17743_v62 = vld [vmem:[#allocation53_spill] sm:$0xff]  ;;  %v17744_v11 = vld [vmem:[#allocation54_spill] sm:$0xff] }
 0x56a   :  { %v10811_v3 = vadd.f32 %v14373_v49, %v17455_v47  ;;  %v14375_v14 = vadd.f32 %v14216_v19, %v17240_v53  ;;  %v10510_v28 = vpop.f32.mrb[43].mxu1 }
 0x56b   :  { %v10809_v32 = vadd.f32 %v14374_v38, %v17455_v47  ;;  %v14376_v26 = vadd.f32 %v10510_v28, %v17741_v59  ;;  %14289 = vmatprep.mubr.bf16.mxu0 %v10931_v15  ;;  %v17745_v15 = vld [vmem:[#allocation55_spill] sm:$0xff] }
 0x56c   :  { %v10812_v27 = vadd.f32 %v14375_v14, %v17455_v47  ;;  %14290 = vmatmul.mubr.bf16.gmra.mrb[132].mxu0 %v10932_v30  ;;  %v10875_v41 = vmax.f32 %v10811_v3, 0.0 }
 0x56d   :  { %v10810_v31 = vadd.f32 %v14376_v26, %v17455_v47  ;;  %v10873_v56 = vmax.f32 %v10809_v32, 0.0 }
 0x56e   :  { %v10876_v43 = vmax.f32 %v10812_v27, 0.0 }
 0x56f   :  { %v10874_v36 = vmax.f32 %v10810_v31, 0.0  ;;  %v14219_v48 = vpop.f32.mrb[44].mxu1 }
 0x570   :  { %v14377_v7 = vadd.f32 %v14219_v48, %v17252_v21  ;;  %v10523_v46 = vpop.f32.mrb[45].mxu1  ;;  %v10934_v53 = vpack.c.bf16 %v10876_v43, %v10875_v41  ;;  %v17746_v41 = vld [vmem:[#allocation56_spill] sm:$0xff]  ;;  %v17747_v48 = vld [vmem:[#allocation57_spill] sm:$0xff] }
 0x571   :  { %v14378_v17 = vadd.f32 %v10523_v46, %v17256_v40  ;;  %v14220_v61 = vpop.f32.mrb[46].mxu1  ;;  %v10933_v22 = vpack.c.bf16 %v10874_v36, %v10873_v56 }
 0x572   :  { %v10815_v34 = vadd.f32 %v14377_v7, %v17455_v47  ;;  %v14379_v50 = vadd.f32 %v14220_v61, %v17260_v42  ;;  %v10526_v63 = vpop.f32.mrb[47].mxu1  ;;  %v17748_v61 = vld [vmem:[#allocation58_spill] sm:$0xff] }
 0x573   :  { %v10813_v51 = vadd.f32 %v14378_v17, %v17455_v47  ;;  %v14380_v55 = vadd.f32 %v10526_v63, %v17264_v24  ;;  %14293 = vmatprep.mubr.bf16.mxu0 %v10933_v22  ;;  %v17749_v63 = vld [vmem:[#allocation59_spill] sm:$0xff] }
 0x574   :  { %v10816_v37 = vadd.f32 %v14379_v50, %v17455_v47  ;;  %14294 = vmatmul.mubr.bf16.gmra.mrb[136].mxu0 %v10934_v53  ;;  %v10879_v52 = vmax.f32 %v10815_v34, 0.0 }
 0x575   :  { %v10814_v21 = vadd.f32 %v14380_v55, %v17455_v47  ;;  %v10877_v40 = vmax.f32 %v10813_v51, 0.0 }
 0x576   :  { %v10880_v13 = vmax.f32 %v10816_v37, 0.0 }
 0x577   :  { %v10878_v5 = vmax.f32 %v10814_v21, 0.0  ;;  %v14223_v57 = vpop.f32.mrb[48].mxu1 }
 0x578   :  { %v14381_v9 = vadd.f32 %v14223_v57, %v17272_v12  ;;  %v10539_v6 = vpop.f32.mrb[49].mxu1  ;;  %v10936_v42 = vpack.c.bf16 %v10880_v13, %v10879_v52  ;;  %v17750_v57 = vld [vmem:[#allocation60_spill] sm:$0xff] }
 0x579   :  { %v14382_v54 = vadd.f32 %v10539_v6, %v17274_v18  ;;  %v14224_v29 = vpop.f32.mrb[50].mxu1  ;;  %v10935_v25 = vpack.c.bf16 %v10878_v5, %v10877_v40 }
 0x57a   :  { %v10819_v24 = vadd.f32 %v14381_v9, %v17455_v47  ;;  %v14383_v35 = vadd.f32 %v14224_v29, %v17278_v39  ;;  %v10542_v4 = vpop.f32.mrb[51].mxu1 }
 0x57b   :  { %v10817_v2 = vadd.f32 %v14382_v54, %v17455_v47  ;;  %v14384_v10 = vadd.f32 %v10542_v4, %v17280_v45  ;;  %14297 = vmatprep.mubr.bf16.mxu0 %v10935_v25  ;;  %v17751_v54 = vld [vmem:[#allocation61_spill] sm:$0xff]  ;;  %v17752_v4 = vld [vmem:[#allocation62_spill] sm:$0xff] }
 0x57c   :  { %v10820_v33 = vadd.f32 %v14383_v35, %v17455_v47  ;;  %14298 = vmatmul.mubr.bf16.gmra.mrb[140].mxu0 %v10936_v42  ;;  %v10883_v58 = vmax.f32 %v10819_v24, 0.0 }
 0x57d   :  { %v10818_v12 = vadd.f32 %v14384_v10, %v17455_v47  ;;  %v10881_v18 = vmax.f32 %v10817_v2, 0.0 }
 0x57e   :  { %v10884_v60 = vmax.f32 %v10820_v33, 0.0 }
 0x57f   :  { %v10882_v0 = vmax.f32 %v10818_v12, 0.0  ;;  %v14227_v44 = vpop.f32.mrb[52].mxu1  ;;  %v17753_v12 = vld [vmem:[#allocation63_spill] sm:$0xff] }
 0x580   :  { %v14385_v1 = vadd.f32 %v14227_v44, %v17742_v8  ;;  %v10555_v20 = vpop.f32.mrb[53].mxu1  ;;  %v10938_v39 = vpack.c.bf16 %v10884_v60, %v10883_v58 }
 0x581   :  { %v14386_v16 = vadd.f32 %v10555_v20, %v17743_v62  ;;  %v14228_v23 = vpop.f32.mrb[54].mxu1  ;;  %v10937_v49 = vpack.c.bf16 %v10882_v0, %v10881_v18 }
 0x582   :  { %v10823_v45 = vadd.f32 %v14385_v1, %v17455_v47  ;;  %v14387_v30 = vadd.f32 %v14228_v23, %v17744_v11  ;;  %v10558_v38 = vpop.f32.mrb[55].mxu1 }
 0x583   :  { %v10821_v19 = vadd.f32 %v14386_v16, %v17455_v47  ;;  %v14388_v3 = vadd.f32 %v10558_v38, %v17745_v15  ;;  %14301 = vmatprep.mubr.bf16.mxu0 %v10937_v49  ;;  %v17755_v49 = vld [vmem:[#allocation17_spill] sm:$0xff] }
 0x584   :  { %v10824_v14 = vadd.f32 %v14387_v30, %v17455_v47  ;;  %14302 = vmatmul.mubr.bf16.gmra.mrb[144].mxu0 %v10938_v39  ;;  %v10887_v32 = vmax.f32 %v10823_v45, 0.0  ;;  %v17754_v39 = vld [vmem:[#allocation16_spill] sm:$0xff] }
 0x585   :  { %v10822_v28 = vadd.f32 %v14388_v3, %v17455_v47  ;;  %v10885_v26 = vmax.f32 %v10821_v19, 0.0  ;;  %v17756_v19 = vld [vmem:[#allocation18_spill] sm:$0xff] }
 0x586   :  { %v10888_v59 = vmax.f32 %v10824_v14, 0.0 }
 0x587   :  { %v10886_v27 = vmax.f32 %v10822_v28, 0.0  ;;  %v14231_v31 = vpop.f32.mrb[56].mxu1  ;;  %v17757_v28 = vld [vmem:[#allocation19_spill] sm:$0xff] }
 0x588   :  { %v14389_v43 = vadd.f32 %v14231_v31, %v17746_v41  ;;  %v10571_v56 = vpop.f32.mrb[57].mxu1  ;;  %v10940_v36 = vpack.c.bf16 %v10888_v59, %v10887_v32 }
 0x589   :  { %v14390_v7 = vadd.f32 %v10571_v56, %v17747_v48  ;;  %v14232_v46 = vpop.f32.mrb[58].mxu1  ;;  %v10939_v53 = vpack.c.bf16 %v10886_v27, %v10885_v26 }
 0x58a   :  { %v10827_v17 = vadd.f32 %v14389_v43, %v17455_v47  ;;  %v14391_v22 = vadd.f32 %v14232_v46, %v17748_v61  ;;  %v10574_v34 = vpop.f32.mrb[59].mxu1 }
 0x58b   :  { %v10825_v50 = vadd.f32 %v14390_v7, %v17455_v47  ;;  %v14392_v51 = vadd.f32 %v10574_v34, %v17749_v63  ;;  %14305 = vmatprep.mubr.bf16.mxu0 %v10939_v53  ;;  %v17759_v53 = vld [vmem:[#allocation21_spill] sm:$0xff] }
 0x58c   :  { %v10828_v55 = vadd.f32 %v14391_v22, %v17455_v47  ;;  %14306 = vmatmul.mubr.bf16.gmra.mrb[148].mxu0 %v10940_v36  ;;  %v10891_v21 = vmax.f32 %v10827_v17, 0.0  ;;  %v17758_v36 = vld [vmem:[#allocation20_spill] sm:$0xff] }
 0x58d   :  { %v10826_v37 = vadd.f32 %v14392_v51, %v17455_v47  ;;  %v10889_v13 = vmax.f32 %v10825_v50, 0.0  ;;  %v17760_v50 = vld [vmem:[#allocation22_spill] sm:$0xff] }
 0x58e   :  { %v10892_v52 = vmax.f32 %v10828_v55, 0.0 }
 0x58f   :  { %v10890_v40 = vmax.f32 %v10826_v37, 0.0  ;;  %v14235_v5 = vpop.f32.mrb[60].mxu1  ;;  %v17761_v37 = vld [vmem:[#allocation23_spill] sm:$0xff] }
 0x590   :  { %v14393_v9 = vadd.f32 %v14235_v5, %v17750_v57  ;;  %v10587_v6 = vpop.f32.mrb[61].mxu1  ;;  %v10942_v42 = vpack.c.bf16 %v10892_v52, %v10891_v21 }
 0x591   :  { %v14394_v29 = vadd.f32 %v10587_v6, %v17751_v54  ;;  %v14236_v25 = vpop.f32.mrb[62].mxu1  ;;  %v10941_v24 = vpack.c.bf16 %v10890_v40, %v10889_v13 }
 0x592   :  { %v10831_v35 = vadd.f32 %v14393_v9, %v17455_v47  ;;  %v14395_v2 = vadd.f32 %v14236_v25, %v17752_v4  ;;  %v10590_v10 = vpop.f32.mrb[63].mxu1 }
 0x593   :  { %v10829_v33 = vadd.f32 %v14394_v29, %v17455_v47  ;;  %v14396_v58 = vadd.f32 %v10590_v10, %v17753_v12  ;;  %14309 = vmatprep.mubr.bf16.mxu0 %v10941_v24  ;;  %v17763_v24 = vld [vmem:[#allocation25_spill] sm:$0xff] }
 0x594   :  { %v10832_v60 = vadd.f32 %v14395_v2, %v17455_v47  ;;  %14310 = vmatmul.mubr.bf16.gmra.mrb[152].mxu0 %v10942_v42  ;;  %v10895_v0 = vmax.f32 %v10831_v35, 0.0  ;;  %v17762_v42 = vld [vmem:[#allocation24_spill] sm:$0xff] }
 0x595   :  { %v10830_v18 = vadd.f32 %v14396_v58, %v17455_v47  ;;  %v10893_v8 = vmax.f32 %v10829_v33, 0.0  ;;  %v17764_v33 = vld [vmem:[#allocation26_spill] sm:$0xff] }
 0x596   :  { %v10896_v44 = vmax.f32 %v10832_v60, 0.0 }
 0x597   :  { %v10894_v1 = vmax.f32 %v10830_v18, 0.0  ;;  %v14239_v20 = vpop.f32.mrb[0].mxu1  ;;  %v17765_v18 = vld [vmem:[#allocation27_spill] sm:$0xff] }
 0x598   :  { %v14397_v62 = vadd.f32 %v14239_v20, %v17754_v39  ;;  %v10603_v16 = vpop.f32.mrb[1].mxu1  ;;  %v10944_v23 = vpack.c.bf16 %v10896_v44, %v10895_v0 }
 0x599   :  { %v14398_v45 = vadd.f32 %v10603_v16, %v17755_v49  ;;  %v14240_v11 = vpop.f32.mrb[2].mxu1  ;;  %v10943_v30 = vpack.c.bf16 %v10894_v1, %v10893_v8 }
 0x59a   :  { %v10835_v38 = vadd.f32 %v14397_v62, %v17455_v47  ;;  %v14399_v15 = vadd.f32 %v14240_v11, %v17756_v19  ;;  %v10606_v3 = vpop.f32.mrb[3].mxu1 }
 0x59b   :  { %v10833_v14 = vadd.f32 %v14398_v45, %v17455_v47  ;;  %v14400_v32 = vadd.f32 %v10606_v3, %v17757_v28  ;;  %14313 = vmatprep.mubr.bf16.mxu0 %v10943_v30  ;;  %v17767_v30 = vld [vmem:[#allocation29_spill] sm:$0xff] }
 0x59c   :  { %v10836_v59 = vadd.f32 %v14399_v15, %v17455_v47  ;;  %14314 = vmatmul.mubr.bf16.gmra.mrb[156].mxu0 %v10944_v23  ;;  %v10899_v27 = vmax.f32 %v10835_v38, 0.0  ;;  %v17766_v23 = vld [vmem:[#allocation28_spill] sm:$0xff] }
 0x59d   :  { %v10834_v26 = vadd.f32 %v14400_v32, %v17455_v47  ;;  %v10897_v41 = vmax.f32 %v10833_v14, 0.0  ;;  %v17768_v14 = vld [vmem:[#allocation30_spill] sm:$0xff] }
 0x59e   :  { %v10900_v31 = vmax.f32 %v10836_v59, 0.0 }
 0x59f   :  { %v10898_v43 = vmax.f32 %v10834_v26, 0.0  ;;  %v14243_v56 = vpop.f32.mrb[4].mxu1  ;;  %v17769_v26 = vld [vmem:[#allocation31_spill] sm:$0xff] }
 0x5a0   :  { %v14401_v48 = vadd.f32 %v14243_v56, %v17758_v36  ;;  %v10619_v7 = vpop.f32.mrb[5].mxu1  ;;  %v10946_v46 = vpack.c.bf16 %v10900_v31, %v10899_v27 }
 0x5a1   :  { %v14402_v17 = vadd.f32 %v10619_v7, %v17759_v53  ;;  %v14244_v61 = vpop.f32.mrb[6].mxu1  ;;  %v10945_v22 = vpack.c.bf16 %v10898_v43, %v10897_v41 }
 0x5a2   :  { %v10839_v34 = vadd.f32 %v14401_v48, %v17455_v47  ;;  %v14403_v63 = vadd.f32 %v14244_v61, %v17760_v50  ;;  %v10622_v51 = vpop.f32.mrb[7].mxu1 }
 0x5a3   :  { %v10837_v55 = vadd.f32 %v14402_v17, %v17455_v47  ;;  %v14404_v21 = vadd.f32 %v10622_v51, %v17761_v37  ;;  %14317 = vmatprep.mubr.bf16.mxu0 %v10945_v22  ;;  %v17771_v22 = vld [vmem:[#allocation33_spill] sm:$0xff] }
 0x5a4   :  { %v10840_v52 = vadd.f32 %v14403_v63, %v17455_v47  ;;  %14318 = vmatmul.mubr.bf16.gmra.mrb[160].mxu0 %v10946_v46  ;;  %v10903_v40 = vmax.f32 %v10839_v34, 0.0  ;;  %v17770_v46 = vld [vmem:[#allocation32_spill] sm:$0xff] }
 0x5a5   :  { %v10838_v13 = vadd.f32 %v14404_v21, %v17455_v47  ;;  %v10901_v57 = vmax.f32 %v10837_v55, 0.0  ;;  %v17772_v55 = vld [vmem:[#allocation34_spill] sm:$0xff] }
 0x5a6   :  { %v10904_v5 = vmax.f32 %v10840_v52, 0.0 }
 0x5a7   :  { %v10902_v9 = vmax.f32 %v10838_v13, 0.0  ;;  %v14247_v6 = vpop.f32.mrb[8].mxu1  ;;  %v17773_v13 = vld [vmem:[#allocation35_spill] sm:$0xff] }
 0x5a8   :  { %v14405_v54 = vadd.f32 %v14247_v6, %v17762_v42  ;;  %v10635_v29 = vpop.f32.mrb[9].mxu1  ;;  %v10948_v25 = vpack.c.bf16 %v10904_v5, %v10903_v40 }
 0x5a9   :  { %v14406_v35 = vadd.f32 %v10635_v29, %v17763_v24  ;;  %v14248_v4 = vpop.f32.mrb[10].mxu1  ;;  %v10947_v2 = vpack.c.bf16 %v10902_v9, %v10901_v57 }
 0x5aa   :  { %v10843_v10 = vadd.f32 %v14405_v54, %v17455_v47  ;;  %v14407_v12 = vadd.f32 %v14248_v4, %v17764_v33  ;;  %v10638_v58 = vpop.f32.mrb[11].mxu1 }
 0x5ab   :  { %v10841_v60 = vadd.f32 %v14406_v35, %v17455_v47  ;;  %v14408_v0 = vadd.f32 %v10638_v58, %v17765_v18  ;;  %14321 = vmatprep.mubr.bf16.mxu0 %v10947_v2  ;;  %v17775_v2 = vld [vmem:[#allocation37_spill] sm:$0xff] }
 0x5ac   :  { %v10844_v44 = vadd.f32 %v14407_v12, %v17455_v47  ;;  %14322 = vmatmul.mubr.bf16.gmra.mrb[164].mxu0 %v10948_v25  ;;  %v10907_v1 = vmax.f32 %v10843_v10, 0.0  ;;  %v17774_v25 = vld [vmem:[#allocation36_spill] sm:$0xff] }
 0x5ad   :  { %v10842_v8 = vadd.f32 %v14408_v0, %v17455_v47  ;;  %v10905_v39 = vmax.f32 %v10841_v60, 0.0  ;;  %v17776_v60 = vld [vmem:[#allocation38_spill] sm:$0xff] }
 0x5ae   :  { %v10908_v20 = vmax.f32 %v10844_v44, 0.0 }
 0x5af   :  { %v10906_v62 = vmax.f32 %v10842_v8, 0.0  ;;  %v14251_v16 = vpop.f32.mrb[12].mxu1  ;;  %v17777_v8 = vld [vmem:[#allocation39_spill] sm:$0xff] }
 0x5b0   :  { %v14409_v49 = vadd.f32 %v14251_v16, %v17766_v23  ;;  %v10651_v45 = vpop.f32.mrb[13].mxu1  ;;  %v10950_v11 = vpack.c.bf16 %v10908_v20, %v10907_v1 }
 0x5b1   :  { %v14410_v38 = vadd.f32 %v10651_v45, %v17767_v30  ;;  %v14252_v19 = vpop.f32.mrb[14].mxu1  ;;  %v10949_v15 = vpack.c.bf16 %v10906_v62, %v10905_v39 }
 0x5b2   :  { %v10847_v3 = vadd.f32 %v14409_v49, %v17455_v47  ;;  %v14411_v28 = vadd.f32 %v14252_v19, %v17768_v14  ;;  %v10654_v32 = vpop.f32.mrb[15].mxu1 }
 0x5b3   :  { %v10845_v59 = vadd.f32 %v14410_v38, %v17455_v47  ;;  %v14412_v27 = vadd.f32 %v10654_v32, %v17769_v26  ;;  %14325 = vmatprep.mubr.bf16.mxu0 %v10949_v15  ;;  %v17779_v15 = vld [vmem:[#allocation41_spill] sm:$0xff] }
 0x5b4   :  { %v10848_v31 = vadd.f32 %v14411_v28, %v17455_v47  ;;  %14326 = vmatmul.mubr.bf16.gmra.mrb[168].mxu0 %v10950_v11  ;;  %v10911_v43 = vmax.f32 %v10847_v3, 0.0  ;;  %v17778_v11 = vld [vmem:[#allocation40_spill] sm:$0xff] }
 0x5b5   :  { %v10846_v41 = vadd.f32 %v14412_v27, %v17455_v47  ;;  %v10909_v36 = vmax.f32 %v10845_v59, 0.0  ;;  %v17780_v59 = vld [vmem:[#allocation42_spill] sm:$0xff] }
 0x5b6   :  { %v10912_v56 = vmax.f32 %v10848_v31, 0.0 }
 0x5b7   :  { %v10910_v48 = vmax.f32 %v10846_v41, 0.0  ;;  %v14255_v7 = vpop.f32.mrb[16].mxu1  ;;  %v17781_v41 = vld [vmem:[#allocation43_spill] sm:$0xff] }
 0x5b8   :  { %v14413_v53 = vadd.f32 %v14255_v7, %v17770_v46  ;;  %v10667_v17 = vpop.f32.mrb[17].mxu1  ;;  %v10952_v61 = vpack.c.bf16 %v10912_v56, %v10911_v43 }
 0x5b9   :  { %v14414_v34 = vadd.f32 %v10667_v17, %v17771_v22  ;;  %v14256_v50 = vpop.f32.mrb[18].mxu1  ;;  %v10951_v63 = vpack.c.bf16 %v10910_v48, %v10909_v36 }
 0x5ba   :  { %v10851_v51 = vadd.f32 %v14413_v53, %v17455_v47  ;;  %v14415_v37 = vadd.f32 %v14256_v50, %v17772_v55  ;;  %v10670_v21 = vpop.f32.mrb[19].mxu1 }
 0x5bb   :  { %v10849_v52 = vadd.f32 %v14414_v34, %v17455_v47  ;;  %v14416_v40 = vadd.f32 %v10670_v21, %v17773_v13  ;;  %14329 = vmatprep.mubr.bf16.mxu0 %v10951_v63  ;;  %v17783_v63 = vld [vmem:[#allocation45_spill] sm:$0xff] }
 0x5bc   :  { %v10852_v5 = vadd.f32 %v14415_v37, %v17455_v47  ;;  %14330 = vmatmul.mubr.bf16.gmra.mrb[172].mxu0 %v10952_v61  ;;  %v10915_v9 = vmax.f32 %v10851_v51, 0.0  ;;  %v17782_v61 = vld [vmem:[#allocation44_spill] sm:$0xff] }
 0x5bd   :  { %v10850_v57 = vadd.f32 %v14416_v40, %v17455_v47  ;;  %v10913_v42 = vmax.f32 %v10849_v52, 0.0  ;;  %v17784_v52 = vld [vmem:[#allocation46_spill] sm:$0xff] }
 0x5be   :  { %v10916_v6 = vmax.f32 %v10852_v5, 0.0 }
 0x5bf   :  { %v10914_v54 = vmax.f32 %v10850_v57, 0.0  ;;  %v14259_v29 = vpop.f32.mrb[20].mxu1  ;;  %v17785_v57 = vld [vmem:[#allocation47_spill] sm:$0xff] }
 0x5c0   :  { %v14417_v24 = vadd.f32 %v14259_v29, %v17774_v25  ;;  %v10683_v35 = vpop.f32.mrb[21].mxu1  ;;  %v10954_v4 = vpack.c.bf16 %v10916_v6, %v10915_v9 }
 0x5c1   :  { %v14418_v10 = vadd.f32 %v10683_v35, %v17775_v2  ;;  %v14260_v33 = vpop.f32.mrb[22].mxu1  ;;  %v10953_v12 = vpack.c.bf16 %v10914_v54, %v10913_v42  ;;  %v12967_v2 = vld [vmem:[#allocation3 + $0x8] sm:$0xff]  }
 0x5c2   :  { %v10855_v58 = vadd.f32 %v14417_v24, %v17455_v47  ;;  %v14419_v18 = vadd.f32 %v14260_v33, %v17776_v60  ;;  %v10686_v0 = vpop.f32.mrb[23].mxu1  ;;  %v17588_v33 = vld [vmem:[%s17675_s6] ss:$0 sm:$0xff]  ;;  %s15472_s6 = smov [#allocation11]  }
 0x5c3   :  { %v10853_v44 = vadd.f32 %v14418_v10, %v17455_v47  ;;  %v14420_v1 = vadd.f32 %v10686_v0, %v17777_v8  ;;  %14333 = vmatprep.mubr.bf16.mxu0 %v10953_v12  ;;  %v12680_v10 = vld [vmem:[#allocation3] sm:$0xff]   ;;  %v12685_v12 = vunpack.c.l.bf16 %v12967_v2  ;;  %v12686_v0 = vunpack.c.h.bf16 %v12967_v2  ;;  %s11902_s11 = sshll.u32 %s15472_s6, 4  ;;  %s11903_s11 = int_to_ptr.vmem [resolvable:$true] %s11902_s11 }
 0x5c4   :  { %v10856_v20 = vadd.f32 %v14419_v18, %v17455_v47  ;;  %14334 = vmatmul.mubr.bf16.gmra.mrb[176].mxu0 %v10954_v4  ;;  %v10919_v62 = vmax.f32 %v10855_v58, 0.0  ;;  %v12681_v60 = vunpack.c.l.bf16 %v12680_v10  ;;  %s15435_s12 = scalar_lea.vmem %s11903_s11, 4096  ;;  %p15440_p5 = scmp.lt.s32.totalorder %s11903_s11, %s11903_s11 }
 0x5c5   :  { %v10854_v39 = vadd.f32 %v14420_v1, %v17455_v47  ;;  %v10917_v23 = vmax.f32 %v10853_v44, 0.0  ;;  %v12682_v1 = vunpack.c.h.bf16 %v12680_v10  ;;  %v12973_v10 = vld [vmem:[#allocation3 + $0x38] sm:$0xff]   ;;  %p15436_p4 = scmp.ne.s32.totalorder %s11903_s11, %s15435_s12  ;;  %p15441_p6 = scmp.lt.s32.totalorder %s15435_s12, %s15435_s12 }
 0x5c6   :  { %v10920_v16 = vmax.f32 %v10856_v20, 0.0 }
 0x5c7   :  { %v10918_v49 = vmax.f32 %v10854_v39, 0.0  ;;  %v14263_v45 = vpop.f32.mrb[24].mxu1  ;;  %p15442_p7 = por %p15441_p6, %p15440_p5 }
 0x5c8   :  { %v14421_v30 = vadd.f32 %v14263_v45, %v17778_v11  ;;  %v10699_v38 = vpop.f32.mrb[25].mxu1  ;;  %v10956_v19 = vpack.c.bf16 %v10920_v16, %v10919_v62  ;;  %v12968_v11 = vld [vmem:[#allocation3 + $0x10] sm:$0xff]  }
 0x5c9   :  { %v14422_v3 = vadd.f32 %v10699_v38, %v17779_v15  ;;  %v14264_v14 = vpop.f32.mrb[26].mxu1  ;;  %v10955_v28 = vpack.c.bf16 %v10918_v49, %v10917_v23  ;;  %v12969_v49 = vld [vmem:[#allocation3 + $0x18] sm:$0xff]   ;;  %p15443_p8 = pnand %p15442_p7, %p15436_p4 }
 0x5ca   :  { %v10859_v32 = vadd.f32 %v14421_v30, %v17455_v47  ;;  %v14423_v26 = vadd.f32 %v14264_v14, %v17780_v59  ;;  %v10702_v27 = vpop.f32.mrb[27].mxu1  ;;  %v12693_v15 = vunpack.c.l.bf16 %v12969_v49 }
 0x5cb   :  { %v10857_v31 = vadd.f32 %v14422_v3, %v17455_v47  ;;  %v14424_v43 = vadd.f32 %v10702_v27, %v17781_v41  ;;  %14337 = vmatprep.mubr.bf16.mxu0 %v10955_v28 }
 0x5cc   :  { %v10860_v56 = vadd.f32 %v14423_v26, %v17455_v47  ;;  %14338 = vmatmul.mubr.bf16.gmra.mrb[180].mxu0 %v10956_v19  ;;  %v10923_v48 = vmax.f32 %v10859_v32, 0.0  ;;  %v12689_v32 = vunpack.c.l.bf16 %v12968_v11 }
 0x5cd   :  { %v10858_v36 = vadd.f32 %v14424_v43, %v17455_v47  ;;  %v10921_v46 = vmax.f32 %v10857_v31, 0.0  ;;  %v12694_v31 = vunpack.c.h.bf16 %v12969_v49 }
 0x5ce   :  { %v10924_v7 = vmax.f32 %v10860_v56, 0.0 }
 0x5cf   :  { %v10922_v53 = vmax.f32 %v10858_v36, 0.0  ;;  %v14267_v17 = vpop.f32.mrb[28].mxu1  ;;  %v12690_v36 = vunpack.c.h.bf16 %v12968_v11 }
 0x5d0   :  { %v14425_v22 = vadd.f32 %v14267_v17, %v17782_v61  ;;  %v10715_v34 = vpop.f32.mrb[29].mxu1  ;;  %v10958_v50 = vpack.c.bf16 %v10924_v7, %v10923_v48  ;;  %v12971_v61 = vld [vmem:[#allocation3 + $0x28] sm:$0xff]  }
 0x5d1   :  { %v14426_v51 = vadd.f32 %v10715_v34, %v17783_v63  ;;  %v14268_v55 = vpop.f32.mrb[30].mxu1  ;;  %v10957_v37 = vpack.c.bf16 %v10922_v53, %v10921_v46  ;;  %v12970_v34 = vld [vmem:[#allocation3 + $0x20] sm:$0xff]  }
 0x5d2   :  { %v10863_v21 = vadd.f32 %v14425_v22, %v17455_v47  ;;  %v14427_v13 = vadd.f32 %v14268_v55, %v17784_v52  ;;  %v10718_v40 = vpop.f32.mrb[31].mxu1  ;;  %v12701_v55 = vunpack.c.l.bf16 %v12971_v61 }
 0x5d3   :  { %v10861_v5 = vadd.f32 %v14426_v51, %v17455_v47  ;;  %v14428_v9 = vadd.f32 %v10718_v40, %v17785_v57  ;;  %14341 = vmatprep.mubr.bf16.mxu0 %v10957_v37 }
 0x5d4   :  { %v10864_v6 = vadd.f32 %v14427_v13, %v17455_v47  ;;  %14342 = vmatmul.mubr.bf16.gmra.mrb[184].mxu0 %v10958_v50  ;;  %v10927_v54 = vmax.f32 %v10863_v21, 0.0  ;;  %v12697_v13 = vunpack.c.l.bf16 %v12970_v34 }
 0x5d5   :  { %v10862_v42 = vadd.f32 %v14428_v9, %v17455_v47  ;;  %v10925_v25 = vmax.f32 %v10861_v5, 0.0  ;;  %v12702_v9 = vunpack.c.h.bf16 %v12971_v61 }
 0x5d6   :  { %v10928_v29 = vmax.f32 %v10864_v6, 0.0 }
 0x5d7   :  { %v10926_v24 = vmax.f32 %v10862_v42, 0.0 }
 0x5d8   :  { %v10960_v35 = vpack.c.bf16 %v10928_v29, %v10927_v54  ;;  %v12698_v29 = vunpack.c.h.bf16 %v12970_v34 }
 0x5d9   :  { %v10959_v4 = vpack.c.bf16 %v10926_v24, %v10925_v25 }
 0x5db   :  { %14345 = vmatprep.mubr.bf16.mxu0 %v10959_v4 }
 0x5dc   :  { %14346 = vmatmul.mubr.bf16.gmra.mrb[188].mxu0 %v10960_v35 }
 0x637   :  { %v14287_v58 = vpop.f32.mrb[128].mxu0 }
 0x638   :  { %v11075_v47 = vadd.f32 %v14287_v58, %v17588_v33  ;;  %v11066_v18 = vpop.f32.mrb[129].mxu0  ;;  %v12972_v58 = vld [vmem:[#allocation3 + $0x30] sm:$0xff]  }
 0x639   :  { %v11067_v44 = vadd.f32 %v17588_v33, %v11066_v18  ;;  %v14288_v8 = vpop.f32.mrb[130].mxu0 }
 0x63a   :  { %v11451_v20 = vadd.f32 %v12685_v12, %v11075_v47  ;;  %v11078_v39 = vadd.f32 %v14288_v8, %v17588_v33  ;;  %v11069_v62 = vpop.f32.mrb[131].mxu0 }
 0x63b   :  { %v11449_v16 = vadd.f32 %v12681_v60, %v11067_v44  ;;  %v11070_v23 = vadd.f32 %v17588_v33, %v11069_v62 }
 0x63c   :  { %v11452_v45 = vadd.f32 %v12686_v0, %v11078_v39  ;;  %v11515_v38 = vmax.f32 %v11451_v20, 0.0  ;;  %v12709_v0 = vunpack.c.l.bf16 %v12973_v10  ;;  %v12705_v20 = vunpack.c.l.bf16 %v12972_v58 }
 0x63d   :  { %v11450_v30 = vadd.f32 %v12682_v1, %v11070_v23  ;;  %v11513_v3 = vmax.f32 %v11449_v16, 0.0  ;;  %v12710_v23 = vunpack.c.h.bf16 %v12973_v10 }
 0x63e   :  { %v11516_v19 = vmax.f32 %v11452_v45, 0.0 }
 0x63f   :  { %v11514_v14 = vmax.f32 %v11450_v30, 0.0  ;;  %v14291_v28 = vpop.f32.mrb[132].mxu0  ;;  %v12706_v30 = vunpack.c.h.bf16 %v12972_v58 }
 0x640   :  { %v12815_v59 = vpack.c.bf16 %v11516_v19, %v11515_v38  ;;  %v11091_v26 = vadd.f32 %v14291_v28, %v17588_v33  ;;  %v11082_v27 = vpop.f32.mrb[133].mxu0  ;;  %v12975_v28 = vld [vmem:[#allocation3 + $0x48] sm:$0xff]  }
 0x641   :  { %v12810_v41 = vpack.c.bf16 %v11514_v14, %v11513_v3  ;;  %v11083_v43 = vadd.f32 %v17588_v33, %v11082_v27  ;;  %v14292_v56 = vpop.f32.mrb[134].mxu0 }
 0x642   :  { %12998 = vst [vmem:[#allocation11 + $0x8] sm:$0xff] %v12815_v59   ;;  %v11455_v48 = vadd.f32 %v12693_v15, %v11091_v26  ;;  %v11094_v7 = vadd.f32 %v14292_v56, %v17588_v33  ;;  %v11085_v46 = vpop.f32.mrb[135].mxu0  ;;  %v12974_v59 = vld [vmem:[#allocation3 + $0x40] sm:$0xff]  }
 0x643   :  { %12811 = vst [vmem:[#allocation11] sm:$0xff] %v12810_v41   ;;  %v11453_v53 = vadd.f32 %v12689_v32, %v11083_v43  ;;  %v11086_v17 = vadd.f32 %v17588_v33, %v11085_v46  ;;  %v12717_v41 = vunpack.c.l.bf16 %v12975_v28 }
 0x644   :  { %v11456_v22 = vadd.f32 %v12694_v31, %v11094_v7  ;;  %v11519_v63 = vmax.f32 %v11455_v48, 0.0  ;;  %v12713_v48 = vunpack.c.l.bf16 %v12974_v59 }
 0x645   :  { %v11454_v50 = vadd.f32 %v12690_v36, %v11086_v17  ;;  %v11517_v37 = vmax.f32 %v11453_v53, 0.0  ;;  %v12718_v17 = vunpack.c.h.bf16 %v12975_v28 }
 0x646   :  { %v11520_v51 = vmax.f32 %v11456_v22, 0.0 }
 0x647   :  { %v11518_v21 = vmax.f32 %v11454_v50, 0.0  ;;  %v14295_v52 = vpop.f32.mrb[136].mxu0  ;;  %v12714_v50 = vunpack.c.h.bf16 %v12974_v59 }
 0x648   :  { %v12825_v40 = vpack.c.bf16 %v11520_v51, %v11519_v63  ;;  %v11107_v5 = vadd.f32 %v14295_v52, %v17588_v33  ;;  %v11098_v57 = vpop.f32.mrb[137].mxu0  ;;  %v12977_v52 = vld [vmem:[#allocation3 + $0x58] sm:$0xff]  }
 0x649   :  { %v12820_v6 = vpack.c.bf16 %v11518_v21, %v11517_v37  ;;  %v11099_v42 = vadd.f32 %v17588_v33, %v11098_v57  ;;  %v14296_v54 = vpop.f32.mrb[138].mxu0 }
 0x64a   :  { %13000 = vst [vmem:[#allocation11 + $0x18] sm:$0xff] %v12825_v40   ;;  %v11459_v25 = vadd.f32 %v12701_v55, %v11107_v5  ;;  %v11110_v24 = vadd.f32 %v14296_v54, %v17588_v33  ;;  %v11101_v35 = vpop.f32.mrb[139].mxu0  ;;  %v12976_v40 = vld [vmem:[#allocation3 + $0x50] sm:$0xff]  }
 0x64b   :  { %12999 = vst [vmem:[#allocation11 + $0x10] sm:$0xff] %v12820_v6   ;;  %v11457_v4 = vadd.f32 %v12697_v13, %v11099_v42  ;;  %v11102_v2 = vadd.f32 %v17588_v33, %v11101_v35  ;;  %v12725_v6 = vunpack.c.l.bf16 %v12977_v52 }
 0x64c   :  { %v11460_v12 = vadd.f32 %v12702_v9, %v11110_v24  ;;  %v11523_v47 = vmax.f32 %v11459_v25, 0.0  ;;  %v12721_v25 = vunpack.c.l.bf16 %v12976_v40 }
 0x64d   :  { %v11458_v60 = vadd.f32 %v12698_v29, %v11102_v2  ;;  %v11521_v44 = vmax.f32 %v11457_v4, 0.0  ;;  %v12726_v2 = vunpack.c.h.bf16 %v12977_v52 }
 0x64e   :  { %v11524_v18 = vmax.f32 %v11460_v12, 0.0 }
 0x64f   :  { %v11522_v8 = vmax.f32 %v11458_v60, 0.0  ;;  %v14299_v1 = vpop.f32.mrb[140].mxu0  ;;  %v12722_v60 = vunpack.c.h.bf16 %v12976_v40 }
 0x650   :  { %v12835_v39 = vpack.c.bf16 %v11524_v18, %v11523_v47  ;;  %v11123_v62 = vadd.f32 %v14299_v1, %v17588_v33  ;;  %v11114_v16 = vpop.f32.mrb[141].mxu0  ;;  %v12979_v1 = vld [vmem:[#allocation3 + $0x68] sm:$0xff]  }
 0x651   :  { %v12830_v49 = vpack.c.bf16 %v11522_v8, %v11521_v44  ;;  %v11115_v45 = vadd.f32 %v17588_v33, %v11114_v16  ;;  %v14300_v11 = vpop.f32.mrb[142].mxu0 }
 0x652   :  { %13002 = vst [vmem:[#allocation11 + $0x28] sm:$0xff] %v12835_v39   ;;  %v11463_v38 = vadd.f32 %v12709_v0, %v11123_v62  ;;  %v11126_v19 = vadd.f32 %v14300_v11, %v17588_v33  ;;  %v11117_v15 = vpop.f32.mrb[143].mxu0  ;;  %v12978_v39 = vld [vmem:[#allocation3 + $0x60] sm:$0xff]  }
 0x653   :  { %13001 = vst [vmem:[#allocation11 + $0x20] sm:$0xff] %v12830_v49   ;;  %v11461_v3 = vadd.f32 %v12705_v20, %v11115_v45  ;;  %v11118_v14 = vadd.f32 %v17588_v33, %v11117_v15  ;;  %v12733_v49 = vunpack.c.l.bf16 %v12979_v1 }
 0x654   :  { %v11464_v32 = vadd.f32 %v12710_v23, %v11126_v19  ;;  %v11527_v27 = vmax.f32 %v11463_v38, 0.0  ;;  %v12729_v38 = vunpack.c.l.bf16 %v12978_v39 }
 0x655   :  { %v11462_v26 = vadd.f32 %v12706_v30, %v11118_v14  ;;  %v11525_v43 = vmax.f32 %v11461_v3, 0.0  ;;  %v12734_v14 = vunpack.c.h.bf16 %v12979_v1 }
 0x656   :  { %v11528_v31 = vmax.f32 %v11464_v32, 0.0 }
 0x657   :  { %v11526_v56 = vmax.f32 %v11462_v26, 0.0  ;;  %v14303_v36 = vpop.f32.mrb[144].mxu0  ;;  %v12730_v26 = vunpack.c.h.bf16 %v12978_v39 }
 0x658   :  { %v12845_v7 = vpack.c.bf16 %v11528_v31, %v11527_v27  ;;  %v11139_v46 = vadd.f32 %v14303_v36, %v17588_v33  ;;  %v11130_v53 = vpop.f32.mrb[145].mxu0  ;;  %v12981_v36 = vld [vmem:[#allocation3 + $0x78] sm:$0xff]  }
 0x659   :  { %v12840_v61 = vpack.c.bf16 %v11526_v56, %v11525_v43  ;;  %v11131_v22 = vadd.f32 %v17588_v33, %v11130_v53  ;;  %v14304_v34 = vpop.f32.mrb[146].mxu0 }
 0x65a   :  { %13004 = vst [vmem:[#allocation11 + $0x38] sm:$0xff] %v12845_v7   ;;  %v11467_v63 = vadd.f32 %v12717_v41, %v11139_v46  ;;  %v11142_v51 = vadd.f32 %v14304_v34, %v17588_v33  ;;  %v11133_v55 = vpop.f32.mrb[147].mxu0  ;;  %v12980_v7 = vld [vmem:[#allocation3 + $0x70] sm:$0xff]  }
 0x65b   :  { %13003 = vst [vmem:[#allocation11 + $0x30] sm:$0xff] %v12840_v61   ;;  %v11465_v37 = vadd.f32 %v12713_v48, %v11131_v22  ;;  %v11134_v21 = vadd.f32 %v17588_v33, %v11133_v55  ;;  %v12741_v61 = vunpack.c.l.bf16 %v12981_v36 }
 0x65c   :  { %v11468_v13 = vadd.f32 %v12718_v17, %v11142_v51  ;;  %v11531_v57 = vmax.f32 %v11467_v63, 0.0  ;;  %v12737_v63 = vunpack.c.l.bf16 %v12980_v7 }
 0x65d   :  { %v11466_v5 = vadd.f32 %v12714_v50, %v11134_v21  ;;  %v11529_v42 = vmax.f32 %v11465_v37, 0.0  ;;  %v12742_v21 = vunpack.c.h.bf16 %v12981_v36 }
 0x65e   :  { %v11532_v9 = vmax.f32 %v11468_v13, 0.0 }
 0x65f   :  { %v11530_v54 = vmax.f32 %v11466_v5, 0.0  ;;  %v14307_v29 = vpop.f32.mrb[148].mxu0  ;;  %v12738_v5 = vunpack.c.h.bf16 %v12980_v7 }
 0x660   :  { %v12855_v24 = vpack.c.bf16 %v11532_v9, %v11531_v57  ;;  %v11155_v35 = vadd.f32 %v14307_v29, %v17588_v33  ;;  %v11146_v4 = vpop.f32.mrb[149].mxu0  ;;  %v12983_v29 = vld [vmem:[#allocation3 + $0x88] sm:$0xff]  }
 0x661   :  { %v12850_v10 = vpack.c.bf16 %v11530_v54, %v11529_v42  ;;  %v11147_v12 = vadd.f32 %v17588_v33, %v11146_v4  ;;  %v14308_v58 = vpop.f32.mrb[150].mxu0 }
 0x662   :  { %13006 = vst [vmem:[#allocation11 + $0x48] sm:$0xff] %v12855_v24   ;;  %v11471_v47 = vadd.f32 %v12725_v6, %v11155_v35  ;;  %v11158_v18 = vadd.f32 %v14308_v58, %v17588_v33  ;;  %v11149_v0 = vpop.f32.mrb[151].mxu0  ;;  %v12982_v24 = vld [vmem:[#allocation3 + $0x80] sm:$0xff]  }
 0x663   :  { %13005 = vst [vmem:[#allocation11 + $0x40] sm:$0xff] %v12850_v10   ;;  %v11469_v44 = vadd.f32 %v12721_v25, %v11147_v12  ;;  %v11150_v8 = vadd.f32 %v17588_v33, %v11149_v0  ;;  %v12749_v10 = vunpack.c.l.bf16 %v12983_v29 }
 0x664   :  { %v11472_v20 = vadd.f32 %v12726_v2, %v11158_v18  ;;  %v11535_v16 = vmax.f32 %v11471_v47, 0.0  ;;  %v12745_v47 = vunpack.c.l.bf16 %v12982_v24 }
 0x665   :  { %v11470_v62 = vadd.f32 %v12722_v60, %v11150_v8  ;;  %v11533_v45 = vmax.f32 %v11469_v44, 0.0  ;;  %v12750_v8 = vunpack.c.h.bf16 %v12983_v29 }
 0x666   :  { %v11536_v23 = vmax.f32 %v11472_v20, 0.0 }
 0x667   :  { %v11534_v11 = vmax.f32 %v11470_v62, 0.0  ;;  %v14311_v30 = vpop.f32.mrb[152].mxu0  ;;  %v12746_v62 = vunpack.c.h.bf16 %v12982_v24 }
 0x668   :  { %v12865_v19 = vpack.c.bf16 %v11536_v23, %v11535_v16  ;;  %v11171_v15 = vadd.f32 %v14311_v30, %v17588_v33  ;;  %v11162_v3 = vpop.f32.mrb[153].mxu0  ;;  %v12985_v30 = vld [vmem:[#allocation3 + $0x98] sm:$0xff]  }
 0x669   :  { %v12860_v28 = vpack.c.bf16 %v11534_v11, %v11533_v45  ;;  %v11163_v32 = vadd.f32 %v17588_v33, %v11162_v3  ;;  %v14312_v59 = vpop.f32.mrb[154].mxu0 }
 0x66a   :  { %13008 = vst [vmem:[#allocation11 + $0x58] sm:$0xff] %v12865_v19   ;;  %v11475_v27 = vadd.f32 %v12733_v49, %v11171_v15  ;;  %v11174_v31 = vadd.f32 %v14312_v59, %v17588_v33  ;;  %v11165_v41 = vpop.f32.mrb[155].mxu0  ;;  %v12984_v19 = vld [vmem:[#allocation3 + $0x90] sm:$0xff]  }
 0x66b   :  { %13007 = vst [vmem:[#allocation11 + $0x50] sm:$0xff] %v12860_v28   ;;  %v11473_v43 = vadd.f32 %v12729_v38, %v11163_v32  ;;  %v11166_v56 = vadd.f32 %v17588_v33, %v11165_v41  ;;  %v12757_v28 = vunpack.c.l.bf16 %v12985_v30 }
 0x66c   :  { %v11476_v48 = vadd.f32 %v12734_v14, %v11174_v31  ;;  %v11539_v53 = vmax.f32 %v11475_v27, 0.0  ;;  %v12753_v27 = vunpack.c.l.bf16 %v12984_v19 }
 0x66d   :  { %v11474_v46 = vadd.f32 %v12730_v26, %v11166_v56  ;;  %v11537_v22 = vmax.f32 %v11473_v43, 0.0  ;;  %v12758_v56 = vunpack.c.h.bf16 %v12985_v30 }
 0x66e   :  { %v11540_v17 = vmax.f32 %v11476_v48, 0.0 }
 0x66f   :  { %v11538_v34 = vmax.f32 %v11474_v46, 0.0  ;;  %v14315_v50 = vpop.f32.mrb[156].mxu0  ;;  %v12754_v46 = vunpack.c.h.bf16 %v12984_v19 }
 0x670   :  { %v12875_v51 = vpack.c.bf16 %v11540_v17, %v11539_v53  ;;  %v11187_v55 = vadd.f32 %v14315_v50, %v17588_v33  ;;  %v11178_v37 = vpop.f32.mrb[157].mxu0  ;;  %v12987_v50 = vld [vmem:[#allocation3 + $0xa8] sm:$0xff]  }
 0x671   :  { %v12870_v52 = vpack.c.bf16 %v11538_v34, %v11537_v22  ;;  %v11179_v13 = vadd.f32 %v17588_v33, %v11178_v37  ;;  %v14316_v40 = vpop.f32.mrb[158].mxu0 }
 0x672   :  { %13010 = vst [vmem:[#allocation11 + $0x68] sm:$0xff] %v12875_v51   ;;  %v11479_v57 = vadd.f32 %v12741_v61, %v11187_v55  ;;  %v11190_v9 = vadd.f32 %v14316_v40, %v17588_v33  ;;  %v11181_v6 = vpop.f32.mrb[159].mxu0  ;;  %v12986_v51 = vld [vmem:[#allocation3 + $0xa0] sm:$0xff]  }
 0x673   :  { %13009 = vst [vmem:[#allocation11 + $0x60] sm:$0xff] %v12870_v52   ;;  %v11477_v42 = vadd.f32 %v12737_v63, %v11179_v13  ;;  %v11182_v54 = vadd.f32 %v17588_v33, %v11181_v6  ;;  %v12765_v52 = vunpack.c.l.bf16 %v12987_v50 }
 0x674   :  { %v11480_v25 = vadd.f32 %v12742_v21, %v11190_v9  ;;  %v11543_v4 = vmax.f32 %v11479_v57, 0.0  ;;  %v12761_v57 = vunpack.c.l.bf16 %v12986_v51 }
 0x675   :  { %v11478_v35 = vadd.f32 %v12738_v5, %v11182_v54  ;;  %v11541_v12 = vmax.f32 %v11477_v42, 0.0  ;;  %v12766_v54 = vunpack.c.h.bf16 %v12987_v50 }
 0x676   :  { %v11544_v2 = vmax.f32 %v11480_v25, 0.0 }
 0x677   :  { %v11542_v58 = vmax.f32 %v11478_v35, 0.0  ;;  %v14319_v60 = vpop.f32.mrb[160].mxu0  ;;  %v12762_v35 = vunpack.c.h.bf16 %v12986_v51 }
 0x678   :  { %v12885_v18 = vpack.c.bf16 %v11544_v2, %v11543_v4  ;;  %v11203_v0 = vadd.f32 %v14319_v60, %v17588_v33  ;;  %v11194_v44 = vpop.f32.mrb[161].mxu0  ;;  %v12989_v60 = vld [vmem:[#allocation3 + $0xb8] sm:$0xff]  }
 0x679   :  { %v12880_v1 = vpack.c.bf16 %v11542_v58, %v11541_v12  ;;  %v11195_v20 = vadd.f32 %v17588_v33, %v11194_v44  ;;  %v14320_v39 = vpop.f32.mrb[162].mxu0 }
 0x67a   :  { %13012 = vst [vmem:[#allocation11 + $0x78] sm:$0xff] %v12885_v18   ;;  %v11483_v16 = vadd.f32 %v12749_v10, %v11203_v0  ;;  %v11206_v23 = vadd.f32 %v14320_v39, %v17588_v33  ;;  %v11197_v49 = vpop.f32.mrb[163].mxu0  ;;  %v12988_v18 = vld [vmem:[#allocation3 + $0xb0] sm:$0xff]  }
 0x67b   :  { %13011 = vst [vmem:[#allocation11 + $0x70] sm:$0xff] %v12880_v1   ;;  %v11481_v45 = vadd.f32 %v12745_v47, %v11195_v20  ;;  %v11198_v11 = vadd.f32 %v17588_v33, %v11197_v49  ;;  %v12773_v1 = vunpack.c.l.bf16 %v12989_v60 }
 0x67c   :  { %v11484_v38 = vadd.f32 %v12750_v8, %v11206_v23  ;;  %v11547_v3 = vmax.f32 %v11483_v16, 0.0  ;;  %v12769_v16 = vunpack.c.l.bf16 %v12988_v18 }
 0x67d   :  { %v11482_v15 = vadd.f32 %v12746_v62, %v11198_v11  ;;  %v11545_v32 = vmax.f32 %v11481_v45, 0.0  ;;  %v12774_v11 = vunpack.c.h.bf16 %v12989_v60 }
 0x67e   :  { %v11548_v14 = vmax.f32 %v11484_v38, 0.0 }
 0x67f   :  { %v11546_v59 = vmax.f32 %v11482_v15, 0.0  ;;  %v14323_v26 = vpop.f32.mrb[164].mxu0  ;;  %v12770_v15 = vunpack.c.h.bf16 %v12988_v18 }
 0x680   :  { %v12895_v31 = vpack.c.bf16 %v11548_v14, %v11547_v3  ;;  %v11219_v41 = vadd.f32 %v14323_v26, %v17588_v33  ;;  %v11210_v43 = vpop.f32.mrb[165].mxu0  ;;  %v12991_v26 = vld [vmem:[#allocation3 + $0xc8] sm:$0xff]  }
 0x681   :  { %v12890_v36 = vpack.c.bf16 %v11546_v59, %v11545_v32  ;;  %v11211_v48 = vadd.f32 %v17588_v33, %v11210_v43  ;;  %v14324_v7 = vpop.f32.mrb[166].mxu0 }
 0x682   :  { %13014 = vst [vmem:[#allocation11 + $0x88] sm:$0xff] %v12895_v31   ;;  %v11487_v53 = vadd.f32 %v12757_v28, %v11219_v41  ;;  %v11222_v17 = vadd.f32 %v14324_v7, %v17588_v33  ;;  %v11213_v61 = vpop.f32.mrb[167].mxu0  ;;  %v12990_v31 = vld [vmem:[#allocation3 + $0xc0] sm:$0xff]  }
 0x683   :  { %13013 = vst [vmem:[#allocation11 + $0x80] sm:$0xff] %v12890_v36   ;;  %v11485_v22 = vadd.f32 %v12753_v27, %v11211_v48  ;;  %v11214_v34 = vadd.f32 %v17588_v33, %v11213_v61  ;;  %v12781_v36 = vunpack.c.l.bf16 %v12991_v26 }
 0x684   :  { %v11488_v63 = vadd.f32 %v12758_v56, %v11222_v17  ;;  %v11551_v37 = vmax.f32 %v11487_v53, 0.0  ;;  %v12777_v53 = vunpack.c.l.bf16 %v12990_v31 }
 0x685   :  { %v11486_v55 = vadd.f32 %v12754_v46, %v11214_v34  ;;  %v11549_v13 = vmax.f32 %v11485_v22, 0.0  ;;  %v12782_v34 = vunpack.c.h.bf16 %v12991_v26 }
 0x686   :  { %v11552_v21 = vmax.f32 %v11488_v63, 0.0 }
 0x687   :  { %v11550_v40 = vmax.f32 %v11486_v55, 0.0  ;;  %v14327_v5 = vpop.f32.mrb[168].mxu0  ;;  %v12778_v55 = vunpack.c.h.bf16 %v12990_v31 }
 0x688   :  { %v12905_v9 = vpack.c.bf16 %v11552_v21, %v11551_v37  ;;  %v11235_v6 = vadd.f32 %v14327_v5, %v17588_v33  ;;  %v11226_v42 = vpop.f32.mrb[169].mxu0  ;;  %v12993_v5 = vld [vmem:[#allocation3 + $0xd8] sm:$0xff]  }
 0x689   :  { %v12900_v29 = vpack.c.bf16 %v11550_v40, %v11549_v13  ;;  %v11227_v25 = vadd.f32 %v17588_v33, %v11226_v42  ;;  %v14328_v24 = vpop.f32.mrb[170].mxu0 }
 0x68a   :  { %13016 = vst [vmem:[#allocation11 + $0x98] sm:$0xff] %v12905_v9   ;;  %v11491_v4 = vadd.f32 %v12765_v52, %v11235_v6  ;;  %v11238_v2 = vadd.f32 %v14328_v24, %v17588_v33  ;;  %v11229_v10 = vpop.f32.mrb[171].mxu0  ;;  %v12992_v9 = vld [vmem:[#allocation3 + $0xd0] sm:$0xff]  }
 0x68b   :  { %13015 = vst [vmem:[#allocation11 + $0x90] sm:$0xff] %v12900_v29   ;;  %v11489_v12 = vadd.f32 %v12761_v57, %v11227_v25  ;;  %v11230_v58 = vadd.f32 %v17588_v33, %v11229_v10  ;;  %v12789_v29 = vunpack.c.l.bf16 %v12993_v5 }
 0x68c   :  { %v11492_v47 = vadd.f32 %v12766_v54, %v11238_v2  ;;  %v11555_v44 = vmax.f32 %v11491_v4, 0.0  ;;  %v12785_v4 = vunpack.c.l.bf16 %v12992_v9 }
 0x68d   :  { %v11490_v0 = vadd.f32 %v12762_v35, %v11230_v58  ;;  %v11553_v20 = vmax.f32 %v11489_v12, 0.0  ;;  %v12790_v58 = vunpack.c.h.bf16 %v12993_v5 }
 0x68e   :  { %v11556_v8 = vmax.f32 %v11492_v47, 0.0 }
 0x68f   :  { %v11554_v39 = vmax.f32 %v11490_v0, 0.0  ;;  %v14331_v62 = vpop.f32.mrb[172].mxu0  ;;  %v12786_v0 = vunpack.c.h.bf16 %v12992_v9 }
 0x690   :  { %v12915_v23 = vpack.c.bf16 %v11556_v8, %v11555_v44  ;;  %v11251_v49 = vadd.f32 %v14331_v62, %v17588_v33  ;;  %v11242_v45 = vpop.f32.mrb[173].mxu0  ;;  %v12995_v62 = vld [vmem:[#allocation3 + $0xe8] sm:$0xff]  }
 0x691   :  { %v12910_v30 = vpack.c.bf16 %v11554_v39, %v11553_v20  ;;  %v11243_v38 = vadd.f32 %v17588_v33, %v11242_v45  ;;  %v14332_v19 = vpop.f32.mrb[174].mxu0 }
 0x692   :  { %13018 = vst [vmem:[#allocation11 + $0xa8] sm:$0xff] %v12915_v23   ;;  %v11495_v3 = vadd.f32 %v12773_v1, %v11251_v49  ;;  %v11254_v14 = vadd.f32 %v14332_v19, %v17588_v33  ;;  %v11245_v28 = vpop.f32.mrb[175].mxu0  ;;  %v12994_v23 = vld [vmem:[#allocation3 + $0xe0] sm:$0xff]  }
 0x693   :  { %13017 = vst [vmem:[#allocation11 + $0xa0] sm:$0xff] %v12910_v30   ;;  %v11493_v32 = vadd.f32 %v12769_v16, %v11243_v38  ;;  %v11246_v59 = vadd.f32 %v17588_v33, %v11245_v28  ;;  %v12797_v30 = vunpack.c.l.bf16 %v12995_v62 }
 0x694   :  { %v11496_v27 = vadd.f32 %v12774_v11, %v11254_v14  ;;  %v11559_v43 = vmax.f32 %v11495_v3, 0.0  ;;  %v12793_v3 = vunpack.c.l.bf16 %v12994_v23 }
 0x695   :  { %v11494_v41 = vadd.f32 %v12770_v15, %v11246_v59  ;;  %v11557_v48 = vmax.f32 %v11493_v32, 0.0  ;;  %v12798_v59 = vunpack.c.h.bf16 %v12995_v62 }
 0x696   :  { %v11560_v56 = vmax.f32 %v11496_v27, 0.0 }
 0x697   :  { %v11558_v7 = vmax.f32 %v11494_v41, 0.0  ;;  %v14335_v46 = vpop.f32.mrb[176].mxu0  ;;  %v12794_v41 = vunpack.c.h.bf16 %v12994_v23 }
 0x698   :  { %v12925_v17 = vpack.c.bf16 %v11560_v56, %v11559_v43  ;;  %v11267_v61 = vadd.f32 %v14335_v46, %v17588_v33  ;;  %v11258_v22 = vpop.f32.mrb[177].mxu0  ;;  %v12997_v46 = vld [vmem:[#allocation3 + $0xf8] sm:$0xff]  }
 0x699   :  { %v12920_v50 = vpack.c.bf16 %v11558_v7, %v11557_v48  ;;  %v11259_v63 = vadd.f32 %v17588_v33, %v11258_v22  ;;  %v14336_v51 = vpop.f32.mrb[178].mxu0 }
 0x69a   :  { %13020 = vst [vmem:[#allocation11 + $0xb8] sm:$0xff] %v12925_v17   ;;  %v11499_v37 = vadd.f32 %v12781_v36, %v11267_v61  ;;  %v11270_v21 = vadd.f32 %v14336_v51, %v17588_v33  ;;  %v11261_v52 = vpop.f32.mrb[179].mxu0  ;;  %v12996_v17 = vld [vmem:[#allocation3 + $0xf0] sm:$0xff]  }
 0x69b   :  { %13019 = vst [vmem:[#allocation11 + $0xb0] sm:$0xff] %v12920_v50   ;;  %v11497_v13 = vadd.f32 %v12777_v53, %v11259_v63  ;;  %v11262_v40 = vadd.f32 %v17588_v33, %v11261_v52  ;;  %v12805_v50 = vunpack.c.l.bf16 %v12997_v46 }
 0x69c   :  { %v11500_v57 = vadd.f32 %v12782_v34, %v11270_v21  ;;  %v11563_v42 = vmax.f32 %v11499_v37, 0.0  ;;  %v12801_v37 = vunpack.c.l.bf16 %v12996_v17 }
 0x69d   :  { %v11498_v6 = vadd.f32 %v12778_v55, %v11262_v40  ;;  %v11561_v25 = vmax.f32 %v11497_v13, 0.0  ;;  %v12806_v40 = vunpack.c.h.bf16 %v12997_v46 }
 0x69e   :  { %v11564_v54 = vmax.f32 %v11500_v57, 0.0 }
 0x69f   :  { %v11562_v24 = vmax.f32 %v11498_v6, 0.0  ;;  %v14339_v35 = vpop.f32.mrb[180].mxu0  ;;  %v12802_v6 = vunpack.c.h.bf16 %v12996_v17 }
 0x6a0   :  { %v12935_v2 = vpack.c.bf16 %v11564_v54, %v11563_v42  ;;  %v11283_v10 = vadd.f32 %v14339_v35, %v17588_v33  ;;  %v11274_v12 = vpop.f32.mrb[181].mxu0 }
 0x6a1   :  { %v12930_v60 = vpack.c.bf16 %v11562_v24, %v11561_v25  ;;  %v11275_v47 = vadd.f32 %v17588_v33, %v11274_v12  ;;  %v14340_v18 = vpop.f32.mrb[182].mxu0 }
 0x6a2   :  { %13022 = vst [vmem:[#allocation11 + $0xc8] sm:$0xff] %v12935_v2   ;;  %v11503_v44 = vadd.f32 %v12789_v29, %v11283_v10  ;;  %v11286_v8 = vadd.f32 %v14340_v18, %v17588_v33  ;;  %v11277_v1 = vpop.f32.mrb[183].mxu0 }
 0x6a3   :  { %13021 = vst [vmem:[#allocation11 + $0xc0] sm:$0xff] %v12930_v60   ;;  %v11501_v20 = vadd.f32 %v12785_v4, %v11275_v47  ;;  %v11278_v39 = vadd.f32 %v17588_v33, %v11277_v1 }
 0x6a4   :  { %v11504_v16 = vadd.f32 %v12790_v58, %v11286_v8  ;;  %v11567_v45 = vmax.f32 %v11503_v44, 0.0 }
 0x6a5   :  { %v11502_v49 = vadd.f32 %v12786_v0, %v11278_v39  ;;  %v11565_v38 = vmax.f32 %v11501_v20, 0.0 }
 0x6a6   :  { %v11568_v11 = vmax.f32 %v11504_v16, 0.0 }
 0x6a7   :  { %v11566_v19 = vmax.f32 %v11502_v49, 0.0  ;;  %v14343_v15 = vpop.f32.mrb[184].mxu0 }
 0x6a8   :  { %v12945_v14 = vpack.c.bf16 %v11568_v11, %v11567_v45  ;;  %v11299_v28 = vadd.f32 %v14343_v15, %v17588_v33  ;;  %v11290_v32 = vpop.f32.mrb[185].mxu0 }
 0x6a9   :  { %v12940_v26 = vpack.c.bf16 %v11566_v19, %v11565_v38  ;;  %v11291_v27 = vadd.f32 %v17588_v33, %v11290_v32  ;;  %v14344_v31 = vpop.f32.mrb[186].mxu0 }
 0x6aa   :  { %13024 = vst [vmem:[#allocation11 + $0xd8] sm:$0xff] %v12945_v14   ;;  %v11507_v43 = vadd.f32 %v12797_v30, %v11299_v28  ;;  %v11302_v56 = vadd.f32 %v14344_v31, %v17588_v33  ;;  %v11293_v36 = vpop.f32.mrb[187].mxu0 }
 0x6ab   :  { %13023 = vst [vmem:[#allocation11 + $0xd0] sm:$0xff] %v12940_v26   ;;  %v11505_v48 = vadd.f32 %v12793_v3, %v11291_v27  ;;  %v11294_v7 = vadd.f32 %v17588_v33, %v11293_v36 }
 0x6ac   :  { %v11508_v53 = vadd.f32 %v12798_v59, %v11302_v56  ;;  %v11571_v22 = vmax.f32 %v11507_v43, 0.0 }
 0x6ad   :  { %v11506_v61 = vadd.f32 %v12794_v41, %v11294_v7  ;;  %v11569_v63 = vmax.f32 %v11505_v48, 0.0 }
 0x6ae   :  { %v11572_v34 = vmax.f32 %v11508_v53, 0.0 }
 0x6af   :  { %v11570_v51 = vmax.f32 %v11506_v61, 0.0  ;;  %v14347_v55 = vpop.f32.mrb[188].mxu0 }
 0x6b0   :  { %v12955_v21 = vpack.c.bf16 %v11572_v34, %v11571_v22  ;;  %v11315_v52 = vadd.f32 %v14347_v55, %v17588_v33  ;;  %v11306_v13 = vpop.f32.mrb[189].mxu0 }
 0x6b1   :  { %v12950_v5 = vpack.c.bf16 %v11570_v51, %v11569_v63  ;;  %v11307_v57 = vadd.f32 %v17588_v33, %v11306_v13  ;;  %v14348_v9 = vpop.f32.mrb[190].mxu0 }
 0x6b2   :  { %13026 = vst [vmem:[#allocation11 + $0xe8] sm:$0xff] %v12955_v21   ;;  %v11511_v42 = vadd.f32 %v12805_v50, %v11315_v52  ;;  %v11318_v54 = vadd.f32 %v14348_v9, %v17588_v33  ;;  %v11309_v29 = vpop.f32.mrb[191].mxu0 }
 0x6b3   :  { %13025 = vst [vmem:[#allocation11 + $0xe0] sm:$0xff] %v12950_v5   ;;  %v11509_v25 = vadd.f32 %v12801_v37, %v11307_v57  ;;  %v11310_v24 = vadd.f32 %v17588_v33, %v11309_v29 }
 0x6b4   :  { %v11512_v35 = vadd.f32 %v12806_v40, %v11318_v54  ;;  %v11575_v2 = vmax.f32 %v11511_v42, 0.0 }
 0x6b5   :  { %v11510_v4 = vadd.f32 %v12802_v6, %v11310_v24  ;;  %v11573_v12 = vmax.f32 %v11509_v25, 0.0 }
 0x6b6   :  { %v11576_v10 = vmax.f32 %v11512_v35, 0.0 }
 0x6b7   :  { %v11574_v58 = vmax.f32 %v11510_v4, 0.0 }
 0x6b8   :  { %v12965_v60 = vpack.c.bf16 %v11576_v10, %v11575_v2 }
 0x6b9   :  { %v12960_v47 = vpack.c.bf16 %v11574_v58, %v11573_v12 }
 0x6ba   :  { %13028 = vst [vmem:[#allocation11 + $0xf8] sm:$0xff] %v12965_v60  }
 0x6bb   :  { %13027 = vst [vmem:[#allocation11 + $0xf0] sm:$0xff] %v12960_v47  }
 0x6bc   :  { %15446 = shalt.err (!%p15443_p8)
}
 0x6bd   :  { %s15447_s0 = scalar_lea.hbm %s17676_s7, 4096 }
 0x6be   :  { %p15448_p9 = scmp.ne.s32.totalorder %s17676_s7, %s15447_s0  ;;  %p15451_p10 = scmp.lt.u32.totalorder %s15447_s0, %s17676_s7 }
 0x6c0   :  { %p15453_p11 = pnand %p15451_p10, %p15448_p9 }
 0x6c2   :  { %15456 = shalt.err (!%p15453_p11)
}
 0x6c3   :  { %11908 = dma.vmem_to_hbm [thread:$0]  %s11903_s11, 4096, %s17676_s7, [#allocation5], %s15467_s13, %s15467_s13, %s15468_s14  }
 0x6c4   :  { %15463 = dma.done.wait [#allocation5], 4096  }
 0x6c5   :  { %15464 = vsyncadd [#allocation5], 4294963200 }
 0x6c6   :  { %11912 = vsyncpa [#allocation4], 1 }
 0x6c7   :  { %11913 = vsyncpa [#allocation7], 1 }
 0x6c8   :  { %11914 = vsyncpa [#allocation10], 1 }
 0x6c9   :  { %11915 = vsyncpa [#allocation5], 1 }

</bundles_post_ra>
